<compile_context>
chip_gen: v7x
topology: tpu7x:2x2x1
jax: 0.10.0
libtpu: 0.0.40
codegen_flags: <defaults>
</compile_context>

<pallas_src>
import math

import jax
import jax.numpy as jnp
import numpy as np
from jax.experimental import pallas as pl
from jax.experimental.pallas import tpu as pltpu

# Matmul-input dtype.  float32 keeps tight agreement with the PyTorch / JAX
# reference; set to jnp.bfloat16 on v5e/v6e for ~2x MXU throughput and half
# the weight DMA bytes (accumulation stays f32 via preferred_element_type).
_MXU_DTYPE = jnp.float32


def _mx(a):
    return a.astype(_MXU_DTYPE)


# ---------------------------------------------------------------------------
# glue: PyTorch `_to_words`  (b, c, h, w) -> (b, patch**2, patch_size**2 * c)
# ---------------------------------------------------------------------------
def to_words(x, patch, patch_size):
    b, c, _, _ = x.shape
    out = x.reshape(b, c, patch, patch_size, patch, patch_size)
    # (b, ph, pw, psh, psw, c)  == unfold(2).unfold(3).permute(0,2,3,4,5,1)
    out = out.transpose(0, 2, 4, 3, 5, 1)
    return out.reshape(b, patch * patch, patch_size * patch_size * c)


# ---------------------------------------------------------------------------
# in-kernel math helpers
# ---------------------------------------------------------------------------
def _layernorm(x, g, b, eps=1e-5):
    mu = jnp.mean(x, axis=-1, keepdims=True)
    var = jnp.mean((x - mu) ** 2, axis=-1, keepdims=True)
    return (x - mu) * jax.lax.rsqrt(var + eps) * g + b


def _erf(x):
    # High-accuracy (~1.5e-7) rational approximation of erf (exp/mul/add only),
    # matches exact-GELU semantics of torch.nn.GELU to well below f32 noise.
    p = 0.3275911
    a1, a2, a3, a4, a5 = (0.254829592, -0.284496736, 1.421413741,
                          -1.453152027, 1.061405429)
    sgn = jnp.where(x >= 0.0, 1.0, -1.0)
    ax = jnp.abs(x)
    t = 1.0 / (1.0 + p * ax)
    poly = ((((a5 * t + a4) * t + a3) * t + a2) * t + a1) * t
    return sgn * (1.0 - poly * jnp.exp(-ax * ax))


def _gelu(x):
    return 0.5 * x * (1.0 + _erf(x * 0.7071067811865475))


# ---------------------------------------------------------------------------
# Pallas kernel: grid = (batch_tiles, num_layers)
# ---------------------------------------------------------------------------
def _make_kernel(num_heads, n_real):
    def kernel(patches_ref, cls_ref, pos_ref, emb_w_ref, emb_b_ref,
               la1_g_ref, la1_b_ref, wq_ref, wk_ref, wv_ref, wo_ref, bo_ref,
               la2_g_ref, la2_b_ref, w1_ref, b1_ref, w2_ref, b2_ref,
               fc_g_ref, fc_b_ref, fc_w_ref, fc_bias_ref,
               out_ref, x_ref):
        f32 = jnp.float32
        l = pl.program_id(1)
        n_layers = pl.num_programs(1)
        TB, Npad, H = x_ref.shape
        Np, f = patches_ref.shape[1], patches_ref.shape[2]
        Hf = wq_ref.shape[2]
        dh = Hf // num_heads
        TBN = TB * Npad
        inv_sqrt_d = 1.0 / math.sqrt(float(Hf))

        # ---- first layer step of a batch tile: patch embed + cls + pos ----
        @pl.when(l == 0)
        def _init():
            pf = patches_ref[...].reshape(TB * Np, f)
            tok = jnp.dot(_mx(pf), _mx(emb_w_ref[...]),
                          preferred_element_type=f32) + emb_b_ref[...]
            tok = tok.reshape(TB, Np, H)
            cls_b = jnp.broadcast_to(cls_ref[...].reshape(1, 1, H), (TB, 1, H))
            pieces = [cls_b, tok]
            if Npad - 1 - Np > 0:
                pieces.append(jnp.zeros((TB, Npad - 1 - Np, H), f32))
            x0 = jnp.concatenate(pieces, axis=1)            # (TB, Npad, H)
            x_ref[...] = x0 + pos_ref[...][None, :, :]      # padded pos rows = 0

        # ---- transformer encoder layer `l` on the whole batch tile --------
        xf = x_ref[...].reshape(TBN, H)

        # multi-head self-attention
        y = _layernorm(xf, la1_g_ref[0], la1_b_ref[0])
        yc = _mx(y)
        q = jnp.dot(yc, _mx(wq_ref[0]), preferred_element_type=f32) * inv_sqrt_d
        k = jnp.dot(yc, _mx(wk_ref[0]), preferred_element_type=f32)
        v = jnp.dot(yc, _mx(wv_ref[0]), preferred_element_type=f32)
        q3 = q.reshape(TB, Npad, Hf)
        k3 = k.reshape(TB, Npad, Hf)
        v3 = v.reshape(TB, Npad, Hf)

        # mask padded key columns (token index >= n_real) before softmax
        col = jax.lax.broadcasted_iota(jnp.int32, (Npad, Npad), 1)
        kmask = jnp.where(col < n_real, 0.0, -1e30).astype(f32)[None, :, :]

        heads_out = []
        for h in range(num_heads):
            sl = slice(h * dh, (h + 1) * dh)
            s = jnp.einsum('bik,bjk->bij', _mx(q3[:, :, sl]), _mx(k3[:, :, sl]),
                           preferred_element_type=f32) + kmask
            s = s - jnp.max(s, axis=-1, keepdims=True)
            e = jnp.exp(s)
            p = e * pl.reciprocal(jnp.sum(e, axis=-1, keepdims=True), approx=True)
            heads_out.append(
                jnp.einsum('bij,bjd->bid', _mx(p), _mx(v3[:, :, sl]),
                           preferred_element_type=f32))
        attn = jnp.concatenate(heads_out, axis=-1).reshape(TBN, Hf)
        o = jnp.dot(_mx(attn), _mx(wo_ref[0]),
                    preferred_element_type=f32) + bo_ref[0]
        x1 = xf + o                                          # residual

        # MLP: Linear -> GELU, Linear -> GELU
        y2 = _layernorm(x1, la2_g_ref[0], la2_b_ref[0])
        h1 = _gelu(jnp.dot(_mx(y2), _mx(w1_ref[0]),
                           preferred_element_type=f32) + b1_ref[0])
        h2 = _gelu(jnp.dot(_mx(h1), _mx(w2_ref[0]),
                           preferred_element_type=f32) + b2_ref[0])
        x2 = x1 + h2                                         # residual
        x_ref[...] = x2.reshape(TB, Npad, H)

        # ---- last layer: final LayerNorm + classifier on cls tokens -------
        @pl.when(l == n_layers - 1)
        def _final():
            cls_tok = x2.reshape(TB, Npad, H)[:, 0:1, :].reshape(TB, H)
            yf = _layernorm(cls_tok, fc_g_ref[...], fc_b_ref[...])
            out_ref[0] = jnp.dot(_mx(yf), _mx(fc_w_ref[...]),
                                 preferred_element_type=f32) + fc_bias_ref[...]

    return kernel


# ---------------------------------------------------------------------------
# wrapper
# ---------------------------------------------------------------------------
def vit11_slim_forward(x, P, *, patch, patch_size, head, batch_tile=8):
    """x: (B, C, H, W) float32 NCHW.  Returns logits (B, num_classes)."""
    B = x.shape[0]
    patches = to_words(x, patch, patch_size)                # (B, Np, f)
    Np, f = patches.shape[1], patches.shape[2]
    N, H = P['pos'].shape
    L, _, Hf = P['wq'].shape
    Mh = P['w1'].shape[2]
    C = P['fc_w'].shape[1]

    # batch tiling (fold TB images into the matmul M dimension)
    TB = max(1, min(batch_tile, B))
    n_tiles = (B + TB - 1) // TB
    Bpad = n_tiles * TB
    if Bpad != B:
        patches = jnp.pad(patches, ((0, Bpad - B), (0, 0), (0, 0)))

    # sublane-pad tokens, lane-pad classifier output
    Npad = ((N + 7) // 8) * 8
    pos_p = jnp.pad(P['pos'], ((0, Npad - N), (0, 0)))
    Cpad = ((C + 127) // 128) * 128
    fc_w_p = jnp.pad(P['fc_w'], ((0, 0), (0, Cpad - C)))
    fc_b_p = jnp.pad(P['fc_bias'], ((0, 0), (0, Cpad - C)))

    weights = [P['cls'], pos_p, P['emb_w'], P['emb_b'],
               P['la1_g'], P['la1_b'], P['wq'], P['wk'], P['wv'],
               P['wo'], P['bo'], P['la2_g'], P['la2_b'],
               P['w1'], P['b1'], P['w2'], P['b2'],
               P['fc_g'], P['fc_b'], fc_w_p, fc_b_p]

    def rep_spec(a):                 # loaded once, reused across the grid
        nd = a.ndim
        return pl.BlockSpec(a.shape, lambda b, l, _nd=nd: (0,) * _nd)

    def layer_spec(a):               # streamed per layer (double-buffered)
        tail = a.shape[1:]
        nz = len(tail)
        return pl.BlockSpec((1,) + tail, lambda b, l, _nz=nz: (l,) + (0,) * _nz)

    in_specs = [pl.BlockSpec((TB, Np, f), lambda b, l: (b, 0, 0)),
                rep_spec(P['cls']), rep_spec(pos_p),
                rep_spec(P['emb_w']), rep_spec(P['emb_b']),
                layer_spec(P['la1_g']), layer_spec(P['la1_b']),
                layer_spec(P['wq']), layer_spec(P['wk']), layer_spec(P['wv']),
                layer_spec(P['wo']), layer_spec(P['bo']),
                layer_spec(P['la2_g']), layer_spec(P['la2_b']),
                layer_spec(P['w1']), layer_spec(P['b1']),
                layer_spec(P['w2']), layer_spec(P['b2']),
                rep_spec(P['fc_g']), rep_spec(P['fc_b']),
                rep_spec(fc_w_p), rep_spec(fc_b_p)]

    # advisory cost estimate for XLA scheduling around the custom call
    flops = int(Bpad * (L * (6 * Npad * H * Hf + 4 * Npad * Npad * Hf
                             + 2 * Npad * Hf * H + 4 * Npad * H * Mh)
                        + 2 * Np * f * H + 2 * H * Cpad))
    trans = int(Bpad * L * (head * Npad * Npad + Npad * (Mh + H)))
    w_bytes = sum(int(np.prod(w.shape)) for w in weights) * 4
    bytes_accessed = int(patches.size) * 4 + n_tiles * TB * Cpad * 4 + n_tiles * w_bytes

    kernel = _make_kernel(head, N)

    out = pl.pallas_call(
        kernel,
        out_shape=jax.ShapeDtypeStruct((n_tiles, TB, Cpad), jnp.float32),
        grid_spec=pltpu.PrefetchScalarGridSpec(
            num_scalar_prefetch=0,
            grid=(n_tiles, L),
            in_specs=in_specs,
            out_specs=pl.BlockSpec((1, TB, Cpad), lambda b, l: (b, 0, 0)),
            scratch_shapes=[pltpu.VMEM((TB, Npad, H), jnp.float32)],
        ),
        compiler_params=pltpu.CompilerParams(
            dimension_semantics=("parallel", "arbitrary"),
            vmem_limit_bytes=32 * 1024 * 1024),
        cost_estimate=pl.CostEstimate(flops=flops, transcendentals=trans,
                                      bytes_accessed=bytes_accessed),
    )(patches, *weights)

    return out.reshape(Bpad, Cpad)[:B, :C]


# ---------------------------------------------------------------------------
# pure-JAX reference (mirrors the PyTorch forward)
# ---------------------------------------------------------------------------
def _ln_ref(x, g, b, eps=1e-5):
    mu = jnp.mean(x, axis=-1, keepdims=True)
    var = jnp.mean((x - mu) ** 2, axis=-1, keepdims=True)
    return (x - mu) / jnp.sqrt(var + eps) * g + b


def reference_forward(x, P, *, patch, patch_size, head):
    HI = jax.lax.Precision.HIGHEST
    B = x.shape[0]
    N, H = P['pos'].shape
    patches = to_words(x, patch, patch_size)
    tok = jnp.einsum('bnf,fh->bnh', patches, P['emb_w'], precision=HI) + P['emb_b'][0]
    cls = jnp.broadcast_to(P['cls'][None], (B, 1, H))
    out = jnp.concatenate([cls, tok], axis=1) + P['pos'][None]
    L = P['wq'].shape[0]
    for l in range(L):
        y = _ln_ref(out, P['la1_g'][l, 0], P['la1_b'][l, 0])
        q = jnp.einsum('bnh,hk->bnk', y, P['wq'][l], precision=HI)
        k = jnp.einsum('bnh,hk->bnk', y, P['wk'][l], precision=HI)
        v = jnp.einsum('bnh,hk->bnk', y, P['wv'][l], precision=HI)
        Hf = q.shape[-1]
        dh = Hf // head
        qh = q.reshape(B, N, head, dh).transpose(0, 2, 1, 3)
        kh = k.reshape(B, N, head, dh).transpose(0, 2, 1, 3)
        vh = v.reshape(B, N, head, dh).transpose(0, 2, 1, 3)
        dots = jnp.einsum('bhif,bhjf->bhij', qh, kh, precision=HI) / math.sqrt(Hf)
        score = jax.nn.softmax(dots, axis=-1)
        attn = jnp.einsum('bhij,bhjf->bihf', score, vh, precision=HI).reshape(B, N, Hf)
        o = jnp.einsum('bnk,kh->bnh', attn, P['wo'][l], precision=HI) + P['bo'][l, 0]
        out = o + out
        y2 = _ln_ref(out, P['la2_g'][l, 0], P['la2_b'][l, 0])
        h1 = jax.nn.gelu(jnp.einsum('bnh,hm->bnm', y2, P['w1'][l], precision=HI)
                         + P['b1'][l, 0], approximate=False)
        h2 = jax.nn.gelu(jnp.einsum('bnm,mh->bnh', h1, P['w2'][l], precision=HI)
                         + P['b2'][l, 0], approximate=False)
        out = h2 + out
    clsv = out[:, 0]
    yf = _ln_ref(clsv, P['fc_g'][0], P['fc_b'][0])
    return jnp.einsum('bh,hc->bc', yf, P['fc_w'], precision=HI) + P['fc_bias'][0]


# ---------------------------------------------------------------------------
# deterministic parameter init (synthetic; shapes follow the module __init__)
# ---------------------------------------------------------------------------
def init_params(key, *, f, hidden, hidden_feats, mlp_hidden, num_layers,
                num_tokens, num_classes):
    ks = jax.random.split(key, 16)

    def nrm(k, shape, scale=0.1):
        return (scale * jax.random.normal(k, shape)).astype(jnp.float32)

    L = num_layers
    P = {
        'emb_w': nrm(ks[0], (f, hidden)),
        'emb_b': nrm(ks[1], (1, hidden)),
        'cls':   jax.random.normal(ks[2], (1, hidden), jnp.float32),
        'pos':   jax.random.normal(ks[3], (num_tokens, hidden), jnp.float32),
        'la1_g': jnp.ones((L, 1, hidden), jnp.float32),
        'la1_b': jnp.zeros((L, 1, hidden), jnp.float32),
        'wq':    nrm(ks[4], (L, hidden, hidden_feats)),
        'wk':    nrm(ks[5], (L, hidden, hidden_feats)),
        'wv':    nrm(ks[6], (L, hidden, hidden_feats)),
        'wo':    nrm(ks[7], (L, hidden_feats, hidden)),
        'bo':    nrm(ks[8], (L, 1, hidden)),
        'la2_g': jnp.ones((L, 1, hidden), jnp.float32),
        'la2_b': jnp.zeros((L, 1, hidden), jnp.float32),
        'w1':    nrm(ks[9], (L, hidden, mlp_hidden)),
        'b1':    nrm(ks[10], (L, 1, mlp_hidden)),
        'w2':    nrm(ks[11], (L, mlp_hidden, hidden)),
        'b2':    nrm(ks[12], (L, 1, hidden)),
        'fc_g':  jnp.ones((1, hidden), jnp.float32),
        'fc_b':  jnp.zeros((1, hidden), jnp.float32),
        'fc_w':  nrm(ks[13], (hidden, num_classes)),
        'fc_bias': nrm(ks[14], (1, num_classes)),
    }
    return P


# TODO(synk): `mask` path (F.pad + masked_fill) not implemented — the module is
# exercised with mask=None; dropout(p=0.0) is an identity and is omitted.
if __name__ == "__main__":
    # small config consistent with the module's forward (in_c=3 is hardcoded
    # in the module's `f = (img_size // patch)**2 * 3`)
    B, in_c, img_size = 8, 3, 16
    patch, head, num_layers = 4, 4, 2
    hidden, mlp_hidden, num_classes = 32, 64, 10
    patch_size = img_size // patch
    f = patch_size ** 2 * in_c                 # 48
    num_tokens = patch ** 2 + 1                # 17 (cls token)

    key = jax.random.PRNGKey(0)
    kx, kp = jax.random.split(key)
    x = jax.random.normal(kx, (B, in_c, img_size, img_size), jnp.float32)
    P = init_params(kp, f=f, hidden=hidden, hidden_feats=hidden,
                    mlp_hidden=mlp_hidden, num_layers=num_layers,
                    num_tokens=num_tokens, num_classes=num_classes)

    out = vit11_slim_forward(x, P, patch=patch, patch_size=patch_size,
                             head=head, batch_tile=4)
    out = jax.block_until_ready(out)
    assert out.shape == (B, num_classes)

    ref = jax.block_until_ready(
        reference_forward(x, P, patch=patch, patch_size=patch_size, head=head))
    if not np.allclose(np.asarray(out), np.asarray(ref), atol=2e-2, rtol=2e-2):
        raise AssertionError(
            f"kernel/reference mismatch, max abs err = "
            f"{np.max(np.abs(np.asarray(out) - np.asarray(ref)))}")

    print("KERNEL_OK")
</pallas_src>

<mosaic_0001>
module attributes {stable_mosaic.version = 11 : i64} {
  func.func @kernel(%arg0: i32, %arg1: i32, %arg2: memref<4x16x48xf32, #tpu.memory_space<vmem>>, %arg3: memref<1x32xf32, #tpu.memory_space<vmem>>, %arg4: memref<24x32xf32, #tpu.memory_space<vmem>>, %arg5: memref<48x32xf32, #tpu.memory_space<vmem>>, %arg6: memref<1x32xf32, #tpu.memory_space<vmem>>, %arg7: memref<1x1x32xf32, #tpu.memory_space<vmem>>, %arg8: memref<1x1x32xf32, #tpu.memory_space<vmem>>, %arg9: memref<1x32x32xf32, #tpu.memory_space<vmem>>, %arg10: memref<1x32x32xf32, #tpu.memory_space<vmem>>, %arg11: memref<1x32x32xf32, #tpu.memory_space<vmem>>, %arg12: memref<1x32x32xf32, #tpu.memory_space<vmem>>, %arg13: memref<1x1x32xf32, #tpu.memory_space<vmem>>, %arg14: memref<1x1x32xf32, #tpu.memory_space<vmem>>, %arg15: memref<1x1x32xf32, #tpu.memory_space<vmem>>, %arg16: memref<1x32x64xf32, #tpu.memory_space<vmem>>, %arg17: memref<1x1x64xf32, #tpu.memory_space<vmem>>, %arg18: memref<1x64x32xf32, #tpu.memory_space<vmem>>, %arg19: memref<1x1x32xf32, #tpu.memory_space<vmem>>, %arg20: memref<1x32xf32, #tpu.memory_space<vmem>>, %arg21: memref<1x32xf32, #tpu.memory_space<vmem>>, %arg22: memref<32x128xf32, #tpu.memory_space<vmem>>, %arg23: memref<1x128xf32, #tpu.memory_space<vmem>>, %arg24: memref<1x4x128xf32, #tpu.memory_space<vmem>>, %arg25: memref<4x24x32xf32, #tpu.memory_space<vmem>>) attributes {dimension_semantics = [#tpu.dimension_semantics<parallel>, #tpu.dimension_semantics<arbitrary>], iteration_bounds = array<i64: 2, 2>, scalar_prefetch = 0 : i64, scratch_operands = 1 : i64, tpu.core_type = #tpu.core_type<tc>, window_params = [{transform_indices = @transform_0, window_bounds = array<i64: 4, 16, 48>}, {pipeline_mode = #tpu.pipeline_mode<synchronous>, transform_indices = @transform_1, window_bounds = array<i64: 1, 32>}, {pipeline_mode = #tpu.pipeline_mode<synchronous>, transform_indices = @transform_2, window_bounds = array<i64: 24, 32>}, {pipeline_mode = #tpu.pipeline_mode<synchronous>, transform_indices = @transform_3, window_bounds = array<i64: 48, 32>}, {pipeline_mode = #tpu.pipeline_mode<synchronous>, transform_indices = @transform_4, window_bounds = array<i64: 1, 32>}, {transform_indices = @transform_5, window_bounds = array<i64: 1, 1, 32>}, {transform_indices = @transform_6, window_bounds = array<i64: 1, 1, 32>}, {transform_indices = @transform_7, window_bounds = array<i64: 1, 32, 32>}, {transform_indices = @transform_8, window_bounds = array<i64: 1, 32, 32>}, {transform_indices = @transform_9, window_bounds = array<i64: 1, 32, 32>}, {transform_indices = @transform_10, window_bounds = array<i64: 1, 32, 32>}, {transform_indices = @transform_11, window_bounds = array<i64: 1, 1, 32>}, {transform_indices = @transform_12, window_bounds = array<i64: 1, 1, 32>}, {transform_indices = @transform_13, window_bounds = array<i64: 1, 1, 32>}, {transform_indices = @transform_14, window_bounds = array<i64: 1, 32, 64>}, {transform_indices = @transform_15, window_bounds = array<i64: 1, 1, 64>}, {transform_indices = @transform_16, window_bounds = array<i64: 1, 64, 32>}, {transform_indices = @transform_17, window_bounds = array<i64: 1, 1, 32>}, {pipeline_mode = #tpu.pipeline_mode<synchronous>, transform_indices = @transform_18, window_bounds = array<i64: 1, 32>}, {pipeline_mode = #tpu.pipeline_mode<synchronous>, transform_indices = @transform_19, window_bounds = array<i64: 1, 32>}, {pipeline_mode = #tpu.pipeline_mode<synchronous>, transform_indices = @transform_20, window_bounds = array<i64: 32, 128>}, {pipeline_mode = #tpu.pipeline_mode<synchronous>, transform_indices = @transform_21, window_bounds = array<i64: 1, 128>}, {transform_indices = @transform_22, window_bounds = array<i64: 1, 4, 128>}]} {
    %c0_i32 = arith.constant 0 : i32
    %0 = arith.cmpi eq, %arg1, %c0_i32 : i32
    %1 = arith.extui %0 : i1 to i32
    %c0_i32_0 = arith.constant 0 : i32
    %2 = arith.cmpi ne, %1, %c0_i32_0 : i32
    scf.if %2 {
      %c0_112 = arith.constant 0 : index
      %c0_113 = arith.constant 0 : index
      %c0_114 = arith.constant 0 : index
      %258 = vector.load %arg2[%c0_112, %c0_113, %c0_114] : memref<4x16x48xf32, #tpu.memory_space<vmem>>, vector<4x16x48xf32>
      %259 = vector.shape_cast %258 : vector<4x16x48xf32> to vector<64x48xf32>
      %c0_115 = arith.constant 0 : index
      %c0_116 = arith.constant 0 : index
      %260 = vector.load %arg5[%c0_115, %c0_116] : memref<48x32xf32, #tpu.memory_space<vmem>>, vector<48x32xf32>
      %cst_117 = arith.constant dense<0.000000e+00> : vector<64x32xf32>
      %261 = tpu.matmul %259, %260, %cst_117 {dimension_numbers = #tpu.dot_dimension_numbers<[1], [0], [0], [1], [0, 0, 1, 1], [], []>} : vector<64x48xf32>, vector<48x32xf32>, vector<64x32xf32> -> vector<64x32xf32>
      %c0_118 = arith.constant 0 : index
      %c0_119 = arith.constant 0 : index
      %262 = vector.load %arg6[%c0_118, %c0_119] : memref<1x32xf32, #tpu.memory_space<vmem>>, vector<1x32xf32>
      %263 = vector.broadcast %262 : vector<1x32xf32> to vector<64x32xf32>
      %264 = arith.addf %261, %263 : vector<64x32xf32>
      %265 = vector.shape_cast %264 : vector<64x32xf32> to vector<4x16x32xf32>
      %c0_120 = arith.constant 0 : index
      %c0_121 = arith.constant 0 : index
      %266 = vector.load %arg3[%c0_120, %c0_121] : memref<1x32xf32, #tpu.memory_space<vmem>>, vector<1x32xf32>
      %267 = vector.shape_cast %266 : vector<1x32xf32> to vector<1x1x32xf32>
      %268 = vector.shape_cast %267 : vector<1x1x32xf32> to vector<1x1x32xf32>
      %269 = vector.broadcast %268 : vector<1x1x32xf32> to vector<4x1x32xf32>
      %cst_122 = arith.constant 0.000000e+00 : f32
      %270 = vector.broadcast %cst_122 : f32 to vector<4x7x32xf32>
      %271 = tpu.concatenate %269, %265, %270 in 1 : vector<4x1x32xf32>, vector<4x16x32xf32>, vector<4x7x32xf32> -> vector<4x24x32xf32>
      %c0_123 = arith.constant 0 : index
      %c0_124 = arith.constant 0 : index
      %272 = vector.load %arg4[%c0_123, %c0_124] : memref<24x32xf32, #tpu.memory_space<vmem>>, vector<24x32xf32>
      %273 = vector.shape_cast %272 : vector<24x32xf32> to vector<1x24x32xf32>
      %274 = vector.broadcast %273 : vector<1x24x32xf32> to vector<4x24x32xf32>
      %275 = arith.addf %271, %274 : vector<4x24x32xf32>
      %c0_125 = arith.constant 0 : index
      %c0_126 = arith.constant 0 : index
      %c0_127 = arith.constant 0 : index
      %276 = vector.load %arg25[%c0_125, %c0_126, %c0_127] : memref<4x24x32xf32, #tpu.memory_space<vmem>>, vector<4x24x32xf32>
      tpu.vector_store %arg25[%c0_125, %c0_126, %c0_127], %275 {strides = array<i32>} : memref<4x24x32xf32, #tpu.memory_space<vmem>>, vector<4x24x32xf32>,
    } else {
    }
    %c0 = arith.constant 0 : index
    %c0_1 = arith.constant 0 : index
    %c0_2 = arith.constant 0 : index
    %3 = vector.load %arg25[%c0, %c0_1, %c0_2] : memref<4x24x32xf32, #tpu.memory_space<vmem>>, vector<4x24x32xf32>
    %4 = vector.shape_cast %3 : vector<4x24x32xf32> to vector<96x32xf32>
    %c0_3 = arith.constant 0 : index
    %c0_4 = arith.constant 0 : index
    %c0_5 = arith.constant 0 : index
    %5 = vector.load %arg7[%c0_3, %c0_4, %c0_5] : memref<1x1x32xf32, #tpu.memory_space<vmem>>, vector<1x1x32xf32>
    %6 = vector.shape_cast %5 : vector<1x1x32xf32> to vector<1x32xf32>
    %c0_6 = arith.constant 0 : index
    %c0_7 = arith.constant 0 : index
    %c0_8 = arith.constant 0 : index
    %7 = vector.load %arg8[%c0_6, %c0_7, %c0_8] : memref<1x1x32xf32, #tpu.memory_space<vmem>>, vector<1x1x32xf32>
    %8 = vector.shape_cast %7 : vector<1x1x32xf32> to vector<1x32xf32>
    %cst = arith.constant dense<0.000000e+00> : vector<96xf32>
    %9 = vector.multi_reduction <add>, %4, %cst [1] : vector<96x32xf32> to vector<96xf32>
    %10 = vector.shape_cast %9 : vector<96xf32> to vector<96x1xf32>
    %cst_9 = arith.constant 3.200000e+01 : f32
    %11 = vector.broadcast %cst_9 : f32 to vector<96x1xf32>
    %12 = arith.divf %10, %11 : vector<96x1xf32>
    %13 = vector.broadcast %12 : vector<96x1xf32> to vector<96x32xf32>
    %14 = arith.subf %4, %13 : vector<96x32xf32>
    %15 = arith.mulf %14, %14 : vector<96x32xf32>
    %cst_10 = arith.constant dense<0.000000e+00> : vector<96xf32>
    %16 = vector.multi_reduction <add>, %15, %cst_10 [1] : vector<96x32xf32> to vector<96xf32>
    %17 = vector.shape_cast %16 : vector<96xf32> to vector<96x1xf32>
    %cst_11 = arith.constant 3.200000e+01 : f32
    %18 = vector.broadcast %cst_11 : f32 to vector<96x1xf32>
    %19 = arith.divf %17, %18 : vector<96x1xf32>
    %20 = vector.broadcast %12 : vector<96x1xf32> to vector<96x32xf32>
    %21 = arith.subf %4, %20 : vector<96x32xf32>
    %cst_12 = arith.constant 9.99999974E-6 : f32
    %22 = vector.broadcast %cst_12 : f32 to vector<96x1xf32>
    %23 = arith.addf %19, %22 : vector<96x1xf32>
    %24 = math.rsqrt %23 : vector<96x1xf32>
    %25 = vector.broadcast %24 : vector<96x1xf32> to vector<96x32xf32>
    %26 = arith.mulf %21, %25 : vector<96x32xf32>
    %27 = vector.broadcast %6 : vector<1x32xf32> to vector<96x32xf32>
    %28 = arith.mulf %26, %27 : vector<96x32xf32>
    %29 = vector.broadcast %8 : vector<1x32xf32> to vector<96x32xf32>
    %30 = arith.addf %28, %29 : vector<96x32xf32>
    %c0_13 = arith.constant 0 : index
    %c0_14 = arith.constant 0 : index
    %c0_15 = arith.constant 0 : index
    %31 = vector.load %arg9[%c0_13, %c0_14, %c0_15] : memref<1x32x32xf32, #tpu.memory_space<vmem>>, vector<1x32x32xf32>
    %32 = vector.shape_cast %31 : vector<1x32x32xf32> to vector<32x32xf32>
    %cst_16 = arith.constant dense<0.000000e+00> : vector<96x32xf32>
    %33 = tpu.matmul %30, %32, %cst_16 {dimension_numbers = #tpu.dot_dimension_numbers<[1], [0], [0], [1], [0, 0, 1, 1], [], []>} : vector<96x32xf32>, vector<32x32xf32>, vector<96x32xf32> -> vector<96x32xf32>
    %cst_17 = arith.constant 0.176776692 : f32
    %34 = vector.broadcast %cst_17 : f32 to vector<96x32xf32>
    %35 = arith.mulf %33, %34 : vector<96x32xf32>
    %c0_18 = arith.constant 0 : index
    %c0_19 = arith.constant 0 : index
    %c0_20 = arith.constant 0 : index
    %36 = vector.load %arg10[%c0_18, %c0_19, %c0_20] : memref<1x32x32xf32, #tpu.memory_space<vmem>>, vector<1x32x32xf32>
    %37 = vector.shape_cast %36 : vector<1x32x32xf32> to vector<32x32xf32>
    %cst_21 = arith.constant dense<0.000000e+00> : vector<96x32xf32>
    %38 = tpu.matmul %30, %37, %cst_21 {dimension_numbers = #tpu.dot_dimension_numbers<[1], [0], [0], [1], [0, 0, 1, 1], [], []>} : vector<96x32xf32>, vector<32x32xf32>, vector<96x32xf32> -> vector<96x32xf32>
    %c0_22 = arith.constant 0 : index
    %c0_23 = arith.constant 0 : index
    %c0_24 = arith.constant 0 : index
    %39 = vector.load %arg11[%c0_22, %c0_23, %c0_24] : memref<1x32x32xf32, #tpu.memory_space<vmem>>, vector<1x32x32xf32>
    %40 = vector.shape_cast %39 : vector<1x32x32xf32> to vector<32x32xf32>
    %cst_25 = arith.constant dense<0.000000e+00> : vector<96x32xf32>
    %41 = tpu.matmul %30, %40, %cst_25 {dimension_numbers = #tpu.dot_dimension_numbers<[1], [0], [0], [1], [0, 0, 1, 1], [], []>} : vector<96x32xf32>, vector<32x32xf32>, vector<96x32xf32> -> vector<96x32xf32>
    %42 = vector.shape_cast %35 : vector<96x32xf32> to vector<4x24x32xf32>
    %43 = vector.shape_cast %38 : vector<96x32xf32> to vector<4x24x32xf32>
    %44 = vector.shape_cast %41 : vector<96x32xf32> to vector<4x24x32xf32>
    %45 = tpu.iota {dimensions = array<i32: 1>} : vector<24x24xi32>
    %c17_i32 = arith.constant 17 : i32
    %46 = vector.broadcast %c17_i32 : i32 to vector<24x24xi32>
    %47 = arith.cmpi slt, %45, %46 : vector<24x24xi32>
    %cst_26 = arith.constant 0.000000e+00 : f32
    %cst_27 = arith.constant -1.000000e+30 : f32
    %48 = vector.broadcast %cst_26 : f32 to vector<24x24xf32>
    %49 = vector.broadcast %cst_27 : f32 to vector<24x24xf32>
    %50 = arith.select %47, %48, %49 : vector<24x24xi1>, vector<24x24xf32>
    %51 = vector.shape_cast %50 : vector<24x24xf32> to vector<1x24x24xf32>
    %52 = vector.extract_strided_slice %42 {offsets = [0, 0, 0], sizes = [4, 24, 8], strides = [1, 1, 1]} : vector<4x24x32xf32> to vector<4x24x8xf32>
    %53 = vector.extract_strided_slice %43 {offsets = [0, 0, 0], sizes = [4, 24, 8], strides = [1, 1, 1]} : vector<4x24x32xf32> to vector<4x24x8xf32>
    "tpu.trace_start"() <{level = 10 : i32, message = "bik,bjk->bij"}> : () -> ()
    %cst_28 = arith.constant dense<0.000000e+00> : vector<4x24x24xf32>
    %54 = tpu.matmul %52, %53, %cst_28 {dimension_numbers = #tpu.dot_dimension_numbers<[2], [2], [1], [1], [0, 0, 0, 1, 1, 1], [0], [0]>} : vector<4x24x8xf32>, vector<4x24x8xf32>, vector<4x24x24xf32> -> vector<4x24x24xf32>
    "tpu.trace_stop"() : () -> ()
    %55 = vector.broadcast %51 : vector<1x24x24xf32> to vector<4x24x24xf32>
    %56 = arith.addf %54, %55 : vector<4x24x24xf32>
    %cst_29 = arith.constant dense<0xFF800000> : vector<4x24xf32>
    %57 = vector.multi_reduction <maximumf>, %56, %cst_29 [2] : vector<4x24x24xf32> to vector<4x24xf32>
    %58 = vector.shape_cast %57 : vector<4x24xf32> to vector<4x24x1xf32>
    %59 = vector.broadcast %58 : vector<4x24x1xf32> to vector<4x24x24xf32>
    %60 = arith.subf %56, %59 : vector<4x24x24xf32>
    %61 = math.exp %60 : vector<4x24x24xf32>
    %cst_30 = arith.constant dense<0.000000e+00> : vector<4x24xf32>
    %62 = vector.multi_reduction <add>, %61, %cst_30 [2] : vector<4x24x24xf32> to vector<4x24xf32>
    %63 = vector.shape_cast %62 : vector<4x24xf32> to vector<4x24x1xf32>
    %64 = tpu.reciprocal %63 {approx = true} : vector<4x24x1xf32> -> vector<4x24x1xf32>
    %65 = vector.broadcast %64 : vector<4x24x1xf32> to vector<4x24x24xf32>
    %66 = arith.mulf %61, %65 : vector<4x24x24xf32>
    %67 = vector.extract_strided_slice %44 {offsets = [0, 0, 0], sizes = [4, 24, 8], strides = [1, 1, 1]} : vector<4x24x32xf32> to vector<4x24x8xf32>
    "tpu.trace_start"() <{level = 10 : i32, message = "bij,bjd->bid"}> : () -> ()
    %cst_31 = arith.constant dense<0.000000e+00> : vector<4x24x8xf32>
    %68 = tpu.matmul %66, %67, %cst_31 {dimension_numbers = #tpu.dot_dimension_numbers<[2], [1], [1], [2], [0, 0, 0, 1, 1, 2], [0], [0]>} : vector<4x24x24xf32>, vector<4x24x8xf32>, vector<4x24x8xf32> -> vector<4x24x8xf32>
    "tpu.trace_stop"() : () -> ()
    %69 = vector.extract_strided_slice %42 {offsets = [0, 0, 8], sizes = [4, 24, 8], strides = [1, 1, 1]} : vector<4x24x32xf32> to vector<4x24x8xf32>
    %70 = vector.extract_strided_slice %43 {offsets = [0, 0, 8], sizes = [4, 24, 8], strides = [1, 1, 1]} : vector<4x24x32xf32> to vector<4x24x8xf32>
    "tpu.trace_start"() <{level = 10 : i32, message = "bik,bjk->bij"}> : () -> ()
    %cst_32 = arith.constant dense<0.000000e+00> : vector<4x24x24xf32>
    %71 = tpu.matmul %69, %70, %cst_32 {dimension_numbers = #tpu.dot_dimension_numbers<[2], [2], [1], [1], [0, 0, 0, 1, 1, 1], [0], [0]>} : vector<4x24x8xf32>, vector<4x24x8xf32>, vector<4x24x24xf32> -> vector<4x24x24xf32>
    "tpu.trace_stop"() : () -> ()
    %72 = vector.broadcast %51 : vector<1x24x24xf32> to vector<4x24x24xf32>
    %73 = arith.addf %71, %72 : vector<4x24x24xf32>
    %cst_33 = arith.constant dense<0xFF800000> : vector<4x24xf32>
    %74 = vector.multi_reduction <maximumf>, %73, %cst_33 [2] : vector<4x24x24xf32> to vector<4x24xf32>
    %75 = vector.shape_cast %74 : vector<4x24xf32> to vector<4x24x1xf32>
    %76 = vector.broadcast %75 : vector<4x24x1xf32> to vector<4x24x24xf32>
    %77 = arith.subf %73, %76 : vector<4x24x24xf32>
    %78 = math.exp %77 : vector<4x24x24xf32>
    %cst_34 = arith.constant dense<0.000000e+00> : vector<4x24xf32>
    %79 = vector.multi_reduction <add>, %78, %cst_34 [2] : vector<4x24x24xf32> to vector<4x24xf32>
    %80 = vector.shape_cast %79 : vector<4x24xf32> to vector<4x24x1xf32>
    %81 = tpu.reciprocal %80 {approx = true} : vector<4x24x1xf32> -> vector<4x24x1xf32>
    %82 = vector.broadcast %81 : vector<4x24x1xf32> to vector<4x24x24xf32>
    %83 = arith.mulf %78, %82 : vector<4x24x24xf32>
    %84 = vector.extract_strided_slice %44 {offsets = [0, 0, 8], sizes = [4, 24, 8], strides = [1, 1, 1]} : vector<4x24x32xf32> to vector<4x24x8xf32>
    "tpu.trace_start"() <{level = 10 : i32, message = "bij,bjd->bid"}> : () -> ()
    %cst_35 = arith.constant dense<0.000000e+00> : vector<4x24x8xf32>
    %85 = tpu.matmul %83, %84, %cst_35 {dimension_numbers = #tpu.dot_dimension_numbers<[2], [1], [1], [2], [0, 0, 0, 1, 1, 2], [0], [0]>} : vector<4x24x24xf32>, vector<4x24x8xf32>, vector<4x24x8xf32> -> vector<4x24x8xf32>
    "tpu.trace_stop"() : () -> ()
    %86 = vector.extract_strided_slice %42 {offsets = [0, 0, 16], sizes = [4, 24, 8], strides = [1, 1, 1]} : vector<4x24x32xf32> to vector<4x24x8xf32>
    %87 = vector.extract_strided_slice %43 {offsets = [0, 0, 16], sizes = [4, 24, 8], strides = [1, 1, 1]} : vector<4x24x32xf32> to vector<4x24x8xf32>
    "tpu.trace_start"() <{level = 10 : i32, message = "bik,bjk->bij"}> : () -> ()
    %cst_36 = arith.constant dense<0.000000e+00> : vector<4x24x24xf32>
    %88 = tpu.matmul %86, %87, %cst_36 {dimension_numbers = #tpu.dot_dimension_numbers<[2], [2], [1], [1], [0, 0, 0, 1, 1, 1], [0], [0]>} : vector<4x24x8xf32>, vector<4x24x8xf32>, vector<4x24x24xf32> -> vector<4x24x24xf32>
    "tpu.trace_stop"() : () -> ()
    %89 = vector.broadcast %51 : vector<1x24x24xf32> to vector<4x24x24xf32>
    %90 = arith.addf %88, %89 : vector<4x24x24xf32>
    %cst_37 = arith.constant dense<0xFF800000> : vector<4x24xf32>
    %91 = vector.multi_reduction <maximumf>, %90, %cst_37 [2] : vector<4x24x24xf32> to vector<4x24xf32>
    %92 = vector.shape_cast %91 : vector<4x24xf32> to vector<4x24x1xf32>
    %93 = vector.broadcast %92 : vector<4x24x1xf32> to vector<4x24x24xf32>
    %94 = arith.subf %90, %93 : vector<4x24x24xf32>
    %95 = math.exp %94 : vector<4x24x24xf32>
    %cst_38 = arith.constant dense<0.000000e+00> : vector<4x24xf32>
    %96 = vector.multi_reduction <add>, %95, %cst_38 [2] : vector<4x24x24xf32> to vector<4x24xf32>
    %97 = vector.shape_cast %96 : vector<4x24xf32> to vector<4x24x1xf32>
    %98 = tpu.reciprocal %97 {approx = true} : vector<4x24x1xf32> -> vector<4x24x1xf32>
    %99 = vector.broadcast %98 : vector<4x24x1xf32> to vector<4x24x24xf32>
    %100 = arith.mulf %95, %99 : vector<4x24x24xf32>
    %101 = vector.extract_strided_slice %44 {offsets = [0, 0, 16], sizes = [4, 24, 8], strides = [1, 1, 1]} : vector<4x24x32xf32> to vector<4x24x8xf32>
    "tpu.trace_start"() <{level = 10 : i32, message = "bij,bjd->bid"}> : () -> ()
    %cst_39 = arith.constant dense<0.000000e+00> : vector<4x24x8xf32>
    %102 = tpu.matmul %100, %101, %cst_39 {dimension_numbers = #tpu.dot_dimension_numbers<[2], [1], [1], [2], [0, 0, 0, 1, 1, 2], [0], [0]>} : vector<4x24x24xf32>, vector<4x24x8xf32>, vector<4x24x8xf32> -> vector<4x24x8xf32>
    "tpu.trace_stop"() : () -> ()
    %103 = vector.extract_strided_slice %42 {offsets = [0, 0, 24], sizes = [4, 24, 8], strides = [1, 1, 1]} : vector<4x24x32xf32> to vector<4x24x8xf32>
    %104 = vector.extract_strided_slice %43 {offsets = [0, 0, 24], sizes = [4, 24, 8], strides = [1, 1, 1]} : vector<4x24x32xf32> to vector<4x24x8xf32>
    "tpu.trace_start"() <{level = 10 : i32, message = "bik,bjk->bij"}> : () -> ()
    %cst_40 = arith.constant dense<0.000000e+00> : vector<4x24x24xf32>
    %105 = tpu.matmul %103, %104, %cst_40 {dimension_numbers = #tpu.dot_dimension_numbers<[2], [2], [1], [1], [0, 0, 0, 1, 1, 1], [0], [0]>} : vector<4x24x8xf32>, vector<4x24x8xf32>, vector<4x24x24xf32> -> vector<4x24x24xf32>
    "tpu.trace_stop"() : () -> ()
    %106 = vector.broadcast %51 : vector<1x24x24xf32> to vector<4x24x24xf32>
    %107 = arith.addf %105, %106 : vector<4x24x24xf32>
    %cst_41 = arith.constant dense<0xFF800000> : vector<4x24xf32>
    %108 = vector.multi_reduction <maximumf>, %107, %cst_41 [2] : vector<4x24x24xf32> to vector<4x24xf32>
    %109 = vector.shape_cast %108 : vector<4x24xf32> to vector<4x24x1xf32>
    %110 = vector.broadcast %109 : vector<4x24x1xf32> to vector<4x24x24xf32>
    %111 = arith.subf %107, %110 : vector<4x24x24xf32>
    %112 = math.exp %111 : vector<4x24x24xf32>
    %cst_42 = arith.constant dense<0.000000e+00> : vector<4x24xf32>
    %113 = vector.multi_reduction <add>, %112, %cst_42 [2] : vector<4x24x24xf32> to vector<4x24xf32>
    %114 = vector.shape_cast %113 : vector<4x24xf32> to vector<4x24x1xf32>
    %115 = tpu.reciprocal %114 {approx = true} : vector<4x24x1xf32> -> vector<4x24x1xf32>
    %116 = vector.broadcast %115 : vector<4x24x1xf32> to vector<4x24x24xf32>
    %117 = arith.mulf %112, %116 : vector<4x24x24xf32>
    %118 = vector.extract_strided_slice %44 {offsets = [0, 0, 24], sizes = [4, 24, 8], strides = [1, 1, 1]} : vector<4x24x32xf32> to vector<4x24x8xf32>
    "tpu.trace_start"() <{level = 10 : i32, message = "bij,bjd->bid"}> : () -> ()
    %cst_43 = arith.constant dense<0.000000e+00> : vector<4x24x8xf32>
    %119 = tpu.matmul %117, %118, %cst_43 {dimension_numbers = #tpu.dot_dimension_numbers<[2], [1], [1], [2], [0, 0, 0, 1, 1, 2], [0], [0]>} : vector<4x24x24xf32>, vector<4x24x8xf32>, vector<4x24x8xf32> -> vector<4x24x8xf32>
    "tpu.trace_stop"() : () -> ()
    %120 = tpu.concatenate %68, %85, %102, %119 in 2 : vector<4x24x8xf32>, vector<4x24x8xf32>, vector<4x24x8xf32>, vector<4x24x8xf32> -> vector<4x24x32xf32>
    %121 = vector.shape_cast %120 : vector<4x24x32xf32> to vector<96x32xf32>
    %c0_44 = arith.constant 0 : index
    %c0_45 = arith.constant 0 : index
    %c0_46 = arith.constant 0 : index
    %122 = vector.load %arg12[%c0_44, %c0_45, %c0_46] : memref<1x32x32xf32, #tpu.memory_space<vmem>>, vector<1x32x32xf32>
    %123 = vector.shape_cast %122 : vector<1x32x32xf32> to vector<32x32xf32>
    %cst_47 = arith.constant dense<0.000000e+00> : vector<96x32xf32>
    %124 = tpu.matmul %121, %123, %cst_47 {dimension_numbers = #tpu.dot_dimension_numbers<[1], [0], [0], [1], [0, 0, 1, 1], [], []>} : vector<96x32xf32>, vector<32x32xf32>, vector<96x32xf32> -> vector<96x32xf32>
    %c0_48 = arith.constant 0 : index
    %c0_49 = arith.constant 0 : index
    %c0_50 = arith.constant 0 : index
    %125 = vector.load %arg13[%c0_48, %c0_49, %c0_50] : memref<1x1x32xf32, #tpu.memory_space<vmem>>, vector<1x1x32xf32>
    %126 = vector.shape_cast %125 : vector<1x1x32xf32> to vector<1x32xf32>
    %127 = vector.broadcast %126 : vector<1x32xf32> to vector<96x32xf32>
    %128 = arith.addf %124, %127 : vector<96x32xf32>
    %129 = arith.addf %4, %128 : vector<96x32xf32>
    %c0_51 = arith.constant 0 : index
    %c0_52 = arith.constant 0 : index
    %c0_53 = arith.constant 0 : index
    %130 = vector.load %arg14[%c0_51, %c0_52, %c0_53] : memref<1x1x32xf32, #tpu.memory_space<vmem>>, vector<1x1x32xf32>
    %131 = vector.shape_cast %130 : vector<1x1x32xf32> to vector<1x32xf32>
    %c0_54 = arith.constant 0 : index
    %c0_55 = arith.constant 0 : index
    %c0_56 = arith.constant 0 : index
    %132 = vector.load %arg15[%c0_54, %c0_55, %c0_56] : memref<1x1x32xf32, #tpu.memory_space<vmem>>, vector<1x1x32xf32>
    %133 = vector.shape_cast %132 : vector<1x1x32xf32> to vector<1x32xf32>
    %cst_57 = arith.constant dense<0.000000e+00> : vector<96xf32>
    %134 = vector.multi_reduction <add>, %129, %cst_57 [1] : vector<96x32xf32> to vector<96xf32>
    %135 = vector.shape_cast %134 : vector<96xf32> to vector<96x1xf32>
    %cst_58 = arith.constant 3.200000e+01 : f32
    %136 = vector.broadcast %cst_58 : f32 to vector<96x1xf32>
    %137 = arith.divf %135, %136 : vector<96x1xf32>
    %138 = vector.broadcast %137 : vector<96x1xf32> to vector<96x32xf32>
    %139 = arith.subf %129, %138 : vector<96x32xf32>
    %140 = arith.mulf %139, %139 : vector<96x32xf32>
    %cst_59 = arith.constant dense<0.000000e+00> : vector<96xf32>
    %141 = vector.multi_reduction <add>, %140, %cst_59 [1] : vector<96x32xf32> to vector<96xf32>
    %142 = vector.shape_cast %141 : vector<96xf32> to vector<96x1xf32>
    %cst_60 = arith.constant 3.200000e+01 : f32
    %143 = vector.broadcast %cst_60 : f32 to vector<96x1xf32>
    %144 = arith.divf %142, %143 : vector<96x1xf32>
    %145 = vector.broadcast %137 : vector<96x1xf32> to vector<96x32xf32>
    %146 = arith.subf %129, %145 : vector<96x32xf32>
    %cst_61 = arith.constant 9.99999974E-6 : f32
    %147 = vector.broadcast %cst_61 : f32 to vector<96x1xf32>
    %148 = arith.addf %144, %147 : vector<96x1xf32>
    %149 = math.rsqrt %148 : vector<96x1xf32>
    %150 = vector.broadcast %149 : vector<96x1xf32> to vector<96x32xf32>
    %151 = arith.mulf %146, %150 : vector<96x32xf32>
    %152 = vector.broadcast %131 : vector<1x32xf32> to vector<96x32xf32>
    %153 = arith.mulf %151, %152 : vector<96x32xf32>
    %154 = vector.broadcast %133 : vector<1x32xf32> to vector<96x32xf32>
    %155 = arith.addf %153, %154 : vector<96x32xf32>
    %c0_62 = arith.constant 0 : index
    %c0_63 = arith.constant 0 : index
    %c0_64 = arith.constant 0 : index
    %156 = vector.load %arg16[%c0_62, %c0_63, %c0_64] : memref<1x32x64xf32, #tpu.memory_space<vmem>>, vector<1x32x64xf32>
    %157 = vector.shape_cast %156 : vector<1x32x64xf32> to vector<32x64xf32>
    %cst_65 = arith.constant dense<0.000000e+00> : vector<96x64xf32>
    %158 = tpu.matmul %155, %157, %cst_65 {dimension_numbers = #tpu.dot_dimension_numbers<[1], [0], [0], [1], [0, 0, 1, 1], [], []>} : vector<96x32xf32>, vector<32x64xf32>, vector<96x64xf32> -> vector<96x64xf32>
    %c0_66 = arith.constant 0 : index
    %c0_67 = arith.constant 0 : index
    %c0_68 = arith.constant 0 : index
    %159 = vector.load %arg17[%c0_66, %c0_67, %c0_68] : memref<1x1x64xf32, #tpu.memory_space<vmem>>, vector<1x1x64xf32>
    %160 = vector.shape_cast %159 : vector<1x1x64xf32> to vector<1x64xf32>
    %161 = vector.broadcast %160 : vector<1x64xf32> to vector<96x64xf32>
    %162 = arith.addf %158, %161 : vector<96x64xf32>
    %cst_69 = arith.constant 5.000000e-01 : f32
    %163 = vector.broadcast %cst_69 : f32 to vector<96x64xf32>
    %164 = arith.mulf %163, %162 : vector<96x64xf32>
    %cst_70 = arith.constant 0.707106769 : f32
    %165 = vector.broadcast %cst_70 : f32 to vector<96x64xf32>
    %166 = arith.mulf %162, %165 : vector<96x64xf32>
    %cst_71 = arith.constant 0.000000e+00 : f32
    %167 = vector.broadcast %cst_71 : f32 to vector<96x64xf32>
    %168 = arith.cmpf oge, %166, %167 : vector<96x64xf32>
    %cst_72 = arith.constant 1.000000e+00 : f32
    %cst_73 = arith.constant -1.000000e+00 : f32
    %169 = vector.broadcast %cst_72 : f32 to vector<96x64xf32>
    %170 = vector.broadcast %cst_73 : f32 to vector<96x64xf32>
    %171 = arith.select %168, %169, %170 : vector<96x64xi1>, vector<96x64xf32>
    %172 = math.absf %166 : vector<96x64xf32>
    %cst_74 = arith.constant 0.327591091 : f32
    %173 = vector.broadcast %cst_74 : f32 to vector<96x64xf32>
    %174 = arith.mulf %173, %172 : vector<96x64xf32>
    %cst_75 = arith.constant 1.000000e+00 : f32
    %175 = vector.broadcast %cst_75 : f32 to vector<96x64xf32>
    %176 = arith.addf %175, %174 : vector<96x64xf32>
    %cst_76 = arith.constant 1.000000e+00 : f32
    %177 = vector.broadcast %cst_76 : f32 to vector<96x64xf32>
    %178 = arith.divf %177, %176 : vector<96x64xf32>
    %cst_77 = arith.constant 1.06140542 : f32
    %179 = vector.broadcast %cst_77 : f32 to vector<96x64xf32>
    %180 = arith.mulf %179, %178 : vector<96x64xf32>
    %cst_78 = arith.constant -1.45315206 : f32
    %181 = vector.broadcast %cst_78 : f32 to vector<96x64xf32>
    %182 = arith.addf %180, %181 : vector<96x64xf32>
    %183 = arith.mulf %182, %178 : vector<96x64xf32>
    %cst_79 = arith.constant 1.42141378 : f32
    %184 = vector.broadcast %cst_79 : f32 to vector<96x64xf32>
    %185 = arith.addf %183, %184 : vector<96x64xf32>
    %186 = arith.mulf %185, %178 : vector<96x64xf32>
    %cst_80 = arith.constant -0.284496725 : f32
    %187 = vector.broadcast %cst_80 : f32 to vector<96x64xf32>
    %188 = arith.addf %186, %187 : vector<96x64xf32>
    %189 = arith.mulf %188, %178 : vector<96x64xf32>
    %cst_81 = arith.constant 0.254829586 : f32
    %190 = vector.broadcast %cst_81 : f32 to vector<96x64xf32>
    %191 = arith.addf %189, %190 : vector<96x64xf32>
    %192 = arith.mulf %191, %178 : vector<96x64xf32>
    %cst_82 = arith.constant 0.000000e+00 : f32
    %193 = vector.broadcast %cst_82 : f32 to vector<96x64xf32>
    %194 = arith.subf %193, %172 : vector<96x64xf32>
    %195 = arith.mulf %194, %172 : vector<96x64xf32>
    %196 = math.exp %195 : vector<96x64xf32>
    %197 = arith.mulf %192, %196 : vector<96x64xf32>
    %cst_83 = arith.constant 1.000000e+00 : f32
    %198 = vector.broadcast %cst_83 : f32 to vector<96x64xf32>
    %199 = arith.subf %198, %197 : vector<96x64xf32>
    %200 = arith.mulf %171, %199 : vector<96x64xf32>
    %cst_84 = arith.constant 1.000000e+00 : f32
    %201 = vector.broadcast %cst_84 : f32 to vector<96x64xf32>
    %202 = arith.addf %201, %200 : vector<96x64xf32>
    %203 = arith.mulf %164, %202 : vector<96x64xf32>
    %c0_85 = arith.constant 0 : index
    %c0_86 = arith.constant 0 : index
    %c0_87 = arith.constant 0 : index
    %204 = vector.load %arg18[%c0_85, %c0_86, %c0_87] : memref<1x64x32xf32, #tpu.memory_space<vmem>>, vector<1x64x32xf32>
    %205 = vector.shape_cast %204 : vector<1x64x32xf32> to vector<64x32xf32>
    %cst_88 = arith.constant dense<0.000000e+00> : vector<96x32xf32>
    %206 = tpu.matmul %203, %205, %cst_88 {dimension_numbers = #tpu.dot_dimension_numbers<[1], [0], [0], [1], [0, 0, 1, 1], [], []>} : vector<96x64xf32>, vector<64x32xf32>, vector<96x32xf32> -> vector<96x32xf32>
    %c0_89 = arith.constant 0 : index
    %c0_90 = arith.constant 0 : index
    %c0_91 = arith.constant 0 : index
    %207 = vector.load %arg19[%c0_89, %c0_90, %c0_91] : memref<1x1x32xf32, #tpu.memory_space<vmem>>, vector<1x1x32xf32>
    %208 = vector.shape_cast %207 : vector<1x1x32xf32> to vector<1x32xf32>
    %209 = vector.broadcast %208 : vector<1x32xf32> to vector<96x32xf32>
    %210 = arith.addf %206, %209 : vector<96x32xf32>
    %cst_92 = arith.constant 5.000000e-01 : f32
    %211 = vector.broadcast %cst_92 : f32 to vector<96x32xf32>
    %212 = arith.mulf %211, %210 : vector<96x32xf32>
    %cst_93 = arith.constant 0.707106769 : f32
    %213 = vector.broadcast %cst_93 : f32 to vector<96x32xf32>
    %214 = arith.mulf %210, %213 : vector<96x32xf32>
    %cst_94 = arith.constant 0.000000e+00 : f32
    %215 = vector.broadcast %cst_94 : f32 to vector<96x32xf32>
    %216 = arith.cmpf oge, %214, %215 : vector<96x32xf32>
    %cst_95 = arith.constant 1.000000e+00 : f32
    %cst_96 = arith.constant -1.000000e+00 : f32
    %217 = vector.broadcast %cst_95 : f32 to vector<96x32xf32>
    %218 = vector.broadcast %cst_96 : f32 to vector<96x32xf32>
    %219 = arith.select %216, %217, %218 : vector<96x32xi1>, vector<96x32xf32>
    %220 = math.absf %214 : vector<96x32xf32>
    %cst_97 = arith.constant 0.327591091 : f32
    %221 = vector.broadcast %cst_97 : f32 to vector<96x32xf32>
    %222 = arith.mulf %221, %220 : vector<96x32xf32>
    %cst_98 = arith.constant 1.000000e+00 : f32
    %223 = vector.broadcast %cst_98 : f32 to vector<96x32xf32>
    %224 = arith.addf %223, %222 : vector<96x32xf32>
    %cst_99 = arith.constant 1.000000e+00 : f32
    %225 = vector.broadcast %cst_99 : f32 to vector<96x32xf32>
    %226 = arith.divf %225, %224 : vector<96x32xf32>
    %cst_100 = arith.constant 1.06140542 : f32
    %227 = vector.broadcast %cst_100 : f32 to vector<96x32xf32>
    %228 = arith.mulf %227, %226 : vector<96x32xf32>
    %cst_101 = arith.constant -1.45315206 : f32
    %229 = vector.broadcast %cst_101 : f32 to vector<96x32xf32>
    %230 = arith.addf %228, %229 : vector<96x32xf32>
    %231 = arith.mulf %230, %226 : vector<96x32xf32>
    %cst_102 = arith.constant 1.42141378 : f32
    %232 = vector.broadcast %cst_102 : f32 to vector<96x32xf32>
    %233 = arith.addf %231, %232 : vector<96x32xf32>
    %234 = arith.mulf %233, %226 : vector<96x32xf32>
    %cst_103 = arith.constant -0.284496725 : f32
    %235 = vector.broadcast %cst_103 : f32 to vector<96x32xf32>
    %236 = arith.addf %234, %235 : vector<96x32xf32>
    %237 = arith.mulf %236, %226 : vector<96x32xf32>
    %cst_104 = arith.constant 0.254829586 : f32
    %238 = vector.broadcast %cst_104 : f32 to vector<96x32xf32>
    %239 = arith.addf %237, %238 : vector<96x32xf32>
    %240 = arith.mulf %239, %226 : vector<96x32xf32>
    %cst_105 = arith.constant 0.000000e+00 : f32
    %241 = vector.broadcast %cst_105 : f32 to vector<96x32xf32>
    %242 = arith.subf %241, %220 : vector<96x32xf32>
    %243 = arith.mulf %242, %220 : vector<96x32xf32>
    %244 = math.exp %243 : vector<96x32xf32>
    %245 = arith.mulf %240, %244 : vector<96x32xf32>
    %cst_106 = arith.constant 1.000000e+00 : f32
    %246 = vector.broadcast %cst_106 : f32 to vector<96x32xf32>
    %247 = arith.subf %246, %245 : vector<96x32xf32>
    %248 = arith.mulf %219, %247 : vector<96x32xf32>
    %cst_107 = arith.constant 1.000000e+00 : f32
    %249 = vector.broadcast %cst_107 : f32 to vector<96x32xf32>
    %250 = arith.addf %249, %248 : vector<96x32xf32>
    %251 = arith.mulf %212, %250 : vector<96x32xf32>
    %252 = arith.addf %129, %251 : vector<96x32xf32>
    %253 = vector.shape_cast %252 : vector<96x32xf32> to vector<4x24x32xf32>
    %c0_108 = arith.constant 0 : index
    %c0_109 = arith.constant 0 : index
    %c0_110 = arith.constant 0 : index
    %254 = vector.load %arg25[%c0_108, %c0_109, %c0_110] : memref<4x24x32xf32, #tpu.memory_space<vmem>>, vector<4x24x32xf32>
    tpu.vector_store %arg25[%c0_108, %c0_109, %c0_110], %253 {strides = array<i32>} : memref<4x24x32xf32, #tpu.memory_space<vmem>>, vector<4x24x32xf32>,
    %c1_i32 = arith.constant 1 : i32
    %255 = arith.cmpi eq, %arg1, %c1_i32 : i32
    %256 = arith.extui %255 : i1 to i32
    %c0_i32_111 = arith.constant 0 : i32
    %257 = arith.cmpi ne, %256, %c0_i32_111 : i32
    scf.if %257 {
      %258 = vector.shape_cast %252 : vector<96x32xf32> to vector<4x24x32xf32>
      %259 = vector.extract_strided_slice %258 {offsets = [0, 0, 0], sizes = [4, 1, 32], strides = [1, 1, 1]} : vector<4x24x32xf32> to vector<4x1x32xf32>
      %260 = vector.shape_cast %259 : vector<4x1x32xf32> to vector<4x32xf32>
      %c0_112 = arith.constant 0 : index
      %c0_113 = arith.constant 0 : index
      %261 = vector.load %arg20[%c0_112, %c0_113] : memref<1x32xf32, #tpu.memory_space<vmem>>, vector<1x32xf32>
      %c0_114 = arith.constant 0 : index
      %c0_115 = arith.constant 0 : index
      %262 = vector.load %arg21[%c0_114, %c0_115] : memref<1x32xf32, #tpu.memory_space<vmem>>, vector<1x32xf32>
      %cst_116 = arith.constant dense<0.000000e+00> : vector<4xf32>
      %263 = vector.multi_reduction <add>, %260, %cst_116 [1] : vector<4x32xf32> to vector<4xf32>
      %264 = vector.shape_cast %263 : vector<4xf32> to vector<4x1xf32>
      %cst_117 = arith.constant 3.200000e+01 : f32
      %265 = vector.broadcast %cst_117 : f32 to vector<4x1xf32>
      %266 = arith.divf %264, %265 : vector<4x1xf32>
      %267 = vector.broadcast %266 : vector<4x1xf32> to vector<4x32xf32>
      %268 = arith.subf %260, %267 : vector<4x32xf32>
      %269 = arith.mulf %268, %268 : vector<4x32xf32>
      %cst_118 = arith.constant dense<0.000000e+00> : vector<4xf32>
      %270 = vector.multi_reduction <add>, %269, %cst_118 [1] : vector<4x32xf32> to vector<4xf32>
      %271 = vector.shape_cast %270 : vector<4xf32> to vector<4x1xf32>
      %cst_119 = arith.constant 3.200000e+01 : f32
      %272 = vector.broadcast %cst_119 : f32 to vector<4x1xf32>
      %273 = arith.divf %271, %272 : vector<4x1xf32>
      %274 = vector.broadcast %266 : vector<4x1xf32> to vector<4x32xf32>
      %275 = arith.subf %260, %274 : vector<4x32xf32>
      %cst_120 = arith.constant 9.99999974E-6 : f32
      %276 = vector.broadcast %cst_120 : f32 to vector<4x1xf32>
      %277 = arith.addf %273, %276 : vector<4x1xf32>
      %278 = math.rsqrt %277 : vector<4x1xf32>
      %279 = vector.broadcast %278 : vector<4x1xf32> to vector<4x32xf32>
      %280 = arith.mulf %275, %279 : vector<4x32xf32>
      %281 = vector.broadcast %261 : vector<1x32xf32> to vector<4x32xf32>
      %282 = arith.mulf %280, %281 : vector<4x32xf32>
      %283 = vector.broadcast %262 : vector<1x32xf32> to vector<4x32xf32>
      %284 = arith.addf %282, %283 : vector<4x32xf32>
      %c0_121 = arith.constant 0 : index
      %c0_122 = arith.constant 0 : index
      %285 = vector.load %arg22[%c0_121, %c0_122] : memref<32x128xf32, #tpu.memory_space<vmem>>, vector<32x128xf32>
      %cst_123 = arith.constant dense<0.000000e+00> : vector<4x128xf32>
      %286 = tpu.matmul %284, %285, %cst_123 {dimension_numbers = #tpu.dot_dimension_numbers<[1], [0], [0], [1], [0, 0, 1, 1], [], []>} : vector<4x32xf32>, vector<32x128xf32>, vector<4x128xf32> -> vector<4x128xf32>
      %c0_124 = arith.constant 0 : index
      %c0_125 = arith.constant 0 : index
      %287 = vector.load %arg23[%c0_124, %c0_125] : memref<1x128xf32, #tpu.memory_space<vmem>>, vector<1x128xf32>
      %288 = vector.broadcast %287 : vector<1x128xf32> to vector<4x128xf32>
      %289 = arith.addf %286, %288 : vector<4x128xf32>
      %c0_126 = arith.constant 0 : index
      %c0_127 = arith.constant 0 : index
      %c0_128 = arith.constant 0 : index
      %290 = vector.load %arg24[%c0_126, %c0_127, %c0_128] : memref<1x4x128xf32, #tpu.memory_space<vmem>>, vector<1x4x128xf32>
      %291 = vector.shape_cast %290 : vector<1x4x128xf32> to vector<4x128xf32>
      %292 = vector.shape_cast %289 : vector<4x128xf32> to vector<1x4x128xf32>
      tpu.vector_store %arg24[%c0_126, %c0_127, %c0_128], %292 {strides = array<i32>} : memref<1x4x128xf32, #tpu.memory_space<vmem>>, vector<1x4x128xf32>,
    } else {
    }
    return
  }
  func.func @transform_0(%arg0: i32, %arg1: i32) -> (i32, i32, i32) {
    %c0_i32 = arith.constant 0 : i32
    %c0_i32_0 = arith.constant 0 : i32
    %c0_i32_1 = arith.constant 0 : i32
    return %arg0, %c0_i32, %c0_i32_0 : i32, i32, i32
  }
  func.func @transform_1(%arg0: i32, %arg1: i32) -> (i32, i32) {
    %c0_i32 = arith.constant 0 : i32
    %c0_i32_0 = arith.constant 0 : i32
    %c0_i32_1 = arith.constant 0 : i32
    return %c0_i32, %c0_i32_0 : i32, i32
  }
  func.func @transform_2(%arg0: i32, %arg1: i32) -> (i32, i32) {
    %c0_i32 = arith.constant 0 : i32
    %c0_i32_0 = arith.constant 0 : i32
    %c0_i32_1 = arith.constant 0 : i32
    return %c0_i32, %c0_i32_0 : i32, i32
  }
  func.func @transform_3(%arg0: i32, %arg1: i32) -> (i32, i32) {
    %c0_i32 = arith.constant 0 : i32
    %c0_i32_0 = arith.constant 0 : i32
    %c0_i32_1 = arith.constant 0 : i32
    return %c0_i32, %c0_i32_0 : i32, i32
  }
  func.func @transform_4(%arg0: i32, %arg1: i32) -> (i32, i32) {
    %c0_i32 = arith.constant 0 : i32
    %c0_i32_0 = arith.constant 0 : i32
    %c0_i32_1 = arith.constant 0 : i32
    return %c0_i32, %c0_i32_0 : i32, i32
  }
  func.func @transform_5(%arg0: i32, %arg1: i32) -> (i32, i32, i32) {
    %c0_i32 = arith.constant 0 : i32
    %c0_i32_0 = arith.constant 0 : i32
    %c0_i32_1 = arith.constant 0 : i32
    return %arg1, %c0_i32, %c0_i32_0 : i32, i32, i32
  }
  func.func @transform_6(%arg0: i32, %arg1: i32) -> (i32, i32, i32) {
    %c0_i32 = arith.constant 0 : i32
    %c0_i32_0 = arith.constant 0 : i32
    %c0_i32_1 = arith.constant 0 : i32
    return %arg1, %c0_i32, %c0_i32_0 : i32, i32, i32
  }
  func.func @transform_7(%arg0: i32, %arg1: i32) -> (i32, i32, i32) {
    %c0_i32 = arith.constant 0 : i32
    %c0_i32_0 = arith.constant 0 : i32
    %c0_i32_1 = arith.constant 0 : i32
    return %arg1, %c0_i32, %c0_i32_0 : i32, i32, i32
  }
  func.func @transform_8(%arg0: i32, %arg1: i32) -> (i32, i32, i32) {
    %c0_i32 = arith.constant 0 : i32
    %c0_i32_0 = arith.constant 0 : i32
    %c0_i32_1 = arith.constant 0 : i32
    return %arg1, %c0_i32, %c0_i32_0 : i32, i32, i32
  }
  func.func @transform_9(%arg0: i32, %arg1: i32) -> (i32, i32, i32) {
    %c0_i32 = arith.constant 0 : i32
    %c0_i32_0 = arith.constant 0 : i32
    %c0_i32_1 = arith.constant 0 : i32
    return %arg1, %c0_i32, %c0_i32_0 : i32, i32, i32
  }
  func.func @transform_10(%arg0: i32, %arg1: i32) -> (i32, i32, i32) {
    %c0_i32 = arith.constant 0 : i32
    %c0_i32_0 = arith.constant 0 : i32
    %c0_i32_1 = arith.constant 0 : i32
    return %arg1, %c0_i32, %c0_i32_0 : i32, i32, i32
  }
  func.func @transform_11(%arg0: i32, %arg1: i32) -> (i32, i32, i32) {
    %c0_i32 = arith.constant 0 : i32
    %c0_i32_0 = arith.constant 0 : i32
    %c0_i32_1 = arith.constant 0 : i32
    return %arg1, %c0_i32, %c0_i32_0 : i32, i32, i32
  }
  func.func @transform_12(%arg0: i32, %arg1: i32) -> (i32, i32, i32) {
    %c0_i32 = arith.constant 0 : i32
    %c0_i32_0 = arith.constant 0 : i32
    %c0_i32_1 = arith.constant 0 : i32
    return %arg1, %c0_i32, %c0_i32_0 : i32, i32, i32
  }
  func.func @transform_13(%arg0: i32, %arg1: i32) -> (i32, i32, i32) {
    %c0_i32 = arith.constant 0 : i32
    %c0_i32_0 = arith.constant 0 : i32
    %c0_i32_1 = arith.constant 0 : i32
    return %arg1, %c0_i32, %c0_i32_0 : i32, i32, i32
  }
  func.func @transform_14(%arg0: i32, %arg1: i32) -> (i32, i32, i32) {
    %c0_i32 = arith.constant 0 : i32
    %c0_i32_0 = arith.constant 0 : i32
    %c0_i32_1 = arith.constant 0 : i32
    return %arg1, %c0_i32, %c0_i32_0 : i32, i32, i32
  }
  func.func @transform_15(%arg0: i32, %arg1: i32) -> (i32, i32, i32) {
    %c0_i32 = arith.constant 0 : i32
    %c0_i32_0 = arith.constant 0 : i32
    %c0_i32_1 = arith.constant 0 : i32
    return %arg1, %c0_i32, %c0_i32_0 : i32, i32, i32
  }
  func.func @transform_16(%arg0: i32, %arg1: i32) -> (i32, i32, i32) {
    %c0_i32 = arith.constant 0 : i32
    %c0_i32_0 = arith.constant 0 : i32
    %c0_i32_1 = arith.constant 0 : i32
    return %arg1, %c0_i32, %c0_i32_0 : i32, i32, i32
  }
  func.func @transform_17(%arg0: i32, %arg1: i32) -> (i32, i32, i32) {
    %c0_i32 = arith.constant 0 : i32
    %c0_i32_0 = arith.constant 0 : i32
    %c0_i32_1 = arith.constant 0 : i32
    return %arg1, %c0_i32, %c0_i32_0 : i32, i32, i32
  }
  func.func @transform_18(%arg0: i32, %arg1: i32) -> (i32, i32) {
    %c0_i32 = arith.constant 0 : i32
    %c0_i32_0 = arith.constant 0 : i32
    %c0_i32_1 = arith.constant 0 : i32
    return %c0_i32, %c0_i32_0 : i32, i32
  }
  func.func @transform_19(%arg0: i32, %arg1: i32) -> (i32, i32) {
    %c0_i32 = arith.constant 0 : i32
    %c0_i32_0 = arith.constant 0 : i32
    %c0_i32_1 = arith.constant 0 : i32
    return %c0_i32, %c0_i32_0 : i32, i32
  }
  func.func @transform_20(%arg0: i32, %arg1: i32) -> (i32, i32) {
    %c0_i32 = arith.constant 0 : i32
    %c0_i32_0 = arith.constant 0 : i32
    %c0_i32_1 = arith.constant 0 : i32
    return %c0_i32, %c0_i32_0 : i32, i32
  }
  func.func @transform_21(%arg0: i32, %arg1: i32) -> (i32, i32) {
    %c0_i32 = arith.constant 0 : i32
    %c0_i32_0 = arith.constant 0 : i32
    %c0_i32_1 = arith.constant 0 : i32
    return %c0_i32, %c0_i32_0 : i32, i32
  }
  func.func @transform_22(%arg0: i32, %arg1: i32) -> (i32, i32, i32) {
    %c0_i32 = arith.constant 0 : i32
    %c0_i32_0 = arith.constant 0 : i32
    %c0_i32_1 = arith.constant 0 : i32
    return %arg0, %c0_i32, %c0_i32_0 : i32, i32, i32
  }
}

</mosaic_0001>

<bundles_post_ra>
// kernel: tpu_custom_call.1
= control target key start
LH: loop header
LB: loop body
LE: loop exit
PB: predicated region body
PF: predicated region fallthrough
CT: control target
= control target key end

     0   :  { %s13479_s0 = inlined_call_operand.vmem [shape: f32[8,16,48], index: 0, kind: input, shape index: {}]   ;;  %s13480_s1 = inlined_call_operand.vmem [shape: f32[1,32], index: 1, kind: input, shape index: {}]   ;;  %s13481_s2 = inlined_call_operand.hbm [shape: f32[24,32], index: 2, kind: input, shape index: {}]   ;;  %s13482_s3 = inlined_call_operand.vmem [shape: f32[48,32], index: 3, kind: input, shape index: {}]   ;;  %s13483_s4 = inlined_call_operand.hbm [shape: f32[1,32], index: 4, kind: input, shape index: {}]   ;;  %s13484_s5 = inlined_call_operand.hbm [shape: f32[2,1,32], index: 5, kind: input, shape index: {}]   ;;  %s13485_s6 = inlined_call_operand.hbm [shape: f32[2,1,32], index: 6, kind: input, shape index: {}]   ;;  %s13486_s7 = inlined_call_operand.vmem [shape: f32[2,32,32], index: 7, kind: input, shape index: {}]   ;;  %s13487_s8 = inlined_call_operand.vmem [shape: f32[2,32,32], index: 8, kind: input, shape index: {}]   ;;  %s13488_s9 = inlined_call_operand.hbm [shape: f32[2,32,32], index: 9, kind: input, shape index: {}]   ;;  %s13489_s10 = inlined_call_operand.hbm [shape: f32[2,32,32], index: 10, kind: input, shape index: {}]   ;;  %s13490_s11 = inlined_call_operand.hbm [shape: f32[2,1,32], index: 11, kind: input, shape index: {}]   ;;  %s13491_s12 = inlined_call_operand.hbm [shape: f32[2,1,32], index: 12, kind: input, shape index: {}]   ;;  %s13492_s13 = inlined_call_operand.hbm [shape: f32[2,1,32], index: 13, kind: input, shape index: {}]   ;;  %s13493_s14 = inlined_call_operand.hbm [shape: f32[2,32,64], index: 14, kind: input, shape index: {}]   ;;  %s13494_s15 = inlined_call_operand.vmem [shape: f32[2,1,64], index: 15, kind: input, shape index: {}]   ;;  %s13495_s16 = inlined_call_operand.vmem [shape: f32[2,64,32], index: 16, kind: input, shape index: {}]   ;;  %s13496_s17 = inlined_call_operand.vmem [shape: f32[2,1,32], index: 17, kind: input, shape index: {}]   ;;  %s13497_s18 = inlined_call_operand.vmem [shape: f32[1,32], index: 18, kind: input, shape index: {}]   ;;  %s13498_s19 = inlined_call_operand.vmem [shape: f32[1,32], index: 19, kind: input, shape index: {}]   ;;  %s13499_s20 = inlined_call_operand.hbm [shape: f32[32,128], index: 20, kind: input, shape index: {}]   ;;  %s13500_s21 = inlined_call_operand.vmem [shape: f32[1,128], index: 21, kind: input, shape index: {}]   ;;  %s13501_s22 = inlined_call_operand.hbm [shape: f32[2,4,128], index: 22, kind: output, shape index: {}]  }
   0x1   :  { %13553 = sst [smem:[#allocation59_spill]] %s13479_s0 }
   0x2   :  { %13554 = sst [smem:[#allocation60_spill]] %s13480_s1 }
   0x3   :  { %13555 = sst [smem:[#allocation61_spill]] %s13481_s2 }
   0x4   :  { %13556 = sst [smem:[#allocation62_spill]] %s13482_s3 }
   0x5   :  { %13557 = sst [smem:[#allocation63_spill]] %s13483_s4 }
   0x6   :  { %13558 = sst [smem:[#allocation64_spill]] %s13484_s5 }
   0x7   :  { %13559 = sst [smem:[#allocation65_spill]] %s13485_s6 }
   0x8   :  { %13560 = sst [smem:[#allocation66_spill]] %s13486_s7 }
   0x9   :  { %13561 = sst [smem:[#allocation67_spill]] %s13487_s8 }
   0xa   :  { %13562 = sst [smem:[#allocation68_spill]] %s13488_s9 }
   0xb   :  { %13563 = sst [smem:[#allocation69_spill]] %s13489_s10 }
   0xc   :  { %13564 = sst [smem:[#allocation70_spill]] %s13490_s11 }
   0xd   :  { %13565 = sst [smem:[#allocation71_spill]] %s13491_s12 }
   0xe   :  { %13566 = sst [smem:[#allocation72_spill]] %s13492_s13 }
   0xf   :  { %13567 = sst [smem:[#allocation73_spill]] %s13494_s15 }
  0x10   :  { %13568 = sst [smem:[#allocation74_spill]] %s13495_s16 }
  0x11   :  { %13569 = sst [smem:[#allocation75_spill]] %s13496_s17 }
  0x12   :  { %13570 = sst [smem:[#allocation76_spill]] %s13497_s18 }
  0x13   :  { %13571 = sst [smem:[#allocation77_spill]] %s13498_s19 }
  0x14   :  { %13572 = sst [smem:[#allocation78_spill]] %s13500_s21 }
  0x15   :  { %13573 = sst [smem:[#allocation79_spill]] %s13501_s22 }
  0x16   :  { %27 = vsyncpa [#allocation4], 0 }
  0x17   :  { %28 = vsyncpa [#allocation7], 0 }
  0x18   :  { %29 = vsyncpa [#allocation5], 0 }
  0x19   :  { %31 = vsyncpa [#allocation5 + $0x1], 0  ;;  %s10489_s3 = smov 0   ;;  %s10491_s28 = smov 0  }
  0x1a   :  { %s10493_s29 = smov 0   ;;  %s10495_s30 = smov 0  }
  0x1b   :  { %s10497_s4 = smov 0   ;;  %s10499_s0 = smov 0  }
  0x1c   :  { %s10501_s23 = smov 0   ;;  %s10503_s1 = smov 0  }
  0x1d   :  { %s10505_s5 = smov 0   ;;  %s10507_s24 = smov 0  }
  0x1e   :  { %s10509_s6 = smov 0  }
  0x1f LB: > { %13574 = sst [smem:[#allocation23_spill]] %s10304_s3  ;;  %s10543_s25 = sadd.s32 4294967295, %s10344_s6   ;;  %s10344_s6 = sphi %s10509_s6, %s37_s6   ;;  %s10340_s24 = sphi %s10507_s24, %s13722_s24   ;;  %s10336_s5 = sphi %s10505_s5, %s13721_s5   ;;  %s10332_s1 = sphi %s10503_s1, %s13720_s1   ;;  %s10328_s23 = sphi %s10501_s23, %s13719_s23   ;;  %s10324_s0 = sphi %s10499_s0, %s13718_s0   ;;  %s10320_s4 = sphi %s10497_s4, %s13717_s4   ;;  %s10316_s30 = sphi %s10495_s30, %s13716_s30   ;;  %s10312_s29 = sphi %s10493_s29, %s13715_s29   ;;  %s10308_s28 = sphi %s10491_s28, %s13714_s28   ;;  %s10304_s3 = sphi %s10489_s3, %s13713_s3  }
  0x20   : > { %13575 = sst [smem:[#allocation24_spill]] %s10308_s28  ;;  %s7760_s26 = sadd.s32 4294967294, %s10344_s6  }
  0x21   : > { %13576 = sst [smem:[#allocation25_spill]] %s10312_s29  ;;  %p173_p0 = scmp.ne.s32.totalorder %s10324_s0, %s10320_s4 }
  0x22   : > { %13577 = sst [smem:[#allocation26_spill]] %s10320_s4  ;;  %p174_p1 = scmp.eq.s32.totalorder %s10344_s6, 0 }
  0x23   : > { %13578 = sst [smem:[#allocation27_spill]] %s10324_s0  ;;  %p179_p2 = scmp.ne.s32.totalorder %s10320_s4, %s10316_s30 }
  0x24   : > { %13579 = sst [smem:[#allocation28_spill]] %s10328_s23  ;;  %p13512_p3 = scmp.eq.s32.totalorder %s10543_s25, 0 }
  0x25   : > { %13580 = sst [smem:[#allocation29_spill]] %s10332_s1  ;;  %p10553_p4 = por %p174_p1, %p173_p0 }
  0x26   : > { %13581 = sst [smem:[#allocation30_spill]] %s10336_s5  ;;  %p598_p5 = scmp.ne.s32.totalorder %s10312_s29, %s10308_s28 }
  0x27   : > { %13582 = sst [smem:[#allocation31_spill]] %s10340_s24  ;;  %p10561_p6 = por %p13512_p3, %p179_p2 }
  0x28   : > { %13583 = sst [smem:[#allocation32_spill]] %s10344_s6  ;;  %p599_p7 = scmp.eq.s32.totalorder %s10543_s25, 3 }
  0x29   : > { %13584 = sst [smem:[#allocation33_spill]] %s10543_s25  ;;  %p604_p8 = scmp.ne.s32.totalorder %s10308_s28, %s10304_s3 }
  0x2a   : > { %s13586_s21 = scalar_select %p10561_p6, 1, 0 }
  0x2b   : > { %p605_p9 = scmp.eq.s32.totalorder %s7760_s26, 3  ;;  %p10568_p10 = por %p599_p7, %p598_p5 }
  0x2c   : > { %13587 = sst [smem:[#allocation34_spill]] %s13586_s21  ;;  %p7761_p11 = scmp.ge.s32.totalorder %s10344_s6, 1 }
  0x2d   : > { %s13588_s30 = scalar_select %p10568_p10, 1, 0 }
  0x2e   : > { %p10573_p12 = por %p605_p9, %p604_p8  ;;  %p612_p13 = scmp.lt.s32.totalorder %s10344_s6, 5 }
  0x2f   : > { %13589 = sst [smem:[#allocation35_spill]] %s13588_s30  ;;  %s10346_s19 = smov [#allocation3]  }
  0x30   : > { %s13590_s27 = scalar_select %p10573_p12, 1, 0 }
  0x31   : > { %p10578_p0 = pnand %p7761_p11, %p612_p13  ;;  %s627_s18 = sshll.u32 %s10346_s19, 4  ;;  %s628_s18 = int_to_ptr.vmem [resolvable:$true] %s627_s18 }
  0x32   : > { %13591 = sst [smem:[#allocation36_spill]] %s13590_s27  ;;  %p9304_p2 = scmp.lt.s32.totalorder %s10344_s6, 4 }
  0x33   : > { %s13592_s2 = scalar_select %p10578_p0, 1, 0 }
  0x34   : > { %p9262_p1 = pneg %p10578_p0  ;;  %p10593_p7 = pnand %p9304_p2, %p10553_p4 }
  0x35   : > { %s13595_s17 = sld [smem:[#allocation61_spill]] }
  0x36   : > { %p10587_p5 = pnand %p9262_p1, %p13512_p3 }
  0x37   : > { %s13594_s27 = scalar_select %p10593_p7, 1, 0 }
  0x38   : > { %s13593_s26 = scalar_select %p10587_p5, 1, 0 }
  0x39   : > { %p10605_p9 = pneg %p10587_p5 }
  0x3b   : > { %s9886_s16 = scalar_lea.hbm %s13595_s17, 384 }
  0x3c   : > { %p9887_p8 = scmp.ne.s32.totalorder %s13595_s17, %s9886_s16  ;;  %p9893_p13 = scmp.lt.u32.totalorder %s9886_s16, %s13595_s17 }
  0x3d   : > { %s13596_s8 = scalar_select %p10605_p9, 1, 0 }
  0x3e   : > { %p9889_p11 = pnand %p10605_p9, %p9887_p8 }
  0x40   : > { %p9890_p4 = pneg %p9889_p11 }
  0x42   : > { %p9895_p1 = pnand %p9893_p13, %p9890_p4 }
  0x44   : > { %9898 = shalt.err (!%p9895_p1)
}
  0x45   : > { %s9899_s3 = scalar_lea.vmem %s628_s18, 384  ;;  %p9907_p10 = scmp.lt.s32.totalorder %s628_s18, %s628_s18 }
  0x46   : > { %p9900_p2 = scmp.ne.s32.totalorder %s628_s18, %s9899_s3  ;;  %p9908_p6 = scmp.lt.s32.totalorder %s9899_s3, %s9899_s3 }
  0x48   : > { %p9902_p3 = pnand %p9900_p2, %p10605_p9  ;;  %p9909_p0 = por %p9908_p6, %p9907_p10 }
  0x4a   : > { %p9903_p12 = pneg %p9902_p3 }
  0x4c   : > { %p9910_p7 = pnand %p9909_p0, %p9903_p12 }
  0x4e   : > { %9913 = shalt.err (!%p9910_p7)
}
  0x4f   : > { %s13518_s15 = smov 128   ;;  %s13520_s7 = smov 8  }
  0x50   : > { %9265 = dma.hbm_to_vmem [thread:$0]  (!%p10587_p5), %s13595_s17, 384, %s628_s18, [#allocation4], %s13518_s15, %s13518_s15, %s13520_s7  }
  0x51   : > { %s46_s19 = sadd.s32 1, %s10336_s5  ;;  %s49_s22 = sadd.s32 1, %s10340_s24 }
  0x52   : > { %p47_p3 = scmp.ge.s32.totalorder %s46_s19, 2  ;;  %s687_s3 = sand.u32 1, %s10344_s6  }
  0x53   : > { %s10628_s23 = sand.u32 1, %s10324_s0   ;;  %s10636_s16 = sshll.u32 %s10336_s5, 4 }
  0x54   : > { %s13724_s19 = smov (%p47_p3, %s46_s19), 0  ;;  %s13726_s22 = smov (!%p47_p3, %s49_s22), %s10340_s24 }
  0x55   : > { %13597 = sst [smem:[#allocation37_spill]] %s13724_s19  ;;  %s163_s1 = ssub.s32 %s10336_s5, %s13724_s19 }
  0x56   : > { %p51_p6 = scmp.ge.s32.totalorder %s13726_s22, 2  ;;  %p164_p10 = scmp.eq.s32.totalorder %s163_s1, 0 }
  0x57   : > { %s690_s18 = scalar_lea.vmem [#allocation8], %s10628_s23  ;;  %s13599_s15 = sadd.s32 1, %s10324_s0 }
  0x58   : > { %s697_s30 = sshll.u32 %s690_s18, 4  ;;  %s13728_s22 = smov (%p51_p6, %s13726_s22), 0  ;;  %s10658_s30 = int_to_ptr.vmem [resolvable:$true] %s697_s30 }
  0x59   : > { %13598 = sst [smem:[#allocation38_spill]] %s13728_s22  ;;  %s585_s17 = ssub.s32 %s10340_s24, %s13728_s22 }
  0x5a   : > { %s10644_s7 = scalar_select %p164_p10, %s10324_s0, %s13599_s15  }
  0x5b   : > { %s13601_s21 = sld [smem:[#allocation64_spill]]  ;;  %p10654_p12 = scmp.eq.s32.totalorder %s585_s17, 0 }
  0x5c   : > { %13600 = sst [smem:[#allocation39_spill]] %s10644_s7  ;;  %s10660_s18 = scalar_lea.sflag [#allocation4], %s687_s3 }
  0x5d   : > { %s13602_s1 = scalar_select %p10654_p12, 1, 0 }
  0x5e   : > { %p13603_p7 = scmp.ne.s32.totalorder %s13594_s27, 0 }
  0x60   : > { %p10666_p8 = pneg %p13603_p7 }
  0x61   : > { %s10652_s4 = scalar_lea.hbm %s13601_s21, %s10636_s16  ;;  %s9919_s6 = scalar_lea.hbm %s13601_s21, 32 }
  0x62   : > { %s9914_s15 = scalar_lea.hbm %s10652_s4, 16  ;;  %p9920_p13 = scmp.lt.u32.totalorder %s10652_s4, %s13601_s21 }
  0x63   : > { %p9915_p0 = scmp.ne.s32.totalorder %s10652_s4, %s9914_s15  ;;  %p9921_p1 = scmp.lt.u32.totalorder %s9919_s6, %s9914_s15 }
  0x64   : > { %p9923_p3 = scmp.lt.u32.totalorder %s9914_s15, %s10652_s4 }
  0x65   : > { %p9917_p11 = pnand %p10666_p8, %p9915_p0  ;;  %p9922_p2 = por %p9921_p1, %p9920_p13 }
  0x67   : > { %p9918_p4 = pneg %p9917_p11  ;;  %p9924_p6 = por %p9923_p3, %p9922_p2 }
  0x69   : > { %p9925_p10 = pnand %p9924_p6, %p9918_p4 }
  0x6b   : > { %9928 = shalt.err (!%p9925_p10)
}
  0x6c   : > { %s9929_s3 = scalar_lea.vmem %s10658_s30, 16  ;;  %s10349_s28 = smov [#allocation8]  }
  0x6d   : > { %p9930_p0 = scmp.ne.s32.totalorder %s10658_s30, %s9929_s3  ;;  %s9934_s17 = sshll.u32 %s10349_s28, 4  ;;  %s9935_s17 = int_to_ptr.vmem [resolvable:$false] %s9934_s17 }
  0x6e   : > { %s9936_s24 = scalar_lea.vmem %s9935_s17, 32  ;;  %p9937_p9 = scmp.lt.s32.totalorder %s10658_s30, %s9935_s17 }
  0x6f   : > { %p9932_p11 = pnand %p9930_p0, %p10666_p8  ;;  %p9938_p12 = scmp.lt.s32.totalorder %s9936_s24, %s9929_s3 }
  0x71   : > { %p9933_p5 = pneg %p9932_p11  ;;  %p9939_p13 = por %p9938_p12, %p9937_p9 }
  0x73   : > { %p9940_p1 = pnand %p9939_p13, %p9933_p5 }
  0x75   : > { %9943 = shalt.err (!%p9940_p1)
}
  0x76   : > { %9275 = dma.hbm_to_vmem [thread:$0]  (!%p13603_p7), %s10652_s4, 16, %s10658_s30, %s10660_s18  }
  0x77   : > { %s13605_s19 = sadd.s32 1, %s10312_s29  ;;  %p13606_p4 = scmp.ne.s32.totalorder %s13602_s1, 0 }
  0x78   : > { %s13608_s28 = sld [smem:[#allocation65_spill]]  ;;  %s707_s21 = scalar_lea.vmem [#allocation9], %s10628_s23 }
  0x79   : > { %s10695_s15 = scalar_select %p13606_p4, %s10312_s29, %s13605_s19  }
  0x7a   : > { %s714_s7 = sshll.u32 %s707_s21, 4  ;;  %s10705_s0 = sshll.u32 %s10628_s23, 5  ;;  %s715_s7 = int_to_ptr.vmem [resolvable:$true] %s714_s7 }
  0x7b   : > { %13607 = sst [smem:[#allocation40_spill]] %s10695_s15 }
  0x7e   : > { %s13609_s17 = smov %s13608_s28  ;;  %s10701_s24 = scalar_lea.hbm %s13608_s28, %s10636_s16 }
  0x7f   : > { %s9944_s25 = scalar_lea.hbm %s10701_s24, 16  ;;  %s9949_s1 = scalar_lea.hbm %s13609_s17, 32 }
  0x80   : > { %p9945_p5 = scmp.ne.s32.totalorder %s10701_s24, %s9944_s25  ;;  %p9950_p2 = scmp.lt.u32.totalorder %s10701_s24, %s13609_s17 }
  0x81   : > { %p9951_p3 = scmp.lt.u32.totalorder %s9949_s1, %s9944_s25  ;;  %p9953_p10 = scmp.lt.u32.totalorder %s9944_s25, %s10701_s24 }
  0x82   : > { %p9947_p9 = pnand %p9945_p5, %p10666_p8 }
  0x83   : > { %p9952_p6 = por %p9951_p3, %p9950_p2 }
  0x84   : > { %p9948_p12 = pneg %p9947_p9 }
  0x85   : > { %p9954_p0 = por %p9953_p10, %p9952_p6 }
  0x87   : > { %p9955_p11 = pnand %p9954_p0, %p9948_p12 }
  0x89   : > { %9958 = shalt.err (!%p9955_p11)
}
  0x8a   : > { %s9959_s21 = scalar_lea.vmem %s715_s7, 16  ;;  %s10350_s3 = smov [#allocation9]  }
  0x8b   : > { %p9960_p13 = scmp.ne.s32.totalorder %s715_s7, %s9959_s21  ;;  %s9964_s28 = sshll.u32 %s10350_s3, 4  ;;  %s9965_s28 = int_to_ptr.vmem [resolvable:$false] %s9964_s28 }
  0x8c   : > { %s9966_s4 = scalar_lea.vmem %s9965_s28, 32  ;;  %p9967_p5 = scmp.lt.s32.totalorder %s715_s7, %s9965_s28 }
  0x8d   : > { %p9962_p1 = pnand %p9960_p13, %p10666_p8  ;;  %p9968_p9 = scmp.lt.s32.totalorder %s9966_s4, %s9959_s21 }
  0x8f   : > { %p9963_p4 = pneg %p9962_p1  ;;  %p9969_p7 = por %p9968_p9, %p9967_p5 }
  0x91   : > { %p9970_p2 = pnand %p9969_p7, %p9963_p4 }
  0x93   : > { %9973 = shalt.err (!%p9970_p2)
}
  0x94   : > { %p13610_p3 = scmp.ne.s32.totalorder %s13594_s27, 0  ;;  %s10726_s25 = sshll.u32 %s10336_s5, 9 }
  0x95   : > { %s741_s30 = scalar_lea.vmem [#allocation10], %s10705_s0  ;;  %s13611_s9 = sld [smem:[#allocation68_spill]] }
  0x96   : > { %9278 = dma.hbm_to_vmem [thread:$0]  (!%p13610_p3), %s10701_s24, 16, %s715_s7, %s10660_s18  }
  0x97   : > { %s748_s1 = sshll.u32 %s741_s30, 4  ;;  %s10735_s1 = int_to_ptr.vmem [resolvable:$true] %s748_s1 }
  0x9b   : > { %s10733_s21 = scalar_lea.hbm %s13611_s9, %s10726_s25  ;;  %s9979_s28 = scalar_lea.hbm %s13611_s9, 1024 }
  0x9c   : > { %s9974_s3 = scalar_lea.hbm %s10733_s21, 512  ;;  %p9980_p10 = scmp.lt.u32.totalorder %s10733_s21, %s13611_s9 }
  0x9d   : > { %p9975_p7 = scmp.ne.s32.totalorder %s10733_s21, %s9974_s3  ;;  %p9981_p0 = scmp.lt.u32.totalorder %s9979_s28, %s9974_s3 }
  0x9e   : > { %p9983_p13 = scmp.lt.u32.totalorder %s9974_s3, %s10733_s21 }
  0x9f   : > { %p9977_p12 = pnand %p9975_p7, %p10666_p8  ;;  %p9982_p11 = por %p9981_p0, %p9980_p10 }
  0xa1   : > { %p9978_p6 = pneg %p9977_p12  ;;  %p9984_p1 = por %p9983_p13, %p9982_p11 }
  0xa3   : > { %p9985_p4 = pnand %p9984_p1, %p9978_p6 }
  0xa5   : > { %9988 = shalt.err (!%p9985_p4)
}
  0xa6   : > { %s9989_s19 = scalar_lea.vmem %s10735_s1, 512  ;;  %s10351_s6 = smov [#allocation10]  }
  0xa7   : > { %p9990_p5 = scmp.ne.s32.totalorder %s10735_s1, %s9989_s19  ;;  %s9994_s7 = sshll.u32 %s10351_s6, 4  ;;  %s9995_s7 = int_to_ptr.vmem [resolvable:$false] %s9994_s7 }
  0xa8   : > { %s9996_s24 = scalar_lea.vmem %s9995_s7, 1024  ;;  %p9997_p7 = scmp.lt.s32.totalorder %s10735_s1, %s9995_s7 }
  0xa9   : > { %p9992_p9 = pnand %p9990_p5, %p10666_p8  ;;  %p9998_p12 = scmp.lt.s32.totalorder %s9996_s24, %s9989_s19 }
  0xab   : > { %p9993_p2 = pneg %p9992_p9  ;;  %p9999_p10 = por %p9998_p12, %p9997_p7 }
  0xad   : > { %p10000_p0 = pnand %p9999_p10, %p9993_p2 }
  0xaf   : > { %10003 = shalt.err (!%p10000_p0)
}
  0xb0   : > { %s13612_s3 = smov 8   ;;  %s13613_s28 = smov 128  }
  0xb1   : > { %9281 = dma.hbm_to_vmem [thread:$0]  (!%p13610_p3), %s10733_s21, 512, %s10735_s1, %s10660_s18, %s13613_s28, %s13613_s28, %s13612_s3  }
  0xb2   : > { %s13614_s10 = sld [smem:[#allocation69_spill]]  ;;  %s762_s6 = scalar_lea.vmem [#allocation11], %s10705_s0 }
  0xb3   : > { %s769_s7 = sshll.u32 %s762_s6, 4  ;;  %s13615_s11 = sld [smem:[#allocation70_spill]]  ;;  %s10769_s7 = int_to_ptr.vmem [resolvable:$true] %s769_s7 }
  0xb8   : > { %s10766_s19 = scalar_lea.hbm %s13614_s10, %s10726_s25  ;;  %s10009_s4 = scalar_lea.hbm %s13614_s10, 1024 }
  0xb9   : > { %s10775_s17 = scalar_lea.hbm %s13615_s11, %s10636_s16  ;;  %s10004_s5 = scalar_lea.hbm %s10766_s19, 512 }
  0xba   : > { %p10005_p6 = scmp.ne.s32.totalorder %s10766_s19, %s10004_s5  ;;  %p10010_p1 = scmp.lt.u32.totalorder %s10766_s19, %s13614_s10 }
  0xbb   : > { %p10011_p4 = scmp.lt.u32.totalorder %s10009_s4, %s10004_s5  ;;  %p10013_p9 = scmp.lt.u32.totalorder %s10004_s5, %s10766_s19 }
  0xbc   : > { %p10007_p11 = pnand %p10005_p6, %p10666_p8 }
  0xbd   : > { %p10012_p5 = por %p10011_p4, %p10010_p1 }
  0xbe   : > { %p10008_p13 = pneg %p10007_p11 }
  0xbf   : > { %p10014_p2 = por %p10013_p9, %p10012_p5 }
  0xc1   : > { %p10015_p7 = pnand %p10014_p2, %p10008_p13 }
  0xc3   : > { %10018 = shalt.err (!%p10015_p7)
}
  0xc4   : > { %s10019_s9 = scalar_lea.vmem %s10769_s7, 512  ;;  %s10352_s6 = smov [#allocation11]  }
  0xc5   : > { %p10020_p12 = scmp.ne.s32.totalorder %s10769_s7, %s10019_s9  ;;  %s10024_s24 = sshll.u32 %s10352_s6, 4  ;;  %s10025_s24 = int_to_ptr.vmem [resolvable:$false] %s10024_s24 }
  0xc6   : > { %s10026_s15 = scalar_lea.vmem %s10025_s24, 1024  ;;  %p10027_p6 = scmp.lt.s32.totalorder %s10769_s7, %s10025_s24 }
  0xc7   : > { %p10022_p10 = pnand %p10020_p12, %p10666_p8  ;;  %p10028_p11 = scmp.lt.s32.totalorder %s10026_s15, %s10019_s9 }
  0xc9   : > { %p10023_p0 = pneg %p10022_p10  ;;  %p10029_p1 = por %p10028_p11, %p10027_p6 }
  0xcb   : > { %p10030_p4 = pnand %p10029_p1, %p10023_p0 }
  0xcd   : > { %10033 = shalt.err (!%p10030_p4)
}
  0xce   : > { %9284 = dma.hbm_to_vmem [thread:$0]  (!%p13610_p3), %s10766_s19, 512, %s10769_s7, %s10660_s18, %s13613_s28, %s13613_s28, %s13612_s3  }
  0xcf   : > { %s782_s5 = scalar_lea.vmem [#allocation12], %s10628_s23  ;;  %s13616_s12 = sld [smem:[#allocation71_spill]] }
  0xd0   : > { %s789_s1 = sshll.u32 %s782_s5, 4  ;;  %s10034_s9 = scalar_lea.hbm %s10775_s17, 16  ;;  %s790_s1 = int_to_ptr.vmem [resolvable:$true] %s789_s1 }
  0xd1   : > { %p10035_p13 = scmp.ne.s32.totalorder %s10775_s17, %s10034_s9  ;;  %s10039_s15 = scalar_lea.hbm %s13615_s11, 32 }
  0xd2   : > { %p10040_p2 = scmp.lt.u32.totalorder %s10775_s17, %s13615_s11  ;;  %p10041_p7 = scmp.lt.u32.totalorder %s10039_s15, %s10034_s9 }
  0xd3   : > { %p10037_p5 = pnand %p10035_p13, %p10666_p8  ;;  %p10043_p10 = scmp.lt.u32.totalorder %s10034_s9, %s10775_s17 }
  0xd4   : > { %p10042_p12 = por %p10041_p7, %p10040_p2 }
  0xd5   : > { %s10807_s30 = scalar_lea.hbm %s13616_s12, %s10636_s16  ;;  %p10038_p9 = pneg %p10037_p5 }
  0xd6   : > { %p10044_p0 = por %p10043_p10, %p10042_p12 }
  0xd8   : > { %p10045_p6 = pnand %p10044_p0, %p10038_p9 }
  0xda   : > { %10048 = shalt.err (!%p10045_p6)
}
  0xdb   : > { %s10049_s19 = scalar_lea.vmem %s790_s1, 16  ;;  %s10353_s7 = smov [#allocation12]  }
  0xdc   : > { %p10050_p11 = scmp.ne.s32.totalorder %s790_s1, %s10049_s19  ;;  %s10054_s5 = sshll.u32 %s10353_s7, 4  ;;  %s10055_s5 = int_to_ptr.vmem [resolvable:$false] %s10054_s5 }
  0xdd   : > { %s10056_s21 = scalar_lea.vmem %s10055_s5, 32  ;;  %p10057_p13 = scmp.lt.s32.totalorder %s790_s1, %s10055_s5 }
  0xde   : > { %p10052_p1 = pnand %p10050_p11, %p10666_p8  ;;  %p10058_p5 = scmp.lt.s32.totalorder %s10056_s21, %s10049_s19 }
  0xe0   : > { %p10053_p4 = pneg %p10052_p1  ;;  %p10059_p3 = por %p10058_p5, %p10057_p13 }
  0xe2   : > { %p10060_p2 = pnand %p10059_p3, %p10053_p4 }
  0xe4   : > { %10063 = shalt.err (!%p10060_p2)
}
  0xe5   : > { %p13617_p7 = scmp.ne.s32.totalorder %s13594_s27, 0  ;;  %s799_s10 = scalar_lea.vmem [#allocation13], %s10628_s23 }
  0xe6   : > { %s806_s29 = sshll.u32 %s799_s10, 4  ;;  %s10354_s4 = smov [#allocation6]   ;;  %s10828_s29 = int_to_ptr.vmem [resolvable:$true] %s806_s29 }
  0xe7   : > { %9287 = dma.hbm_to_vmem [thread:$0]  (!%p13617_p7), %s10775_s17, 16, %s790_s1, %s10660_s18  }
  0xe8   : > { %s644_s9 = sshll.u32 %s10354_s4, 4  ;;  %s10064_s6 = scalar_lea.hbm %s10807_s30, 16  ;;  %s645_s9 = int_to_ptr.vmem [resolvable:$true] %s644_s9 }
  0xe9   : > { %p10065_p3 = scmp.ne.s32.totalorder %s10807_s30, %s10064_s6  ;;  %s10069_s19 = scalar_lea.hbm %s13616_s12, 32 }
  0xea   : > { %p10070_p10 = scmp.lt.u32.totalorder %s10807_s30, %s13616_s12  ;;  %p10071_p0 = scmp.lt.u32.totalorder %s10069_s19, %s10064_s6 }
  0xeb   : > { %p10067_p9 = pnand %p10065_p3, %p10666_p8  ;;  %p10073_p11 = scmp.lt.u32.totalorder %s10064_s6, %s10807_s30 }
  0xec   : > { %p10072_p6 = por %p10071_p0, %p10070_p10 }
  0xed   : > { %p10068_p12 = pneg %p10067_p9 }
  0xee   : > { %p10074_p1 = por %p10073_p11, %p10072_p6 }
  0xf0   : > { %p10075_p4 = pnand %p10074_p1, %p10068_p12 }
  0xf2   : > { %10078 = shalt.err (!%p10075_p4)
}
  0xf3   : > { %s10079_s17 = scalar_lea.vmem %s10828_s29, 16  ;;  %s10355_s1 = smov [#allocation13]  }
  0xf4   : > { %p10080_p13 = scmp.ne.s32.totalorder %s10828_s29, %s10079_s17  ;;  %s10084_s21 = sshll.u32 %s10355_s1, 4  ;;  %s10085_s21 = int_to_ptr.vmem [resolvable:$false] %s10084_s21 }
  0xf5   : > { %s10086_s10 = scalar_lea.vmem %s10085_s21, 32  ;;  %p10087_p3 = scmp.lt.s32.totalorder %s10828_s29, %s10085_s21 }
  0xf6   : > { %p10082_p5 = pnand %p10080_p13, %p10666_p8  ;;  %p10088_p9 = scmp.lt.s32.totalorder %s10086_s10, %s10079_s17 }
  0xf8   : > { %p10083_p2 = pneg %p10082_p5  ;;  %p10089_p10 = por %p10088_p9, %p10087_p3 }
  0xfa   : > { %p10090_p0 = pnand %p10089_p10, %p10083_p2 }
  0xfc   : > { %10093 = shalt.err (!%p10090_p0)
}
  0xfd   : > { %9290 = dma.hbm_to_vmem [thread:$0]  (!%p13617_p7), %s10807_s30, 16, %s10828_s29, %s10660_s18  }
  0xfe   : > { %s13618_s24 = sld [smem:[#allocation63_spill]]  ;;  %p13620_p6 = scmp.ne.s32.totalorder %s13596_s8, 0 }
 0x104   : > { %s13619_s15 = smov %s13618_s24  ;;  %s10094_s19 = scalar_lea.hbm %s13618_s24, 16 }
 0x105   : > { %p10095_p12 = scmp.ne.s32.totalorder %s13619_s15, %s10094_s19  ;;  %p10101_p4 = scmp.lt.u32.totalorder %s10094_s19, %s13619_s15 }
 0x107   : > { %p10097_p11 = pnand %p10095_p12, %p13620_p6 }
 0x109   : > { %p10098_p1 = pneg %p10097_p11 }
 0x10b   : > { %p10103_p13 = pnand %p10101_p4, %p10098_p1 }
 0x10d   : > { %10106 = shalt.err (!%p10103_p13)
}
 0x10e   : > { %s10107_s21 = scalar_lea.vmem %s645_s9, 16  ;;  %s10114_s30 = scalar_lea.vmem %s645_s9, 32 }
 0x10f   : > { %p10108_p5 = scmp.ne.s32.totalorder %s645_s9, %s10107_s21  ;;  %p10115_p9 = scmp.lt.s32.totalorder %s645_s9, %s645_s9 }
 0x110   : > { %p10116_p10 = scmp.lt.s32.totalorder %s10114_s30, %s10107_s21 }
 0x111   : > { %p10110_p2 = pnand %p10108_p5, %p13620_p6 }
 0x112   : > { %p10117_p0 = por %p10116_p10, %p10115_p9 }
 0x113   : > { %p10111_p3 = pneg %p10110_p2 }
 0x115   : > { %p10118_p7 = pnand %p10117_p0, %p10111_p3 }
 0x117   : > { %10121 = shalt.err (!%p10118_p7)
}
 0x118   : > { %p13621_p12 = scmp.ne.s32.totalorder %s13593_s26, 0  ;;  %s13622_s13 = sld [smem:[#allocation72_spill]] }
 0x119   : > { %s816_s19 = scalar_lea.vmem [#allocation14], %s10628_s23 }
 0x11a   : > { %9268 = dma.hbm_to_vmem [thread:$0]  (!%p13621_p12), %s13619_s15, 16, %s645_s9, [#allocation7]  }
 0x11b   : > { %s823_s7 = sshll.u32 %s816_s19, 4  ;;  %s824_s7 = int_to_ptr.vmem [resolvable:$true] %s823_s7 }
 0x11e   : > { %s10874_s24 = scalar_lea.hbm %s13622_s13, %s10636_s16  ;;  %s10127_s9 = scalar_lea.hbm %s13622_s13, 32 }
 0x11f   : > { %s10122_s5 = scalar_lea.hbm %s10874_s24, 16  ;;  %p10128_p4 = scmp.lt.u32.totalorder %s10874_s24, %s13622_s13 }
 0x120   : > { %p10123_p7 = scmp.ne.s32.totalorder %s10874_s24, %s10122_s5  ;;  %p10129_p13 = scmp.lt.u32.totalorder %s10127_s9, %s10122_s5 }
 0x121   : > { %p10131_p2 = scmp.lt.u32.totalorder %s10122_s5, %s10874_s24 }
 0x122   : > { %p10125_p11 = pnand %p10123_p7, %p10666_p8  ;;  %p10130_p5 = por %p10129_p13, %p10128_p4 }
 0x124   : > { %p10126_p1 = pneg %p10125_p11  ;;  %p10132_p3 = por %p10131_p2, %p10130_p5 }
 0x126   : > { %p10133_p9 = pnand %p10132_p3, %p10126_p1 }
 0x128   : > { %10136 = shalt.err (!%p10133_p9)
}
 0x129   : > { %s10137_s23 = scalar_lea.vmem %s824_s7, 16  ;;  %s10356_s16 = smov [#allocation14]  }
 0x12a   : > { %p10138_p10 = scmp.ne.s32.totalorder %s824_s7, %s10137_s23  ;;  %s10142_s29 = sshll.u32 %s10356_s16, 4  ;;  %s10143_s29 = int_to_ptr.vmem [resolvable:$false] %s10142_s29 }
 0x12b   : > { %s10144_s10 = scalar_lea.vmem %s10143_s29, 32  ;;  %p10145_p11 = scmp.lt.s32.totalorder %s824_s7, %s10143_s29 }
 0x12c   : > { %p10140_p0 = pnand %p10138_p10, %p10666_p8  ;;  %p10146_p12 = scmp.lt.s32.totalorder %s10144_s10, %s10137_s23 }
 0x12e   : > { %p10141_p7 = pneg %p10140_p0  ;;  %p10147_p6 = por %p10146_p12, %p10145_p11 }
 0x130   : > { %p10148_p4 = pnand %p10147_p6, %p10141_p7 }
 0x132   : > { %10151 = shalt.err (!%p10148_p4)
}
 0x133   : > { %p13623_p13 = scmp.ne.s32.totalorder %s13594_s27, 0  ;;  %s10357_s4 = smov [#allocation16]  }
 0x134   : > { %s660_s6 = sshll.u32 %s10357_s4, 4  ;;  %s10899_s17 = scalar_lea.hbm %s13493_s14, %s10726_s25  ;;  %s661_s6 = int_to_ptr.vmem [resolvable:$true] %s660_s6 }
 0x135   : > { %9293 = dma.hbm_to_vmem [thread:$0]  (!%p13623_p13), %s10874_s24, 16, %s824_s7, %s10660_s18  }
 0x136   : > { %s10152_s21 = scalar_lea.hbm %s13499_s20, 512  ;;  %p13624_p12 = scmp.ne.s32.totalorder %s13596_s8, 0 }
 0x137   : > { %p10153_p6 = scmp.ne.s32.totalorder %s13499_s20, %s10152_s21  ;;  %p10159_p2 = scmp.lt.u32.totalorder %s10152_s21, %s13499_s20 }
 0x139   : > { %p10155_p1 = pnand %p10153_p6, %p13624_p12 }
 0x13b   : > { %p10156_p5 = pneg %p10155_p1 }
 0x13d   : > { %p10161_p3 = pnand %p10159_p2, %p10156_p5 }
 0x13f   : > { %10164 = shalt.err (!%p10161_p3)
}
 0x140   : > { %s10165_s16 = scalar_lea.vmem %s661_s6, 512  ;;  %p10173_p7 = scmp.lt.s32.totalorder %s661_s6, %s661_s6 }
 0x141   : > { %p10166_p9 = scmp.ne.s32.totalorder %s661_s6, %s10165_s16  ;;  %p10174_p11 = scmp.lt.s32.totalorder %s10165_s16, %s10165_s16 }
 0x143   : > { %p10168_p10 = pnand %p10166_p9, %p13624_p12  ;;  %p10175_p4 = por %p10174_p11, %p10173_p7 }
 0x145   : > { %p10169_p0 = pneg %p10168_p10 }
 0x147   : > { %p10176_p13 = pnand %p10175_p4, %p10169_p0 }
 0x149   : > { %10179 = shalt.err (!%p10176_p13)
}
 0x14a   : > { %p13625_p6 = scmp.ne.s32.totalorder %s13593_s26, 0  ;;  %s834_s8 = scalar_lea.vmem [#allocation15], %s10705_s0 }
 0x14b   : > { %s841_s10 = sshll.u32 %s834_s8, 4  ;;  %s10180_s4 = scalar_lea.hbm %s10899_s17, 512  ;;  %s10923_s10 = int_to_ptr.vmem [resolvable:$true] %s841_s10 }
 0x14c   : > { %9271 = dma.hbm_to_vmem [thread:$0]  (!%p13625_p6), %s13499_s20, 512, %s661_s6, [#allocation7], %s13613_s28, %s13613_s28, %s13612_s3  }
 0x14d   : > { %p10181_p13 = scmp.ne.s32.totalorder %s10899_s17, %s10180_s4  ;;  %s10185_s5 = scalar_lea.hbm %s13493_s14, 1024 }
 0x14e   : > { %p10186_p5 = scmp.lt.u32.totalorder %s10899_s17, %s13493_s14  ;;  %p10187_p2 = scmp.lt.u32.totalorder %s10185_s5, %s10180_s4 }
 0x14f   : > { %p10183_p12 = pnand %p10181_p13, %p10666_p8  ;;  %p10189_p9 = scmp.lt.u32.totalorder %s10180_s4, %s10899_s17 }
 0x150   : > { %p10188_p3 = por %p10187_p2, %p10186_p5 }
 0x151   : > { %p10184_p1 = pneg %p10183_p12 }
 0x152   : > { %p10190_p10 = por %p10189_p9, %p10188_p3 }
 0x154   : > { %p10191_p0 = pnand %p10190_p10, %p10184_p1 }
 0x156   : > { %10194 = shalt.err (!%p10191_p0)
}
 0x157   : > { %s10195_s0 = scalar_lea.vmem %s10923_s10, 512  ;;  %s10358_s6 = smov [#allocation15]  }
 0x158   : > { %p10196_p7 = scmp.ne.s32.totalorder %s10923_s10, %s10195_s0  ;;  %s10200_s21 = sshll.u32 %s10358_s6, 4  ;;  %s10201_s21 = int_to_ptr.vmem [resolvable:$false] %s10200_s21 }
 0x159   : > { %s10202_s30 = scalar_lea.vmem %s10201_s21, 1024  ;;  %p10203_p6 = scmp.lt.s32.totalorder %s10923_s10, %s10201_s21 }
 0x15a   : > { %p10198_p11 = pnand %p10196_p7, %p10666_p8  ;;  %p10204_p13 = scmp.lt.s32.totalorder %s10202_s30, %s10195_s0 }
 0x15c   : > { %p10199_p4 = pneg %p10198_p11  ;;  %p10205_p12 = por %p10204_p13, %p10203_p6 }
 0x15e   : > { %p10206_p5 = pnand %p10205_p12, %p10199_p4 }
 0x160   : > { %10209 = shalt.err (!%p10206_p5)
}
 0x161   : > { %p13626_p1 = scmp.ne.s32.totalorder %s13594_s27, 0  ;;  %p13627_p8 = scmp.ne.s32.totalorder %s13592_s2, 0 }
 0x163   : > { %9296 = dma.hbm_to_vmem [thread:$0]  (!%p13626_p1), %s10899_s17, 512, %s10923_s10, %s10660_s18, %s13613_s28, %s13613_s28, %s13612_s3  }
 0x164   : > { %873 = sbr.rel (%p13627_p8) target bundleno = 5544 (0x15a8), region = 108 }
 0x16b   : > { %s13628_s22 = sld [smem:[#allocation33_spill]] }
 0x171   : > { %p13629_p2 = scmp.eq.s32.totalorder %s13628_s22, 0 }
 0x173   : > { %10283 = dma.done.wait (%p13629_p2), [#allocation4], 384   ;;  %p13630_p3 = pmov %p13629_p2 }
 0x174   : > { %p13631_p9 = pmov %p13629_p2 }
 0x175   : > { %10285 = vsyncadd (%p13630_p3), [#allocation4], 4294966912 }
 0x176   : > { %10287 = dma.done.wait (%p13631_p9), [#allocation7], 16   ;;  %p13632_p10 = pmov %p13629_p2 }
 0x177   : > { %s13633_s27 = sld [smem:[#allocation26_spill]]  ;;  %s13634_s23 = sld [smem:[#allocation34_spill]] }
 0x178   : > { %10289 = vsyncadd (%p13632_p10), [#allocation7], 4294967280  ;;  %s883_s24 = sand.u32 1, %s13628_s22  }
 0x179   : > { %s884_s2 = scalar_lea.sflag [#allocation4], %s883_s24 }
 0x17d   : > { %s10962_s18 = sand.u32 1, %s13633_s27   ;;  %p13635_p0 = scmp.ne.s32.totalorder %s13634_s23, 0 }
 0x17f   : > { %10291 = dma.done.wait (%p13635_p0), %s884_s2, 1616  }
 0x180   : > { %10293 = vsyncadd (%p13635_p0), %s884_s2, 4294965680  ;;  %s7783_s28 = sshll.u32 %s10962_s18, 5  ;;  %p13636_p7 = pmov %p13629_p2 }
 0x181   : > { %s10971_s7 = scalar_lea.vmem [#allocation10], %s7783_s28  ;;  %s10973_s16 = scalar_lea.vmem [#allocation11], %s7783_s28 }
 0x182   : > { %s10978_s10 = scalar_lea.vmem [#allocation15], %s7783_s28 }
 0x183   : > { %10295 = dma.done.wait (%p13636_p7), [#allocation7], 512   ;;  %p13637_p11 = pmov %p13629_p2 }
 0x184   : > { %s13638_s4 = sld [smem:[#allocation24_spill]]  ;;  %s13639_s26 = sld [smem:[#allocation29_spill]] }
 0x185   : > { %10297 = vsyncadd (%p13637_p11), [#allocation7], 4294966784  ;;  %s13640_s19 = sld [smem:[#allocation28_spill]]  ;;  %s13642_s28 = sld [smem:[#allocation66_spill]] }
 0x186   : > { %s13641_s22 = sld [smem:[#allocation59_spill]]  ;;  %s13644_s3 = sld [smem:[#allocation73_spill]] }
 0x187   : > { %s13643_s8 = sld [smem:[#allocation67_spill]] }
 0x188   : > { %s13646_s24 = sld [smem:[#allocation75_spill]] }
 0x18a   : > { %s13548_s5 = sand.u32 1, %s13638_s4   ;;  %s7788_s1 = sshll.u32 %s13639_s26, 2 }
 0x18b   : > { %s10988_s9 = sshll.u32 %s13548_s5, 2  ;;  %p1068_p4 = scmp.lt.s32.totalorder %s7788_s1, 7 }
 0x18c   : > { %p1074_p6 = scmp.lt.s32.totalorder %s13640_s19, 1  ;;  %p7797_p13 = scmp.ne.s32.totalorder %s13640_s19, 0 }
 0x18d   : > { %s13730_s1 = smov (!%p1068_p4, %s7788_s1), 7  ;;  %vm1120_vm0 = vcmask (!%p7797_p13), 392192   ;;  %v7798_v17 = vld [vmem:[#allocation6] ss:$0 sm:$0xff] (!%p7797_p13)  ;;  %vm1259_vm1 = vcmask (!%p7797_p13), 1040384   ;;  %v1294_v27 = vld [vmem:[#allocation3 + $0x10] sm:$0xff] (!%p7797_p13) }
 0x18e   : > { %s10992_s0 = scalar_select %p1074_p6, %s13640_s19, 1 }
 0x18f   : > { %s8042_s6 = sshll.u32 %s13730_s1, 4  ;;  %vm1307_vm2 = vcmask (!%p7797_p13), 261120   ;;  %v1292_v31 = vld [vmem:[#allocation3] sm:$0xff] (!%p7797_p13)  ;;  %v1293_v32 = vld [vmem:[#allocation3 + $0x8] sm:$0xff] (!%p7797_p13) }
 0x190   : > { %s10997_s27 = scalar_lea.vmem %s13641_s22, %s8042_s6  ;;  %s8043_s23 = sshll.u32 %s10992_s0, 5 }
 0x191   : > { %s11003_s4 = scalar_lea.vmem %s13642_s28, %s8043_s23  ;;  %s11008_s29 = scalar_lea.vmem %s13643_s8, %s8043_s23  ;;  %v1099_v8 = vld [vmem:[%s10997_s27] sm:$0xff] (!%p7797_p13)  ;;  %v1100_v11 = vld [vmem:[%s10997_s27 + $0x8] sm:$0xff] (!%p7797_p13)  ;;  %v1101_v13 = vld [vmem:[%s10997_s27 + $0x10] sm:$0xff] (!%p7797_p13) }
 0x192   : > { %s1086_s1 = scalar_lea.vmem %s13644_s3, %s10992_s0  ;;  %s8045_s11 = sshll.u32 %s10992_s0, 6  ;;  %v1103_v9 = vld [vmem:[%s10997_s27 + $0x20] sm:$0xff] (!%p7797_p13)  ;;  %8369 = vmatprep.mubr.msk.f32.mxu0 (!%p7797_p13), %vm1120_vm0, %v1099_v8  ;;  %v1104_v12 = vld [vmem:[%s10997_s27 + $0x28] sm:$0xff] (!%p7797_p13)  ;;  %v1105_v14 = vld [vmem:[%s10997_s27 + $0x30] sm:$0xff] (!%p7797_p13) }
 0x193   : > { %s13645_s6 = sld [smem:[#allocation74_spill]]  ;;  %s1094_s2 = scalar_lea.vmem %s13646_s24, %s10992_s0  ;;  %8375 = vmatprep.mubr.msk.f32.mxu1 (!%p7797_p13), %vm1120_vm0, %v1103_v9  ;;  %v1102_v15 = vld [vmem:[%s10997_s27 + $0x18] sm:$0xff] (!%p7797_p13) }
 0x194   : > { %s1066_s28 = scalar_lea.vmem [#allocation17], %s10988_s9  ;;  %1098 = sbr.rel (%p7797_p13) target bundleno = 656 (0x290), region = 156  ;;  %v1106_v16 = vld [vmem:[%s10997_s27 + $0x38] sm:$0xff] (!%p7797_p13) }
 0x195   : > { %s13647_s23 = sld [smem:[#allocation62_spill]] (!%p7797_p13)  ;;  %s13649_s8 = sld [smem:[#allocation60_spill]] (!%p7797_p13) }
 0x199   : > { %s11018_s30 = scalar_lea.vmem %s13645_s6, %s8045_s11 }
 0x19b   : > { %s13648_s26 = smov %s13647_s23  ;;  %v1107_v0 = vld [vmem:[%s13647_s23] sm:$0xff] }
 0x19c   : > { %v1108_v1 = vld [vmem:[%s13648_s26 + $0x8] sm:$0xff]  ;;  %v1109_v2 = vld [vmem:[%s13648_s26 + $0x10] sm:$0xff]  ;;  %v1110_v4 = vld [vmem:[%s13648_s26 + $0x18] sm:$0xff] }
 0x19d   : > { %v9036_v3 = vpack.c.bf16 %v1108_v1, %v1107_v0  ;;  %v9040_v5 = vpack.c.bf16 %v1110_v4, %v1109_v2  ;;  %v1111_v6 = vld [vmem:[%s13648_s26 + $0x20] sm:$0xff]  ;;  %v1112_v7 = vld [vmem:[%s13648_s26 + $0x28] sm:$0xff] }
 0x19e   : > { %v9044_v10 = vpack.c.bf16 %v1112_v7, %v1111_v6  ;;  %v1250_v29 = vld [vmem:[%s13649_s8] sm:$0x1] }
 0x19f   : > { %9037 = vmatprep.subr.bf16.mxu0 %v9036_v3  ;;  %9222 = vmatprep.subr.bf16.mxu1 %v9036_v3 }
 0x1a0   : > { %9039 = vmatpush3.bf16.msra.mxu0 %v9036_v3  ;;  %9225 = vmatpush3.bf16.msra.mxu1 %v9036_v3 }
 0x1a1   : > { %9041 = vmatprep.subr.bf16.mxu0 %v9040_v5  ;;  %9223 = vmatprep.subr.bf16.mxu1 %v9040_v5 }
 0x1a4   : > { %9043 = vmatpush3.bf16.msra.mxu0 %v9040_v5  ;;  %9226 = vmatpush3.bf16.msra.mxu1 %v9040_v5 }
 0x1a5   : > { %9045 = vmatprep.subr.bf16.mxu0 %v9044_v10  ;;  %9224 = vmatprep.subr.bf16.mxu1 %v9044_v10 }
 0x1a8   : > { %9047 = vmatpush3.bf16.msra.mxu0 %v9044_v10  ;;  %9227 = vmatpush3.bf16.msra.mxu1 %v9044_v10 }
 0x1ab   : > { %8370 = vmatmul.mubr.msk.f32.vlgmr.msra.gmra.mrb[0].mxu0 %vm1120_vm0, %v1100_v11  ;;  %8376 = vmatmul.mubr.msk.f32.vlgmr.msra.gmra.mrb[0].mxu1 %vm1120_vm0, %v1104_v12 }
 0x1ac   : > { %8372 = vmatprep.mubr.msk.f32.mxu0 %vm1120_vm0, %v1101_v13  ;;  %8378 = vmatprep.mubr.msk.f32.mxu1 %vm1120_vm0, %v1105_v14 }
 0x1af   : > { %8373 = vmatmul.mubr.msk.f32.gmra.mrb[2].mxu0 %vm1120_vm0, %v1102_v15  ;;  %8379 = vmatmul.mubr.msk.f32.gmra.mrb[2].mxu1 %vm1120_vm0, %v1106_v16 }
 0x27e   : > { %v8371_v18 = vpop.f32.mrb[0].mxu0  ;;  %v8377_v19 = vpop.f32.mrb[0].mxu1 }
 0x27f   : > { %v1217_v20 = vadd.f32 %v8371_v18, %v7798_v17  ;;  %v1237_v21 = vadd.f32 %v8377_v19, %v7798_v17  ;;  %v1211_v22 = vpop.f32.mrb[1].mxu0  ;;  %v1231_v23 = vpop.f32.mrb[1].mxu1 }
 0x280   : > { %v1212_v24 = vadd.f32 %v7798_v17, %v1211_v22  ;;  %v1232_v25 = vadd.f32 %v7798_v17, %v1231_v23 }
 0x281   : > { %v1261_v26 = vrot.slane %v1217_v20, 7  ;;  %v1267_v28 = vrot.slane %v1237_v21, 7 }
 0x282   : > { %v1260_v30 = vrot.slane %v1212_v24, 7  ;;  %v1266_v33 = vrot.slane %v1232_v25, 7  ;;  %v8374_v34 = vpop.f32.mrb[2].mxu0  ;;  %v8380_v35 = vpop.f32.mrb[2].mxu1 }
 0x283   : > { %v1288_v36 = vsel %vm1259_vm1, %v1261_v26, 0.0  ;;  %v1290_v37 = vsel %vm1259_vm1, %v1267_v28, 0.0  ;;  %v1227_v38 = vadd.f32 %v8374_v34, %v7798_v17  ;;  %v1247_v39 = vadd.f32 %v8380_v35, %v7798_v17  ;;  %v1221_v40 = vpop.f32.mrb[3].mxu0  ;;  %v1241_v41 = vpop.f32.mrb[3].mxu1 }
 0x284   : > { %v1297_v42 = vadd.f32 %v1294_v27, %v1288_v36  ;;  %v1303_v43 = vadd.f32 %v1294_v27, %v1290_v37  ;;  %v1262_v44 = vsel %vm1259_vm1, %v1260_v30, %v1261_v26  ;;  %v1284_v45 = vsel %vm1259_vm1, %v1250_v29, %v1260_v30 }
 0x285   : > { %v1295_v46 = vadd.f32 %v1292_v31, %v1284_v45  ;;  %v1296_v47 = vadd.f32 %v1293_v32, %v1262_v44  ;;  %v1268_v48 = vsel %vm1259_vm1, %v1266_v33, %v1267_v28  ;;  %v1286_v49 = vsel %vm1259_vm1, %v1250_v29, %v1266_v33 }
 0x286   : > { %1310 = vst.msk [vmem:[#allocation2 + $0x10] sm:$0xff] %vm1307_vm2, %v1297_v42  ;;  %1316 = vst.msk [vmem:[#allocation2 + $0x40] sm:$0xff] %vm1307_vm2, %v1303_v43  ;;  %v1301_v50 = vadd.f32 %v1292_v31, %v1286_v49  ;;  %v1302_v51 = vadd.f32 %v1293_v32, %v1268_v48  ;;  %v1264_v52 = vrot.slane %v1227_v38, 7  ;;  %v1270_v53 = vrot.slane %v1247_v39, 7 }
 0x287   : > { %1308 = vst.msk [vmem:[#allocation2] sm:$0xff] %vm1307_vm2, %v1295_v46  ;;  %1309 = vst.msk [vmem:[#allocation2 + $0x8] sm:$0xff] %vm1307_vm2, %v1296_v47  ;;  %v1222_v54 = vadd.f32 %v7798_v17, %v1221_v40  ;;  %v1242_v55 = vadd.f32 %v7798_v17, %v1241_v41 }
 0x288   : > { %1314 = vst.msk [vmem:[#allocation2 + $0x30] sm:$0xff] %vm1307_vm2, %v1301_v50  ;;  %1315 = vst.msk [vmem:[#allocation2 + $0x38] sm:$0xff] %vm1307_vm2, %v1302_v51  ;;  %v1289_v56 = vsel %vm1259_vm1, %v1264_v52, 0.0  ;;  %v1291_v57 = vsel %vm1259_vm1, %v1270_v53, 0.0 }
 0x289   : > { %v1300_v58 = vadd.f32 %v1294_v27, %v1289_v56  ;;  %v1306_v59 = vadd.f32 %v1294_v27, %v1291_v57  ;;  %v1263_v60 = vrot.slane %v1222_v54, 7  ;;  %v1269_v61 = vrot.slane %v1242_v55, 7 }
 0x28b   : > { %1313 = vst.msk [vmem:[#allocation2 + $0x28] sm:$0xff] %vm1307_vm2, %v1300_v58  ;;  %1319 = vst.msk [vmem:[#allocation2 + $0x58] sm:$0xff] %vm1307_vm2, %v1306_v59  ;;  %v1265_v62 = vsel %vm1259_vm1, %v1263_v60, %v1264_v52  ;;  %v1285_v63 = vsel %vm1259_vm1, %v1250_v29, %v1263_v60  ;;  %v1271_v0 = vsel %vm1259_vm1, %v1269_v61, %v1270_v53 }
 0x28c   : > { %v1287_v1 = vsel %vm1259_vm1, %v1250_v29, %v1269_v61  ;;  %v1298_v2 = vadd.f32 %v1292_v31, %v1285_v63  ;;  %v1299_v3 = vadd.f32 %v1293_v32, %v1265_v62  ;;  %v1305_v5 = vadd.f32 %v1293_v32, %v1271_v0 }
 0x28d   : > { %v1304_v4 = vadd.f32 %v1292_v31, %v1287_v1 }
 0x28e   : > { %1311 = vst.msk [vmem:[#allocation2 + $0x18] sm:$0xff] %vm1307_vm2, %v1298_v2  ;;  %1312 = vst.msk [vmem:[#allocation2 + $0x20] sm:$0xff] %vm1307_vm2, %v1299_v3 }
 0x28f   : > { %1317 = vst.msk [vmem:[#allocation2 + $0x48] sm:$0xff] %vm1307_vm2, %v1304_v4  ;;  %1318 = vst.msk [vmem:[#allocation2 + $0x50] sm:$0xff] %vm1307_vm2, %v1305_v5 }
 0x290 PF: > { %v1326_v6 = vld [vmem:[#allocation2 + $0x30] sm:$0xff]  ;;  %vm1334_vm3 = vcmask 261120   ;;  %v1328_v7 = vld [vmem:[#allocation2 + $0x40] sm:$0xff]  ;;  %v1327_v8 = vld [vmem:[#allocation2 + $0x38] sm:$0xff]  ;;  %s13651_s5 = scalar_lea.vmem [#allocation9], %s10962_s18  ;;  %vm10360_vm4 = vmmov 0  }
 0x291   : > { %v1353_v9 = vsel %vm1334_vm3, %v1326_v6, 0.0  ;;  %v1359_v10 = vsel %vm1334_vm3, %v1328_v7, 0.0  ;;  %v1356_v12 = vsel %vm1334_vm3, %v1327_v8, 0.0  ;;  %v1320_v18 = vld [vmem:[#allocation2] sm:$0xff]  ;;  %v1321_v19 = vld [vmem:[#allocation2 + $0x8] sm:$0xff]  ;;  %v1322_v22 = vld [vmem:[#allocation2 + $0x10] sm:$0xff] }
 0x292   : > { %1354 = vadd.xlane.f32.xlu0 %v1353_v9  ;;  %1360 = vadd.xlane.f32.xlu1 %v1359_v10  ;;  %v1331_v15 = vld [vmem:[#allocation2 + $0x58] sm:$0xff]  ;;  %v1335_v20 = vsel %vm1334_vm3, %v1320_v18, 0.0  ;;  %v1338_v21 = vsel %vm1334_vm3, %v1321_v19, 0.0  ;;  %v1341_v24 = vsel %vm1334_vm3, %v1322_v22, 0.0  ;;  %v11099_v27 = vld [vmem:[#allocation2 + $0x28] sm:$0xff]  ;;  %vm1967_vm5 = vcmask 64512  }
 0x293   : > { %v1368_v17 = vsel %vm1334_vm3, %v1331_v15, 0.0  ;;  %v1350_v29 = vsel %vm1334_vm3, %v11099_v27, 0.0  ;;  %vm11312_vm6 = vmpackc.low %vm1967_vm5, %vm1967_vm5  ;;  %vm2360_vm8 = vcmask 195584   ;;  %s10365_s23 = smov 104   ;;  %s10366_s3 = smov 8   ;;  %vm5837_vm9 = vcmask 130048  }
 0x294   : > { %s10367_s17 = smov 16   ;;  %s10368_s11 = smov 24   ;;  %vm6751_vm12 = vcmask 523264  }
 0x295   : > { %v1323_v23 = vld [vmem:[#allocation2 + $0x18] sm:$0xff]  ;;  %v11097_v26 = vld [vmem:[#allocation2 + $0x20] sm:$0xff]  ;;  %s13696_s12 = scalar_lea.vmem [#allocation14], %s10962_s18  ;;  %s13699_s0 = sld [smem:[#allocation28_spill]] }
 0x296   : > { %v1329_v11 = vld [vmem:[#allocation2 + $0x48] sm:$0xff]  ;;  %v1330_v14 = vld [vmem:[#allocation2 + $0x50] sm:$0xff]  ;;  %1357 = vadd.xlane.f32.xlu0 %v1356_v12  ;;  %v1344_v25 = vsel %vm1334_vm3, %v1323_v23, 0.0  ;;  %v1347_v28 = vsel %vm1334_vm3, %v11097_v26, 0.0 }
 0x297   : > { %v1362_v13 = vsel %vm1334_vm3, %v1329_v11, 0.0  ;;  %v1365_v16 = vsel %vm1334_vm3, %v1330_v14, 0.0 }
 0x298   : > { %1363 = vadd.xlane.f32.xlu1 %v1362_v13 }
 0x29a   : > { %1366 = vadd.xlane.f32.xlu0 %v1365_v16 }
 0x29b   : > { %p8030_p12 = scmp.ne.s32.totalorder %s13699_s0, 1 }
 0x29c   : > { %1369 = vadd.xlane.f32.xlu1 %v1368_v17  ;;  %s13700_s6 = sld [smem:[#allocation76_spill]] (!%p8030_p12)  ;;  %s13701_s27 = sld [smem:[#allocation77_spill]] (!%p8030_p12) }
 0x29e   : > { %1336 = vadd.xlane.f32.xlu0 %v1335_v20 }
 0x2a0   : > { %1339 = vadd.xlane.f32.xlu1 %v1338_v21 }
 0x2a2   : > { %1342 = vadd.xlane.f32.xlu0 %v1341_v24 }
 0x2a4   : > { %1345 = vadd.xlane.f32.xlu1 %v1344_v25 }
 0x2a6   : > { %1348 = vadd.xlane.f32.xlu0 %v1347_v28 }
 0x2a8   : > { %1351 = vadd.xlane.f32.xlu1 %v1350_v29  ;;  %v1530_v29 = vld [vmem:[%s11003_s4 + $0x10] sm:$0xff] }
 0x31f   : > { %v1355_v30 = vpop.xlane.xlu0 %1354  ;;  %v1361_v31 = vpop.xlane.xlu1 %1360 }
 0x320   : > { %v1378_v32 = vmul.f32 0.03125, %v1355_v30  ;;  %v1380_v33 = vmul.f32 0.03125, %v1361_v31  ;;  %v1531_v30 = vld [vmem:[%s11003_s4 + $0x18] sm:$0xff] }
 0x321   : > { %v9052_v31 = vpack.c.bf16 %v1531_v30, %v1530_v29 }
 0x322   : > { %v11105_v34 = vsub.f32 %v1326_v6, %v1378_v32  ;;  %v11107_v35 = vsub.f32 %v1328_v7, %v1380_v33  ;;  %v1705_v32 = vld [vmem:[%s11008_s29] sm:$0xff]  ;;  %v1706_v33 = vld [vmem:[%s11008_s29 + $0x8] sm:$0xff] }
 0x323   : > { %v1358_v36 = vpop.xlane.xlu0 %1357 }
 0x324   : > { %v1379_v38 = vmul.f32 0.03125, %v1358_v36  ;;  %v1402_v40 = vmul.f32 %v11105_v34, %v11105_v34  ;;  %v1404_v41 = vmul.f32 %v11107_v35, %v11107_v35  ;;  %v11173_v36 = vpack.c.bf16 %v1706_v33, %v1705_v32 }
 0x325   : > { %v1364_v37 = vpop.xlane.xlu1 %1363 }
 0x326   : > { %v1381_v39 = vmul.f32 0.03125, %v1364_v37  ;;  %v11113_v42 = vsub.f32 %v1327_v8, %v1379_v38  ;;  %v1426_v44 = vsel %vm1334_vm3, %v1402_v40, 0.0  ;;  %v1432_v47 = vsel %vm1334_vm3, %v1404_v41, 0.0  ;;  %v1834_v37 = vld [vmem:[%s10971_s7] sm:$0xff]  ;;  %v1835_v38 = vld [vmem:[%s10971_s7 + $0x8] sm:$0xff] }
 0x327   : > { %v1367_v45 = vpop.xlane.xlu0 %1366  ;;  %1427 = vadd.xlane.f32.xlu0 %v1426_v44 }
 0x328   : > { %v11115_v43 = vsub.f32 %v1329_v11, %v1381_v39  ;;  %v1382_v48 = vmul.f32 0.03125, %v1367_v45  ;;  %v1403_v50 = vmul.f32 %v11113_v42, %v11113_v42  ;;  %v11178_v39 = vpack.c.bf16 %v1835_v38, %v1834_v37 }
 0x329   : > { %v1370_v46 = vpop.xlane.xlu1 %1369 }
 0x32a   : > { %v1383_v49 = vmul.f32 0.03125, %v1370_v46  ;;  %v1405_v51 = vmul.f32 %v11115_v43, %v11115_v43  ;;  %v11123_v52 = vsub.f32 %v1330_v14, %v1382_v48  ;;  %v1429_v54 = vsel %vm1334_vm3, %v1403_v50, 0.0 }
 0x32b   : > { %1430 = vadd.xlane.f32.xlu1 %v1429_v54  ;;  %1433 = vadd.xlane.f32.xlu0 %v1432_v47  ;;  %v1337_v55 = vpop.xlane.xlu0 %1336 }
 0x32c   : > { %v11125_v53 = vsub.f32 %v1331_v15, %v1383_v49  ;;  %v1435_v56 = vsel %vm1334_vm3, %v1405_v51, 0.0  ;;  %v1372_v58 = vmul.f32 0.03125, %v1337_v55  ;;  %v1406_v60 = vmul.f32 %v11123_v52, %v11123_v52 }
 0x32d   : > { %v1340_v57 = vpop.xlane.xlu1 %1339 }
 0x32e   : > { %v1373_v59 = vmul.f32 0.03125, %v1340_v57  ;;  %v1407_v61 = vmul.f32 %v11125_v53, %v11125_v53  ;;  %v11133_v62 = vsub.f32 %v1320_v18, %v1372_v58  ;;  %v1438_v0 = vsel %vm1334_vm3, %v1406_v60, 0.0 }
 0x32f   : > { %1436 = vadd.xlane.f32.xlu1 %v1435_v56  ;;  %1439 = vadd.xlane.f32.xlu0 %v1438_v0  ;;  %v1343_v1 = vpop.xlane.xlu0 %1342 }
 0x330   : > { %v11135_v63 = vsub.f32 %v1321_v19, %v1373_v59  ;;  %v1441_v2 = vsel %vm1334_vm3, %v1407_v61, 0.0  ;;  %v1374_v4 = vmul.f32 0.03125, %v1343_v1  ;;  %v1396_v6 = vmul.f32 %v11133_v62, %v11133_v62 }
 0x331   : > { %v1346_v3 = vpop.xlane.xlu1 %1345 }
 0x332   : > { %v1375_v5 = vmul.f32 0.03125, %v1346_v3  ;;  %v1397_v7 = vmul.f32 %v11135_v63, %v11135_v63  ;;  %v11143_v8 = vsub.f32 %v1322_v22, %v1374_v4  ;;  %v1408_v10 = vsel %vm1334_vm3, %v1396_v6, 0.0 }
 0x333   : > { %1442 = vadd.xlane.f32.xlu1 %v1441_v2  ;;  %1409 = vadd.xlane.f32.xlu0 %v1408_v10  ;;  %v1349_v11 = vpop.xlane.xlu0 %1348 }
 0x334   : > { %v11145_v9 = vsub.f32 %v1323_v23, %v1375_v5  ;;  %v1411_v12 = vsel %vm1334_vm3, %v1397_v7, 0.0  ;;  %v1376_v14 = vmul.f32 0.03125, %v1349_v11  ;;  %v1398_v16 = vmul.f32 %v11143_v8, %v11143_v8 }
 0x335   : > { %v1352_v13 = vpop.xlane.xlu1 %1351 }
 0x336   : > { %v1377_v15 = vmul.f32 0.03125, %v1352_v13  ;;  %v1399_v17 = vmul.f32 %v11145_v9, %v11145_v9  ;;  %v11154_v18 = vsub.f32 %v11097_v26, %v1376_v14  ;;  %v1414_v20 = vsel %vm1334_vm3, %v1398_v16, 0.0  ;;  %v1528_v26 = vld [vmem:[%s11003_s4] sm:$0xff] }
 0x337   : > { %1412 = vadd.xlane.f32.xlu1 %v1411_v12  ;;  %1415 = vadd.xlane.f32.xlu0 %v1414_v20  ;;  %v11188_v12 = vld [vmem:[%s13651_s5] ss:$0 sm:$0xff]  ;;  %s13702_s5 = sld [smem:[#allocation78_spill]] (!%p8030_p12) }
 0x338   : > { %v11157_v19 = vsub.f32 %v11099_v27, %v1377_v15  ;;  %v1417_v21 = vsel %vm1334_vm3, %v1399_v17, 0.0  ;;  %v1400_v22 = vmul.f32 %v11154_v18, %v11154_v18  ;;  %v1529_v27 = vld [vmem:[%s11003_s4 + $0x8] sm:$0xff]  ;;  %s13650_s4 = scalar_lea.vmem [#allocation8], %s10962_s18 }
 0x339   : > { %v9048_v28 = vpack.c.bf16 %v1529_v27, %v1528_v26  ;;  %v11183_v4 = vld [vmem:[%s13650_s4] ss:$0 sm:$0xff]  ;;  %v1707_v26 = vld [vmem:[%s11008_s29 + $0x10] sm:$0xff]  ;;  %v1708_v27 = vld [vmem:[%s11008_s29 + $0x18] sm:$0xff]  ;;  %s10364_s29 = smov 112  }
 0x33a   : > { %v1401_v23 = vmul.f32 %v11157_v19, %v11157_v19  ;;  %v1420_v24 = vsel %vm1334_vm3, %v1400_v22, 0.0  ;;  %v9060_v38 = vpack.c.bf16 %v1708_v27, %v1707_v26 }
 0x33b   : > { %1418 = vadd.xlane.f32.xlu1 %v1417_v21  ;;  %1421 = vadd.xlane.f32.xlu0 %v1420_v24 }
 0x33c   : > { %v1423_v25 = vsel %vm1334_vm3, %v1401_v23, 0.0  ;;  %9228 = vmatprep.subr.bf16.mxu1 %v9048_v28  ;;  %9049 = vmatprep.subr.bf16.mxu0 %v9048_v28 }
 0x33d   : > { %9230 = vmatpush3.bf16.msra.mxu1 %v9048_v28  ;;  %9051 = vmatpush3.bf16.msra.mxu0 %v9048_v28 }
 0x33e   : > { %9229 = vmatprep.subr.bf16.mxu1 %v9052_v31  ;;  %9053 = vmatprep.subr.bf16.mxu0 %v9052_v31 }
 0x33f   : > { %1424 = vadd.xlane.f32.xlu1 %v1423_v25 }
 0x341   : > { %9231 = vmatpush3.bf16.msra.mxu1 %v9052_v31  ;;  %9055 = vmatpush3.bf16.msra.mxu0 %v9052_v31 }
 0x342   : > { %9057 = vmatprep.subr.bf16.mxu1 %v11173_v36  ;;  %9065 = vmatprep.subr.bf16.mxu0 %v11178_v39 }
 0x3b4   : > { %v1428_v40 = vpop.xlane.xlu0 %1427 }
 0x3b5   : > { %v1450_v41 = vmul.f32 0.03125, %v1428_v40 }
 0x3b7   : > { %v1462_v44 = vadd.f32 1e-05, %v1450_v41 }
 0x3b8   : > { %v1431_v45 = vpop.xlane.xlu1 %1430  ;;  %v1434_v46 = vpop.xlane.xlu0 %1433 }
 0x3b9   : > { %9536 = vrsqrt.f32 %v1462_v44  ;;  %v1451_v47 = vmul.f32 0.03125, %v1431_v45  ;;  %v1452_v48 = vmul.f32 0.03125, %v1434_v46 }
 0x3bb   : > { %v1463_v49 = vadd.f32 1e-05, %v1451_v47  ;;  %v1464_v50 = vadd.f32 1e-05, %v1452_v48 }
 0x3bc   : > { %v1437_v51 = vpop.xlane.xlu1 %1436  ;;  %v1440_v54 = vpop.xlane.xlu0 %1439 }
 0x3bd   : > { %9538 = vrsqrt.f32 %v1463_v49  ;;  %v1453_v55 = vmul.f32 0.03125, %v1437_v51  ;;  %v1454_v56 = vmul.f32 0.03125, %v1440_v54 }
 0x3be   : > { %9540 = vrsqrt.f32 %v1464_v50 }
 0x3bf   : > { %v1465_v57 = vadd.f32 1e-05, %v1453_v55  ;;  %v1466_v58 = vadd.f32 1e-05, %v1454_v56 }
 0x3c0   : > { %v1443_v59 = vpop.xlane.xlu1 %1442  ;;  %v1410_v60 = vpop.xlane.xlu0 %1409 }
 0x3c1   : > { %9542 = vrsqrt.f32 %v1465_v57  ;;  %v1455_v61 = vmul.f32 0.03125, %v1443_v59  ;;  %v1444_v0 = vmul.f32 0.03125, %v1410_v60  ;;  %v1836_v60 = vld [vmem:[%s10971_s7 + $0x10] sm:$0xff] }
 0x3c2   : > { %9544 = vrsqrt.f32 %v1466_v58 }
 0x3c3   : > { %v9537_v1 = vpop.eup %9536  ;;  %v1467_v2 = vadd.f32 1e-05, %v1455_v61  ;;  %v1456_v3 = vadd.f32 1e-05, %v1444_v0  ;;  %v1837_v61 = vld [vmem:[%s10971_s7 + $0x18] sm:$0xff]  ;;  %s10362_s7 = smov 120  }
 0x3c4   : > { %v1413_v5 = vpop.xlane.xlu1 %1412  ;;  %v1416_v6 = vpop.xlane.xlu0 %1415  ;;  %v1486_v7 = vmul.f32 %v9537_v1, %v11105_v34 }
 0x3c5   : > { %9546 = vrsqrt.f32 %v1467_v2  ;;  %v1445_v10 = vmul.f32 0.03125, %v1413_v5  ;;  %v1446_v11 = vmul.f32 0.03125, %v1416_v6  ;;  %v9068_v6 = vpack.c.bf16 %v1837_v61, %v1836_v60 }
 0x3c6   : > { %9548 = vrsqrt.f32 %v1456_v3  ;;  %v1504_v13 = vmul.f32 %v11183_v4, %v1486_v7 }
 0x3c7   : > { %v9539_v14 = vpop.eup %9538  ;;  %v1457_v15 = vadd.f32 1e-05, %v1445_v10  ;;  %v1458_v16 = vadd.f32 1e-05, %v1446_v11 }
 0x3c8   : > { %v9541_v17 = vpop.eup %9540  ;;  %v1419_v20 = vpop.xlane.xlu1 %1418  ;;  %v11192_v22 = vadd.f32 %v11188_v12, %v1504_v13  ;;  %v1487_v34 = vmul.f32 %v9539_v14, %v11113_v42 }
 0x3c9   : > { %v1422_v21 = vpop.xlane.xlu0 %1421  ;;  %9550 = vrsqrt.f32 %v1457_v15  ;;  %v1447_v23 = vmul.f32 0.03125, %v1419_v20  ;;  %v1488_v25 = vmul.f32 %v9541_v17, %v11107_v35 }
 0x3ca   : > { %v1448_v24 = vmul.f32 0.03125, %v1422_v21  ;;  %9552 = vrsqrt.f32 %v1458_v16  ;;  %8398 = vmatprep.mubr.msk.f32.mxu1 %vm1334_vm3, %v11192_v22  ;;  %v1505_v28 = vmul.f32 %v11183_v4, %v1487_v34 }
 0x3cb   : > { %v9543_v29 = vpop.eup %9542  ;;  %v1459_v30 = vadd.f32 1e-05, %v1447_v23  ;;  %v1506_v32 = vmul.f32 %v11183_v4, %v1488_v25 }
 0x3cc   : > { %v1460_v31 = vadd.f32 1e-05, %v1448_v24  ;;  %v9545_v33 = vpop.eup %9544  ;;  %v1425_v42 = vpop.xlane.xlu1 %1424  ;;  %v11203_v37 = vadd.f32 %v11188_v12, %v1505_v28  ;;  %v1489_v35 = vmul.f32 %v9543_v29, %v11115_v43 }
 0x3cd   : > { %9554 = vrsqrt.f32 %v1459_v30  ;;  %v1449_v40 = vmul.f32 0.03125, %v1425_v42  ;;  %v11207_v41 = vadd.f32 %v11188_v12, %v1506_v32  ;;  %v1490_v44 = vmul.f32 %v9545_v33, %v11123_v52 }
 0x3ce   : > { %9556 = vrsqrt.f32 %v1460_v31  ;;  %8399 = vmatmul.mubr.msk.f32.vlgmr.msra.gmra.mrb[0].mxu1 %vm1334_vm3, %v11203_v37  ;;  %v1507_v45 = vmul.f32 %v11183_v4, %v1489_v35 }
 0x3cf   : > { %v9547_v46 = vpop.eup %9546  ;;  %v1461_v47 = vadd.f32 1e-05, %v1449_v40  ;;  %8401 = vmatprep.mubr.msk.f32.mxu1 %vm1334_vm3, %v11207_v41  ;;  %v1508_v43 = vmul.f32 %v11183_v4, %v1490_v44  ;;  %9059 = vmatpush3.bf16.msra.mxu1 %v11173_v36 }
 0x3d0   : > { %v9549_v48 = vpop.eup %9548  ;;  %v11218_v49 = vadd.f32 %v11188_v12, %v1507_v45  ;;  %v1491_v52 = vmul.f32 %v9547_v46, %v11125_v53  ;;  %9061 = vmatprep.subr.bf16.mxu1 %v9060_v38 }
 0x3d1   : > { %9558 = vrsqrt.f32 %v1461_v47  ;;  %v11222_v50 = vadd.f32 %v11188_v12, %v1508_v43  ;;  %v1480_v51 = vmul.f32 %v9549_v48, %v11133_v62 }
 0x3d2   : > { %8402 = vmatmul.mubr.msk.f32.gmra.mrb[2].mxu1 %vm1334_vm3, %v11218_v49  ;;  %v1509_v36 = vmul.f32 %v11183_v4, %v1491_v52 }
 0x3d3   : > { %v9551_v54 = vpop.eup %9550  ;;  %8404 = vmatprep.mubr.msk.f32.mxu1 %vm1334_vm3, %v11222_v50  ;;  %v1498_v53 = vmul.f32 %v11183_v4, %v1480_v51  ;;  %9063 = vmatpush3.bf16.msra.mxu1 %v9060_v38 }
 0x3d4   : > { %v9553_v55 = vpop.eup %9552  ;;  %v1527_v56 = vadd.f32 %v11188_v12, %v1509_v36  ;;  %v1481_v57 = vmul.f32 %v9551_v54, %v11135_v63 }
 0x3d5   : > { %v1516_v58 = vadd.f32 %v11188_v12, %v1498_v53  ;;  %v1482_v62 = vmul.f32 %v9553_v55, %v11143_v8 }
 0x3d6   : > { %8405 = vmatmul.mubr.msk.f32.gmra.mrb[4].mxu1 %vm1334_vm3, %v1527_v56  ;;  %v1499_v59 = vmul.f32 %v11183_v4, %v1481_v57 }
 0x3d7   : > { %v9555_v0 = vpop.eup %9554  ;;  %8389 = vmatprep.mubr.msk.f32.mxu0 %vm1334_vm3, %v1516_v58  ;;  %8415 = vmatprep.mubr.msk.f32.mxu1 %vm1334_vm3, %v1516_v58  ;;  %v1500_v1 = vmul.f32 %v11183_v4, %v1482_v62 }
 0x3d8   : > { %v9557_v2 = vpop.eup %9556  ;;  %v1517_v63 = vadd.f32 %v11188_v12, %v1499_v59  ;;  %v1483_v3 = vmul.f32 %v9555_v0, %v11145_v9 }
 0x3d9   : > { %v1518_v8 = vadd.f32 %v11188_v12, %v1500_v1  ;;  %v1484_v5 = vmul.f32 %v9557_v2, %v11154_v18 }
 0x3da   : > { %8390 = vmatmul.mubr.msk.f32.vlgmr.msra.gmra.mrb[0].mxu0 %vm1334_vm3, %v1517_v63  ;;  %8416 = vmatmul.mubr.msk.f32.vlgmr.msra.gmra.mrb[6].mxu1 %vm1334_vm3, %v1517_v63  ;;  %v1501_v7 = vmul.f32 %v11183_v4, %v1483_v3 }
 0x3db   : > { %v9559_v10 = vpop.eup %9558  ;;  %8392 = vmatprep.mubr.msk.f32.mxu0 %vm1334_vm3, %v1518_v8  ;;  %8418 = vmatprep.mubr.msk.f32.mxu1 %vm1334_vm3, %v1518_v8  ;;  %v1502_v11 = vmul.f32 %v11183_v4, %v1484_v5 }
 0x3dc   : > { %v1519_v9 = vadd.f32 %v11188_v12, %v1501_v7  ;;  %9067 = vmatpush3.bf16.msra.mxu0 %v11178_v39  ;;  %v1485_v18 = vmul.f32 %v9559_v10, %v11157_v19  ;;  %v13549_v19 = vmov 0.0|0.0   ;;  %v13551_v39 = vmov 0.0  }
 0x3dd   : > { %v1520_v13 = vadd.f32 %v11188_v12, %v1502_v11  ;;  %9069 = vmatprep.subr.bf16.mxu0 %v9068_v6  ;;  %9072 = vmatprep.subr.bf16.mxu1 %v13549_v19 }
 0x3de   : > { %8393 = vmatmul.mubr.msk.f32.gmra.mrb[2].mxu0 %vm1334_vm3, %v1519_v9  ;;  %8419 = vmatmul.mubr.msk.f32.gmra.mrb[8].mxu1 %vm1334_vm3, %v1519_v9  ;;  %v1503_v14 = vmul.f32 %v11183_v4, %v1485_v18 }
 0x3df   : > { %8395 = vmatprep.mubr.msk.f32.mxu0 %vm1334_vm3, %v1520_v13  ;;  %8421 = vmatprep.mubr.msk.f32.mxu1 %vm1334_vm3, %v1520_v13 }
 0x3e0   : > { %v1521_v15 = vadd.f32 %v11188_v12, %v1503_v14  ;;  %9071 = vmatpush3.bf16.msra.mxu0 %v9068_v6 }
 0x3e1   : > { %9080 = vmatprep.subr.bf16.mxu0 %v13549_v19 }
 0x3e2   : > { %8396 = vmatmul.mubr.msk.f32.gmra.mrb[4].mxu0 %vm1334_vm3, %v1521_v15  ;;  %8422 = vmatmul.mubr.msk.f32.gmra.mrb[10].mxu1 %vm1334_vm3, %v1521_v15 }
 0x3e3   : > { %8424 = vmatprep.mubr.msk.f32.mxu1 %vm1334_vm3, %v11192_v22  ;;  %8441 = vmatprep.mubr.msk.f32.mxu0 %vm1334_vm3, %v1516_v58 }
 0x3e6   : > { %8425 = vmatmul.mubr.msk.f32.gmra.mrb[12].mxu1 %vm1334_vm3, %v11203_v37  ;;  %8442 = vmatmul.mubr.msk.f32.vlgmr.msra.gmra.mrb[6].mxu0 %vm1334_vm3, %v1517_v63 }
 0x3e7   : > { %8427 = vmatprep.mubr.msk.f32.mxu1 %vm1334_vm3, %v11207_v41  ;;  %8444 = vmatprep.mubr.msk.f32.mxu0 %vm1334_vm3, %v1518_v8 }
 0x3ea   : > { %8428 = vmatmul.mubr.msk.f32.gmra.mrb[14].mxu1 %vm1334_vm3, %v11218_v49  ;;  %8445 = vmatmul.mubr.msk.f32.gmra.mrb[8].mxu0 %vm1334_vm3, %v1519_v9 }
 0x3eb   : > { %8430 = vmatprep.mubr.msk.f32.mxu1 %vm1334_vm3, %v11222_v50  ;;  %8447 = vmatprep.mubr.msk.f32.mxu0 %vm1334_vm3, %v1520_v13 }
 0x3ee   : > { %8431 = vmatmul.mubr.msk.f32.gmra.mrb[16].mxu1 %vm1334_vm3, %v1527_v56  ;;  %8448 = vmatmul.mubr.msk.f32.gmra.mrb[10].mxu0 %vm1334_vm3, %v1521_v15 }
 0x3ef   : > { %8450 = vmatprep.mubr.msk.f32.mxu0 %vm1334_vm3, %v11192_v22  ;;  %8465 = vmatprep.mubr.msk.f32.mxu1 %vm10360_vm4, %v13551_v39 }
 0x3f2   : > { %8451 = vmatmul.mubr.msk.f32.gmra.mrb[12].mxu0 %vm1334_vm3, %v11203_v37 }
 0x3f3   : > { %8453 = vmatprep.mubr.msk.f32.mxu0 %vm1334_vm3, %v11207_v41 }
 0x3f6   : > { %8454 = vmatmul.mubr.msk.f32.gmra.mrb[14].mxu0 %vm1334_vm3, %v11218_v49 }
 0x3f7   : > { %8456 = vmatprep.mubr.msk.f32.mxu0 %vm1334_vm3, %v11222_v50 }
 0x3fa   : > { %8457 = vmatmul.mubr.msk.f32.gmra.mrb[16].mxu0 %vm1334_vm3, %v1527_v56 }
 0x3fb   : > { %8495 = vmatprep.mubr.msk.f32.mxu0 %vm10360_vm4, %v13551_v39 }
 0x4a1   : > { %v11298_v4 = vpop.f32.mrb[0].mxu1 }
 0x4a2   : > { %v11300_v12 = vpop.f32.mrb[1].mxu1  ;;  %v11414_v6 = vmul.f32 0.17677669, %v11298_v4 }
 0x4a3   : > { %v11389_v1 = vmul.f32 0.17677669, %v11300_v12 }
 0x4a5   : > { %v11302_v16 = vpop.f32.mrb[2].mxu1 }
 0x4a6   : > { %v11304_v17 = vpop.f32.mrb[3].mxu1  ;;  %v11461_v4 = vmul.f32 0.17677669, %v11302_v16 }
 0x4a7   : > { %v11436_v9 = vmul.f32 0.17677669, %v11304_v17  ;;  %v1963_v17 = vlaneseq }
 0x4a9   : > { %v11306_v20 = vpop.f32.mrb[4].mxu1 }
 0x4aa   : > { %v11308_v21 = vpop.f32.mrb[5].mxu1  ;;  %v11480_v16 = vmul.f32 0.17677669, %v11306_v20 }
 0x4ab   : > { %v11471_v12 = vmul.f32 0.17677669, %v11308_v21  ;;  %v1964_v21 = vand.u32 127, %v1963_v17 }
 0x4ad   : > { %v8391_v22 = vpop.f32.mrb[0].mxu0  ;;  %v8417_v34 = vpop.f32.mrb[6].mxu1  ;;  %vm1965_vm7 = vcmp.lt.s32.totalorder %v1964_v21, 17 }
 0x4ae   : > { %v1634_v23 = vpop.f32.mrb[1].mxu0  ;;  %v1775_v24 = vpop.f32.mrb[7].mxu1  ;;  %v11352_v51 = vmul.f32 0.17677669, %v8391_v22  ;;  %v10363_v22 = vmov -1e+30  }
 0x4af   : > { %v11316_v26 = vpack.i.bf16 %v8417_v34, %v1775_v24  ;;  %v9073_v27 = vpack.c.bf16 %v8417_v34, %v1775_v24  ;;  %v11337_v44 = vmul.f32 0.17677669, %v1634_v23  ;;  %v11487_v34 = vsel %vm1965_vm7, 0.0, %v10363_v22 }
 0x4b1   : > { %9417 = vrot.lane.b32.xlu0 %v11316_v26, %s10362_s7  ;;  %v8394_v28 = vpop.f32.mrb[2].mxu0  ;;  %v8420_v29 = vpop.f32.mrb[8].mxu1  ;;  %9075 = vmatpush3.bf16.xpose.msk.msra.mxu1 %vm11312_vm6, %v9073_v27 }
 0x4b2   : > { %v1644_v30 = vpop.f32.mrb[3].mxu0  ;;  %v11322_v31 = vpop.f32.mrb[9].mxu1  ;;  %8463 = vmatprep.subr.mxu1 %v13551_v39  ;;  %v11391_v2 = vmul.f32 0.17677669, %v8394_v28 }
 0x4b3   : > { %2859 = vrot.lane.b32.xlu1 %v11322_v31, %s10362_s7  ;;  %v11372_v56 = vmul.f32 0.17677669, %v1644_v30 }
 0x4b5   : > { %v11327_v32 = vpop.f32.mrb[4].mxu0  ;;  %v11329_v33 = vpop.f32.mrb[10].mxu1 }
 0x4b6   : > { %v1654_v42 = vpop.f32.mrb[5].mxu0  ;;  %v1795_v37 = vpop.f32.mrb[11].mxu1  ;;  %v11439_v18 = vmul.f32 0.17677669, %v11327_v32 }
 0x4b7   : > { %v11331_v35 = vpack.i.bf16 %v1795_v37, %v8420_v29  ;;  %v9077_v38 = vpack.c.bf16 %v1795_v37, %v8420_v29  ;;  %v11416_v7 = vmul.f32 0.17677669, %v1654_v42 }
 0x4b9   : > { %8464 = vmatpush3.xpose.msk.msra.mxu1 %vm1967_vm5, %v11322_v31  ;;  %9422 = vrot.lane.b32.xlu1 %v11331_v35, %s10362_s7  ;;  %v8426_v40 = vpop.f32.mrb[12].mxu1  ;;  %v8443_v41 = vpop.f32.mrb[6].mxu0 }
 0x4ba   : > { %v1805_v45 = vpop.f32.mrb[13].mxu1  ;;  %v1904_v46 = vpop.f32.mrb[7].mxu0  ;;  %9076 = vmatprep.subr.bf16.mxu1 %v13549_v19 }
 0x4bb   : > { %v11340_v47 = vpack.i.bf16 %v8426_v40, %v1805_v45  ;;  %v9081_v43 = vpack.c.bf16 %v8426_v40, %v1805_v45  ;;  %v11342_v48 = vpack.i.bf16 %v8443_v41, %v1904_v46  ;;  %v9089_v49 = vpack.c.bf16 %v8443_v41, %v1904_v46 }
 0x4bc   : > { %8466 = vmatmul.mubr.msk.f32.vlgmr.msra.gmra.mrb[18].mxu1 %vm1967_vm5, %v11337_v44 }
 0x4bd   : > { %9079 = vmatpush3.bf16.xpose.msk.msra.mxu1 %vm11312_vm6, %v9077_v38  ;;  %v8429_v52 = vpop.f32.mrb[14].mxu1  ;;  %v11348_v50 = vpop.f32.mrb[8].mxu0  ;;  %9083 = vmatpush3.bf16.xpose.msk.msra.mxu0 %vm11312_vm6, %v9081_v43 }
 0x4be   : > { %9427 = vrot.lane.b32.xlu1 %v11340_v47, %s10362_s7  ;;  %v11356_v36 = vpop.f32.mrb[15].mxu1  ;;  %v11358_v54 = vpop.f32.mrb[9].mxu0  ;;  %8468 = vmatprep.mubr.msk.f32.mxu1 %vm10360_vm4, %v13551_v39 }
 0x4bf   : > { %8478 = vmatprep.subr.mxu1 %v13551_v39  ;;  %8493 = vmatprep.subr.mxu0 %v13551_v39 }
 0x4c0   : > { %8469 = vmatmul.mubr.msk.f32.gmra.mrb[20].mxu1 %vm1967_vm5, %v11352_v51 }
 0x4c1   : > { %v11366_v53 = vpop.f32.mrb[16].mxu1  ;;  %v11368_v55 = vpop.f32.mrb[10].mxu0  ;;  %8471 = vmatprep.mubr.msk.f32.mxu1 %vm10360_vm4, %v13551_v39 }
 0x4c2   : > { %v1825_v57 = vpop.f32.mrb[17].mxu1  ;;  %v1924_v58 = vpop.f32.mrb[11].mxu0 }
 0x4c3   : > { %v11374_v62 = vpack.i.bf16 %v1825_v57, %v8429_v52  ;;  %v9085_v59 = vpack.c.bf16 %v1825_v57, %v8429_v52  ;;  %v11377_v60 = vpack.i.bf16 %v1924_v58, %v11348_v50  ;;  %v9092_v61 = vpack.c.bf16 %v1924_v58, %v11348_v50 }
 0x4c4   : > { %8472 = vmatmul.mubr.msk.f32.gmra.mrb[22].mxu1 %vm1967_vm5, %v11372_v56 }
 0x4c5   : > { %v11382_v0 = vpop.f32.mrb[12].mxu0  ;;  %8479 = vmatpush3.xpose.msk.msra.mxu1 %vm1967_vm5, %v11329_v33  ;;  %8494 = vmatpush3.xpose.msk.msra.mxu0 %vm1967_vm5, %v11356_v36 }
 0x4c6   : > { %v11393_v63 = vpop.f32.mrb[13].mxu0  ;;  %8480 = vmatprep.mubr.msk.f32.mxu1 %vm10360_vm4, %v13551_v39  ;;  %9084 = vmatprep.subr.bf16.mxu1 %v13549_v19 }
 0x4c7   : > { %v11400_v3 = vpack.i.bf16 %v11382_v0, %v11393_v63  ;;  %9088 = vmatprep.subr.bf16.mxu0 %v13549_v19 }
 0x4c8   : > { %8481 = vmatmul.mubr.msk.f32.vlgmr.msra.gmra.mrb[24].mxu1 %vm1967_vm5, %v11391_v2  ;;  %8496 = vmatmul.mubr.msk.f32.vlgmr.msra.gmra.mrb[18].mxu0 %vm1967_vm5, %v11389_v1 }
 0x4c9   : > { %v11409_v5 = vpop.f32.mrb[14].mxu0  ;;  %9087 = vmatpush3.bf16.xpose.msk.msra.mxu1 %vm11312_vm6, %v9085_v59  ;;  %9090 = vmatpush3.bf16.msra.mxu0 %v9089_v49 }
 0x4ca   : > { %v11418_v10 = vpop.f32.mrb[15].mxu0  ;;  %8483 = vmatprep.mubr.msk.f32.mxu1 %vm10360_vm4, %v13551_v39  ;;  %8498 = vmatprep.mubr.msk.f32.mxu0 %vm10360_vm4, %v13551_v39 }
 0x4cb   : > { %8523 = vmatprep.subr.mxu0 %v13551_v39  ;;  %8508 = vmatprep.subr.mxu1 %v13551_v39 }
 0x4cc   : > { %8484 = vmatmul.mubr.msk.f32.gmra.mrb[26].mxu1 %vm1967_vm5, %v11416_v7  ;;  %8499 = vmatmul.mubr.msk.f32.gmra.mrb[20].mxu0 %vm1967_vm5, %v11414_v6 }
 0x4cd   : > { %v11430_v11 = vpop.f32.mrb[16].mxu0  ;;  %8524 = vmatpush3.msra.mxu0 %v11358_v54  ;;  %8486 = vmatprep.mubr.msk.f32.mxu1 %vm10360_vm4, %v13551_v39 }
 0x4ce   : > { %v11441_v13 = vpop.f32.mrb[17].mxu0  ;;  %8501 = vmatprep.mubr.msk.f32.mxu0 %vm10360_vm4, %v13551_v39  ;;  %9094 = vmatprep.subr.bf16.mxu0 %v13549_v19 }
 0x4cf   : > { %v11448_v14 = vpack.i.bf16 %v11441_v13, %v11409_v5 }
 0x4d0   : > { %8487 = vmatmul.mubr.msk.f32.gmra.mrb[28].mxu1 %vm1967_vm5, %v11439_v18  ;;  %8502 = vmatmul.mubr.msk.f32.gmra.mrb[22].mxu0 %vm1967_vm5, %v11436_v9 }
 0x4d1   : > { %8509 = vmatpush3.xpose.msk.msra.mxu1 %vm1967_vm5, %v11366_v53  ;;  %8510 = vmatprep.mubr.msk.f32.mxu1 %vm10360_vm4, %v13551_v39 }
 0x4d2   : > { %9091 = vmatprep.subr.bf16.mxu1 %v13549_v19  ;;  %8525 = vmatprep.mubr.msk.f32.mxu0 %vm10360_vm4, %v13551_v39 }
 0x4d4   : > { %8511 = vmatmul.mubr.msk.f32.vlgmr.msra.gmra.mrb[30].mxu1 %vm1967_vm5, %v11461_v4 }
 0x4d5   : > { %9093 = vmatpush3.bf16.msra.mxu1 %v9092_v61  ;;  %8513 = vmatprep.mubr.msk.f32.mxu1 %vm10360_vm4, %v13551_v39 }
 0x4d6   : > { %8538 = vmatprep.subr.mxu1 %v13551_v39 }
 0x4d8   : > { %8514 = vmatmul.mubr.msk.f32.gmra.mrb[32].mxu1 %vm1967_vm5, %v11471_v12 }
 0x4d9   : > { %8539 = vmatpush3.msra.mxu1 %v11368_v55  ;;  %8516 = vmatprep.mubr.msk.f32.mxu1 %vm10360_vm4, %v13551_v39 }
 0x4da   : > { %9097 = vmatprep.subr.bf16.mxu1 %v13549_v19 }
 0x4dc   : > { %8517 = vmatmul.mubr.msk.f32.gmra.mrb[34].mxu1 %vm1967_vm5, %v11480_v16 }
 0x4dd   : > { %8540 = vmatprep.mubr.msk.f32.mxu1 %vm10360_vm4, %v13551_v39 }
 0x58f   : > { %v2052_v23 = vpop.f32.mrb[18].mxu1 }
 0x590   : > { %v11490_v24 = vadd.f32 %v2052_v23, %v11487_v34  ;;  %v8467_v20 = vpop.f32.mrb[19].mxu1 }
 0x592   : > { %v2361_v27 = vsel %vm2360_vm8, %v11490_v24, -inf }
 0x593   : > { %2362 = vmax.xlane.f32.xlu0 %v2361_v27  ;;  %v2057_v28 = vpop.f32.mrb[20].mxu1 }
 0x594   : > { %v11495_v29 = vadd.f32 %v2057_v28, %v11487_v34  ;;  %v8470_v30 = vpop.f32.mrb[21].mxu1 }
 0x596   : > { %v2364_v32 = vsel %vm2360_vm8, %v11495_v29, -inf }
 0x597   : > { %2365 = vmax.xlane.f32.xlu1 %v2364_v32  ;;  %v2062_v42 = vpop.f32.mrb[22].mxu1 }
 0x598   : > { %v11500_v37 = vadd.f32 %v2062_v42, %v11487_v34  ;;  %v8473_v38 = vpop.f32.mrb[23].mxu1 }
 0x59a   : > { %v2367_v40 = vsel %vm2360_vm8, %v11500_v37, -inf }
 0x59b   : > { %2368 = vmax.xlane.f32.xlu1 %v2367_v40  ;;  %v2150_v41 = vpop.f32.mrb[24].mxu1  ;;  %v2248_v45 = vpop.f32.mrb[18].mxu0 }
 0x59c   : > { %v11505_v46 = vadd.f32 %v2150_v41, %v11487_v34  ;;  %v11508_v43 = vadd.f32 %v2248_v45, %v11487_v34  ;;  %v8482_v49 = vpop.f32.mrb[25].mxu1  ;;  %v8497_v52 = vpop.f32.mrb[19].mxu0 }
 0x59e   : > { %v2370_v50 = vsel %vm2360_vm8, %v11505_v46, -inf  ;;  %v2379_v57 = vsel %vm2360_vm8, %v11508_v43, -inf }
 0x59f   : > { %2371 = vmax.xlane.f32.xlu0 %v2370_v50  ;;  %2380 = vmax.xlane.f32.xlu1 %v2379_v57  ;;  %v2155_v58 = vpop.f32.mrb[26].mxu1  ;;  %v2253_v59 = vpop.f32.mrb[20].mxu0 }
 0x5a0   : > { %v11515_v61 = vadd.f32 %v2155_v58, %v11487_v34  ;;  %v2254_v17 = vadd.f32 %v2253_v59, %v11487_v34  ;;  %v8485_v21 = vpop.f32.mrb[27].mxu1  ;;  %v8500_v22 = vpop.f32.mrb[21].mxu0 }
 0x5a2   : > { %v2382_v23 = vsel %vm2360_vm8, %v2254_v17, -inf  ;;  %v2373_v20 = vsel %vm2360_vm8, %v11515_v61, -inf }
 0x5a3   : > { %2383 = vmax.xlane.f32.xlu1 %v2382_v23  ;;  %v2258_v27 = vpop.f32.mrb[22].mxu0  ;;  %2374 = vmax.xlane.f32.xlu0 %v2373_v20  ;;  %v2160_v28 = vpop.f32.mrb[28].mxu1 }
 0x5a4   : > { %v2259_v30 = vadd.f32 %v2258_v27, %v11487_v34  ;;  %v11523_v32 = vadd.f32 %v2160_v28, %v11487_v34  ;;  %v8488_v42 = vpop.f32.mrb[29].mxu1  ;;  %v8503_v38 = vpop.f32.mrb[23].mxu0 }
 0x5a5   : > { %v11549_v28 = vpop.permute.xlu1 %2859  ;;  %v11553_v38 = vpop.permute.xlu0 %9417 }
 0x5a6   : > { %v2385_v40 = vsel %vm2360_vm8, %v2259_v30, -inf  ;;  %v2376_v41 = vsel %vm2360_vm8, %v11523_v32, -inf }
 0x5a7   : > { %2386 = vmax.xlane.f32.xlu1 %v2385_v40  ;;  %2377 = vmax.xlane.f32.xlu0 %v2376_v41  ;;  %v2346_v45 = vpop.f32.mrb[30].mxu1 }
 0x5a8   : > { %v11529_v49 = vadd.f32 %v2346_v45, %v11487_v34  ;;  %v8512_v52 = vpop.f32.mrb[31].mxu1 }
 0x5a9   : > { %v11551_v42 = vpop.permute.xlu1 %9422 }
 0x5aa   : > { %v2388_v50 = vsel %vm2360_vm8, %v11529_v49, -inf }
 0x5ab   : > { %2389 = vmax.xlane.f32.xlu0 %v2388_v50  ;;  %v2351_v57 = vpop.f32.mrb[32].mxu1 }
 0x5ac   : > { %v11534_v58 = vadd.f32 %v2351_v57, %v11487_v34  ;;  %v8515_v59 = vpop.f32.mrb[33].mxu1 }
 0x5ad   : > { %v11555_v40 = vpop.permute.xlu1 %9427 }
 0x5ae   : > { %v2391_v21 = vsel %vm2360_vm8, %v11534_v58, -inf }
 0x5af   : > { %2392 = vmax.xlane.f32.xlu0 %v2391_v21  ;;  %v2356_v22 = vpop.f32.mrb[34].mxu1 }
 0x5b0   : > { %v8518_v23 = vpop.f32.mrb[35].mxu1  ;;  %v11543_v20 = vadd.f32 %v2356_v22, %v11487_v34 }
 0x5b2   : > { %v2394_v27 = vsel %vm2360_vm8, %v11543_v20, -inf }
 0x5b8   : > { %2963 = vrot.lane.b32.xlu1 %v11329_v33, %s10362_s7 }
 0x5c5   : > { %2849 = vrot.lane.b32.xlu0 %v11337_v44, %s10362_s7 }
 0x5dc   : > { %2395 = vmax.xlane.f32.xlu1 %v2394_v27 }
 0x5ed   : > { %9432 = vrot.lane.b32.xlu1 %v11374_v62, %s10362_s7 }
 0x620   : > { %v2363_v41 = vpop.xlane.xlu0 %2362 }
 0x621   : > { %v2397_v45 = vsub.f32 %v11490_v24, %v2363_v41 }
 0x623   : > { %v2409_v52 = vmul.f32 1.442695, %v2397_v45 }
 0x624   : > { %v2366_v50 = vpop.xlane.xlu1 %2365 }
 0x625   : > { %9560 = vpow2.f32 %v2409_v52  ;;  %v2398_v57 = vsub.f32 %v11495_v29, %v2366_v50 }
 0x627   : > { %v2411_v59 = vmul.f32 1.442695, %v2398_v57 }
 0x628   : > { %v2369_v21 = vpop.xlane.xlu1 %2368 }
 0x629   : > { %9562 = vpow2.f32 %v2411_v59  ;;  %v2399_v22 = vsub.f32 %v11500_v37, %v2369_v21 }
 0x62b   : > { %v2413_v23 = vmul.f32 1.442695, %v2399_v22 }
 0x62c   : > { %v2381_v27 = vpop.xlane.xlu1 %2380  ;;  %v2372_v22 = vpop.xlane.xlu0 %2371 }
 0x62d   : > { %9564 = vpow2.f32 %v2413_v23  ;;  %v2403_v15 = vsub.f32 %v11508_v43, %v2381_v27  ;;  %v2400_v27 = vsub.f32 %v11505_v46, %v2372_v22 }
 0x62f   : > { %v11561_v19 = vpop.eup %9560  ;;  %v2421_v39 = vmul.f32 1.442695, %v2403_v15 }
 0x630   : > { %v2384_v8 = vpop.xlane.xlu1 %2383  ;;  %v2433_v24 = vsel %vm2360_vm8, %v11561_v19, 0.0  ;;  %v2375_v23 = vpop.xlane.xlu0 %2374 }
 0x631   : > { %9566 = vpow2.f32 %v2421_v39  ;;  %v2404_v41 = vsub.f32 %v2254_v17, %v2384_v8  ;;  %2434 = vadd.xlane.f32.xlu0 %v2433_v24 }
 0x633   : > { %v11565_v29 = vpop.eup %9562  ;;  %v2423_v45 = vmul.f32 1.442695, %v2404_v41  ;;  %v2415_v41 = vmul.f32 1.442695, %v2400_v27 }
 0x634   : > { %v2387_v52 = vpop.xlane.xlu1 %2386  ;;  %v2436_v37 = vsel %vm2360_vm8, %v11565_v29, 0.0  ;;  %v2378_v24 = vpop.xlane.xlu0 %2377 }
 0x635   : > { %9568 = vpow2.f32 %v2423_v45  ;;  %v2405_v50 = vsub.f32 %v2259_v30, %v2387_v52  ;;  %2437 = vadd.xlane.f32.xlu1 %v2436_v37  ;;  %v2401_v45 = vsub.f32 %v11515_v61, %v2375_v23 }
 0x637   : > { %v11569_v43 = vpop.eup %9564  ;;  %v2425_v15 = vmul.f32 1.442695, %v2405_v50  ;;  %v2417_v37 = vmul.f32 1.442695, %v2401_v45  ;;  %v2402_v50 = vsub.f32 %v11523_v32, %v2378_v24 }
 0x638   : > { %v2439_v57 = vsel %vm2360_vm8, %v11569_v43, 0.0  ;;  %v2390_v52 = vpop.xlane.xlu0 %2389  ;;  %v11596_v22 = vpop.permute.xlu1 %2963 }
 0x639   : > { %9570 = vpow2.f32 %v2425_v15  ;;  %2440 = vadd.xlane.f32.xlu1 %v2439_v57  ;;  %v2419_v15 = vmul.f32 1.442695, %v2402_v50  ;;  %v2406_v57 = vsub.f32 %v11529_v49, %v2390_v52 }
 0x63a   : > { %9572 = vpow2.f32 %v2415_v41 }
 0x63b   : > { %v11573_v39 = vpop.eup %9566  ;;  %9574 = vpow2.f32 %v2417_v37 }
 0x63c   : > { %v2451_v8 = vsel %vm2360_vm8, %v11573_v39, 0.0  ;;  %9576 = vpow2.f32 %v2419_v15 }
 0x63d   : > { %2452 = vadd.xlane.f32.xlu1 %v2451_v8  ;;  %v2393_v8 = vpop.xlane.xlu0 %2392 }
 0x63e   : > { %v2407_v46 = vsub.f32 %v11534_v58, %v2393_v8 }
 0x63f   : > { %v11577_v17 = vpop.eup %9568 }
 0x640   : > { %v2454_v30 = vsel %vm2360_vm8, %v11577_v17, 0.0  ;;  %v2429_v61 = vmul.f32 1.442695, %v2407_v46 }
 0x641   : > { %2455 = vadd.xlane.f32.xlu1 %v2454_v30  ;;  %v2427_v30 = vmul.f32 1.442695, %v2406_v57  ;;  %v2850_v8 = vpop.permute.xlu0 %2849 }
 0x643   : > { %v11581_v59 = vpop.eup %9570  ;;  %9578 = vpow2.f32 %v2427_v30 }
 0x644   : > { %v2457_v21 = vsel %vm2360_vm8, %v11581_v59, 0.0  ;;  %9580 = vpow2.f32 %v2429_v61 }
 0x645   : > { %2458 = vadd.xlane.f32.xlu1 %v2457_v21  ;;  %v11594_v21 = vpop.eup %9572 }
 0x646   : > { %v2442_v23 = vsel %vm2360_vm8, %v11594_v21, 0.0  ;;  %v11600_v27 = vpop.eup %9574 }
 0x647   : > { %2851 = vrot.lane.b32.xlu0 %v11352_v51, %s10362_s7  ;;  %v2445_v49 = vsel %vm2360_vm8, %v11600_v27, 0.0  ;;  %v11604_v24 = vpop.eup %9576 }
 0x648   : > { %v2448_v45 = vsel %vm2360_vm8, %v11604_v24, 0.0 }
 0x64d   : > { %v11609_v52 = vpop.eup %9578 }
 0x64e   : > { %v2460_v37 = vsel %vm2360_vm8, %v11609_v52, 0.0  ;;  %v11613_v50 = vpop.eup %9580 }
 0x64f   : > { %v2463_v15 = vsel %vm2360_vm8, %v11613_v50, 0.0 }
 0x656   : > { %2853 = vrot.lane.b32.xlu1 %v11372_v56, %s10362_s7 }
 0x666   : > { %2443 = vadd.xlane.f32.xlu0 %v2442_v23 }
 0x669   : > { %v2396_v32 = vpop.xlane.xlu1 %2395 }
 0x66a   : > { %v2408_v58 = vsub.f32 %v11543_v20, %v2396_v32  ;;  %2446 = vadd.xlane.f32.xlu0 %v2445_v49 }
 0x66c   : > { %v2431_v41 = vmul.f32 1.442695, %v2408_v58 }
 0x66d   : > { %v11663_v30 = vpop.permute.xlu1 %9432 }
 0x66e   : > { %9582 = vpow2.f32 %v2431_v41  ;;  %2449 = vadd.xlane.f32.xlu0 %v2448_v45  ;;  %v13654_v45 = vpack.c.bf16 %v11382_v0, %v11393_v63  ;;  %v13656_v63 = vmov 0.0|0.0  }
 0x672   : > { %2461 = vadd.xlane.f32.xlu0 %v2460_v37  ;;  %v13655_v37 = vmov 0.0  }
 0x676   : > { %2464 = vadd.xlane.f32.xlu0 %v2463_v15 }
 0x678   : > { %v11617_v20 = vpop.eup %9582 }
 0x679   : > { %v2466_v57 = vsel %vm2360_vm8, %v11617_v20, 0.0 }
 0x67a   : > { %2467 = vadd.xlane.f32.xlu1 %v2466_v57 }
 0x68b   : > { %3067 = vrot.lane.b32.xlu1 %v11356_v36, %s10362_s7 }
 0x68c   : > { %2953 = vrot.lane.b32.xlu0 %v11391_v2, %s10362_s7 }
 0x68f   : > { %2957 = vrot.lane.b32.xlu1 %v11439_v18, %s10362_s7 }
 0x690   : > { %2955 = vrot.lane.b32.xlu0 %v11416_v7, %s10362_s7 }
 0x693   : > { %3059 = vrot.lane.b32.xlu1 %v11414_v6, %s10362_s7 }
 0x694   : > { %3057 = vrot.lane.b32.xlu0 %v11389_v1, %s10362_s7 }
 0x697   : > { %3061 = vrot.lane.b32.xlu1 %v11436_v9, %s10362_s7 }
 0x698   : > { %3171 = vrot.lane.b32.xlu0 %v11366_v53, %s10362_s7 }
 0x69b   : > { %3165 = vrot.lane.b32.xlu1 %v11480_v16, %s10362_s7 }
 0x69c   : > { %3161 = vrot.lane.b32.xlu0 %v11461_v4, %s10362_s7 }
 0x69f   : > { %9442 = vrot.lane.b32.xlu1 %v11377_v60, %s10362_s7 }
 0x6a0   : > { %3163 = vrot.lane.b32.xlu0 %v11471_v12, %s10362_s7 }
 0x6a3   : > { %9447 = vrot.lane.b32.xlu1 %v11400_v3, %s10362_s7 }
 0x6a4   : > { %9437 = vrot.lane.b32.xlu0 %v11342_v48, %s10362_s7 }
 0x6a7   : > { %9452 = vrot.lane.b32.xlu1 %v11448_v14, %s10362_s7 }
 0x6a8   : > { %3404 = vrot.lane.b32.xlu0 %v11358_v54, %s10362_s7 }
 0x6ab   : > { %3707 = vrot.lane.b32.xlu1 %v11430_v11, %s10362_s7 }
 0x6ac   : > { %3505 = vrot.lane.b32.xlu0 %v11368_v55, %s10362_s7 }
 0x6af   : > { %9462 = vrot.lane.b32.xlu1 %v11331_v35, %s10364_s29 }
 0x6b0   : > { %3606 = vrot.lane.b32.xlu0 %v11418_v10, %s10362_s7 }
 0x6b4   : > { %9457 = vrot.lane.b32.xlu0 %v11316_v26, %s10364_s29 }
 0x6be   : > { %v2435_v46 = vpop.xlane.xlu0 %2434 }
 0x6bf   : > { %9584 = vrcp.f32 %v2435_v46 }
 0x6c2   : > { %v2438_v61 = vpop.xlane.xlu1 %2437 }
 0x6c3   : > { %9586 = vrcp.f32 %v2438_v61  ;;  %v9420_v61 = vunpack.i.h.bf16 %v11553_v38 }
 0x6c6   : > { %v2441_v23 = vpop.xlane.xlu1 %2440 }
 0x6c7   : > { %9588 = vrcp.f32 %v2441_v23  ;;  %v9419_v23 = vunpack.i.l.bf16 %v11553_v38 }
 0x6c9   : > { %v9585_v32 = vpop.eup %9584 }
 0x6ca   : > { %v2481_v49 = vmul.f32 %v9585_v32, %v11561_v19  ;;  %v2453_v58 = vpop.xlane.xlu1 %2452 }
 0x6cb   : > { %9590 = vrcp.f32 %v2453_v58 }
 0x6cc   : > { %8526 = vmatmul.mubr.msk.f32.vlgmr.msra.gmra.mrb[24].mxu0 %vm2360_vm8, %v2481_v49  ;;  %v9101_v49 = vpack.c.bf16 %v9420_v61, %v9419_v23  ;;  %v13657_v61 = vpack.c.bf16 %v11441_v13, %v11409_v5 }
 0x6cd   : > { %v9587_v41 = vpop.eup %9586  ;;  %9096 = vmatpush3.bf16.msra.mxu0 %v13654_v45  ;;  %8528 = vmatprep.mubr.msk.f32.mxu0 %vm10360_vm4, %v13655_v37  ;;  %v9429_v45 = vunpack.i.l.bf16 %v11555_v40 }
 0x6ce   : > { %v2456_v15 = vpop.xlane.xlu1 %2455  ;;  %8553 = vmatprep.subr.mxu0 %v13655_v37  ;;  %v2482_v57 = vmul.f32 %v9587_v41, %v11565_v29  ;;  %v9430_v41 = vunpack.i.h.bf16 %v11555_v40  ;;  %v2852_v40 = vpop.permute.xlu0 %2851 }
 0x6cf   : > { %9592 = vrcp.f32 %v2456_v15 }
 0x6d0   : > { %8529 = vmatmul.mubr.msk.f32.gmra.mrb[26].mxu0 %vm2360_vm8, %v2482_v57 }
 0x6d1   : > { %v9589_v19 = vpop.eup %9588  ;;  %8554 = vmatpush3.msra.mxu0 %v11418_v10  ;;  %8531 = vmatprep.mubr.msk.f32.mxu0 %vm10360_vm4, %v13655_v37 }
 0x6d2   : > { %v2459_v46 = vpop.xlane.xlu1 %2458  ;;  %v2483_v0 = vmul.f32 %v9589_v19, %v11569_v43  ;;  %9100 = vmatprep.subr.bf16.mxu0 %v13656_v63 }
 0x6d3   : > { %9594 = vrcp.f32 %v2459_v46 }
 0x6d4   : > { %8532 = vmatmul.mubr.msk.f32.gmra.mrb[28].mxu0 %vm2360_vm8, %v2483_v0 }
 0x6d5   : > { %v9591_v29 = vpop.eup %9590  ;;  %8555 = vmatprep.mubr.msk.f32.mxu0 %vm10360_vm4, %v13655_v37 }
 0x6d6   : > { %v2487_v32 = vmul.f32 %v9591_v29, %v11573_v39 }
 0x6d8   : > { %8556 = vmatmul.mubr.msk.f32.vlgmr.msra.gmra.mrb[30].mxu0 %vm2360_vm8, %v2487_v32 }
 0x6d9   : > { %v9593_v58 = vpop.eup %9592  ;;  %9103 = vmatpush3.bf16.xpose.msk.msra.mxu0 %vm11312_vm6, %v9101_v49  ;;  %8558 = vmatprep.mubr.msk.f32.mxu0 %vm10360_vm4, %v13655_v37  ;;  %v9425_v49 = vunpack.i.h.bf16 %v11551_v42 }
 0x6da   : > { %v2488_v38 = vmul.f32 %v9593_v58, %v11577_v17  ;;  %8583 = vmatprep.subr.mxu0 %v13655_v37  ;;  %v9109_v17 = vpack.c.bf16 %v9430_v41, %v9429_v45  ;;  %v9424_v58 = vunpack.i.l.bf16 %v11551_v42 }
 0x6dc   : > { %8559 = vmatmul.mubr.msk.f32.gmra.mrb[32].mxu0 %vm2360_vm8, %v2488_v38  ;;  %v9105_v41 = vpack.c.bf16 %v9425_v49, %v9424_v58 }
 0x6dd   : > { %v9595_v43 = vpop.eup %9594  ;;  %8561 = vmatprep.mubr.msk.f32.mxu0 %vm10360_vm4, %v13655_v37 }
 0x6de   : > { %v2489_v39 = vmul.f32 %v9595_v43, %v11581_v59 }
 0x6e0   : > { %8562 = vmatmul.mubr.msk.f32.gmra.mrb[34].mxu0 %vm2360_vm8, %v2489_v39 }
 0x6e1   : > { %8584 = vmatpush3.xpose.msk.msra.mxu0 %vm1967_vm5, %v11549_v28  ;;  %8585 = vmatprep.mubr.msk.f32.mxu0 %vm10360_vm4, %v13655_v37  ;;  %v2854_v28 = vpop.permute.xlu1 %2853 }
 0x6e2   : > { %9108 = vmatprep.subr.bf16.mxu0 %v13656_v63 }
 0x6e4   : > { %8586 = vmatmul.mubr.msk.f32.vlgmr.msra.gmra.mrb[36].mxu0 %vm1967_vm5, %v2850_v8 }
 0x6e5   : > { %9111 = vmatpush3.bf16.xpose.msk.msra.mxu0 %vm11312_vm6, %v9109_v17  ;;  %8588 = vmatprep.mubr.msk.f32.mxu0 %vm10360_vm4, %v13655_v37 }
 0x6e6   : > { %8613 = vmatprep.subr.mxu0 %v13655_v37 }
 0x6e8   : > { %8589 = vmatmul.mubr.msk.f32.gmra.mrb[38].mxu0 %vm1967_vm5, %v2852_v40 }
 0x6e9   : > { %8591 = vmatprep.mubr.msk.f32.mxu0 %vm10360_vm4, %v13655_v37 }
 0x6ec   : > { %8592 = vmatmul.mubr.msk.f32.gmra.mrb[40].mxu0 %vm1967_vm5, %v2854_v28 }
 0x6ed   : > { %8615 = vmatprep.mubr.msk.f32.mxu0 %vm10360_vm4, %v13655_v37 }
 0x6f3   : > { %v2444_v59 = vpop.xlane.xlu0 %2443 }
 0x6f4   : > { %9596 = vrcp.f32 %v2444_v59 }
 0x6f7   : > { %v2447_v8 = vpop.xlane.xlu0 %2446 }
 0x6f8   : > { %9598 = vrcp.f32 %v2447_v8  ;;  %v9435_v8 = vunpack.i.h.bf16 %v11663_v30 }
 0x6fb   : > { %v2450_v15 = vpop.xlane.xlu0 %2449 }
 0x6fc   : > { %9600 = vrcp.f32 %v2450_v15 }
 0x6fe   : > { %v9597_v57 = vpop.eup %9596 }
 0x6ff   : > { %v2484_v19 = vmul.f32 %v9597_v57, %v11594_v21  ;;  %v2462_v46 = vpop.xlane.xlu0 %2461 }
 0x700   : > { %9602 = vrcp.f32 %v2462_v46 }
 0x701   : > { %8541 = vmatmul.mubr.msk.f32.vlgmr.msra.gmra.mrb[36].mxu1 %vm2360_vm8, %v2484_v19 }
 0x702   : > { %v9599_v0 = vpop.eup %9598  ;;  %9099 = vmatpush3.bf16.msra.mxu1 %v13657_v61  ;;  %8543 = vmatprep.mubr.msk.f32.mxu1 %vm10360_vm4, %v13655_v37 }
 0x703   : > { %v2465_v23 = vpop.xlane.xlu0 %2464  ;;  %8568 = vmatprep.subr.mxu1 %v13655_v37  ;;  %v2485_v29 = vmul.f32 %v9599_v0, %v11600_v27 }
 0x704   : > { %9604 = vrcp.f32 %v2465_v23 }
 0x705   : > { %8544 = vmatmul.mubr.msk.f32.gmra.mrb[38].mxu1 %vm2360_vm8, %v2485_v29 }
 0x706   : > { %v9601_v21 = vpop.eup %9600  ;;  %8569 = vmatpush3.msra.mxu1 %v11430_v11  ;;  %8546 = vmatprep.mubr.msk.f32.mxu1 %vm10360_vm4, %v13655_v37 }
 0x707   : > { %v2468_v32 = vpop.xlane.xlu1 %2467  ;;  %v2954_v5 = vpop.permute.xlu0 %2953  ;;  %v2486_v13 = vmul.f32 %v9601_v21, %v11604_v24  ;;  %9104 = vmatprep.subr.bf16.mxu1 %v13656_v63 }
 0x708   : > { %9606 = vrcp.f32 %v2468_v32 }
 0x709   : > { %8547 = vmatmul.mubr.msk.f32.gmra.mrb[40].mxu1 %vm2360_vm8, %v2486_v13 }
 0x70a   : > { %v9603_v27 = vpop.eup %9602  ;;  %8570 = vmatprep.mubr.msk.f32.mxu1 %vm10360_vm4, %v13655_v37 }
 0x70b   : > { %v2490_v38 = vmul.f32 %v9603_v27, %v11609_v52  ;;  %v3068_v43 = vpop.permute.xlu1 %3067  ;;  %v2956_v39 = vpop.permute.xlu0 %2955 }
 0x70c   : > { %8614 = vmatpush3.xpose.msk.msra.mxu0 %vm1967_vm5, %v3068_v43 }
 0x70d   : > { %8571 = vmatmul.mubr.msk.f32.vlgmr.msra.gmra.mrb[42].mxu1 %vm2360_vm8, %v2490_v38  ;;  %9116 = vmatprep.subr.bf16.mxu0 %v13656_v63 }
 0x70e   : > { %v9605_v24 = vpop.eup %9604  ;;  %9107 = vmatpush3.bf16.xpose.msk.msra.mxu1 %vm11312_vm6, %v9105_v41  ;;  %8573 = vmatprep.mubr.msk.f32.mxu1 %vm10360_vm4, %v13655_v37 }
 0x70f   : > { %v2958_v42 = vpop.permute.xlu1 %2957  ;;  %v3058_v45 = vpop.permute.xlu0 %3057  ;;  %v2491_v52 = vmul.f32 %v9605_v24, %v11613_v50  ;;  %8598 = vmatprep.subr.mxu1 %v13655_v37  ;;  %v9434_v50 = vunpack.i.l.bf16 %v11663_v30 }
 0x710   : > { %8616 = vmatmul.mubr.msk.f32.vlgmr.msra.gmra.mrb[42].mxu0 %vm1967_vm5, %v3058_v45 }
 0x711   : > { %8574 = vmatmul.mubr.msk.f32.gmra.mrb[44].mxu1 %vm2360_vm8, %v2491_v52  ;;  %8618 = vmatprep.mubr.msk.f32.mxu0 %vm10360_vm4, %v13655_v37 }
 0x712   : > { %v9607_v17 = vpop.eup %9606  ;;  %8576 = vmatprep.mubr.msk.f32.mxu1 %vm10360_vm4, %v13655_v37 }
 0x713   : > { %v3060_v40 = vpop.permute.xlu1 %3059  ;;  %v3172_v28 = vpop.permute.xlu0 %3171  ;;  %v2492_v59 = vmul.f32 %v9607_v17, %v11617_v20  ;;  %v9113_v20 = vpack.c.bf16 %v9435_v8, %v9434_v50 }
 0x714   : > { %8619 = vmatmul.mubr.msk.f32.gmra.mrb[44].mxu0 %vm1967_vm5, %v3060_v40 }
 0x715   : > { %8577 = vmatmul.mubr.msk.f32.gmra.mrb[46].mxu1 %vm2360_vm8, %v2492_v59  ;;  %8621 = vmatprep.mubr.msk.f32.mxu0 %vm10360_vm4, %v13655_v37 }
 0x716   : > { %8599 = vmatpush3.xpose.msk.msra.mxu1 %vm1967_vm5, %v11596_v22  ;;  %8600 = vmatprep.mubr.msk.f32.mxu1 %vm10360_vm4, %v13655_v37 }
 0x717   : > { %v3062_v15 = vpop.permute.xlu1 %3061  ;;  %v3162_v57 = vpop.permute.xlu0 %3161  ;;  %9112 = vmatprep.subr.bf16.mxu1 %v13656_v63 }
 0x718   : > { %8622 = vmatmul.mubr.msk.f32.gmra.mrb[46].mxu0 %vm1967_vm5, %v3062_v15 }
 0x719   : > { %8601 = vmatmul.mubr.msk.f32.vlgmr.msra.gmra.mrb[48].mxu1 %vm1967_vm5, %v2954_v5  ;;  %8645 = vmatprep.mubr.msk.f32.mxu0 %vm10360_vm4, %v13655_v37 }
 0x71a   : > { %9115 = vmatpush3.bf16.xpose.msk.msra.mxu1 %vm11312_vm6, %v9113_v20  ;;  %8603 = vmatprep.mubr.msk.f32.mxu1 %vm10360_vm4, %v13655_v37 }
 0x71b   : > { %v3166_v22 = vpop.permute.xlu1 %3165  ;;  %v3164_v30 = vpop.permute.xlu0 %3163  ;;  %8628 = vmatprep.subr.mxu1 %v13655_v37 }
 0x71d   : > { %8604 = vmatmul.mubr.msk.f32.gmra.mrb[50].mxu1 %vm1967_vm5, %v2956_v39 }
 0x71e   : > { %8606 = vmatprep.mubr.msk.f32.mxu1 %vm10360_vm4, %v13655_v37 }
 0x71f   : > { %v9443_v19 = vpop.permute.xlu1 %9442  ;;  %v9438_v46 = vpop.permute.xlu0 %9437 }
 0x720   : > { %v9445_v0 = vunpack.i.h.bf16 %v9443_v19  ;;  %v9444_v61 = vunpack.i.l.bf16 %v9443_v19  ;;  %v9440_v23 = vunpack.i.h.bf16 %v9438_v46  ;;  %v9439_v29 = vunpack.i.l.bf16 %v9438_v46 }
 0x721   : > { %8607 = vmatmul.mubr.msk.f32.gmra.mrb[52].mxu1 %vm1967_vm5, %v2958_v42 }
 0x722   : > { %v9120_v21 = vpack.c.bf16 %v9445_v0, %v9444_v61  ;;  %v9117_v32 = vpack.c.bf16 %v9440_v23, %v9439_v29  ;;  %8629 = vmatpush3.xpose.msk.msra.mxu1 %vm1967_vm5, %v3172_v28  ;;  %8630 = vmatprep.mubr.msk.f32.mxu1 %vm10360_vm4, %v13655_v37 }
 0x723   : > { %v3405_v5 = vpop.permute.xlu0 %3404  ;;  %9119 = vmatprep.subr.bf16.mxu1 %v13656_v63 }
 0x724   : > { %9118 = vmatpush3.bf16.msra.mxu0 %v9117_v32 }
 0x725   : > { %8631 = vmatmul.mubr.msk.f32.vlgmr.msra.gmra.mrb[54].mxu1 %vm1967_vm5, %v3162_v57  ;;  %8643 = vmatprep.subr.mxu0 %v13655_v37 }
 0x726   : > { %9121 = vmatpush3.bf16.msra.mxu1 %v9120_v21  ;;  %8633 = vmatprep.mubr.msk.f32.mxu1 %vm10360_vm4, %v13655_v37 }
 0x727   : > { %v3506_v13 = vpop.permute.xlu0 %3505  ;;  %8658 = vmatprep.subr.mxu1 %v13655_v37 }
 0x728   : > { %8644 = vmatpush3.msra.mxu0 %v3405_v5 }
 0x729   : > { %8634 = vmatmul.mubr.msk.f32.gmra.mrb[56].mxu1 %vm1967_vm5, %v3164_v30  ;;  %9122 = vmatprep.subr.bf16.mxu0 %v13656_v63 }
 0x72a   : > { %8659 = vmatpush3.msra.mxu1 %v3506_v13  ;;  %8636 = vmatprep.mubr.msk.f32.mxu1 %vm10360_vm4, %v13655_v37 }
 0x72b   : > { %9125 = vmatprep.subr.bf16.mxu1 %v13656_v63 }
 0x72d   : > { %8637 = vmatmul.mubr.msk.f32.gmra.mrb[58].mxu1 %vm1967_vm5, %v3166_v22 }
 0x72e   : > { %8660 = vmatprep.mubr.msk.f32.mxu1 %vm10360_vm4, %v13655_v37 }
 0x79f   : > { %v11795_v49 = vpop.f32.mrb[24].mxu0 }
 0x7a0   : > { %13658 = vst [vmem:[#allocation41_spill] sm:$0xff] %v11795_v49  ;;  %v8527_v58 = vpop.f32.mrb[25].mxu0 }
 0x7a3   : > { %v11797_v27 = vpop.f32.mrb[26].mxu0 }
 0x7a4   : > { %13659 = vst [vmem:[#allocation42_spill] sm:$0xff] %v11797_v27  ;;  %v8530_v38 = vpop.f32.mrb[27].mxu0 }
 0x7a7   : > { %v11799_v43 = vpop.f32.mrb[28].mxu0 }
 0x7a8   : > { %13660 = vst [vmem:[#allocation43_spill] sm:$0xff] %v11799_v43  ;;  %v8533_v39 = vpop.f32.mrb[29].mxu0 }
 0x7ab   : > { %v11801_v41 = vpop.f32.mrb[30].mxu0 }
 0x7ac   : > { %13661 = vst [vmem:[#allocation44_spill] sm:$0xff] %v11801_v41  ;;  %v8557_v24 = vpop.f32.mrb[31].mxu0 }
 0x7af   : > { %v11803_v42 = vpop.f32.mrb[32].mxu0 }
 0x7b0   : > { %13662 = vst [vmem:[#allocation45_spill] sm:$0xff] %v11803_v42  ;;  %v8560_v45 = vpop.f32.mrb[33].mxu0 }
 0x7b3   : > { %v11805_v52 = vpop.f32.mrb[34].mxu0 }
 0x7b4   : > { %13663 = vst [vmem:[#allocation46_spill] sm:$0xff] %v11805_v52  ;;  %v8563_v17 = vpop.f32.mrb[35].mxu0 }
 0x7b7   : > { %v2939_v40 = vpop.f32.mrb[36].mxu0 }
 0x7b8   : > { %v11808_v28 = vadd.f32 %v2939_v40, %v11487_v34  ;;  %v8587_v59 = vpop.f32.mrb[37].mxu0 }
 0x7ba   : > { %v3265_v8 = vsel %vm2360_vm8, %v11808_v28, -inf }
 0x7bb   : > { %3266 = vmax.xlane.f32.xlu0 %v3265_v8  ;;  %v2944_v50 = vpop.f32.mrb[38].mxu0 }
 0x7bc   : > { %v11813_v15 = vadd.f32 %v2944_v50, %v11487_v34  ;;  %v8590_v57 = vpop.f32.mrb[39].mxu0 }
 0x7be   : > { %v3268_v20 = vsel %vm2360_vm8, %v11813_v15, -inf }
 0x7bf   : > { %3269 = vmax.xlane.f32.xlu1 %v3268_v20  ;;  %v2949_v22 = vpop.f32.mrb[40].mxu0 }
 0x7c0   : > { %v11818_v30 = vadd.f32 %v2949_v22, %v11487_v34  ;;  %v8593_v19 = vpop.f32.mrb[41].mxu0 }
 0x7c2   : > { %v3271_v46 = vsel %vm2360_vm8, %v11818_v30, -inf }
 0x7c3   : > { %3272 = vmax.xlane.f32.xlu0 %v3271_v46 }
 0x7d4   : > { %v11822_v0 = vpop.f32.mrb[36].mxu1 }
 0x7d5   : > { %13664 = vst [vmem:[#allocation47_spill] sm:$0xff] %v11822_v0  ;;  %v8542_v61 = vpop.f32.mrb[37].mxu1 }
 0x7d8   : > { %v11824_v23 = vpop.f32.mrb[38].mxu1 }
 0x7d9   : > { %13665 = vst [vmem:[#allocation48_spill] sm:$0xff] %v11824_v23  ;;  %v8545_v29 = vpop.f32.mrb[39].mxu1 }
 0x7dc   : > { %v11826_v21 = vpop.f32.mrb[40].mxu1 }
 0x7dd   : > { %13666 = vst [vmem:[#allocation49_spill] sm:$0xff] %v11826_v21  ;;  %v8548_v32 = vpop.f32.mrb[41].mxu1 }
 0x7e0   : > { %v11828_v5 = vpop.f32.mrb[42].mxu1 }
 0x7e1   : > { %13667 = vst [vmem:[#allocation50_spill] sm:$0xff] %v11828_v5  ;;  %v8572_v13 = vpop.f32.mrb[43].mxu1 }
 0x7e3   : > { %v3147_v58 = vpop.f32.mrb[42].mxu0 }
 0x7e4   : > { %v11831_v38 = vadd.f32 %v3147_v58, %v11487_v34  ;;  %v11833_v39 = vpop.f32.mrb[44].mxu1  ;;  %v8617_v24 = vpop.f32.mrb[43].mxu0 }
 0x7e5   : > { %13668 = vst [vmem:[#allocation51_spill] sm:$0xff] %v11833_v39  ;;  %v8575_v45 = vpop.f32.mrb[45].mxu1 }
 0x7e6   : > { %v3283_v17 = vsel %vm2360_vm8, %v11831_v38, -inf }
 0x7e7   : > { %3284 = vmax.xlane.f32.xlu1 %v3283_v17  ;;  %v3152_v40 = vpop.f32.mrb[44].mxu0 }
 0x7e8   : > { %v11838_v59 = vadd.f32 %v3152_v40, %v11487_v34  ;;  %v11840_v8 = vpop.f32.mrb[46].mxu1  ;;  %v8620_v50 = vpop.f32.mrb[45].mxu0 }
 0x7e9   : > { %13669 = vst [vmem:[#allocation52_spill] sm:$0xff] %v11840_v8  ;;  %v8578_v57 = vpop.f32.mrb[47].mxu1 }
 0x7ea   : > { %v3286_v20 = vsel %vm2360_vm8, %v11838_v59, -inf }
 0x7eb   : > { %3287 = vmax.xlane.f32.xlu1 %v3286_v20  ;;  %v3157_v22 = vpop.f32.mrb[46].mxu0 }
 0x7ec   : > { %v11845_v19 = vadd.f32 %v3157_v22, %v11487_v34  ;;  %v3043_v46 = vpop.f32.mrb[48].mxu1  ;;  %v8623_v61 = vpop.f32.mrb[47].mxu0 }
 0x7ed   : > { %v11848_v29 = vadd.f32 %v3043_v46, %v11487_v34  ;;  %v8602_v32 = vpop.f32.mrb[49].mxu1 }
 0x7ee   : > { %v3289_v13 = vsel %vm2360_vm8, %v11845_v19, -inf }
 0x7ef   : > { %3290 = vmax.xlane.f32.xlu1 %v3289_v13  ;;  %v3274_v58 = vsel %vm2360_vm8, %v11848_v29, -inf }
 0x7f0   : > { %v3048_v24 = vpop.f32.mrb[50].mxu1  ;;  %3275 = vmax.xlane.f32.xlu0 %v3274_v58 }
 0x7f1   : > { %v11855_v45 = vadd.f32 %v3048_v24, %v11487_v34  ;;  %v8605_v17 = vpop.f32.mrb[51].mxu1 }
 0x7f3   : > { %v3277_v40 = vsel %vm2360_vm8, %v11855_v45, -inf }
 0x7f4   : > { %v3053_v50 = vpop.f32.mrb[52].mxu1  ;;  %3278 = vmax.xlane.f32.xlu0 %v3277_v40 }
 0x7f5   : > { %v11860_v57 = vadd.f32 %v3053_v50, %v11487_v34  ;;  %v8608_v20 = vpop.f32.mrb[53].mxu1 }
 0x7f7   : > { %v3280_v22 = vsel %vm2360_vm8, %v11860_v57, -inf }
 0x7f8   : > { %v3251_v46 = vpop.f32.mrb[54].mxu1  ;;  %3281 = vmax.xlane.f32.xlu0 %v3280_v22 }
 0x7f9   : > { %v11865_v61 = vadd.f32 %v3251_v46, %v11487_v34  ;;  %v8632_v32 = vpop.f32.mrb[55].mxu1 }
 0x7fa   : > { %v11885_v32 = vpop.permute.xlu1 %9447 }
 0x7fb   : > { %v3292_v13 = vsel %vm2360_vm8, %v11865_v61, -inf }
 0x7fc   : > { %v3256_v58 = vpop.f32.mrb[56].mxu1  ;;  %3293 = vmax.xlane.f32.xlu0 %v3292_v13 }
 0x7fd   : > { %v11870_v24 = vadd.f32 %v3256_v58, %v11487_v34  ;;  %v8635_v17 = vpop.f32.mrb[57].mxu1  ;;  %v11889_v58 = vpop.permute.xlu0 %3606 }
 0x7fe   : > { %v11887_v13 = vpop.permute.xlu1 %9452 }
 0x7ff   : > { %v3295_v40 = vsel %vm2360_vm8, %v11870_v24, -inf }
 0x800   : > { %v3261_v50 = vpop.f32.mrb[58].mxu1  ;;  %3296 = vmax.xlane.f32.xlu0 %v3295_v40  ;;  %9467 = vrot.lane.b32.xlu1 %v11340_v47, %s10364_s29 }
 0x801   : > { %v8638_v20 = vpop.f32.mrb[59].mxu1  ;;  %v11879_v22 = vadd.f32 %v3261_v50, %v11487_v34  ;;  %v11893_v40 = vpop.permute.xlu0 %9457 }
 0x802   : > { %v11891_v17 = vpop.permute.xlu1 %3707 }
 0x803   : > { %v3298_v46 = vsel %vm2360_vm8, %v11879_v22, -inf }
 0x806   : > { %v11895_v20 = vpop.permute.xlu1 %9462 }
 0x816   : > { %3811 = vrot.lane.b32.xlu0 %v11322_v31, %s10364_s29 }
 0x824   : > { %3299 = vmax.xlane.f32.xlu1 %v3298_v46 }
 0x835   : > { %3915 = vrot.lane.b32.xlu1 %v11329_v33, %s10364_s29 }
 0x848   : > { %v3267_v50 = vpop.xlane.xlu0 %3266 }
 0x849   : > { %v3301_v8 = vsub.f32 %v11808_v28, %v3267_v50 }
 0x84b   : > { %v3313_v39 = vmul.f32 1.442695, %v3301_v8 }
 0x84c   : > { %v3270_v46 = vpop.xlane.xlu1 %3269 }
 0x84d   : > { %9608 = vpow2.f32 %v3313_v39  ;;  %v3302_v43 = vsub.f32 %v11813_v15, %v3270_v46 }
 0x84f   : > { %v3315_v27 = vmul.f32 1.442695, %v3302_v43 }
 0x850   : > { %v3273_v49 = vpop.xlane.xlu0 %3272 }
 0x851   : > { %9610 = vpow2.f32 %v3315_v27  ;;  %v3303_v5 = vsub.f32 %v11818_v30, %v3273_v49 }
 0x853   : > { %v3317_v42 = vmul.f32 1.442695, %v3303_v5 }
 0x855   : > { %9612 = vpow2.f32 %v3317_v42 }
 0x857   : > { %v11900_v21 = vpop.eup %9608 }
 0x858   : > { %v3337_v0 = vsel %vm2360_vm8, %v11900_v21, 0.0 }
 0x859   : > { %3338 = vadd.xlane.f32.xlu0 %v3337_v0 }
 0x85b   : > { %v11904_v52 = vpop.eup %9610 }
 0x85c   : > { %v3340_v28 = vsel %vm2360_vm8, %v11904_v52, 0.0 }
 0x85d   : > { %3341 = vadd.xlane.f32.xlu1 %v3340_v28 }
 0x85f   : > { %v11908_v15 = vpop.eup %9612 }
 0x860   : > { %v3343_v27 = vsel %vm2360_vm8, %v11908_v15, 0.0 }
 0x861   : > { %3344 = vadd.xlane.f32.xlu1 %v3343_v27 }
 0x86f   : > { %3801 = vrot.lane.b32.xlu0 %v11337_v44, %s10364_s29 }
 0x874   : > { %v3285_v49 = vpop.xlane.xlu1 %3284 }
 0x875   : > { %v3307_v43 = vsub.f32 %v11831_v38, %v3285_v49 }
 0x877   : > { %v3325_v42 = vmul.f32 1.442695, %v3307_v43 }
 0x878   : > { %v3288_v30 = vpop.xlane.xlu1 %3287 }
 0x879   : > { %9614 = vpow2.f32 %v3325_v42  ;;  %v3308_v0 = vsub.f32 %v11838_v59, %v3288_v30 }
 0x87b   : > { %v3327_v5 = vmul.f32 1.442695, %v3308_v0 }
 0x87c   : > { %v3291_v39 = vpop.xlane.xlu1 %3290 }
 0x87d   : > { %9616 = vpow2.f32 %v3327_v5  ;;  %v3309_v8 = vsub.f32 %v11845_v19, %v3291_v39  ;;  %v3276_v50 = vpop.xlane.xlu0 %3275 }
 0x87e   : > { %v3304_v46 = vsub.f32 %v11848_v29, %v3276_v50 }
 0x87f   : > { %v3329_v28 = vmul.f32 1.442695, %v3309_v8 }
 0x880   : > { %v3319_v27 = vmul.f32 1.442695, %v3304_v46 }
 0x881   : > { %9618 = vpow2.f32 %v3329_v28  ;;  %v3279_v41 = vpop.xlane.xlu0 %3278 }
 0x882   : > { %9620 = vpow2.f32 %v3319_v27  ;;  %v3305_v38 = vsub.f32 %v11855_v45, %v3279_v41 }
 0x883   : > { %v11919_v49 = vpop.eup %9614 }
 0x884   : > { %v3321_v43 = vmul.f32 1.442695, %v3305_v38  ;;  %v3355_v59 = vsel %vm2360_vm8, %v11919_v49, 0.0 }
 0x885   : > { %v3282_v42 = vpop.xlane.xlu0 %3281  ;;  %3356 = vadd.xlane.f32.xlu1 %v3355_v59  ;;  %v11953_v59 = vpop.permute.xlu1 %9467 }
 0x886   : > { %9622 = vpow2.f32 %v3321_v43  ;;  %v3306_v19 = vsub.f32 %v11860_v57, %v3282_v42 }
 0x887   : > { %v11924_v30 = vpop.eup %9616 }
 0x888   : > { %v3323_v29 = vmul.f32 1.442695, %v3306_v19  ;;  %v3358_v0 = vsel %vm2360_vm8, %v11924_v30, 0.0 }
 0x889   : > { %v3294_v5 = vpop.xlane.xlu0 %3293  ;;  %3359 = vadd.xlane.f32.xlu1 %v3358_v0 }
 0x88a   : > { %9624 = vpow2.f32 %v3323_v29  ;;  %v3310_v41 = vsub.f32 %v11865_v61, %v3294_v5 }
 0x88b   : > { %v11929_v45 = vpop.eup %9618 }
 0x88c   : > { %v11931_v39 = vpop.eup %9620  ;;  %v3331_v8 = vmul.f32 1.442695, %v3310_v41  ;;  %v3361_v50 = vsel %vm2360_vm8, %v11929_v45, 0.0 }
 0x88d   : > { %3362 = vadd.xlane.f32.xlu1 %v3361_v50  ;;  %v3346_v57 = vsel %vm2360_vm8, %v11931_v39, 0.0  ;;  %v3297_v42 = vpop.xlane.xlu0 %3296 }
 0x88e   : > { %9626 = vpow2.f32 %v3331_v8  ;;  %3347 = vadd.xlane.f32.xlu0 %v3346_v57  ;;  %v3311_v19 = vsub.f32 %v11870_v24, %v3297_v42  ;;  %v9450_v42 = vunpack.i.h.bf16 %v11885_v32 }
 0x890   : > { %v11937_v46 = vpop.eup %9622  ;;  %v3333_v0 = vmul.f32 1.442695, %v3311_v19  ;;  %v9449_v19 = vunpack.i.l.bf16 %v11885_v32 }
 0x891   : > { %v3349_v28 = vsel %vm2360_vm8, %v11937_v46, 0.0  ;;  %v11993_v57 = vpop.permute.xlu0 %3811 }
 0x892   : > { %3350 = vadd.xlane.f32.xlu0 %v3349_v28  ;;  %9628 = vpow2.f32 %v3333_v0 }
 0x894   : > { %v11941_v61 = vpop.eup %9624 }
 0x895   : > { %v3352_v27 = vsel %vm2360_vm8, %v11941_v61, 0.0 }
 0x896   : > { %3353 = vadd.xlane.f32.xlu0 %v3352_v27 }
 0x898   : > { %v11945_v38 = vpop.eup %9626 }
 0x899   : > { %v3364_v43 = vsel %vm2360_vm8, %v11945_v38, 0.0 }
 0x89a   : > { %3365 = vadd.xlane.f32.xlu0 %v3364_v43 }
 0x89c   : > { %v11967_v24 = vpop.eup %9628 }
 0x89e   : > { %9472 = vrot.lane.b32.xlu1 %v11374_v62, %s10364_s29 }
 0x8a2   : > { %3805 = vrot.lane.b32.xlu1 %v11372_v56, %s10364_s29 }
 0x8b0   : > { %3803 = vrot.lane.b32.xlu0 %v11352_v51, %s10364_s29 }
 0x8b1   : > { %v3300_v29 = vpop.xlane.xlu1 %3299 }
 0x8b2   : > { %v3312_v5 = vsub.f32 %v11879_v22, %v3300_v29  ;;  %v3367_v22 = vsel %vm2360_vm8, %v11967_v24, 0.0 }
 0x8b4   : > { %3905 = vrot.lane.b32.xlu0 %v11391_v2, %s10364_s29  ;;  %v3335_v41 = vmul.f32 1.442695, %v3312_v5  ;;  %v9123_v5 = vpack.c.bf16 %v9450_v42, %v9449_v19 }
 0x8b5   : > { %v11997_v28 = vpop.permute.xlu1 %3915 }
 0x8b6   : > { %9630 = vpow2.f32 %v3335_v41 }
 0x8b8   : > { %3907 = vrot.lane.b32.xlu0 %v11416_v7, %s10364_s29 }
 0x8bc   : > { %4009 = vrot.lane.b32.xlu0 %v11389_v1, %s10364_s29 }
 0x8c0   : > { %4123 = vrot.lane.b32.xlu0 %v11366_v53, %s10364_s29  ;;  %v11973_v8 = vpop.eup %9630 }
 0x8c1   : > { %v3370_v50 = vsel %vm2360_vm8, %v11973_v8, 0.0 }
 0x8c4   : > { %4113 = vrot.lane.b32.xlu0 %v11461_v4, %s10364_s29 }
 0x8c6   : > { %3368 = vadd.xlane.f32.xlu1 %v3367_v22 }
 0x8c8   : > { %4115 = vrot.lane.b32.xlu0 %v11471_v12, %s10364_s29 }
 0x8ca   : > { %3371 = vadd.xlane.f32.xlu1 %v3370_v50 }
 0x8cc   : > { %9477 = vrot.lane.b32.xlu0 %v11342_v48, %s10364_s29 }
 0x8d0   : > { %4353 = vrot.lane.b32.xlu0 %v11358_v54, %s10364_s29 }
 0x8d4   : > { %4451 = vrot.lane.b32.xlu0 %v11368_v55, %s10364_s29 }
 0x8d8   : > { %4549 = vrot.lane.b32.xlu0 %v11418_v10, %s10364_s29 }
 0x8db   : > { %4019 = vrot.lane.b32.xlu1 %v11356_v36, %s10364_s29 }
 0x8dc   : > { %9497 = vrot.lane.b32.xlu0 %v11316_v26, %s10365_s23 }
 0x8df   : > { %3909 = vrot.lane.b32.xlu1 %v11439_v18, %s10364_s29 }
 0x8e3   : > { %4011 = vrot.lane.b32.xlu1 %v11414_v6, %s10364_s29 }
 0x8e6   : > { %v3339_v27 = vpop.xlane.xlu0 %3338 }
 0x8e7   : > { %9632 = vrcp.f32 %v3339_v27  ;;  %4013 = vrot.lane.b32.xlu1 %v11436_v9, %s10364_s29 }
 0x8ea   : > { %v3342_v43 = vpop.xlane.xlu1 %3341  ;;  %v3802_v50 = vpop.permute.xlu0 %3801 }
 0x8eb   : > { %9634 = vrcp.f32 %v3342_v43  ;;  %4117 = vrot.lane.b32.xlu1 %v11480_v16, %s10364_s29  ;;  %v9459_v43 = vunpack.i.l.bf16 %v11893_v40 }
 0x8ee   : > { %v3345_v26 = vpop.xlane.xlu1 %3344 }
 0x8ef   : > { %9636 = vrcp.f32 %v3345_v26  ;;  %9482 = vrot.lane.b32.xlu1 %v11377_v60, %s10364_s29 }
 0x8f1   : > { %v9633_v29 = vpop.eup %9632 }
 0x8f2   : > { %v3385_v0 = vmul.f32 %v9633_v29, %v11900_v21 }
 0x8f3   : > { %9487 = vrot.lane.b32.xlu1 %v11400_v3, %s10364_s29 }
 0x8f4   : > { %8646 = vmatmul.mubr.msk.f32.vlgmr.msra.gmra.mrb[48].mxu0 %vm2360_vm8, %v3385_v0 }
 0x8f5   : > { %v9635_v41 = vpop.eup %9634  ;;  %9124 = vmatpush3.bf16.msra.mxu0 %v9123_v5  ;;  %8648 = vmatprep.mubr.msk.f32.mxu0 %vm10360_vm4, %v13655_v37 }
 0x8f6   : > { %8673 = vmatprep.subr.mxu0 %v13655_v37  ;;  %v3386_v32 = vmul.f32 %v9635_v41, %v11904_v52  ;;  %v9455_v41 = vunpack.i.h.bf16 %v11887_v13 }
 0x8f7   : > { %9492 = vrot.lane.b32.xlu1 %v11448_v14, %s10364_s29 }
 0x8f8   : > { %8649 = vmatmul.mubr.msk.f32.gmra.mrb[50].mxu0 %vm2360_vm8, %v3386_v32 }
 0x8f9   : > { %v9637_v21 = vpop.eup %9636  ;;  %8674 = vmatpush3.msra.mxu0 %v11889_v58  ;;  %8651 = vmatprep.mubr.msk.f32.mxu0 %vm10360_vm4, %v13655_v37 }
 0x8fa   : > { %v3387_v22 = vmul.f32 %v9637_v21, %v11908_v15  ;;  %9128 = vmatprep.subr.bf16.mxu0 %v13656_v63  ;;  %v9460_v15 = vunpack.i.h.bf16 %v11893_v40 }
 0x8fb   : > { %4647 = vrot.lane.b32.xlu1 %v11430_v11, %s10364_s29 }
 0x8fc   : > { %8652 = vmatmul.mubr.msk.f32.gmra.mrb[52].mxu0 %vm2360_vm8, %v3387_v22  ;;  %v9129_v29 = vpack.c.bf16 %v9460_v15, %v9459_v43 }
 0x8fd   : > { %8675 = vmatprep.mubr.msk.f32.mxu0 %vm10360_vm4, %v13655_v37 }
 0x8ff   : > { %9502 = vrot.lane.b32.xlu1 %v11331_v35, %s10365_s23 }
 0x912   : > { %v3357_v52 = vpop.xlane.xlu1 %3356 }
 0x913   : > { %9638 = vrcp.f32 %v3357_v52  ;;  %v9470_v52 = vunpack.i.h.bf16 %v11953_v59 }
 0x916   : > { %v3360_v58 = vpop.xlane.xlu1 %3359 }
 0x917   : > { %9640 = vrcp.f32 %v3360_v58 }
 0x91a   : > { %v3363_v27 = vpop.xlane.xlu1 %3362 }
 0x91b   : > { %9642 = vrcp.f32 %v3363_v27  ;;  %v3348_v26 = vpop.xlane.xlu0 %3347 }
 0x91c   : > { %9644 = vrcp.f32 %v3348_v26  ;;  %v9464_v26 = vunpack.i.l.bf16 %v11895_v20 }
 0x91d   : > { %v9639_v42 = vpop.eup %9638 }
 0x91e   : > { %v3391_v19 = vmul.f32 %v9639_v42, %v11919_v49  ;;  %v9454_v49 = vunpack.i.l.bf16 %v11887_v13 }
 0x91f   : > { %v3351_v0 = vpop.xlane.xlu0 %3350 }
 0x920   : > { %9646 = vrcp.f32 %v3351_v0  ;;  %8676 = vmatmul.mubr.msk.f32.vlgmr.msra.gmra.mrb[54].mxu0 %vm2360_vm8, %v3391_v19  ;;  %v9126_v15 = vpack.c.bf16 %v9455_v41, %v9454_v49 }
 0x921   : > { %v9641_v35 = vpop.eup %9640  ;;  %9131 = vmatpush3.bf16.xpose.msk.msra.mxu0 %vm11312_vm6, %v9129_v29  ;;  %8678 = vmatprep.mubr.msk.f32.mxu0 %vm10360_vm4, %v13655_v37 }
 0x922   : > { %v3392_v40 = vmul.f32 %v9641_v35, %v11924_v30  ;;  %8703 = vmatprep.subr.mxu0 %v13655_v37  ;;  %v9469_v30 = vunpack.i.l.bf16 %v11953_v59  ;;  %v12061_v59 = vpop.permute.xlu1 %9472 }
 0x923   : > { %v3354_v5 = vpop.xlane.xlu0 %3353 }
 0x924   : > { %9648 = vrcp.f32 %v3354_v5  ;;  %8679 = vmatmul.mubr.msk.f32.gmra.mrb[56].mxu0 %vm2360_vm8, %v3392_v40 }
 0x925   : > { %v9643_v32 = vpop.eup %9642  ;;  %8681 = vmatprep.mubr.msk.f32.mxu0 %vm10360_vm4, %v13655_v37 }
 0x926   : > { %v9645_v21 = vpop.eup %9644  ;;  %v3393_v22 = vmul.f32 %v9643_v32, %v11929_v45  ;;  %v9137_v45 = vpack.c.bf16 %v9470_v52, %v9469_v30 }
 0x927   : > { %v3388_v58 = vmul.f32 %v9645_v21, %v11931_v39  ;;  %v3366_v27 = vpop.xlane.xlu0 %3365 }
 0x928   : > { %9650 = vrcp.f32 %v3366_v27  ;;  %8682 = vmatmul.mubr.msk.f32.gmra.mrb[58].mxu0 %vm2360_vm8, %v3393_v22 }
 0x929   : > { %8704 = vmatpush3.xpose.msk.msra.mxu0 %vm1967_vm5, %v11993_v57  ;;  %8661 = vmatmul.mubr.msk.f32.vlgmr.msra.gmra.mrb[60].mxu1 %vm2360_vm8, %v3388_v58 }
 0x92a   : > { %v9647_v13 = vpop.eup %9646  ;;  %9127 = vmatpush3.bf16.msra.mxu1 %v9126_v15  ;;  %8705 = vmatprep.mubr.msk.f32.mxu0 %vm10360_vm4, %v13655_v37 }
 0x92b   : > { %9136 = vmatprep.subr.bf16.mxu0 %v13656_v63  ;;  %8663 = vmatprep.mubr.msk.f32.mxu1 %vm10360_vm4, %v13655_v37  ;;  %v3389_v39 = vmul.f32 %v9647_v13, %v11937_v46  ;;  %v3804_v57 = vpop.permute.xlu0 %3803 }
 0x92c   : > { %8688 = vmatprep.subr.mxu1 %v13655_v37  ;;  %8706 = vmatmul.mubr.msk.f32.vlgmr.msra.gmra.mrb[60].mxu0 %vm1967_vm5, %v3802_v50  ;;  %v9465_v50 = vunpack.i.h.bf16 %v11895_v20 }
 0x92d   : > { %9139 = vmatpush3.bf16.xpose.msk.msra.mxu0 %vm11312_vm6, %v9137_v45  ;;  %8664 = vmatmul.mubr.msk.f32.gmra.mrb[62].mxu1 %vm2360_vm8, %v3389_v39  ;;  %v9475_v45 = vunpack.i.h.bf16 %v12061_v59  ;;  %v9474_v39 = vunpack.i.l.bf16 %v12061_v59 }
 0x92e   : > { %v9649_v43 = vpop.eup %9648  ;;  %8689 = vmatpush3.msra.mxu1 %v11891_v17  ;;  %8708 = vmatprep.mubr.msk.f32.mxu0 %vm10360_vm4, %v13655_v37  ;;  %v9133_v29 = vpack.c.bf16 %v9465_v50, %v9464_v26 }
 0x92f   : > { %8666 = vmatprep.mubr.msk.f32.mxu1 %vm10360_vm4, %v13655_v37  ;;  %v3390_v46 = vmul.f32 %v9649_v43, %v11941_v61  ;;  %9132 = vmatprep.subr.bf16.mxu1 %v13656_v63  ;;  %v3806_v61 = vpop.permute.xlu1 %3805  ;;  %v3906_v19 = vpop.permute.xlu0 %3905 }
 0x930   : > { %8709 = vmatmul.mubr.msk.f32.gmra.mrb[62].mxu0 %vm1967_vm5, %v3804_v57  ;;  %8733 = vmatprep.subr.mxu0 %v13655_v37 }
 0x931   : > { %8667 = vmatmul.mubr.msk.f32.gmra.mrb[64].mxu1 %vm2360_vm8, %v3390_v46  ;;  %8711 = vmatprep.mubr.msk.f32.mxu0 %vm10360_vm4, %v13655_v37 }
 0x932   : > { %v9651_v17 = vpop.eup %9650  ;;  %8690 = vmatprep.mubr.msk.f32.mxu1 %vm10360_vm4, %v13655_v37 }
 0x933   : > { %v3394_v42 = vmul.f32 %v9651_v17, %v11945_v38  ;;  %v3908_v20 = vpop.permute.xlu0 %3907 }
 0x934   : > { %8712 = vmatmul.mubr.msk.f32.gmra.mrb[64].mxu0 %vm1967_vm5, %v3806_v61 }
 0x935   : > { %8691 = vmatmul.mubr.msk.f32.vlgmr.msra.gmra.mrb[66].mxu1 %vm2360_vm8, %v3394_v42  ;;  %8735 = vmatprep.mubr.msk.f32.mxu0 %vm10360_vm4, %v13655_v37 }
 0x936   : > { %9135 = vmatpush3.bf16.xpose.msk.msra.mxu1 %vm11312_vm6, %v9133_v29  ;;  %8693 = vmatprep.mubr.msk.f32.mxu1 %vm10360_vm4, %v13655_v37 }
 0x937   : > { %8718 = vmatprep.subr.mxu1 %v13655_v37  ;;  %v4010_v38 = vpop.permute.xlu0 %4009 }
 0x93b   : > { %v4124_v0 = vpop.permute.xlu0 %4123 }
 0x93e   : > { %8719 = vmatpush3.xpose.msk.msra.mxu1 %vm1967_vm5, %v11997_v28 }
 0x93f   : > { %9140 = vmatprep.subr.bf16.mxu1 %v13656_v63  ;;  %v4114_v35 = vpop.permute.xlu0 %4113 }
 0x943   : > { %v4116_v40 = vpop.permute.xlu0 %4115 }
 0x947   : > { %v9478_v41 = vpop.permute.xlu0 %9477 }
 0x948   : > { %v9480_v32 = vunpack.i.h.bf16 %v9478_v41  ;;  %v9479_v21 = vunpack.i.l.bf16 %v9478_v41 }
 0x94a   : > { %v9145_v28 = vpack.c.bf16 %v9480_v32, %v9479_v21 }
 0x953   : > { %v3369_v5 = vpop.xlane.xlu1 %3368 }
 0x954   : > { %9652 = vrcp.f32 %v3369_v5 }
 0x957   : > { %v3372_v49 = vpop.xlane.xlu1 %3371 }
 0x958   : > { %9654 = vrcp.f32 %v3372_v49 }
 0x95b   : > { %v4020_v22 = vpop.permute.xlu1 %4019 }
 0x95c   : > { %8734 = vmatpush3.xpose.msk.msra.mxu0 %vm1967_vm5, %v4020_v22 }
 0x95d   : > { %9144 = vmatprep.subr.bf16.mxu0 %v13656_v63 }
 0x95e   : > { %v9653_v52 = vpop.eup %9652 }
 0x95f   : > { %v3910_v30 = vpop.permute.xlu1 %3909  ;;  %8736 = vmatmul.mubr.msk.f32.vlgmr.msra.gmra.mrb[66].mxu0 %vm1967_vm5, %v4010_v38  ;;  %v3395_v58 = vmul.f32 %v9653_v52, %v11967_v24  ;;  %v4354_v24 = vpop.permute.xlu0 %4353 }
 0x960   : > { %9146 = vmatpush3.bf16.msra.mxu0 %v9145_v28  ;;  %8738 = vmatprep.mubr.msk.f32.mxu0 %vm10360_vm4, %v13655_v37 }
 0x961   : > { %8694 = vmatmul.mubr.msk.f32.gmra.mrb[68].mxu1 %vm2360_vm8, %v3395_v58  ;;  %8763 = vmatprep.subr.mxu0 %v13655_v37 }
 0x962   : > { %v9655_v27 = vpop.eup %9654  ;;  %8696 = vmatprep.mubr.msk.f32.mxu1 %vm10360_vm4, %v13655_v37 }
 0x963   : > { %v4012_v15 = vpop.permute.xlu1 %4011  ;;  %v3396_v13 = vmul.f32 %v9655_v27, %v11973_v8  ;;  %v9141_v8 = vpack.c.bf16 %v9475_v45, %v9474_v39  ;;  %v4452_v17 = vpop.permute.xlu0 %4451 }
 0x964   : > { %8739 = vmatmul.mubr.msk.f32.gmra.mrb[68].mxu0 %vm1967_vm5, %v4012_v15 }
 0x965   : > { %8764 = vmatpush3.msra.mxu0 %v4354_v24  ;;  %8697 = vmatmul.mubr.msk.f32.gmra.mrb[70].mxu1 %vm2360_vm8, %v3396_v13 }
 0x966   : > { %8741 = vmatprep.mubr.msk.f32.mxu0 %vm10360_vm4, %v13655_v37  ;;  %8720 = vmatprep.mubr.msk.f32.mxu1 %vm10360_vm4, %v13655_v37 }
 0x967   : > { %v4014_v57 = vpop.permute.xlu1 %4013  ;;  %9150 = vmatprep.subr.bf16.mxu0 %v13656_v63 }
 0x968   : > { %8742 = vmatmul.mubr.msk.f32.gmra.mrb[70].mxu0 %vm1967_vm5, %v4014_v57 }
 0x969   : > { %8721 = vmatmul.mubr.msk.f32.vlgmr.msra.gmra.mrb[72].mxu1 %vm1967_vm5, %v3906_v19  ;;  %8765 = vmatprep.mubr.msk.f32.mxu0 %vm10360_vm4, %v13655_v37 }
 0x96a   : > { %9143 = vmatpush3.bf16.xpose.msk.msra.mxu1 %vm11312_vm6, %v9141_v8  ;;  %8723 = vmatprep.mubr.msk.f32.mxu1 %vm10360_vm4, %v13655_v37 }
 0x96b   : > { %v4118_v59 = vpop.permute.xlu1 %4117  ;;  %8748 = vmatprep.subr.mxu1 %v13655_v37 }
 0x96d   : > { %8724 = vmatmul.mubr.msk.f32.gmra.mrb[74].mxu1 %vm1967_vm5, %v3908_v20 }
 0x96e   : > { %8726 = vmatprep.mubr.msk.f32.mxu1 %vm10360_vm4, %v13655_v37 }
 0x96f   : > { %v9483_v43 = vpop.permute.xlu1 %9482 }
 0x970   : > { %v9485_v46 = vunpack.i.h.bf16 %v9483_v43  ;;  %v9484_v50 = vunpack.i.l.bf16 %v9483_v43 }
 0x971   : > { %8727 = vmatmul.mubr.msk.f32.gmra.mrb[76].mxu1 %vm1967_vm5, %v3910_v30 }
 0x972   : > { %v9148_v26 = vpack.c.bf16 %v9485_v46, %v9484_v50  ;;  %8749 = vmatpush3.xpose.msk.msra.mxu1 %vm1967_vm5, %v4124_v0  ;;  %8750 = vmatprep.mubr.msk.f32.mxu1 %vm10360_vm4, %v13655_v37 }
 0x973   : > { %9147 = vmatprep.subr.bf16.mxu1 %v13656_v63 }
 0x975   : > { %8751 = vmatmul.mubr.msk.f32.vlgmr.msra.gmra.mrb[78].mxu1 %vm1967_vm5, %v4114_v35 }
 0x976   : > { %9149 = vmatpush3.bf16.msra.mxu1 %v9148_v26  ;;  %8753 = vmatprep.mubr.msk.f32.mxu1 %vm10360_vm4, %v13655_v37 }
 0x977   : > { %8778 = vmatprep.subr.mxu1 %v13655_v37 }
 0x979   : > { %8754 = vmatmul.mubr.msk.f32.gmra.mrb[80].mxu1 %vm1967_vm5, %v4116_v40 }
 0x97a   : > { %8779 = vmatpush3.msra.mxu1 %v4452_v17  ;;  %8756 = vmatprep.mubr.msk.f32.mxu1 %vm10360_vm4, %v13655_v37 }
 0x97b   : > { %9153 = vmatprep.subr.bf16.mxu1 %v13656_v63 }
 0x97d   : > { %8757 = vmatmul.mubr.msk.f32.gmra.mrb[82].mxu1 %vm1967_vm5, %v4118_v59 }
 0x97e   : > { %8780 = vmatprep.mubr.msk.f32.mxu1 %vm10360_vm4, %v13655_v37 }
 0x9c7   : > { %v12143_v61 = vpop.f32.mrb[48].mxu0 }
 0x9c8   : > { %v8647_v42 = vpop.f32.mrb[49].mxu0 }
 0x9cb   : > { %v12145_v19 = vpop.f32.mrb[50].mxu0 }
 0x9cc   : > { %v8650_v29 = vpop.f32.mrb[51].mxu0 }
 0x9cf   : > { %v12147_v20 = vpop.f32.mrb[52].mxu0 }
 0x9d0   : > { %v8653_v38 = vpop.f32.mrb[53].mxu0 }
 0x9f3   : > { %v12149_v0 = vpop.f32.mrb[54].mxu0 }
 0x9f4   : > { %v8677_v35 = vpop.f32.mrb[55].mxu0 }
 0x9f7   : > { %v12151_v40 = vpop.f32.mrb[56].mxu0 }
 0x9f8   : > { %13670 = vst [vmem:[#allocation53_spill] sm:$0xff] %v12151_v40  ;;  %v8680_v5 = vpop.f32.mrb[57].mxu0 }
 0x9fb   : > { %v12153_v41 = vpop.f32.mrb[58].mxu0 }
 0x9fc   : > { %v12155_v49 = vpop.f32.mrb[60].mxu1  ;;  %v8683_v32 = vpop.f32.mrb[59].mxu0 }
 0x9fd   : > { %13671 = vst [vmem:[#allocation54_spill] sm:$0xff] %v12155_v49  ;;  %v8662_v21 = vpop.f32.mrb[61].mxu1 }
 0x9ff   : > { %v3891_v22 = vpop.f32.mrb[60].mxu0 }
 0xa00   : > { %v12158_v52 = vadd.f32 %v3891_v22, %v11487_v34  ;;  %v12160_v28 = vpop.f32.mrb[62].mxu1  ;;  %v8707_v30 = vpop.f32.mrb[61].mxu0 }
 0xa01   : > { %v8665_v58 = vpop.f32.mrb[63].mxu1 }
 0xa02   : > { %v4217_v27 = vsel %vm2360_vm8, %v12158_v52, -inf }
 0xa03   : > { %4218 = vmax.xlane.f32.xlu0 %v4217_v27  ;;  %v3896_v15 = vpop.f32.mrb[62].mxu0 }
 0xa04   : > { %v12165_v13 = vadd.f32 %v3896_v15, %v11487_v34  ;;  %v12167_v45 = vpop.f32.mrb[64].mxu1  ;;  %v8710_v39 = vpop.f32.mrb[63].mxu0 }
 0xa05   : > { %13672 = vst [vmem:[#allocation55_spill] sm:$0xff] %v12167_v45  ;;  %v8668_v24 = vpop.f32.mrb[65].mxu1 }
 0xa06   : > { %v4220_v57 = vsel %vm2360_vm8, %v12165_v13, -inf }
 0xa07   : > { %4221 = vmax.xlane.f32.xlu1 %v4220_v57  ;;  %v3901_v8 = vpop.f32.mrb[64].mxu0 }
 0xa08   : > { %v12172_v59 = vadd.f32 %v3901_v8, %v11487_v34  ;;  %v12174_v43 = vpop.f32.mrb[66].mxu1  ;;  %v8713_v46 = vpop.f32.mrb[65].mxu0 }
 0xa09   : > { %13673 = vst [vmem:[#allocation56_spill] sm:$0xff] %v12174_v43  ;;  %v8692_v50 = vpop.f32.mrb[67].mxu1 }
 0xa0a   : > { %v4223_v26 = vsel %vm2360_vm8, %v12172_v59, -inf }
 0xa0b   : > { %4224 = vmax.xlane.f32.xlu0 %v4223_v26 }
 0xa32   : > { %v4099_v17 = vpop.f32.mrb[66].mxu0 }
 0xa33   : > { %v12179_v42 = vadd.f32 %v4099_v17, %v11487_v34  ;;  %v8737_v29 = vpop.f32.mrb[67].mxu0 }
 0xa34   : > { %v12181_v38 = vpop.f32.mrb[68].mxu1 }
 0xa35   : > { %13674 = vst [vmem:[#allocation57_spill] sm:$0xff] %v12181_v38  ;;  %v8695_v35 = vpop.f32.mrb[69].mxu1  ;;  %v4235_v5 = vsel %vm2360_vm8, %v12179_v42, -inf }
 0xa36   : > { %4236 = vmax.xlane.f32.xlu1 %v4235_v5 }
 0xa37   : > { %v4104_v32 = vpop.f32.mrb[68].mxu0 }
 0xa38   : > { %v12186_v21 = vadd.f32 %v4104_v32, %v11487_v34  ;;  %v12188_v22 = vpop.f32.mrb[70].mxu1  ;;  %v8740_v30 = vpop.f32.mrb[69].mxu0 }
 0xa39   : > { %13675 = vst [vmem:[#allocation58_spill] sm:$0xff] %v12188_v22  ;;  %v8698_v58 = vpop.f32.mrb[71].mxu1 }
 0xa3a   : > { %v4238_v27 = vsel %vm2360_vm8, %v12186_v21, -inf }
 0xa3b   : > { %4239 = vmax.xlane.f32.xlu1 %v4238_v27  ;;  %v4109_v15 = vpop.f32.mrb[70].mxu0 }
 0xa3c   : > { %v12193_v39 = vadd.f32 %v4109_v15, %v11487_v34  ;;  %v3995_v24 = vpop.f32.mrb[72].mxu1  ;;  %v8743_v57 = vpop.f32.mrb[71].mxu0 }
 0xa3d   : > { %v12196_v8 = vadd.f32 %v3995_v24, %v11487_v34  ;;  %v8722_v46 = vpop.f32.mrb[73].mxu1 }
 0xa3e   : > { %v4241_v50 = vsel %vm2360_vm8, %v12193_v39, -inf }
 0xa3f   : > { %4242 = vmax.xlane.f32.xlu1 %v4241_v50  ;;  %v4226_v26 = vsel %vm2360_vm8, %v12196_v8, -inf }
 0xa40   : > { %v4000_v17 = vpop.f32.mrb[74].mxu1  ;;  %4227 = vmax.xlane.f32.xlu0 %v4226_v26 }
 0xa41   : > { %v12203_v29 = vadd.f32 %v4000_v17, %v11487_v34  ;;  %v8725_v35 = vpop.f32.mrb[75].mxu1 }
 0xa43   : > { %v4229_v5 = vsel %vm2360_vm8, %v12203_v29, -inf }
 0xa44   : > { %v4005_v32 = vpop.f32.mrb[76].mxu1  ;;  %4230 = vmax.xlane.f32.xlu0 %v4229_v5 }
 0xa45   : > { %v12208_v30 = vadd.f32 %v4005_v32, %v11487_v34  ;;  %v8728_v58 = vpop.f32.mrb[77].mxu1 }
 0xa47   : > { %v4232_v27 = vsel %vm2360_vm8, %v12208_v30, -inf }
 0xa48   : > { %v4203_v15 = vpop.f32.mrb[78].mxu1  ;;  %4233 = vmax.xlane.f32.xlu0 %v4232_v27 }
 0xa49   : > { %v12213_v24 = vadd.f32 %v4203_v15, %v11487_v34  ;;  %v8752_v57 = vpop.f32.mrb[79].mxu1  ;;  %v12231_v15 = vpop.permute.xlu1 %9487 }
 0xa4b   : > { %v4244_v46 = vsel %vm2360_vm8, %v12213_v24, -inf }
 0xa4c   : > { %v4208_v50 = vpop.f32.mrb[80].mxu1  ;;  %4245 = vmax.xlane.f32.xlu0 %v4244_v46  ;;  %v12237_v46 = vpop.permute.xlu0 %4549 }
 0xa4d   : > { %v12218_v26 = vadd.f32 %v4208_v50, %v11487_v34  ;;  %v8755_v17 = vpop.f32.mrb[81].mxu1  ;;  %v12233_v57 = vpop.permute.xlu1 %9492 }
 0xa4f   : > { %v4247_v35 = vsel %vm2360_vm8, %v12218_v26, -inf }
 0xa50   : > { %v4213_v5 = vpop.f32.mrb[82].mxu1  ;;  %4248 = vmax.xlane.f32.xlu0 %v4247_v35  ;;  %9507 = vrot.lane.b32.xlu1 %v11340_v47, %s10365_s23  ;;  %v12241_v50 = vpop.permute.xlu0 %9497 }
 0xa51   : > { %v8758_v32 = vpop.f32.mrb[83].mxu1  ;;  %v12227_v58 = vadd.f32 %v4213_v5, %v11487_v34  ;;  %v12239_v47 = vpop.permute.xlu1 %4647 }
 0xa53   : > { %v4250_v27 = vsel %vm2360_vm8, %v12227_v58, -inf }
 0xa66   : > { %4751 = vrot.lane.b32.xlu0 %v11322_v31, %s10365_s23  ;;  %v12243_v31 = vpop.permute.xlu1 %9502 }
 0xa74   : > { %4251 = vmax.xlane.f32.xlu1 %v4250_v27 }
 0xa85   : > { %4855 = vrot.lane.b32.xlu1 %v11329_v33, %s10365_s23 }
 0xa90   : > { %v4219_v17 = vpop.xlane.xlu0 %4218 }
 0xa91   : > { %v4253_v35 = vsub.f32 %v12158_v52, %v4219_v17 }
 0xa93   : > { %v4265_v5 = vmul.f32 1.442695, %v4253_v35 }
 0xa94   : > { %v4222_v32 = vpop.xlane.xlu1 %4221 }
 0xa95   : > { %9656 = vpow2.f32 %v4265_v5  ;;  %v4254_v27 = vsub.f32 %v12165_v13, %v4222_v32 }
 0xa97   : > { %v4267_v23 = vmul.f32 1.442695, %v4254_v27 }
 0xa98   : > { %v4225_v22 = vpop.xlane.xlu0 %4224 }
 0xa99   : > { %v4255_v33 = vsub.f32 %v12172_v59, %v4225_v22  ;;  %9658 = vpow2.f32 %v4267_v23 }
 0xa9b   : > { %v4269_v43 = vmul.f32 1.442695, %v4255_v33 }
 0xa9d   : > { %9660 = vpow2.f32 %v4269_v43 }
 0xa9f   : > { %v12248_v40 = vpop.eup %9656 }
 0xaa0   : > { %v4289_v45 = vsel %vm2360_vm8, %v12248_v40, 0.0 }
 0xaa1   : > { %4290 = vadd.xlane.f32.xlu0 %v4289_v45 }
 0xaa3   : > { %v12252_v49 = vpop.eup %9658 }
 0xaa4   : > { %v4292_v52 = vsel %vm2360_vm8, %v12252_v49, 0.0 }
 0xaa7   : > { %v12256_v17 = vpop.eup %9660 }
 0xaa8   : > { %v4295_v13 = vsel %vm2360_vm8, %v12256_v17, 0.0 }
 0xaa9   : > { %4293 = vadd.xlane.f32.xlu1 %v4292_v52 }
 0xaad   : > { %4296 = vadd.xlane.f32.xlu1 %v4295_v13 }
 0xab7   : > { %4741 = vrot.lane.b32.xlu0 %v11337_v44, %s10365_s23 }
 0xac3   : > { %v4237_v23 = vpop.xlane.xlu1 %4236 }
 0xac4   : > { %v4259_v59 = vsub.f32 %v12179_v42, %v4237_v23 }
 0xac6   : > { %v4277_v43 = vmul.f32 1.442695, %v4259_v59 }
 0xac8   : > { %9662 = vpow2.f32 %v4277_v43  ;;  %v4240_v45 = vpop.xlane.xlu1 %4239 }
 0xac9   : > { %v4260_v22 = vsub.f32 %v12186_v21, %v4240_v45 }
 0xacb   : > { %v4279_v35 = vmul.f32 1.442695, %v4260_v22 }
 0xacc   : > { %v4243_v5 = vpop.xlane.xlu1 %4242 }
 0xacd   : > { %9664 = vpow2.f32 %v4279_v35  ;;  %v4261_v32 = vsub.f32 %v12193_v39, %v4243_v5  ;;  %v4228_v27 = vpop.xlane.xlu0 %4227 }
 0xace   : > { %v4256_v33 = vsub.f32 %v12196_v8, %v4228_v27 }
 0xacf   : > { %v4281_v52 = vmul.f32 1.442695, %v4261_v32 }
 0xad0   : > { %v4271_v13 = vmul.f32 1.442695, %v4256_v33 }
 0xad1   : > { %9666 = vpow2.f32 %v4281_v52  ;;  %v4231_v44 = vpop.xlane.xlu0 %4230 }
 0xad2   : > { %v12266_v38 = vpop.eup %9662  ;;  %9668 = vpow2.f32 %v4271_v13  ;;  %v4257_v42 = vsub.f32 %v12203_v29, %v4231_v44 }
 0xad3   : > { %v4307_v21 = vsel %vm2360_vm8, %v12266_v38, 0.0 }
 0xad4   : > { %v4273_v23 = vmul.f32 1.442695, %v4257_v42  ;;  %4308 = vadd.xlane.f32.xlu1 %v4307_v21  ;;  %v12301_v21 = vpop.permute.xlu1 %9507 }
 0xad5   : > { %v4234_v59 = vpop.xlane.xlu0 %4233 }
 0xad6   : > { %9670 = vpow2.f32 %v4273_v23  ;;  %v4258_v39 = vsub.f32 %v12208_v30, %v4234_v59 }
 0xad7   : > { %v12272_v43 = vpop.eup %9664 }
 0xad8   : > { %v4275_v8 = vmul.f32 1.442695, %v4258_v39  ;;  %v4310_v45 = vsel %vm2360_vm8, %v12272_v43, 0.0 }
 0xad9   : > { %v4246_v22 = vpop.xlane.xlu0 %4245  ;;  %4311 = vadd.xlane.f32.xlu1 %v4310_v45 }
 0xada   : > { %9672 = vpow2.f32 %v4275_v8  ;;  %v4262_v29 = vsub.f32 %v12213_v24, %v4246_v22 }
 0xadb   : > { %v12277_v35 = vpop.eup %9666 }
 0xadc   : > { %v12279_v5 = vpop.eup %9668  ;;  %v4283_v32 = vmul.f32 1.442695, %v4262_v29  ;;  %v4313_v27 = vsel %vm2360_vm8, %v12277_v35, 0.0 }
 0xadd   : > { %4314 = vadd.xlane.f32.xlu1 %v4313_v27  ;;  %v4298_v30 = vsel %vm2360_vm8, %v12279_v5, 0.0  ;;  %v4249_v23 = vpop.xlane.xlu0 %4248  ;;  %v9499_v27 = vunpack.i.l.bf16 %v12241_v50 }
 0xade   : > { %9674 = vpow2.f32 %v4283_v32  ;;  %4299 = vadd.xlane.f32.xlu0 %v4298_v30  ;;  %v4263_v59 = vsub.f32 %v12218_v26, %v4249_v23  ;;  %v9490_v26 = vunpack.i.h.bf16 %v12231_v15 }
 0xae0   : > { %v12285_v33 = vpop.eup %9670  ;;  %v4285_v8 = vmul.f32 1.442695, %v4263_v59 }
 0xae1   : > { %v4301_v52 = vsel %vm2360_vm8, %v12285_v33, 0.0 }
 0xae2   : > { %4302 = vadd.xlane.f32.xlu0 %v4301_v52  ;;  %9676 = vpow2.f32 %v4285_v8  ;;  %v9495_v8 = vunpack.i.h.bf16 %v12233_v57 }
 0xae4   : > { %v12289_v24 = vpop.eup %9672 }
 0xae5   : > { %v4304_v13 = vsel %vm2360_vm8, %v12289_v24, 0.0 }
 0xae6   : > { %4305 = vadd.xlane.f32.xlu0 %v4304_v13 }
 0xae8   : > { %v12293_v44 = vpop.eup %9674 }
 0xae9   : > { %v4316_v42 = vsel %vm2360_vm8, %v12293_v44, 0.0 }
 0xaea   : > { %4317 = vadd.xlane.f32.xlu0 %v4316_v42 }
 0xaee   : > { %9512 = vrot.lane.b32.xlu1 %v11374_v62, %s10365_s23 }
 0xaf2   : > { %4745 = vrot.lane.b32.xlu1 %v11372_v56, %s10365_s23 }
 0xb00   : > { %4743 = vrot.lane.b32.xlu0 %v11352_v51, %s10365_s23  ;;  %v12315_v51 = vpop.eup %9676 }
 0xb01   : > { %v4252_v39 = vpop.xlane.xlu1 %4251  ;;  %v4319_v56 = vsel %vm2360_vm8, %v12315_v51, 0.0 }
 0xb02   : > { %v4264_v45 = vsub.f32 %v12227_v58, %v4252_v39  ;;  %v9489_v58 = vunpack.i.l.bf16 %v12231_v15 }
 0xb04   : > { %4845 = vrot.lane.b32.xlu0 %v11391_v2, %s10365_s23  ;;  %v4287_v62 = vmul.f32 1.442695, %v4264_v45  ;;  %v9151_v32 = vpack.c.bf16 %v9490_v26, %v9489_v58  ;;  %v9509_v26 = vunpack.i.l.bf16 %v12301_v21  ;;  %v9505_v58 = vunpack.i.h.bf16 %v12243_v31 }
 0xb06   : > { %9678 = vpow2.f32 %v4287_v62 }
 0xb08   : > { %4847 = vrot.lane.b32.xlu0 %v11416_v7, %s10365_s23  ;;  %v12327_v7 = vpop.permute.xlu0 %4751 }
 0xb0c   : > { %4949 = vrot.lane.b32.xlu0 %v11389_v1, %s10365_s23 }
 0xb10   : > { %5063 = vrot.lane.b32.xlu0 %v11366_v53, %s10365_s23  ;;  %v12321_v2 = vpop.eup %9678 }
 0xb11   : > { %v4322_v1 = vsel %vm2360_vm8, %v12321_v2, 0.0 }
 0xb14   : > { %5053 = vrot.lane.b32.xlu0 %v11461_v4, %s10365_s23  ;;  %v12333_v4 = vpop.permute.xlu1 %4855 }
 0xb16   : > { %4320 = vadd.xlane.f32.xlu1 %v4319_v56 }
 0xb18   : > { %5055 = vrot.lane.b32.xlu0 %v11471_v12, %s10365_s23 }
 0xb1a   : > { %4323 = vadd.xlane.f32.xlu1 %v4322_v1 }
 0xb2b   : > { %4959 = vrot.lane.b32.xlu1 %v11356_v36, %s10365_s23 }
 0xb2e   : > { %v4291_v53 = vpop.xlane.xlu0 %4290 }
 0xb2f   : > { %9680 = vrcp.f32 %v4291_v53  ;;  %4849 = vrot.lane.b32.xlu1 %v11439_v18, %s10365_s23 }
 0xb33   : > { %4951 = vrot.lane.b32.xlu1 %v11414_v6, %s10365_s23 }
 0xb36   : > { %v4294_v12 = vpop.xlane.xlu1 %4293 }
 0xb37   : > { %9682 = vrcp.f32 %v4294_v12  ;;  %4953 = vrot.lane.b32.xlu1 %v11436_v9, %s10365_s23 }
 0xb39   : > { %v9681_v36 = vpop.eup %9680 }
 0xb3a   : > { %v4337_v22 = vmul.f32 %v9681_v36, %v12248_v40  ;;  %v4297_v29 = vpop.xlane.xlu1 %4296  ;;  %v9504_v36 = vunpack.i.l.bf16 %v12243_v31 }
 0xb3b   : > { %9684 = vrcp.f32 %v4297_v29  ;;  %5057 = vrot.lane.b32.xlu1 %v11480_v16, %s10365_s23 }
 0xb3c   : > { %8766 = vmatmul.mubr.msk.f32.vlgmr.msra.gmra.mrb[72].mxu0 %vm2360_vm8, %v4337_v22  ;;  %v9161_v29 = vpack.c.bf16 %v9505_v58, %v9504_v36 }
 0xb3d   : > { %9152 = vmatpush3.bf16.msra.mxu0 %v9151_v32  ;;  %8768 = vmatprep.mubr.msk.f32.mxu0 %vm10360_vm4, %v13655_v37 }
 0xb3e   : > { %8793 = vmatprep.subr.mxu0 %v13655_v37 }
 0xb41   : > { %v9683_v6 = vpop.eup %9682  ;;  %8794 = vmatpush3.msra.mxu0 %v12237_v46  ;;  %v4742_v46 = vpop.permute.xlu0 %4741 }
 0xb42   : > { %v4338_v9 = vmul.f32 %v9683_v6, %v12252_v49  ;;  %9156 = vmatprep.subr.bf16.mxu0 %v13656_v63  ;;  %v9500_v49 = vunpack.i.h.bf16 %v12241_v50 }
 0xb44   : > { %8769 = vmatmul.mubr.msk.f32.gmra.mrb[74].mxu0 %vm2360_vm8, %v4338_v9  ;;  %v9157_v42 = vpack.c.bf16 %v9500_v49, %v9499_v27 }
 0xb45   : > { %v9685_v18 = vpop.eup %9684  ;;  %8771 = vmatprep.mubr.msk.f32.mxu0 %vm10360_vm4, %v13655_v37 }
 0xb46   : > { %v4339_v16 = vmul.f32 %v9685_v18, %v12256_v17 }
 0xb48   : > { %8772 = vmatmul.mubr.msk.f32.gmra.mrb[76].mxu0 %vm2360_vm8, %v4339_v16 }
 0xb49   : > { %8795 = vmatprep.mubr.msk.f32.mxu0 %vm10360_vm4, %v13655_v37 }
 0xb61   : > { %v4309_v40 = vpop.xlane.xlu1 %4308 }
 0xb62   : > { %9686 = vrcp.f32 %v4309_v40 }
 0xb66   : > { %v4312_v15 = vpop.xlane.xlu1 %4311 }
 0xb67   : > { %9688 = vrcp.f32 %v4312_v15 }
 0xb6a   : > { %v4315_v30 = vpop.xlane.xlu1 %4314 }
 0xb6b   : > { %9690 = vrcp.f32 %v4315_v30  ;;  %v4300_v52 = vpop.xlane.xlu0 %4299 }
 0xb6c   : > { %v9687_v13 = vpop.eup %9686  ;;  %9692 = vrcp.f32 %v4300_v52 }
 0xb6d   : > { %v4343_v17 = vmul.f32 %v9687_v13, %v12266_v38  ;;  %v9494_v38 = vunpack.i.l.bf16 %v12233_v57 }
 0xb6f   : > { %v4303_v23 = vpop.xlane.xlu0 %4302  ;;  %8796 = vmatmul.mubr.msk.f32.vlgmr.msra.gmra.mrb[78].mxu0 %vm2360_vm8, %v4343_v17  ;;  %v9154_v12 = vpack.c.bf16 %v9495_v8, %v9494_v38 }
 0xb70   : > { %9694 = vrcp.f32 %v4303_v23  ;;  %9159 = vmatpush3.bf16.xpose.msk.msra.mxu0 %vm11312_vm6, %v9157_v42  ;;  %8798 = vmatprep.mubr.msk.f32.mxu0 %vm10360_vm4, %v13655_v37 }
 0xb71   : > { %v9689_v59 = vpop.eup %9688  ;;  %8823 = vmatprep.subr.mxu0 %v13655_v37 }
 0xb72   : > { %v4344_v50 = vmul.f32 %v9689_v59, %v12272_v43  ;;  %v9510_v43 = vunpack.i.h.bf16 %v12301_v21 }
 0xb73   : > { %v4306_v39 = vpop.xlane.xlu0 %4305 }
 0xb74   : > { %9696 = vrcp.f32 %v4306_v39  ;;  %8799 = vmatmul.mubr.msk.f32.gmra.mrb[80].mxu0 %vm2360_vm8, %v4344_v50 }
 0xb75   : > { %v9691_v45 = vpop.eup %9690  ;;  %8801 = vmatprep.mubr.msk.f32.mxu0 %vm10360_vm4, %v13655_v37 }
 0xb76   : > { %v9693_v62 = vpop.eup %9692  ;;  %v4345_v56 = vmul.f32 %v9691_v45, %v12277_v35 }
 0xb77   : > { %v4340_v1 = vmul.f32 %v9693_v62, %v12279_v5  ;;  %v4318_v53 = vpop.xlane.xlu0 %4317  ;;  %v9165_v5 = vpack.c.bf16 %v9510_v43, %v9509_v26 }
 0xb78   : > { %9698 = vrcp.f32 %v4318_v53  ;;  %8824 = vmatpush3.xpose.msk.msra.mxu0 %vm1967_vm5, %v12327_v7  ;;  %v9513_v7 = vpop.permute.xlu1 %9512 }
 0xb79   : > { %8802 = vmatmul.mubr.msk.f32.gmra.mrb[82].mxu0 %vm2360_vm8, %v4345_v56  ;;  %8781 = vmatmul.mubr.msk.f32.vlgmr.msra.gmra.mrb[84].mxu1 %vm2360_vm8, %v4340_v1  ;;  %v9515_v30 = vunpack.i.h.bf16 %v9513_v7  ;;  %v9514_v52 = vunpack.i.l.bf16 %v9513_v7 }
 0xb7a   : > { %v9695_v57 = vpop.eup %9694  ;;  %9155 = vmatpush3.bf16.msra.mxu1 %v9154_v12  ;;  %8825 = vmatprep.mubr.msk.f32.mxu0 %vm10360_vm4, %v13655_v37 }
 0xb7b   : > { %9164 = vmatprep.subr.bf16.mxu0 %v13656_v63  ;;  %8783 = vmatprep.mubr.msk.f32.mxu1 %vm10360_vm4, %v13655_v37  ;;  %v4341_v35 = vmul.f32 %v9695_v57, %v12285_v33  ;;  %v4744_v22 = vpop.permute.xlu0 %4743  ;;  %v9169_v13 = vpack.c.bf16 %v9515_v30, %v9514_v52 }
 0xb7c   : > { %8808 = vmatprep.subr.mxu1 %v13655_v37  ;;  %v4746_v31 = vpop.permute.xlu1 %4745 }
 0xb7d   : > { %8826 = vmatmul.mubr.msk.f32.vlgmr.msra.gmra.mrb[84].mxu0 %vm1967_vm5, %v4742_v46  ;;  %8784 = vmatmul.mubr.msk.f32.gmra.mrb[86].mxu1 %vm2360_vm8, %v4341_v35 }
 0xb7e   : > { %v9697_v21 = vpop.eup %9696  ;;  %9167 = vmatpush3.bf16.xpose.msk.msra.mxu0 %vm11312_vm6, %v9165_v5  ;;  %8809 = vmatpush3.msra.mxu1 %v12239_v47 }
 0xb7f   : > { %8828 = vmatprep.mubr.msk.f32.mxu0 %vm10360_vm4, %v13655_v37  ;;  %8786 = vmatprep.mubr.msk.f32.mxu1 %vm10360_vm4, %v13655_v37  ;;  %v4342_v33 = vmul.f32 %v9697_v21, %v12289_v24 }
 0xb80   : > { %9160 = vmatprep.subr.bf16.mxu1 %v13656_v63  ;;  %8853 = vmatprep.subr.mxu0 %v13655_v37 }
 0xb81   : > { %8829 = vmatmul.mubr.msk.f32.gmra.mrb[86].mxu0 %vm1967_vm5, %v4744_v22  ;;  %8787 = vmatmul.mubr.msk.f32.gmra.mrb[88].mxu1 %vm2360_vm8, %v4342_v33 }
 0xb82   : > { %v9699_v47 = vpop.eup %9698  ;;  %8831 = vmatprep.mubr.msk.f32.mxu0 %vm10360_vm4, %v13655_v37  ;;  %8810 = vmatprep.mubr.msk.f32.mxu1 %vm10360_vm4, %v13655_v37 }
 0xb83   : > { %v4346_v24 = vmul.f32 %v9699_v47, %v12293_v44  ;;  %v4846_v44 = vpop.permute.xlu0 %4845 }
 0xb85   : > { %8832 = vmatmul.mubr.msk.f32.gmra.mrb[88].mxu0 %vm1967_vm5, %v4746_v31  ;;  %8811 = vmatmul.mubr.msk.f32.vlgmr.msra.gmra.mrb[90].mxu1 %vm2360_vm8, %v4346_v24 }
 0xb86   : > { %9163 = vmatpush3.bf16.xpose.msk.msra.mxu1 %vm11312_vm6, %v9161_v29  ;;  %8855 = vmatprep.mubr.msk.f32.mxu0 %vm10360_vm4, %v13655_v37 }
 0xb87   : > { %8838 = vmatprep.subr.mxu1 %v13655_v37  ;;  %8813 = vmatprep.mubr.msk.f32.mxu1 %vm10360_vm4, %v13655_v37  ;;  %v4848_v9 = vpop.permute.xlu0 %4847 }
 0xb8b   : > { %v4950_v40 = vpop.permute.xlu0 %4949 }
 0xb8e   : > { %8839 = vmatpush3.xpose.msk.msra.mxu1 %vm1967_vm5, %v12333_v4 }
 0xb8f   : > { %9168 = vmatprep.subr.bf16.mxu1 %v13656_v63 }
 0xba3   : > { %v4321_v32 = vpop.xlane.xlu1 %4320 }
 0xba4   : > { %9700 = vrcp.f32 %v4321_v32 }
 0xba7   : > { %v4324_v6 = vpop.xlane.xlu1 %4323 }
 0xba8   : > { %9702 = vrcp.f32 %v4324_v6 }
 0xbab   : > { %v4960_v18 = vpop.permute.xlu1 %4959 }
 0xbac   : > { %8854 = vmatpush3.xpose.msk.msra.mxu0 %vm1967_vm5, %v4960_v18 }
 0xbad   : > { %9172 = vmatprep.subr.bf16.mxu0 %v13656_v63 }
 0xbae   : > { %v9701_v16 = vpop.eup %9700 }
 0xbaf   : > { %v4850_v15 = vpop.permute.xlu1 %4849  ;;  %8856 = vmatmul.mubr.msk.f32.vlgmr.msra.gmra.mrb[90].mxu0 %vm1967_vm5, %v4950_v40  ;;  %v4347_v4 = vmul.f32 %v9701_v16, %v12315_v51 }
 0xbb0   : > { %8858 = vmatprep.mubr.msk.f32.mxu0 %vm10360_vm4, %v13655_v37 }
 0xbb1   : > { %8814 = vmatmul.mubr.msk.f32.gmra.mrb[92].mxu1 %vm2360_vm8, %v4347_v4 }
 0xbb2   : > { %v9703_v46 = vpop.eup %9702  ;;  %8816 = vmatprep.mubr.msk.f32.mxu1 %vm10360_vm4, %v13655_v37 }
 0xbb3   : > { %v4952_v49 = vpop.permute.xlu1 %4951  ;;  %v4348_v27 = vmul.f32 %v9703_v46, %v12321_v2  ;;  %v5064_v2 = vpop.permute.xlu0 %5063 }
 0xbb4   : > { %8859 = vmatmul.mubr.msk.f32.gmra.mrb[92].mxu0 %vm1967_vm5, %v4952_v49 }
 0xbb5   : > { %8817 = vmatmul.mubr.msk.f32.gmra.mrb[94].mxu1 %vm2360_vm8, %v4348_v27  ;;  %8861 = vmatprep.mubr.msk.f32.mxu0 %vm10360_vm4, %v13655_v37 }
 0xbb6   : > { %8840 = vmatprep.mubr.msk.f32.mxu1 %vm10360_vm4, %v13655_v37 }
 0xbb7   : > { %v4954_v51 = vpop.permute.xlu1 %4953  ;;  %v5054_v17 = vpop.permute.xlu0 %5053 }
 0xbb8   : > { %8862 = vmatmul.mubr.msk.f32.gmra.mrb[94].mxu0 %vm1967_vm5, %v4954_v51 }
 0xbb9   : > { %8841 = vmatmul.mubr.msk.f32.vlgmr.msra.gmra.mrb[96].mxu1 %vm1967_vm5, %v4846_v44  ;;  %8885 = vmatprep.mubr.msk.f32.mxu0 %vm10360_vm4, %v13655_v37 }
 0xbba   : > { %9171 = vmatpush3.bf16.xpose.msk.msra.mxu1 %vm11312_vm6, %v9169_v13  ;;  %8843 = vmatprep.mubr.msk.f32.mxu1 %vm10360_vm4, %v13655_v37 }
 0xbbb   : > { %8868 = vmatprep.subr.mxu1 %v13655_v37  ;;  %v5056_v25 = vpop.permute.xlu0 %5055  ;;  %v5058_v42 = vpop.permute.xlu1 %5057 }
 0xbbd   : > { %8844 = vmatmul.mubr.msk.f32.gmra.mrb[98].mxu1 %vm1967_vm5, %v4848_v9 }
 0xbbe   : > { %8846 = vmatprep.mubr.msk.f32.mxu1 %vm10360_vm4, %v13655_v37 }
 0xbc1   : > { %8847 = vmatmul.mubr.msk.f32.gmra.mrb[100].mxu1 %vm1967_vm5, %v4850_v15 }
 0xbc2   : > { %8869 = vmatpush3.xpose.msk.msra.mxu1 %vm1967_vm5, %v5064_v2  ;;  %8870 = vmatprep.mubr.msk.f32.mxu1 %vm10360_vm4, %v13655_v37 }
 0xbc3   : > { %9175 = vmatprep.subr.bf16.mxu1 %v13656_v63 }
 0xbc5   : > { %8871 = vmatmul.mubr.msk.f32.vlgmr.msra.gmra.mrb[102].mxu1 %vm1967_vm5, %v5054_v17 }
 0xbc6   : > { %8873 = vmatprep.mubr.msk.f32.mxu1 %vm10360_vm4, %v13655_v37 }
 0xbc9   : > { %8874 = vmatmul.mubr.msk.f32.gmra.mrb[104].mxu1 %vm1967_vm5, %v5056_v25 }
 0xbca   : > { %8876 = vmatprep.mubr.msk.f32.mxu1 %vm10360_vm4, %v13655_v37 }
 0xbcd   : > { %8877 = vmatmul.mubr.msk.f32.gmra.mrb[106].mxu1 %vm1967_vm5, %v5058_v42 }
 0xbce   : > { %8900 = vmatprep.mubr.msk.f32.mxu1 %vm10360_vm4, %v13655_v37 }
 0xc0f   : > { %v12463_v23 = vpop.f32.mrb[72].mxu0 }
 0xc10   : > { %v8767_v59 = vpop.f32.mrb[73].mxu0 }
 0xc17   : > { %v12465_v50 = vpop.f32.mrb[74].mxu0 }
 0xc18   : > { %v8770_v39 = vpop.f32.mrb[75].mxu0 }
 0xc1b   : > { %v12467_v8 = vpop.f32.mrb[76].mxu0 }
 0xc1c   : > { %v8773_v38 = vpop.f32.mrb[77].mxu0 }
 0xc42   : > { %v12469_v45 = vpop.f32.mrb[78].mxu0 }
 0xc43   : > { %v8797_v62 = vpop.f32.mrb[79].mxu0 }
 0xc47   : > { %v12471_v56 = vpop.f32.mrb[80].mxu0 }
 0xc48   : > { %v8800_v1 = vpop.f32.mrb[81].mxu0 }
 0xc4c   : > { %v12473_v53 = vpop.f32.mrb[82].mxu0  ;;  %v12475_v12 = vpop.f32.mrb[84].mxu1 }
 0xc4d   : > { %v8803_v43 = vpop.f32.mrb[83].mxu0  ;;  %v8782_v26 = vpop.f32.mrb[85].mxu1 }
 0xc50   : > { %v4831_v57 = vpop.f32.mrb[84].mxu0  ;;  %v12477_v35 = vpop.f32.mrb[86].mxu1 }
 0xc51   : > { %v12480_v5 = vadd.f32 %v4831_v57, %v11487_v34  ;;  %v8827_v21 = vpop.f32.mrb[85].mxu0  ;;  %v8785_v7 = vpop.f32.mrb[87].mxu1 }
 0xc53   : > { %v5157_v33 = vsel %vm2360_vm8, %v12480_v5, -inf }
 0xc54   : > { %5158 = vmax.xlane.f32.xlu0 %v5157_v33  ;;  %v4836_v58 = vpop.f32.mrb[86].mxu0  ;;  %v12484_v36 = vpop.f32.mrb[88].mxu1 }
 0xc55   : > { %v12487_v22 = vadd.f32 %v4836_v58, %v11487_v34  ;;  %v8830_v47 = vpop.f32.mrb[87].mxu0  ;;  %v8788_v24 = vpop.f32.mrb[89].mxu1 }
 0xc57   : > { %v5160_v29 = vsel %vm2360_vm8, %v12487_v22, -inf }
 0xc58   : > { %5161 = vmax.xlane.f32.xlu1 %v5160_v29  ;;  %v4841_v31 = vpop.f32.mrb[88].mxu0  ;;  %v12491_v44 = vpop.f32.mrb[90].mxu1 }
 0xc59   : > { %v12494_v32 = vadd.f32 %v4841_v31, %v11487_v34  ;;  %v8833_v6 = vpop.f32.mrb[89].mxu0  ;;  %v8812_v9 = vpop.f32.mrb[91].mxu1 }
 0xc5b   : > { %v5163_v18 = vsel %vm2360_vm8, %v12494_v32, -inf }
 0xc5c   : > { %5164 = vmax.xlane.f32.xlu0 %v5163_v18 }
 0xc82   : > { %v5039_v16 = vpop.f32.mrb[90].mxu0 }
 0xc83   : > { %v12499_v40 = vadd.f32 %v5039_v16, %v11487_v34  ;;  %v8857_v15 = vpop.f32.mrb[91].mxu0 }
 0xc84   : > { %v12501_v4 = vpop.f32.mrb[92].mxu1 }
 0xc85   : > { %v8815_v46 = vpop.f32.mrb[93].mxu1  ;;  %v5175_v49 = vsel %vm2360_vm8, %v12499_v40, -inf }
 0xc86   : > { %5176 = vmax.xlane.f32.xlu1 %v5175_v49 }
 0xc87   : > { %v5044_v27 = vpop.f32.mrb[92].mxu0 }
 0xc88   : > { %v12506_v30 = vadd.f32 %v5044_v27, %v11487_v34  ;;  %v12508_v52 = vpop.f32.mrb[94].mxu1  ;;  %v8860_v51 = vpop.f32.mrb[93].mxu0 }
 0xc89   : > { %v8818_v13 = vpop.f32.mrb[95].mxu1 }
 0xc8a   : > { %v5178_v2 = vsel %vm2360_vm8, %v12506_v30, -inf }
 0xc8b   : > { %5179 = vmax.xlane.f32.xlu1 %v5178_v2  ;;  %v5049_v17 = vpop.f32.mrb[94].mxu0 }
 0xc8c   : > { %v12513_v25 = vadd.f32 %v5049_v17, %v11487_v34  ;;  %v4935_v42 = vpop.f32.mrb[96].mxu1  ;;  %v8863_v59 = vpop.f32.mrb[95].mxu0 }
 0xc8d   : > { %v12516_v39 = vadd.f32 %v4935_v42, %v11487_v34  ;;  %v8842_v38 = vpop.f32.mrb[97].mxu1 }
 0xc8e   : > { %v5181_v62 = vsel %vm2360_vm8, %v12513_v25, -inf }
 0xc8f   : > { %5182 = vmax.xlane.f32.xlu1 %v5181_v62  ;;  %v5166_v1 = vsel %vm2360_vm8, %v12516_v39, -inf }
 0xc90   : > { %v4940_v43 = vpop.f32.mrb[98].mxu1  ;;  %5167 = vmax.xlane.f32.xlu0 %v5166_v1 }
 0xc91   : > { %v12523_v26 = vadd.f32 %v4940_v43, %v11487_v34  ;;  %v8845_v57 = vpop.f32.mrb[99].mxu1 }
 0xc93   : > { %v5169_v21 = vsel %vm2360_vm8, %v12523_v26, -inf }
 0xc94   : > { %v4945_v7 = vpop.f32.mrb[100].mxu1  ;;  %5170 = vmax.xlane.f32.xlu0 %v5169_v21 }
 0xc95   : > { %v12528_v33 = vadd.f32 %v4945_v7, %v11487_v34  ;;  %v8848_v58 = vpop.f32.mrb[101].mxu1 }
 0xc97   : > { %v5172_v47 = vsel %vm2360_vm8, %v12528_v33, -inf }
 0xc98   : > { %v5143_v24 = vpop.f32.mrb[102].mxu1  ;;  %5173 = vmax.xlane.f32.xlu0 %v5172_v47 }
 0xc99   : > { %v12533_v29 = vadd.f32 %v5143_v24, %v11487_v34  ;;  %v8872_v31 = vpop.f32.mrb[103].mxu1 }
 0xc9b   : > { %v5184_v6 = vsel %vm2360_vm8, %v12533_v29, -inf }
 0xc9c   : > { %v5148_v9 = vpop.f32.mrb[104].mxu1  ;;  %5185 = vmax.xlane.f32.xlu0 %v5184_v6 }
 0xc9d   : > { %v12538_v18 = vadd.f32 %v5148_v9, %v11487_v34  ;;  %v8875_v16 = vpop.f32.mrb[105].mxu1 }
 0xc9f   : > { %v5187_v15 = vsel %vm2360_vm8, %v12538_v18, -inf }
 0xca0   : > { %v5153_v46 = vpop.f32.mrb[106].mxu1  ;;  %5188 = vmax.xlane.f32.xlu0 %v5187_v15  ;;  %9522 = vrot.lane.b32.xlu1 %v11377_v60, %s10365_s23 }
 0xca1   : > { %v8878_v49 = vpop.f32.mrb[107].mxu1  ;;  %v12553_v27 = vadd.f32 %v5153_v46, %v11487_v34 }
 0xca3   : > { %v5190_v51 = vsel %vm2360_vm8, %v12553_v27, -inf }
 0xca4   : > { %5391 = vrot.lane.b32.xlu1 %v11368_v55, %s10365_s23 }
 0xcb6   : > { %9517 = vrot.lane.b32.xlu0 %v11342_v48, %s10365_s23 }
 0xcba   : > { %5293 = vrot.lane.b32.xlu0 %v11358_v54, %s10365_s23 }
 0xcbe   : > { %9527 = vrot.lane.b32.xlu0 %v11400_v3, %s10365_s23 }
 0xcc8   : > { %5191 = vmax.xlane.f32.xlu1 %v5190_v51 }
 0xcd9   : > { %9532 = vrot.lane.b32.xlu1 %v11448_v14, %s10365_s23 }
 0xce1   : > { %v5159_v55 = vpop.xlane.xlu0 %5158 }
 0xce2   : > { %v5193_v60 = vsub.f32 %v12480_v5, %v5159_v55 }
 0xce4   : > { %v5205_v48 = vmul.f32 1.442695, %v5193_v60 }
 0xce5   : > { %v5162_v13 = vpop.xlane.xlu1 %5161 }
 0xce6   : > { %9704 = vpow2.f32 %v5205_v48  ;;  %v5194_v54 = vsub.f32 %v12487_v22, %v5162_v13 }
 0xce8   : > { %v5207_v3 = vmul.f32 1.442695, %v5194_v54 }
 0xce9   : > { %v5165_v2 = vpop.xlane.xlu0 %5164 }
 0xcea   : > { %v5195_v34 = vsub.f32 %v12494_v32, %v5165_v2  ;;  %9706 = vpow2.f32 %v5207_v3 }
 0xcec   : > { %v5209_v17 = vmul.f32 1.442695, %v5195_v34 }
 0xcee   : > { %9708 = vpow2.f32 %v5209_v17 }
 0xcf0   : > { %v12562_v42 = vpop.eup %9704 }
 0xcf1   : > { %v5229_v59 = vsel %vm2360_vm8, %v12562_v42, 0.0 }
 0xcf2   : > { %5230 = vadd.xlane.f32.xlu0 %v5229_v59 }
 0xcf4   : > { %v12566_v14 = vpop.eup %9706 }
 0xcf5   : > { %v5232_v5 = vsel %vm2360_vm8, %v12566_v14, 0.0 }
 0xcf8   : > { %v12570_v38 = vpop.eup %9708 }
 0xcf9   : > { %v5235_v22 = vsel %vm2360_vm8, %v12570_v38, 0.0 }
 0xcfd   : > { %5233 = vadd.xlane.f32.xlu1 %v5232_v5 }
 0xd01   : > { %5236 = vadd.xlane.f32.xlu1 %v5235_v22 }
 0xd13   : > { %v5177_v32 = vpop.xlane.xlu1 %5176 }
 0xd14   : > { %v5199_v62 = vsub.f32 %v12499_v40, %v5177_v32 }
 0xd16   : > { %v5217_v1 = vmul.f32 1.442695, %v5199_v62 }
 0xd18   : > { %9710 = vpow2.f32 %v5217_v1  ;;  %v5180_v43 = vpop.xlane.xlu1 %5179 }
 0xd19   : > { %v5200_v57 = vsub.f32 %v12506_v30, %v5180_v43 }
 0xd1b   : > { %v5219_v21 = vmul.f32 1.442695, %v5200_v57 }
 0xd1c   : > { %v5183_v7 = vpop.xlane.xlu1 %5182 }
 0xd1d   : > { %9712 = vpow2.f32 %v5219_v21  ;;  %v5201_v58 = vsub.f32 %v12513_v25, %v5183_v7  ;;  %v5168_v47 = vpop.xlane.xlu0 %5167 }
 0xd1e   : > { %v5196_v24 = vsub.f32 %v12516_v39, %v5168_v47 }
 0xd1f   : > { %v5221_v31 = vmul.f32 1.442695, %v5201_v58 }
 0xd20   : > { %v5211_v6 = vmul.f32 1.442695, %v5196_v24  ;;  %v9523_v9 = vpop.permute.xlu1 %9522 }
 0xd21   : > { %9714 = vpow2.f32 %v5221_v31  ;;  %v9525_v16 = vunpack.i.h.bf16 %v9523_v9  ;;  %v9524_v15 = vunpack.i.l.bf16 %v9523_v9  ;;  %v5171_v40 = vpop.xlane.xlu0 %5170 }
 0xd22   : > { %v12578_v46 = vpop.eup %9710  ;;  %9716 = vpow2.f32 %v5211_v6  ;;  %v5197_v30 = vsub.f32 %v12523_v26, %v5171_v40 }
 0xd23   : > { %v9176_v49 = vpack.c.bf16 %v9525_v16, %v9524_v15  ;;  %v5247_v51 = vsel %vm2360_vm8, %v12578_v46, 0.0 }
 0xd24   : > { %v5213_v25 = vmul.f32 1.442695, %v5197_v30  ;;  %5248 = vadd.xlane.f32.xlu1 %v5247_v51  ;;  %v5392_v48 = vpop.permute.xlu1 %5391 }
 0xd25   : > { %v5174_v55 = vpop.xlane.xlu0 %5173  ;;  %9177 = vmatpush3.bf16.msra.mxu1 %v9176_v49 }
 0xd26   : > { %9718 = vpow2.f32 %v5213_v25  ;;  %v5198_v39 = vsub.f32 %v12528_v33, %v5174_v55  ;;  %8898 = vmatprep.subr.mxu1 %v13655_v37 }
 0xd27   : > { %v12585_v60 = vpop.eup %9712 }
 0xd28   : > { %v5215_v13 = vmul.f32 1.442695, %v5198_v39  ;;  %v5250_v26 = vsel %vm2360_vm8, %v12585_v60, 0.0 }
 0xd29   : > { %v5186_v54 = vpop.xlane.xlu0 %5185  ;;  %5251 = vadd.xlane.f32.xlu1 %v5250_v26  ;;  %8899 = vmatpush3.msra.mxu1 %v5392_v48 }
 0xd2a   : > { %9720 = vpow2.f32 %v5215_v13  ;;  %v5202_v2 = vsub.f32 %v12533_v29, %v5186_v54  ;;  %9181 = vmatprep.subr.bf16.mxu1 %v13656_v63 }
 0xd2b   : > { %v12591_v3 = vpop.eup %9714 }
 0xd2c   : > { %v12593_v33 = vpop.eup %9716  ;;  %v5223_v34 = vmul.f32 1.442695, %v5202_v2  ;;  %v5253_v17 = vsel %vm2360_vm8, %v12591_v3, 0.0 }
 0xd2d   : > { %v5189_v59 = vpop.xlane.xlu0 %5188  ;;  %5254 = vadd.xlane.f32.xlu1 %v5253_v17  ;;  %v5238_v5 = vsel %vm2360_vm8, %v12593_v33, 0.0 }
 0xd2e   : > { %9722 = vpow2.f32 %v5223_v34  ;;  %v5203_v22 = vsub.f32 %v12538_v18, %v5189_v59  ;;  %5239 = vadd.xlane.f32.xlu0 %v5238_v5 }
 0xd30   : > { %v12600_v29 = vpop.eup %9718  ;;  %v5225_v32 = vmul.f32 1.442695, %v5203_v22 }
 0xd31   : > { %v9518_v62 = vpop.permute.xlu0 %9517  ;;  %v5241_v1 = vsel %vm2360_vm8, %v12600_v29, 0.0 }
 0xd32   : > { %9724 = vpow2.f32 %v5225_v32  ;;  %v9520_v43 = vunpack.i.h.bf16 %v9518_v62  ;;  %v9519_v57 = vunpack.i.l.bf16 %v9518_v62  ;;  %5242 = vadd.xlane.f32.xlu0 %v5241_v1 }
 0xd34   : > { %v12604_v21 = vpop.eup %9720  ;;  %v9173_v7 = vpack.c.bf16 %v9520_v43, %v9519_v57 }
 0xd35   : > { %v5244_v58 = vsel %vm2360_vm8, %v12604_v21, 0.0  ;;  %v5294_v47 = vpop.permute.xlu0 %5293 }
 0xd36   : > { %5245 = vadd.xlane.f32.xlu0 %v5244_v58  ;;  %9174 = vmatpush3.bf16.msra.mxu0 %v9173_v7  ;;  %v13682_v7 = vld [vmem:[#allocation48_spill] sm:$0xff] }
 0xd37   : > { %8883 = vmatprep.subr.mxu0 %v13655_v37 }
 0xd38   : > { %v12609_v18 = vpop.eup %9722 }
 0xd39   : > { %v5256_v24 = vsel %vm2360_vm8, %v12609_v18, 0.0 }
 0xd3a   : > { %5257 = vadd.xlane.f32.xlu0 %v5256_v24  ;;  %8884 = vmatpush3.msra.mxu0 %v5294_v47 }
 0xd3b   : > { %9178 = vmatprep.subr.bf16.mxu0 %v13656_v63 }
 0xd3c   : > { %v12614_v31 = vpop.eup %9724 }
 0xd3d   : > { %v5259_v6 = vsel %vm2360_vm8, %v12614_v31, 0.0 }
 0xd3e   : > { %5260 = vadd.xlane.f32.xlu1 %v5259_v6 }
 0xd50   : > { %5489 = vrot.lane.b32.xlu0 %v11418_v10, %s10365_s23 }
 0xd54   : > { %5693 = vrot.lane.b32.xlu0 %v12143_v61, %s10366_s3  ;;  %v9528_v61 = vpop.permute.xlu0 %9527 }
 0xd55   : > { %v5192_v9 = vpop.xlane.xlu1 %5191 }
 0xd56   : > { %v5204_v16 = vsub.f32 %v12553_v27, %v5192_v9  ;;  %v13683_v9 = vld [vmem:[#allocation44_spill] sm:$0xff] }
 0xd58   : > { %v5227_v15 = vmul.f32 1.442695, %v5204_v16  ;;  %5741 = vrot.lane.b32.xlu0 %v12463_v23, %s10367_s17  ;;  %v9529_v23 = vunpack.i.l.bf16 %v9528_v61 }
 0xd5a   : > { %9726 = vpow2.f32 %v5227_v15 }
 0xd5c   : > { %5697 = vrot.lane.b32.xlu0 %v12147_v20, %s10366_s3  ;;  %v13676_v20 = vld [vmem:[#allocation57_spill] sm:$0xff] }
 0xd60   : > { %5745 = vrot.lane.b32.xlu0 %v12467_v8, %s10367_s17 }
 0xd64   : > { %v12629_v10 = vpop.eup %9726  ;;  %5701 = vrot.lane.b32.xlu0 %v12160_v28, %s10366_s3  ;;  %v9533_v28 = vpop.permute.xlu1 %9532 }
 0xd65   : > { %v5262_v63 = vsel %vm2360_vm8, %v12629_v10, 0.0  ;;  %v9535_v39 = vunpack.i.h.bf16 %v9533_v28  ;;  %v9534_v48 = vunpack.i.l.bf16 %v9533_v28 }
 0xd66   : > { %5263 = vadd.xlane.f32.xlu1 %v5262_v63 }
 0xd67   : > { %v9182_v2 = vpack.c.bf16 %v9535_v39, %v9534_v48  ;;  %v13688_v48 = vld [vmem:[#allocation50_spill] sm:$0xff] }
 0xd68   : > { %5749 = vrot.lane.b32.xlu0 %v12477_v35, %s10367_s17 }
 0xd6c   : > { %5705 = vrot.lane.b32.xlu0 %v12149_v0, %s10366_s3 }
 0xd70   : > { %5753 = vrot.lane.b32.xlu0 %v12469_v45, %s10367_s17 }
 0xd74   : > { %5709 = vrot.lane.b32.xlu0 %v12153_v41, %s10366_s3  ;;  %v13677_v41 = vld [vmem:[#allocation54_spill] sm:$0xff] }
 0xd77   : > { %5587 = vrot.lane.b32.xlu1 %v11430_v11, %s10365_s23  ;;  %v9530_v11 = vunpack.i.h.bf16 %v9528_v61 }
 0xd78   : > { %5757 = vrot.lane.b32.xlu0 %v12473_v53, %s10367_s17  ;;  %v13678_v53 = vld [vmem:[#allocation55_spill] sm:$0xff] }
 0xd79   : > { %v9179_v35 = vpack.c.bf16 %v9530_v11, %v9529_v23 }
 0xd7b   : > { %5695 = vrot.lane.b32.xlu1 %v12145_v19, %s10366_s3 }
 0xd7c   : > { %5713 = vrot.lane.b32.xlu0 %v13676_v20, %s10366_s3  ;;  %v13684_v20 = vld [vmem:[#allocation46_spill] sm:$0xff] }
 0xd7f   : > { %v5231_v0 = vpop.xlane.xlu0 %5230  ;;  %5743 = vrot.lane.b32.xlu1 %v12465_v50, %s10367_s17 }
 0xd80   : > { %9728 = vrcp.f32 %v5231_v0 }
 0xd83   : > { %5699 = vrot.lane.b32.xlu1 %v13677_v41, %s10366_s3 }
 0xd87   : > { %5747 = vrot.lane.b32.xlu1 %v12475_v12, %s10367_s17  ;;  %v13679_v12 = vld [vmem:[#allocation53_spill] sm:$0xff] }
 0xd8a   : > { %v9729_v8 = vpop.eup %9728  ;;  %v5234_v45 = vpop.xlane.xlu1 %5233 }
 0xd8b   : > { %v5277_v19 = vmul.f32 %v9729_v8, %v12562_v42  ;;  %9730 = vrcp.f32 %v5234_v45  ;;  %5703 = vrot.lane.b32.xlu1 %v13678_v53, %s10366_s3 }
 0xd8d   : > { %8886 = vmatmul.mubr.msk.f32.vlgmr.msra.gmra.mrb[96].mxu0 %vm2360_vm8, %v5277_v19 }
 0xd8e   : > { %9180 = vmatpush3.bf16.msra.mxu0 %v9179_v35  ;;  %v5237_v50 = vpop.xlane.xlu1 %5236  ;;  %8888 = vmatprep.mubr.msk.f32.mxu0 %vm10360_vm4, %v13655_v37 }
 0xd8f   : > { %9732 = vrcp.f32 %v5237_v50  ;;  %5751 = vrot.lane.b32.xlu1 %v12484_v36, %s10367_s17  ;;  %8913 = vmatprep.subr.mxu0 %v13655_v37  ;;  %v13680_v36 = vld [vmem:[#allocation56_spill] sm:$0xff] }
 0xd93   : > { %5707 = vrot.lane.b32.xlu1 %v13679_v12, %s10366_s3 }
 0xd95   : > { %v9731_v27 = vpop.eup %9730 }
 0xd96   : > { %v5278_v42 = vmul.f32 %v9731_v27, %v12566_v14 }
 0xd97   : > { %5755 = vrot.lane.b32.xlu1 %v12471_v56, %s10367_s17  ;;  %v13681_v56 = vld [vmem:[#allocation58_spill] sm:$0xff] }
 0xd98   : > { %8889 = vmatmul.mubr.msk.f32.gmra.mrb[98].mxu0 %vm2360_vm8, %v5278_v42  ;;  %v13685_v42 = vld [vmem:[#allocation47_spill] sm:$0xff] }
 0xd99   : > { %v9733_v40 = vpop.eup %9732  ;;  %8891 = vmatprep.mubr.msk.f32.mxu0 %vm10360_vm4, %v13655_v37 }
 0xd9a   : > { %v5279_v30 = vmul.f32 %v9733_v40, %v12570_v38 }
 0xd9b   : > { %5711 = vrot.lane.b32.xlu1 %v13680_v36, %s10366_s3 }
 0xd9c   : > { %8892 = vmatmul.mubr.msk.f32.gmra.mrb[100].mxu0 %vm2360_vm8, %v5279_v30 }
 0xd9d   : > { %8915 = vmatprep.mubr.msk.f32.mxu0 %vm10360_vm4, %v13655_v37 }
 0xd9f   : > { %5759 = vrot.lane.b32.xlu1 %v12491_v44, %s10367_s17 }
 0xda3   : > { %5715 = vrot.lane.b32.xlu1 %v13681_v56, %s10366_s3  ;;  %v13686_v56 = vld [vmem:[#allocation49_spill] sm:$0xff] }
 0xdb1   : > { %v5249_v14 = vpop.xlane.xlu1 %5248 }
 0xdb6   : > { %v5252_v51 = vpop.xlane.xlu1 %5251 }
 0xdba   : > { %v5255_v25 = vpop.xlane.xlu1 %5254 }
 0xdbb   : > { %v5240_v49 = vpop.xlane.xlu0 %5239 }
 0xdbc   : > { %9734 = vrcp.f32 %v5240_v49 }
 0xdbd   : > { %9736 = vrcp.f32 %v5249_v14 }
 0xdbf   : > { %v5243_v38 = vpop.xlane.xlu0 %5242 }
 0xdc0   : > { %9738 = vrcp.f32 %v5243_v38 }
 0xdc1   : > { %9740 = vrcp.f32 %v5252_v51  ;;  %v13687_v51 = vld [vmem:[#allocation45_spill] sm:$0xff] }
 0xdc3   : > { %v5246_v55 = vpop.xlane.xlu0 %5245 }
 0xdc4   : > { %9742 = vrcp.f32 %v5246_v55 }
 0xdc5   : > { %9744 = vrcp.f32 %v5255_v25 }
 0xdc6   : > { %v9735_v13 = vpop.eup %9734 }
 0xdc7   : > { %v5280_v44 = vmul.f32 %v9735_v13, %v12593_v33  ;;  %v5258_v26 = vpop.xlane.xlu0 %5257  ;;  %v9737_v54 = vpop.eup %9736 }
 0xdc8   : > { %v5283_v17 = vmul.f32 %v9737_v54, %v12578_v46  ;;  %9746 = vrcp.f32 %v5258_v26  ;;  %v5862_v54 = vld [vmem:[%s10973_s16] sm:$0xff] }
 0xdc9   : > { %8901 = vmatmul.mubr.msk.f32.vlgmr.msra.gmra.mrb[108].mxu1 %vm2360_vm8, %v5280_v44 }
 0xdca   : > { %v9739_v34 = vpop.eup %9738  ;;  %9183 = vmatpush3.bf16.msra.mxu1 %v9182_v2  ;;  %8903 = vmatprep.mubr.msk.f32.mxu1 %vm10360_vm4, %v13655_v37  ;;  %v5863_v2 = vld [vmem:[%s10973_s16 + $0x8] sm:$0xff] }
 0xdcb   : > { %v5490_v59 = vpop.permute.xlu0 %5489  ;;  %v5281_v5 = vmul.f32 %v9739_v34, %v12600_v29  ;;  %8928 = vmatprep.subr.mxu1 %v13655_v37  ;;  %v9741_v22 = vpop.eup %9740  ;;  %v5864_v34 = vld [vmem:[%s10973_s16 + $0x10] sm:$0xff] }
 0xdcc   : > { %8914 = vmatpush3.msra.mxu0 %v5490_v59  ;;  %v5284_v29 = vmul.f32 %v9741_v22, %v12585_v60  ;;  %v5865_v59 = vld [vmem:[%s10973_s16 + $0x18] sm:$0xff]  ;;  %s13694_s16 = scalar_lea.vmem [#allocation12], %s10962_s18 }
 0xdcd   : > { %8904 = vmatmul.mubr.msk.f32.gmra.mrb[110].mxu1 %vm2360_vm8, %v5281_v5  ;;  %8916 = vmatmul.mubr.msk.f32.vlgmr.msra.gmra.mrb[102].mxu0 %vm2360_vm8, %v5283_v17  ;;  %v9184_v17 = vpack.c.bf16 %v5863_v2, %v5862_v54  ;;  %v9188_v5 = vpack.c.bf16 %v5865_v59, %v5864_v34  ;;  %v13692_v34 = vld [vmem:[#allocation51_spill] sm:$0xff] }
 0xdce   : > { %v9743_v33 = vpop.eup %9742  ;;  %8906 = vmatprep.mubr.msk.f32.mxu1 %vm10360_vm4, %v13655_v37  ;;  %8918 = vmatprep.mubr.msk.f32.mxu0 %vm10360_vm4, %v13655_v37 }
 0xdcf   : > { %v12697_v32 = vpop.permute.xlu0 %5693  ;;  %v5282_v46 = vmul.f32 %v9743_v33, %v12604_v21  ;;  %v9745_v62 = vpop.eup %9744  ;;  %9185 = vmatprep.subr.bf16.mxu0 %v9184_v17 }
 0xdd0   : > { %v5285_v43 = vmul.f32 %v9745_v62, %v12591_v3  ;;  %v5261_v3 = vpop.xlane.xlu1 %5260  ;;  %9187 = vmatpush3.bf16.msra.mxu0 %v9184_v17 }
 0xdd1   : > { %8907 = vmatmul.mubr.msk.f32.gmra.mrb[112].mxu1 %vm2360_vm8, %v5282_v46  ;;  %8919 = vmatmul.mubr.msk.f32.gmra.mrb[104].mxu0 %vm2360_vm8, %v5284_v29  ;;  %9748 = vrcp.f32 %v5261_v3 }
 0xdd2   : > { %8921 = vmatprep.mubr.msk.f32.mxu0 %vm10360_vm4, %v13655_v37  ;;  %8930 = vmatprep.mubr.msk.f32.mxu1 %vm10360_vm4, %v13655_v37  ;;  %v9747_v11 = vpop.eup %9746 }
 0xdd3   : > { %v12707_v1 = vpop.permute.xlu0 %5741  ;;  %v5286_v8 = vmul.f32 %v9747_v11, %v12609_v18  ;;  %9189 = vmatprep.subr.bf16.mxu0 %v9188_v5 }
 0xdd4   : > { %9191 = vmatpush3.bf16.msra.mxu0 %v9188_v5  ;;  %v13693_v5 = vld [vmem:[#allocation52_spill] sm:$0xff] }
 0xdd5   : > { %8922 = vmatmul.mubr.msk.f32.gmra.mrb[106].mxu0 %vm2360_vm8, %v5285_v43 }
 0xdd7   : > { %v12711_v57 = vpop.permute.xlu0 %5697 }
 0xddb   : > { %v12713_v60 = vpop.permute.xlu0 %5745  ;;  %v9749_v19 = vpop.eup %9748 }
 0xddc   : > { %v5287_v35 = vmul.f32 %v9749_v19, %v12614_v31  ;;  %v13689_v19 = vld [vmem:[#allocation41_spill] sm:$0xff] }
 0xddf   : > { %v5702_v21 = vpop.permute.xlu0 %5701 }
 0xde0   : > { %v5829_v58 = vsel %vm1967_vm5, %v13682_v7, %v5702_v21 }
 0xde3   : > { %v5750_v47 = vpop.permute.xlu0 %5749 }
 0xde4   : > { %v12718_v24 = vsel %vm5837_vm9, %v5829_v58, %v5750_v47 }
 0xde7   : > { %v5706_v6 = vpop.permute.xlu0 %5705 }
 0xde8   : > { %v5831_v16 = vsel %vm1967_vm5, %v13683_v9, %v5706_v6 }
 0xdeb   : > { %v5754_v15 = vpop.permute.xlu0 %5753 }
 0xdec   : > { %v12723_v63 = vsel %vm5837_vm9, %v5831_v16, %v5754_v15 }
 0xdef   : > { %v5710_v61 = vpop.permute.xlu0 %5709 }
 0xdf0   : > { %v5833_v0 = vsel %vm1967_vm5, %v13684_v20, %v5710_v61 }
 0xdf3   : > { %v5758_v41 = vpop.permute.xlu0 %5757  ;;  %v5264_v28 = vpop.xlane.xlu1 %5263 }
 0xdf4   : > { %v12728_v23 = vsel %vm5837_vm9, %v5833_v0, %v5758_v41  ;;  %9750 = vrcp.f32 %v5264_v28 }
 0xdf7   : > { %v5588_v45 = vpop.permute.xlu1 %5587  ;;  %v5714_v11 = vpop.permute.xlu0 %5713 }
 0xdf8   : > { %8929 = vmatpush3.msra.mxu1 %v5588_v45  ;;  %v5835_v17 = vsel %vm1967_vm5, %v13692_v34, %v5714_v11  ;;  %v9875_v11 = vld [vmem:[#allocation2 + $0x10] sm:$0xff] }
 0xdf9   : > { %8931 = vmatmul.mubr.msk.f32.vlgmr.msra.gmra.mrb[114].mxu1 %vm2360_vm8, %v5286_v8 }
 0xdfa   : > { %8933 = vmatprep.mubr.msk.f32.mxu1 %vm10360_vm4, %v13655_v37 }
 0xdfb   : > { %v12734_v53 = vpop.permute.xlu1 %5695 }
 0xdfd   : > { %8934 = vmatmul.mubr.msk.f32.gmra.mrb[116].mxu1 %vm2360_vm8, %v5287_v35 }
 0xdfe   : > { %v9751_v50 = vpop.eup %9750  ;;  %8936 = vmatprep.mubr.msk.f32.mxu1 %vm10360_vm4, %v13655_v37 }
 0xdff   : > { %v12740_v12 = vpop.permute.xlu1 %5743  ;;  %v5288_v18 = vmul.f32 %v9751_v50, %v12629_v10 }
 0xe01   : > { %8937 = vmatmul.mubr.msk.f32.gmra.mrb[118].mxu1 %vm2360_vm8, %v5288_v18 }
 0xe03   : > { %v5700_v27 = vpop.permute.xlu1 %5699 }
 0xe04   : > { %v5828_v40 = vsel %vm1967_vm5, %v13685_v42, %v5700_v27 }
 0xe07   : > { %v5748_v30 = vpop.permute.xlu1 %5747 }
 0xe08   : > { %v12747_v31 = vsel %vm5837_vm9, %v5828_v40, %v5748_v30  ;;  %v13690_v40 = vld [vmem:[#allocation42_spill] sm:$0xff] }
 0xe09   : > { %v5826_v30 = vsel %vm1967_vm5, %v13690_v40, %v12734_v53 }
 0xe0b   : > { %v5704_v36 = vpop.permute.xlu1 %5703 }
 0xe0c   : > { %v5830_v37 = vsel %vm1967_vm5, %v13686_v56, %v5704_v36  ;;  %v13691_v56 = vld [vmem:[#allocation43_spill] sm:$0xff] }
 0xe0f   : > { %v5752_v14 = vpop.permute.xlu1 %5751 }
 0xe10   : > { %v12752_v10 = vsel %vm5837_vm9, %v5830_v37, %v5752_v14  ;;  %v5827_v37 = vsel %vm1967_vm5, %v13691_v56, %v12711_v57 }
 0xe11   : > { %v5840_v14 = vsel %vm5837_vm9, %v5827_v37, %v12713_v60 }
 0xe13   : > { %v5708_v49 = vpop.permute.xlu1 %5707 }
 0xe14   : > { %v5832_v38 = vsel %vm1967_vm5, %v13687_v51, %v5708_v49 }
 0xe17   : > { %v5756_v25 = vpop.permute.xlu1 %5755 }
 0xe18   : > { %v12757_v55 = vsel %vm5837_vm9, %v5832_v38, %v5756_v25 }
 0xe1b   : > { %v5712_v39 = vpop.permute.xlu1 %5711 }
 0xe1c   : > { %v5834_v13 = vsel %vm1967_vm5, %v13688_v48, %v5712_v39 }
 0xe1f   : > { %v5760_v44 = vpop.permute.xlu1 %5759 }
 0xe20   : > { %v12762_v26 = vsel %vm5837_vm9, %v5834_v13, %v5760_v44 }
 0xe23   : > { %v5716_v42 = vpop.permute.xlu1 %5715 }
 0xe60   : > { %v5373_v22 = vpop.f32.mrb[96].mxu0 }
 0xe61   : > { %5789 = vrot.lane.b32.xlu0 %v5373_v22, %s10368_s11  ;;  %v8887_v33 = vpop.f32.mrb[97].mxu0  ;;  %v5836_v22 = vsel %vm1967_vm5, %v13693_v5, %v5716_v42  ;;  %v9877_v42 = vld [vmem:[#allocation2 + $0x20] sm:$0xff] }
 0xe6b   : > { %v5378_v46 = vpop.f32.mrb[98].mxu0 }
 0xe6c   : > { %5791 = vrot.lane.b32.xlu1 %v5378_v46, %s10368_s11  ;;  %v8890_v29 = vpop.f32.mrb[99].mxu0 }
 0xe6d   : > { %v12838_v29 = vld [vmem:[%s13694_s16] ss:$0 sm:$0xff] }
 0xe6f   : > { %v5383_v62 = vpop.f32.mrb[100].mxu0 }
 0xe70   : > { %5793 = vrot.lane.b32.xlu0 %v5383_v62, %s10368_s11  ;;  %v8893_v43 = vpop.f32.mrb[101].mxu0 }
 0xe9c   : > { %v5471_v21 = vpop.f32.mrb[108].mxu1 }
 0xe9d   : > { %v8902_v7 = vpop.f32.mrb[109].mxu1  ;;  %5795 = vrot.lane.b32.xlu1 %v5471_v21, %s10368_s11 }
 0xea0   : > { %v5476_v58 = vpop.f32.mrb[110].mxu1  ;;  %v5569_v47 = vpop.f32.mrb[102].mxu0 }
 0xea1   : > { %v8905_v6 = vpop.f32.mrb[111].mxu1  ;;  %5801 = vrot.lane.b32.xlu0 %v5569_v47, %s10368_s11  ;;  %v8917_v9 = vpop.f32.mrb[103].mxu0 }
 0xea2   : > { %v9873_v6 = vld [vmem:[#allocation2] sm:$0xff] }
 0xea4   : > { %v5481_v16 = vpop.f32.mrb[112].mxu1  ;;  %v5574_v3 = vpop.f32.mrb[104].mxu0 }
 0xea5   : > { %v8908_v15 = vpop.f32.mrb[113].mxu1  ;;  %5797 = vrot.lane.b32.xlu0 %v5476_v58, %s10368_s11  ;;  %5803 = vrot.lane.b32.xlu1 %v5574_v3, %s10368_s11  ;;  %v8920_v61 = vpop.f32.mrb[105].mxu0  ;;  %v9872_v58 = vld [vmem:[#allocation2 + $0x8] sm:$0xff] }
 0xea8   : > { %v5579_v20 = vpop.f32.mrb[106].mxu0 }
 0xea9   : > { %5761 = vrot.lane.b32.xlu0 %v12501_v4, %s10367_s17  ;;  %5799 = vrot.lane.b32.xlu1 %v5481_v16, %s10368_s11  ;;  %v8923_v0 = vpop.f32.mrb[107].mxu0  ;;  %v5825_v4 = vsel %vm1967_vm5, %v13689_v19, %v12697_v32  ;;  %v5839_v32 = vsel %vm5837_vm9, %v5826_v30, %v12740_v12 }
 0xeaa   : > { %v5838_v35 = vsel %vm5837_vm9, %v5825_v4, %v12707_v1 }
 0xead   : > { %5763 = vrot.lane.b32.xlu1 %v12508_v52, %s10367_s17  ;;  %5805 = vrot.lane.b32.xlu0 %v5579_v20, %s10368_s11 }
 0xecc   : > { %v5667_v41 = vpop.f32.mrb[114].mxu1 }
 0xecd   : > { %v8932_v28 = vpop.f32.mrb[115].mxu1  ;;  %5807 = vrot.lane.b32.xlu1 %v5667_v41, %s10368_s11  ;;  %v9874_v41 = vld [vmem:[#allocation2 + $0x18] sm:$0xff] }
 0xed0   : > { %v5672_v8 = vpop.f32.mrb[116].mxu1 }
 0xed1   : > { %v8935_v45 = vpop.f32.mrb[117].mxu1  ;;  %5809 = vrot.lane.b32.xlu0 %v5672_v8, %s10368_s11 }
 0xed3   : > { %v5790_v50 = vpop.permute.xlu0 %5789 }
 0xed4   : > { %v5850_v52 = vsel %vm2360_vm8, %v5838_v35, %v5790_v50  ;;  %v5677_v18 = vpop.f32.mrb[118].mxu1 }
 0xed5   : > { %8947 = vmatprep.mubr.msk.f32.mxu0 %vm1334_vm3, %v5850_v52  ;;  %v8938_v27 = vpop.f32.mrb[119].mxu1  ;;  %5811 = vrot.lane.b32.xlu1 %v5677_v18, %s10368_s11  ;;  %v9876_v18 = vld [vmem:[#allocation2 + $0x28] sm:$0xff] }
 0xede   : > { %v5792_v36 = vpop.permute.xlu1 %5791 }
 0xedf   : > { %v5851_v1 = vsel %vm2360_vm8, %v5839_v32, %v5792_v36 }
 0xee0   : > { %8948 = vmatmul.mubr.msk.f32.vlgmr.msra.gmra.mrb[108].mxu0 %vm1334_vm3, %v5851_v1 }
 0xee2   : > { %v5794_v49 = vpop.permute.xlu0 %5793 }
 0xee3   : > { %v5852_v51 = vsel %vm2360_vm8, %v5840_v14, %v5794_v49  ;;  %v9878_v14 = vld [vmem:[#allocation2 + $0x38] sm:$0xff] }
 0xee4   : > { %8950 = vmatprep.mubr.msk.f32.mxu0 %vm1334_vm3, %v5852_v51  ;;  %v9879_v51 = vld [vmem:[#allocation2 + $0x30] sm:$0xff] }
 0xf0f   : > { %v5796_v53 = vpop.permute.xlu1 %5795 }
 0xf10   : > { %v5853_v12 = vsel %vm2360_vm8, %v12747_v31, %v5796_v53 }
 0xf11   : > { %8951 = vmatmul.mubr.msk.f32.gmra.mrb[110].mxu0 %vm1334_vm3, %v5853_v12 }
 0xf13   : > { %v5802_v38 = vpop.permute.xlu0 %5801 }
 0xf14   : > { %v5856_v44 = vsel %vm2360_vm8, %v12723_v63, %v5802_v38 }
 0xf17   : > { %v5798_v25 = vpop.permute.xlu0 %5797  ;;  %v5804_v39 = vpop.permute.xlu1 %5803 }
 0xf18   : > { %v5854_v57 = vsel %vm2360_vm8, %v12718_v24, %v5798_v25  ;;  %v5857_v54 = vsel %vm2360_vm8, %v12757_v55, %v5804_v39 }
 0xf19   : > { %8953 = vmatprep.mubr.msk.f32.mxu0 %vm1334_vm3, %v5854_v57 }
 0xf1b   : > { %v5762_v60 = vpop.permute.xlu0 %5761  ;;  %v5800_v48 = vpop.permute.xlu1 %5799 }
 0xf1c   : > { %v5855_v13 = vsel %vm2360_vm8, %v12752_v10, %v5800_v48  ;;  %v5848_v55 = vsel %vm5837_vm9, %v5835_v17, %v5762_v60  ;;  %v9880_v48 = vld [vmem:[#allocation2 + $0x48] sm:$0xff]  ;;  %v9882_v17 = vld [vmem:[#allocation2 + $0x58] sm:$0xff] }
 0xf1d   : > { %8954 = vmatmul.mubr.msk.f32.gmra.mrb[112].mxu0 %vm1334_vm3, %v5855_v13 }
 0xf1e   : > { %8956 = vmatprep.mubr.msk.f32.mxu0 %vm1334_vm3, %v5856_v44  ;;  %v9881_v44 = vld [vmem:[#allocation2 + $0x40] sm:$0xff] }
 0xf1f   : > { %v5806_v31 = vpop.permute.xlu0 %5805  ;;  %v5764_v10 = vpop.permute.xlu1 %5763 }
 0xf20   : > { %v5858_v24 = vsel %vm2360_vm8, %v12728_v23, %v5806_v31  ;;  %v5849_v33 = vsel %vm5837_vm9, %v5836_v22, %v5764_v10 }
 0xf21   : > { %8957 = vmatmul.mubr.msk.f32.gmra.mrb[114].mxu0 %vm1334_vm3, %v5857_v54 }
 0xf22   : > { %8959 = vmatprep.mubr.msk.f32.mxu0 %vm1334_vm3, %v5858_v24 }
 0xf3f   : > { %v5808_v2 = vpop.permute.xlu1 %5807 }
 0xf40   : > { %v5859_v63 = vsel %vm2360_vm8, %v12762_v26, %v5808_v2 }
 0xf41   : > { %8960 = vmatmul.mubr.msk.f32.gmra.mrb[116].mxu0 %vm1334_vm3, %v5859_v63 }
 0xf43   : > { %v5810_v59 = vpop.permute.xlu0 %5809 }
 0xf44   : > { %v5860_v23 = vsel %vm2360_vm8, %v5848_v55, %v5810_v59  ;;  %v9883_v59 = vld [vmem:[#allocation2 + $0x50] sm:$0xff] }
 0xf45   : > { %8962 = vmatprep.mubr.msk.f32.mxu0 %vm1334_vm3, %v5860_v23 }
 0xf47   : > { %v5812_v46 = vpop.permute.xlu1 %5811 }
 0xf48   : > { %v5861_v26 = vsel %vm2360_vm8, %v5849_v33, %v5812_v46 }
 0xf49   : > { %8963 = vmatmul.mubr.msk.f32.gmra.mrb[118].mxu0 %vm1334_vm3, %v5861_v26 }
 0xfb3   : > { %v8949_v62 = vpop.f32.mrb[108].mxu0 }
 0xfb4   : > { %v5981_v43 = vadd.f32 %v8949_v62, %v12838_v29  ;;  %v5975_v21 = vpop.f32.mrb[109].mxu0 }
 0xfb5   : > { %v5976_v7 = vadd.f32 %v12838_v29, %v5975_v21 }
 0xfb6   : > { %v12842_v47 = vadd.f32 %v9872_v58, %v5981_v43 }
 0xfb7   : > { %v12844_v9 = vadd.f32 %v9873_v6, %v5976_v7 }
 0xfb8   : > { %v6051_v16 = vsel %vm1334_vm3, %v12842_v47, 0.0 }
 0xfb9   : > { %6052 = vadd.xlane.f32.xlu1 %v6051_v16  ;;  %v6048_v3 = vsel %vm1334_vm3, %v12844_v9, 0.0  ;;  %v6240_v16 = vld [vmem:[%s10978_s10] sm:$0xff] }
 0xfba   : > { %6049 = vadd.xlane.f32.xlu0 %v6048_v3  ;;  %v6241_v3 = vld [vmem:[%s10978_s10 + $0x8] sm:$0xff] }
 0xfe4   : > { %v8952_v15 = vpop.f32.mrb[110].mxu0 }
 0xfe5   : > { %v5991_v61 = vadd.f32 %v8952_v15, %v12838_v29  ;;  %v5985_v20 = vpop.f32.mrb[111].mxu0  ;;  %v9192_v15 = vpack.c.bf16 %v6241_v3, %v6240_v16 }
 0xfe6   : > { %v5986_v0 = vadd.f32 %v12838_v29, %v5985_v20  ;;  %v6243_v20 = vld [vmem:[%s10978_s10 + $0x18] sm:$0xff] }
 0xfe7   : > { %v12852_v28 = vadd.f32 %v9874_v41, %v5991_v61  ;;  %9193 = vmatprep.subr.bf16.mxu1 %v9192_v15  ;;  %v6242_v61 = vld [vmem:[%s10978_s10 + $0x10] sm:$0xff]  ;;  %s13695_s10 = scalar_lea.vmem [#allocation13], %s10962_s18 }
 0xfe8   : > { %v12854_v8 = vadd.f32 %v9875_v11, %v5986_v0  ;;  %9195 = vmatpush3.bf16.msra.mxu1 %v9192_v15  ;;  %v9196_v0 = vpack.c.bf16 %v6243_v20, %v6242_v61 }
 0xfe9   : > { %v6057_v45 = vsel %vm1334_vm3, %v12852_v28, 0.0 }
 0xfea   : > { %6058 = vadd.xlane.f32.xlu0 %v6057_v45  ;;  %v6054_v19 = vsel %vm1334_vm3, %v12854_v8, 0.0  ;;  %9197 = vmatprep.subr.bf16.mxu1 %v9196_v0 }
 0xfec   : > { %9199 = vmatpush3.bf16.msra.mxu1 %v9196_v0 }
 0xfee   : > { %6055 = vadd.xlane.f32.xlu0 %v6054_v19 }
 0xff0   : > { %v8955_v4 = vpop.f32.mrb[112].mxu0 }
 0xff1   : > { %v6001_v35 = vadd.f32 %v8955_v4, %v12838_v29  ;;  %v5995_v50 = vpop.f32.mrb[113].mxu0 }
 0xff2   : > { %v5996_v52 = vadd.f32 %v12838_v29, %v5995_v50 }
 0xff3   : > { %v12862_v27 = vadd.f32 %v9876_v18, %v6001_v35 }
 0xff4   : > { %v12864_v40 = vadd.f32 %v9877_v42, %v5996_v52  ;;  %v8958_v30 = vpop.f32.mrb[114].mxu0 }
 0xff5   : > { %v6011_v32 = vadd.f32 %v8958_v30, %v12838_v29  ;;  %v6005_v36 = vpop.f32.mrb[115].mxu0  ;;  %v6063_v1 = vsel %vm1334_vm3, %v12862_v27, 0.0 }
 0xff6   : > { %v6006_v56 = vadd.f32 %v12838_v29, %v6005_v36  ;;  %6064 = vadd.xlane.f32.xlu1 %v6063_v1  ;;  %v6060_v37 = vsel %vm1334_vm3, %v12864_v40, 0.0 }
 0xff7   : > { %v12872_v49 = vadd.f32 %v9878_v14, %v6011_v32  ;;  %6061 = vadd.xlane.f32.xlu0 %v6060_v37 }
 0xff8   : > { %v12874_v53 = vadd.f32 %v9879_v51, %v6006_v56 }
 0xff9   : > { %v6069_v12 = vsel %vm1334_vm3, %v12872_v49, 0.0 }
 0xffa   : > { %6070 = vadd.xlane.f32.xlu1 %v6069_v12  ;;  %v6066_v38 = vsel %vm1334_vm3, %v12874_v53, 0.0 }
 0xffb   : > { %6067 = vadd.xlane.f32.xlu0 %v6066_v38 }
0x1014   : > { %v8961_v25 = vpop.f32.mrb[116].mxu0 }
0x1015   : > { %v6021_v39 = vadd.f32 %v8961_v25, %v12838_v29  ;;  %v6015_v57 = vpop.f32.mrb[117].mxu0 }
0x1016   : > { %v6016_v60 = vadd.f32 %v12838_v29, %v6015_v57 }
0x1017   : > { %v12882_v13 = vadd.f32 %v9880_v48, %v6021_v39 }
0x1018   : > { %v12884_v31 = vadd.f32 %v9881_v44, %v6016_v60 }
0x1019   : > { %v6075_v54 = vsel %vm1334_vm3, %v12882_v13, 0.0 }
0x101a   : > { %6076 = vadd.xlane.f32.xlu1 %v6075_v54  ;;  %v6072_v24 = vsel %vm1334_vm3, %v12884_v31, 0.0 }
0x101b   : > { %6073 = vadd.xlane.f32.xlu0 %v6072_v24 }
0x101c   : > { %v8964_v10 = vpop.f32.mrb[118].mxu0 }
0x101d   : > { %v6031_v2 = vadd.f32 %v8964_v10, %v12838_v29  ;;  %v6025_v63 = vpop.f32.mrb[119].mxu0 }
0x101e   : > { %v6026_v34 = vadd.f32 %v12838_v29, %v6025_v63 }
0x101f   : > { %v12892_v55 = vadd.f32 %v9882_v17, %v6031_v2 }
0x1020   : > { %v12894_v23 = vadd.f32 %v9883_v59, %v6026_v34 }
0x1021   : > { %v6081_v5 = vsel %vm1334_vm3, %v12892_v55, 0.0 }
0x1022   : > { %6082 = vadd.xlane.f32.xlu1 %v6081_v5  ;;  %v6078_v22 = vsel %vm1334_vm3, %v12894_v23, 0.0 }
0x1023   : > { %6079 = vadd.xlane.f32.xlu0 %v6078_v22 }
0x1046   : > { %v6053_v33 = vpop.xlane.xlu1 %6052 }
0x1047   : > { %v6085_v46 = vmul.f32 0.03125, %v6053_v33  ;;  %v6050_v26 = vpop.xlane.xlu0 %6049 }
0x1048   : > { %v6084_v29 = vmul.f32 0.03125, %v6050_v26 }
0x1049   : > { %v12901_v62 = vsub.f32 %v12842_v47, %v6085_v46 }
0x104a   : > { %v12904_v43 = vsub.f32 %v12844_v9, %v6084_v29 }
0x104b   : > { %v6109_v21 = vmul.f32 %v12901_v62, %v12901_v62 }
0x104c   : > { %v6108_v7 = vmul.f32 %v12904_v43, %v12904_v43 }
0x104d   : > { %v6123_v58 = vsel %vm1334_vm3, %v6109_v21, 0.0 }
0x104e   : > { %6124 = vadd.xlane.f32.xlu1 %v6123_v58  ;;  %v6120_v6 = vsel %vm1334_vm3, %v6108_v7, 0.0 }
0x104f   : > { %6121 = vadd.xlane.f32.xlu0 %v6120_v6 }
0x1077   : > { %v6059_v41 = vpop.xlane.xlu0 %6058 }
0x1078   : > { %v6087_v11 = vmul.f32 0.03125, %v6059_v41 }
0x107a   : > { %v12917_v45 = vsub.f32 %v12852_v28, %v6087_v11 }
0x107b   : > { %v6056_v19 = vpop.xlane.xlu0 %6055 }
0x107c   : > { %v6086_v4 = vmul.f32 0.03125, %v6056_v19  ;;  %v6111_v35 = vmul.f32 %v12917_v45, %v12917_v45 }
0x107e   : > { %v12922_v50 = vsub.f32 %v12854_v8, %v6086_v4  ;;  %v6129_v52 = vsel %vm1334_vm3, %v6111_v35, 0.0 }
0x107f   : > { %6130 = vadd.xlane.f32.xlu1 %v6129_v52 }
0x1080   : > { %v6110_v18 = vmul.f32 %v12922_v50, %v12922_v50 }
0x1082   : > { %v6126_v42 = vsel %vm1334_vm3, %v6110_v18, 0.0 }
0x1083   : > { %v6065_v30 = vpop.xlane.xlu1 %6064  ;;  %6127 = vadd.xlane.f32.xlu0 %v6126_v42  ;;  %v12978_v42 = vld [vmem:[%s13695_s10] ss:$0 sm:$0xff] }
0x1084   : > { %v6089_v32 = vmul.f32 0.03125, %v6065_v30  ;;  %v6062_v36 = vpop.xlane.xlu0 %6061 }
0x1085   : > { %v6088_v1 = vmul.f32 0.03125, %v6062_v36 }
0x1086   : > { %v12929_v56 = vsub.f32 %v12862_v27, %v6089_v32 }
0x1087   : > { %v12932_v37 = vsub.f32 %v12864_v40, %v6088_v1  ;;  %v6071_v14 = vpop.xlane.xlu1 %6070  ;;  %v12984_v1 = vld [vmem:[%s13696_s12] ss:$0 sm:$0xff] }
0x1088   : > { %v6091_v51 = vmul.f32 0.03125, %v6071_v14  ;;  %v6068_v12 = vpop.xlane.xlu0 %6067  ;;  %v6113_v38 = vmul.f32 %v12929_v56, %v12929_v56 }
0x1089   : > { %v6090_v25 = vmul.f32 0.03125, %v6068_v12  ;;  %v6112_v39 = vmul.f32 %v12932_v37, %v12932_v37 }
0x108a   : > { %v12939_v57 = vsub.f32 %v12872_v49, %v6091_v51  ;;  %v6135_v60 = vsel %vm1334_vm3, %v6113_v38, 0.0 }
0x108b   : > { %v12943_v48 = vsub.f32 %v12874_v53, %v6090_v25  ;;  %6136 = vadd.xlane.f32.xlu1 %v6135_v60  ;;  %v6132_v44 = vsel %vm1334_vm3, %v6112_v39, 0.0 }
0x108c   : > { %6133 = vadd.xlane.f32.xlu0 %v6132_v44  ;;  %v6115_v54 = vmul.f32 %v12939_v57, %v12939_v57 }
0x108d   : > { %v6114_v24 = vmul.f32 %v12943_v48, %v12943_v48 }
0x108e   : > { %v6141_v10 = vsel %vm1334_vm3, %v6115_v54, 0.0 }
0x108f   : > { %6142 = vadd.xlane.f32.xlu1 %v6141_v10  ;;  %v6138_v2 = vsel %vm1334_vm3, %v6114_v24, 0.0 }
0x1090   : > { %6139 = vadd.xlane.f32.xlu0 %v6138_v2 }
0x10a7   : > { %v6077_v63 = vpop.xlane.xlu1 %6076 }
0x10a8   : > { %v6093_v34 = vmul.f32 0.03125, %v6077_v63  ;;  %v6074_v17 = vpop.xlane.xlu0 %6073 }
0x10a9   : > { %v6092_v59 = vmul.f32 0.03125, %v6074_v17 }
0x10aa   : > { %v12953_v5 = vsub.f32 %v12882_v13, %v6093_v34 }
0x10ab   : > { %v12956_v22 = vsub.f32 %v12884_v31, %v6092_v59 }
0x10ac   : > { %v6117_v33 = vmul.f32 %v12953_v5, %v12953_v5 }
0x10ad   : > { %v6116_v46 = vmul.f32 %v12956_v22, %v12956_v22 }
0x10ae   : > { %v6147_v26 = vsel %vm1334_vm3, %v6117_v33, 0.0 }
0x10af   : > { %v6083_v29 = vpop.xlane.xlu1 %6082  ;;  %6148 = vadd.xlane.f32.xlu1 %v6147_v26  ;;  %v6144_v21 = vsel %vm1334_vm3, %v6116_v46, 0.0 }
0x10b0   : > { %v6095_v7 = vmul.f32 0.03125, %v6083_v29  ;;  %6145 = vadd.xlane.f32.xlu0 %v6144_v21  ;;  %v6080_v58 = vpop.xlane.xlu0 %6079 }
0x10b1   : > { %v6094_v6 = vmul.f32 0.03125, %v6080_v58 }
0x10b2   : > { %v12965_v16 = vsub.f32 %v12892_v55, %v6095_v7 }
0x10b3   : > { %v12968_v3 = vsub.f32 %v12894_v23, %v6094_v6 }
0x10b4   : > { %v6119_v15 = vmul.f32 %v12965_v16, %v12965_v16 }
0x10b5   : > { %v6118_v61 = vmul.f32 %v12968_v3, %v12968_v3 }
0x10b6   : > { %v6153_v20 = vsel %vm1334_vm3, %v6119_v15, 0.0 }
0x10b7   : > { %6154 = vadd.xlane.f32.xlu1 %v6153_v20  ;;  %v6150_v0 = vsel %vm1334_vm3, %v6118_v61, 0.0 }
0x10b8   : > { %6151 = vadd.xlane.f32.xlu0 %v6150_v0 }
0x10db   : > { %v6125_v41 = vpop.xlane.xlu1 %6124 }
0x10dc   : > { %v6157_v11 = vmul.f32 0.03125, %v6125_v41  ;;  %v6122_v19 = vpop.xlane.xlu0 %6121 }
0x10dd   : > { %v6156_v4 = vmul.f32 0.03125, %v6122_v19 }
0x10de   : > { %v6169_v35 = vadd.f32 1e-05, %v6157_v11 }
0x10df   : > { %v6168_v52 = vadd.f32 1e-05, %v6156_v4 }
0x10e0   : > { %9752 = vrsqrt.f32 %v6169_v35 }
0x10e1   : > { %9754 = vrsqrt.f32 %v6168_v52 }
0x10ea   : > { %v9753_v18 = vpop.eup %9752 }
0x10eb   : > { %v9755_v30 = vpop.eup %9754  ;;  %v6193_v32 = vmul.f32 %v9753_v18, %v12901_v62 }
0x10ec   : > { %v6192_v36 = vmul.f32 %v9755_v30, %v12904_v43 }
0x10ed   : > { %v6211_v14 = vmul.f32 %v12978_v42, %v6193_v32 }
0x10ee   : > { %v6210_v51 = vmul.f32 %v12978_v42, %v6192_v36 }
0x10ef   : > { %v6229_v38 = vadd.f32 %v12984_v1, %v6211_v14 }
0x10f0   : > { %v6228_v12 = vadd.f32 %v12984_v1, %v6210_v51 }
0x10f2   : > { %8973 = vmatprep.mubr.msk.f32.mxu1 %vm1334_vm3, %v6228_v12 }
0x10f3   : > { %8974 = vmatmul.mubr.msk.f32.vlgmr.msra.gmra.mrb[120].mxu1 %vm1334_vm3, %v6229_v38 }
0x110c   : > { %v6131_v25 = vpop.xlane.xlu1 %6130 }
0x110d   : > { %v6159_v39 = vmul.f32 0.03125, %v6131_v25 }
0x110f   : > { %v6171_v62 = vadd.f32 1e-05, %v6159_v39 }
0x1110   : > { %v6128_v60 = vpop.xlane.xlu0 %6127 }
0x1111   : > { %9756 = vrsqrt.f32 %v6171_v62  ;;  %v6158_v43 = vmul.f32 0.03125, %v6128_v60 }
0x1113   : > { %v6170_v44 = vadd.f32 1e-05, %v6158_v43 }
0x1115   : > { %9758 = vrsqrt.f32 %v6170_v44 }
0x1118   : > { %v6137_v54 = vpop.xlane.xlu1 %6136 }
0x1119   : > { %v6161_v24 = vmul.f32 0.03125, %v6137_v54  ;;  %v6134_v10 = vpop.xlane.xlu0 %6133 }
0x111a   : > { %v6160_v2 = vmul.f32 0.03125, %v6134_v10 }
0x111b   : > { %v9757_v63 = vpop.eup %9756  ;;  %v6173_v34 = vadd.f32 1e-05, %v6161_v24 }
0x111c   : > { %v6172_v17 = vadd.f32 1e-05, %v6160_v2  ;;  %v6143_v59 = vpop.xlane.xlu1 %6142  ;;  %v6195_v26 = vmul.f32 %v9757_v63, %v12917_v45 }
0x111d   : > { %9760 = vrsqrt.f32 %v6173_v34  ;;  %v6163_v33 = vmul.f32 0.03125, %v6143_v59  ;;  %v6140_v46 = vpop.xlane.xlu0 %6139 }
0x111e   : > { %9762 = vrsqrt.f32 %v6172_v17  ;;  %v6162_v29 = vmul.f32 0.03125, %v6140_v46  ;;  %v6213_v15 = vmul.f32 %v12978_v42, %v6195_v26 }
0x111f   : > { %v9759_v21 = vpop.eup %9758  ;;  %v6175_v7 = vadd.f32 1e-05, %v6163_v33 }
0x1120   : > { %v6174_v58 = vadd.f32 1e-05, %v6162_v29  ;;  %v6194_v6 = vmul.f32 %v9759_v21, %v12922_v50  ;;  %v6231_v0 = vadd.f32 %v12984_v1, %v6213_v15  ;;  %v6736_v15 = vld [vmem:[%s11018_s30] sm:$0xff] }
0x1121   : > { %9764 = vrsqrt.f32 %v6175_v7 }
0x1122   : > { %9766 = vrsqrt.f32 %v6174_v58  ;;  %v6212_v61 = vmul.f32 %v12978_v42, %v6194_v6 }
0x1124   : > { %v6230_v20 = vadd.f32 %v12984_v1, %v6212_v61 }
0x1126   : > { %8976 = vmatprep.mubr.msk.f32.mxu1 %vm1334_vm3, %v6230_v20  ;;  %v6739_v20 = vld [vmem:[%s11018_s30 + $0x18] sm:$0xff] }
0x1127   : > { %v9761_v45 = vpop.eup %9760  ;;  %8977 = vmatmul.mubr.msk.f32.gmra.mrb[122].mxu1 %vm1334_vm3, %v6231_v0  ;;  %v6740_v0 = vld [vmem:[%s11018_s30 + $0x20] sm:$0xff] }
0x1128   : > { %v9763_v41 = vpop.eup %9762  ;;  %v6197_v11 = vmul.f32 %v9761_v45, %v12929_v56  ;;  %v6741_v45 = vld [vmem:[%s11018_s30 + $0x28] sm:$0xff] }
0x1129   : > { %v6196_v50 = vmul.f32 %v9763_v41, %v12932_v37  ;;  %v6742_v41 = vld [vmem:[%s11018_s30 + $0x30] sm:$0xff] }
0x112a   : > { %v6215_v19 = vmul.f32 %v12978_v42, %v6197_v11  ;;  %v6743_v11 = vld [vmem:[%s11018_s30 + $0x38] sm:$0xff] }
0x112b   : > { %v9765_v4 = vpop.eup %9764  ;;  %v6214_v35 = vmul.f32 %v12978_v42, %v6196_v50  ;;  %v9212_v50 = vpack.c.bf16 %v6743_v11, %v6742_v41 }
0x112c   : > { %v9767_v52 = vpop.eup %9766  ;;  %v6199_v18 = vmul.f32 %v9765_v4, %v12939_v57  ;;  %v6233_v36 = vadd.f32 %v12984_v1, %v6215_v19  ;;  %v13045_v19 = vld [vmem:[%s1086_s1] ss:$0 sm:$0xff] }
0x112d   : > { %v6232_v30 = vadd.f32 %v12984_v1, %v6214_v35  ;;  %v6198_v32 = vmul.f32 %v9767_v52, %v12943_v48 }
0x112e   : > { %v6217_v14 = vmul.f32 %v12978_v42, %v6199_v18 }
0x112f   : > { %8979 = vmatprep.mubr.msk.f32.mxu1 %vm1334_vm3, %v6232_v30  ;;  %v6216_v56 = vmul.f32 %v12978_v42, %v6198_v32 }
0x1130   : > { %8980 = vmatmul.mubr.msk.f32.gmra.mrb[124].mxu1 %vm1334_vm3, %v6233_v36  ;;  %v6235_v51 = vadd.f32 %v12984_v1, %v6217_v14 }
0x1131   : > { %v6234_v37 = vadd.f32 %v12984_v1, %v6216_v56 }
0x1133   : > { %8982 = vmatprep.mubr.msk.f32.mxu1 %vm1334_vm3, %v6234_v37 }
0x1134   : > { %8983 = vmatmul.mubr.msk.f32.gmra.mrb[126].mxu1 %vm1334_vm3, %v6235_v51 }
0x113c   : > { %v6149_v57 = vpop.xlane.xlu1 %6148 }
0x113d   : > { %v6165_v48 = vmul.f32 0.03125, %v6149_v57  ;;  %v6146_v12 = vpop.xlane.xlu0 %6145 }
0x113e   : > { %v6164_v38 = vmul.f32 0.03125, %v6146_v12 }
0x113f   : > { %v6177_v25 = vadd.f32 1e-05, %v6165_v48 }
0x1140   : > { %v6176_v39 = vadd.f32 1e-05, %v6164_v38 }
0x1141   : > { %9768 = vrsqrt.f32 %v6177_v25 }
0x1142   : > { %9770 = vrsqrt.f32 %v6176_v39 }
0x1144   : > { %v6155_v62 = vpop.xlane.xlu1 %6154 }
0x1145   : > { %v6167_v60 = vmul.f32 0.03125, %v6155_v62  ;;  %v6152_v43 = vpop.xlane.xlu0 %6151 }
0x1146   : > { %v6166_v44 = vmul.f32 0.03125, %v6152_v43 }
0x1147   : > { %v6179_v54 = vadd.f32 1e-05, %v6167_v60 }
0x1148   : > { %v6178_v24 = vadd.f32 1e-05, %v6166_v44 }
0x1149   : > { %9772 = vrsqrt.f32 %v6179_v54 }
0x114a   : > { %9774 = vrsqrt.f32 %v6178_v24 }
0x114b   : > { %v9769_v10 = vpop.eup %9768 }
0x114c   : > { %v9771_v2 = vpop.eup %9770  ;;  %v6201_v63 = vmul.f32 %v9769_v10, %v12953_v5 }
0x114d   : > { %v6200_v34 = vmul.f32 %v9771_v2, %v12956_v22 }
0x114e   : > { %v6219_v17 = vmul.f32 %v12978_v42, %v6201_v63 }
0x114f   : > { %v6218_v59 = vmul.f32 %v12978_v42, %v6200_v34 }
0x1150   : > { %v6237_v46 = vadd.f32 %v12984_v1, %v6219_v17 }
0x1151   : > { %v6236_v33 = vadd.f32 %v12984_v1, %v6218_v59 }
0x1153   : > { %v9773_v26 = vpop.eup %9772  ;;  %8985 = vmatprep.mubr.msk.f32.mxu1 %vm1334_vm3, %v6236_v33 }
0x1154   : > { %v9775_v29 = vpop.eup %9774  ;;  %8986 = vmatmul.mubr.msk.f32.gmra.mrb[128].mxu1 %vm1334_vm3, %v6237_v46  ;;  %v6203_v5 = vmul.f32 %v9773_v26, %v12965_v16  ;;  %v6737_v16 = vld [vmem:[%s11018_s30 + $0x8] sm:$0xff] }
0x1155   : > { %v6202_v22 = vmul.f32 %v9775_v29, %v12968_v3  ;;  %v9200_v61 = vpack.c.bf16 %v6737_v16, %v6736_v15  ;;  %v6738_v3 = vld [vmem:[%s11018_s30 + $0x10] sm:$0xff] }
0x1156   : > { %v6221_v21 = vmul.f32 %v12978_v42, %v6203_v5 }
0x1157   : > { %v6220_v7 = vmul.f32 %v12978_v42, %v6202_v22  ;;  %9201 = vmatprep.subr.bf16.mxu0 %v9200_v61  ;;  %v9204_v42 = vpack.c.bf16 %v6739_v20, %v6738_v3  ;;  %v10369_v20 = vmov -1.0  }
0x1158   : > { %v6239_v6 = vadd.f32 %v12984_v1, %v6221_v21  ;;  %9203 = vmatpush3.bf16.msra.mxu0 %v9200_v61 }
0x1159   : > { %v6238_v58 = vadd.f32 %v12984_v1, %v6220_v7  ;;  %9205 = vmatprep.subr.bf16.mxu0 %v9204_v42  ;;  %v9208_v1 = vpack.c.bf16 %v6741_v45, %v6740_v0 }
0x115b   : > { %8988 = vmatprep.mubr.msk.f32.mxu1 %vm1334_vm3, %v6238_v58 }
0x115c   : > { %8989 = vmatmul.mubr.msk.f32.gmra.mrb[130].mxu1 %vm1334_vm3, %v6239_v6  ;;  %9207 = vmatpush3.bf16.msra.mxu0 %v9204_v42 }
0x115d   : > { %9209 = vmatprep.subr.bf16.mxu0 %v9208_v1 }
0x1160   : > { %9211 = vmatpush3.bf16.msra.mxu0 %v9208_v1 }
0x1161   : > { %9213 = vmatprep.subr.bf16.mxu0 %v9212_v50 }
0x1164   : > { %9215 = vmatpush3.bf16.msra.mxu0 %v9212_v50 }
0x11c6   : > { %v8975_v4 = vpop.f32.mrb[120].mxu1 }
0x11c7   : > { %v6359_v35 = vadd.f32 %v8975_v4, %v13045_v19  ;;  %v6353_v52 = vpop.f32.mrb[121].mxu1 }
0x11c8   : > { %v6354_v18 = vadd.f32 %v13045_v19, %v6353_v52 }
0x11c9   : > { %v6425_v30 = vmul.f32 0.70710677, %v6359_v35  ;;  %v6413_v52 = vmul.f32 0.5, %v6359_v35 }
0x11ca   : > { %v6424_v32 = vmul.f32 0.70710677, %v6354_v18  ;;  %v6412_v50 = vmul.f32 0.5, %v6354_v18 }
0x11cb   : > { %v6461_v36 = vand.u32 2147483647, %v6425_v30  ;;  %vm6437_vm10 = vcmp.ge.f32.partialorder %v6425_v30, 0.0 }
0x11cc   : > { %v6460_v14 = vand.u32 2147483647, %v6424_v32  ;;  %vm6436_vm11 = vcmp.ge.f32.partialorder %v6424_v32, 0.0  ;;  %v6449_v42 = vsel %vm6437_vm10, 1.0, %v10369_v20 }
0x11cd   : > { %v6473_v56 = vmul.f32 0.3275911, %v6461_v36  ;;  %v6629_v48 = vsub.f32 0.0, %v6461_v36  ;;  %v6448_v1 = vsel %vm6436_vm11, 1.0, %v10369_v20 }
0x11ce   : > { %v6472_v37 = vmul.f32 0.3275911, %v6460_v14  ;;  %v6628_v12 = vsub.f32 0.0, %v6460_v14 }
0x11cf   : > { %v6485_v51 = vadd.f32 1.0, %v6473_v56  ;;  %v6641_v25 = vmul.f32 %v6629_v48, %v6461_v36 }
0x11d0   : > { %v6484_v57 = vadd.f32 1.0, %v6472_v37  ;;  %v6640_v60 = vmul.f32 %v6628_v12, %v6460_v14 }
0x11d1   : > { %9776 = vrcp.f32 %v6485_v51  ;;  %v6654_v54 = vmul.f32 1.442695, %v6641_v25 }
0x11d2   : > { %9778 = vrcp.f32 %v6484_v57  ;;  %v6652_v2 = vmul.f32 1.442695, %v6640_v60 }
0x11d3   : > { %9780 = vpow2.f32 %v6654_v54 }
0x11d4   : > { %9782 = vpow2.f32 %v6652_v2 }
0x11db   : > { %v9777_v38 = vpop.eup %9776 }
0x11dc   : > { %v9779_v39 = vpop.eup %9778  ;;  %v6521_v62 = vmul.f32 1.0614054, %v9777_v38 }
0x11dd   : > { %v6520_v43 = vmul.f32 1.0614054, %v9779_v39  ;;  %v9781_v58 = vpop.eup %9780 }
0x11de   : > { %v6533_v44 = vadd.f32 -1.4531521, %v6521_v62  ;;  %v9783_v15 = vpop.eup %9782 }
0x11df   : > { %v6532_v24 = vadd.f32 -1.4531521, %v6520_v43 }
0x11e0   : > { %v6545_v10 = vmul.f32 %v9777_v38, %v6533_v44 }
0x11e1   : > { %v6544_v63 = vmul.f32 %v9779_v39, %v6532_v24 }
0x11e2   : > { %v6557_v34 = vadd.f32 1.4214138, %v6545_v10 }
0x11e3   : > { %v6556_v17 = vadd.f32 1.4214138, %v6544_v63 }
0x11e4   : > { %v6569_v59 = vmul.f32 %v9777_v38, %v6557_v34 }
0x11e5   : > { %v6568_v33 = vmul.f32 %v9779_v39, %v6556_v17 }
0x11e6   : > { %v6581_v46 = vadd.f32 -0.28449672, %v6569_v59 }
0x11e7   : > { %v6580_v26 = vadd.f32 -0.28449672, %v6568_v33 }
0x11e8   : > { %v6593_v29 = vmul.f32 %v9777_v38, %v6581_v46 }
0x11e9   : > { %v6592_v5 = vmul.f32 %v9779_v39, %v6580_v26 }
0x11ea   : > { %v6605_v22 = vadd.f32 0.2548296, %v6593_v29 }
0x11eb   : > { %v6604_v21 = vadd.f32 0.2548296, %v6592_v5 }
0x11ec   : > { %v6617_v7 = vmul.f32 %v9777_v38, %v6605_v22 }
0x11ed   : > { %v6616_v6 = vmul.f32 %v9779_v39, %v6604_v21 }
0x11ee   : > { %v6677_v16 = vmul.f32 %v9781_v58, %v6617_v7 }
0x11ef   : > { %v6676_v61 = vmul.f32 %v9783_v15, %v6616_v6 }
0x11f0   : > { %v6689_v3 = vsub.f32 1.0, %v6677_v16 }
0x11f1   : > { %v6688_v0 = vsub.f32 1.0, %v6676_v61 }
0x11f2   : > { %v6701_v45 = vmul.f32 %v6689_v3, %v6449_v42 }
0x11f3   : > { %v6700_v41 = vmul.f32 %v6688_v0, %v6448_v1 }
0x11f4   : > { %v6713_v11 = vadd.f32 1.0, %v6701_v45 }
0x11f5   : > { %v6712_v4 = vadd.f32 1.0, %v6700_v41 }
0x11f6   : > { %v6725_v14 = vmul.f32 %v6713_v11, %v6413_v52 }
0x11f7   : > { %v6724_v36 = vmul.f32 %v6712_v4, %v6412_v50 }
0x11f9   : > { %9007 = vmatprep.mubr.msk.f32.mxu0 %vm6751_vm12, %v6724_v36 }
0x11fa   : > { %v8978_v30 = vpop.f32.mrb[122].mxu1  ;;  %9008 = vmatmul.mubr.msk.f32.vlgmr.msra.gmra.mrb[120].mxu0 %vm6751_vm12, %v6725_v14 }
0x11fb   : > { %v13054_v32 = vadd.f32 %v8978_v30, %v13045_v19  ;;  %v6363_v56 = vpop.f32.mrb[123].mxu1 }
0x11fc   : > { %v13057_v37 = vadd.f32 %v13045_v19, %v6363_v56 }
0x11fd   : > { %v13060_v51 = vmul.f32 0.70710677, %v13054_v32 }
0x11fe   : > { %v13063_v35 = vmul.f32 0.70710677, %v13057_v37 }
0x11ff   : > { %v6463_v18 = vand.u32 2147483647, %v13060_v51  ;;  %vm6439_vm13 = vcmp.ge.f32.partialorder %v13060_v51, 0.0 }
0x1200   : > { %v6462_v57 = vand.u32 2147483647, %v13063_v35  ;;  %vm6438_vm14 = vcmp.ge.f32.partialorder %v13063_v35, 0.0 }
0x1201   : > { %v6475_v48 = vmul.f32 0.3275911, %v6463_v18  ;;  %v6631_v33 = vsub.f32 0.0, %v6463_v18 }
0x1202   : > { %v6474_v12 = vmul.f32 0.3275911, %v6462_v57  ;;  %v6630_v29 = vsub.f32 0.0, %v6462_v57 }
0x1203   : > { %v6487_v38 = vadd.f32 1.0, %v6475_v48  ;;  %v8981_v25 = vpop.f32.mrb[124].mxu1  ;;  %v6643_v6 = vmul.f32 %v6631_v33, %v6463_v18 }
0x1204   : > { %v6486_v39 = vadd.f32 1.0, %v6474_v12  ;;  %v13068_v62 = vadd.f32 %v8981_v25, %v13045_v19  ;;  %v6373_v60 = vpop.f32.mrb[125].mxu1  ;;  %v6642_v3 = vmul.f32 %v6630_v29, %v6462_v57 }
0x1205   : > { %9784 = vrcp.f32 %v6487_v38  ;;  %v13071_v43 = vadd.f32 %v13045_v19, %v6373_v60  ;;  %v6658_v50 = vmul.f32 1.442695, %v6643_v6 }
0x1206   : > { %9786 = vrcp.f32 %v6486_v39  ;;  %v13074_v44 = vmul.f32 0.70710677, %v13068_v62  ;;  %v6656_v36 = vmul.f32 1.442695, %v6642_v3  ;;  %v13107_v3 = vmul.f32 0.5, %v13057_v37 }
0x1207   : > { %v13077_v54 = vmul.f32 0.70710677, %v13071_v43  ;;  %v8984_v24 = vpop.f32.mrb[126].mxu1 }
0x1208   : > { %v6465_v10 = vand.u32 2147483647, %v13074_v44  ;;  %v13081_v2 = vadd.f32 %v8984_v24, %v13045_v19  ;;  %v6383_v63 = vpop.f32.mrb[127].mxu1  ;;  %vm6441_vm15 = vcmp.ge.f32.partialorder %v13074_v44, 0.0 }
0x1209   : > { %v6464_v34 = vand.u32 2147483647, %v13077_v54  ;;  %v13085_v17 = vadd.f32 %v13045_v19, %v6383_v63  ;;  %vm6440_vm0 = vcmp.ge.f32.partialorder %v13077_v54, 0.0  ;;  %v6416_v54 = vmul.f32 0.5, %v13071_v43 }
0x120a   : > { %v6477_v59 = vmul.f32 0.3275911, %v6465_v10  ;;  %v13088_v26 = vmul.f32 0.70710677, %v13081_v2  ;;  %v6633_v41 = vsub.f32 0.0, %v6465_v10 }
0x120b   : > { %v6476_v46 = vmul.f32 0.3275911, %v6464_v34  ;;  %v13091_v22 = vmul.f32 0.70710677, %v13085_v17  ;;  %v6632_v14 = vsub.f32 0.0, %v6464_v34 }
0x120c   : > { %v6489_v5 = vadd.f32 1.0, %v6477_v59  ;;  %v6467_v7 = vand.u32 2147483647, %v13088_v26  ;;  %v6645_v48 = vmul.f32 %v6633_v41, %v6465_v10  ;;  %vm6443_vm1 = vcmp.ge.f32.partialorder %v13088_v26, 0.0 }
0x120d   : > { %v6488_v21 = vadd.f32 1.0, %v6476_v46  ;;  %v6466_v42 = vand.u32 2147483647, %v13091_v22  ;;  %v6644_v25 = vmul.f32 %v6632_v14, %v6464_v34  ;;  %vm6442_vm2 = vcmp.ge.f32.partialorder %v13091_v22, 0.0 }
0x120e   : > { %9788 = vrcp.f32 %v6489_v5  ;;  %v6479_v15 = vmul.f32 0.3275911, %v6467_v7  ;;  %v6635_v63 = vsub.f32 0.0, %v6467_v7  ;;  %v6662_v33 = vmul.f32 1.442695, %v6645_v48 }
0x120f   : > { %v9785_v58 = vpop.eup %9784  ;;  %9790 = vrcp.f32 %v6488_v21  ;;  %v6478_v11 = vmul.f32 0.3275911, %v6466_v42  ;;  %v6634_v5 = vsub.f32 0.0, %v6466_v42  ;;  %v13102_v21 = vmul.f32 0.5, %v13054_v32 }
0x1210   : > { %v9787_v16 = vpop.eup %9786  ;;  %v6523_v61 = vmul.f32 1.0614054, %v9785_v58  ;;  %v6491_v45 = vadd.f32 1.0, %v6479_v15  ;;  %v6454_v43 = vsel %vm6442_vm2, 1.0, %v10369_v20 }
0x1211   : > { %v6522_v0 = vmul.f32 1.0614054, %v9787_v16  ;;  %v6490_v30 = vadd.f32 1.0, %v6478_v11 }
0x1212   : > { %v6535_v1 = vadd.f32 -1.4531521, %v6523_v61  ;;  %9792 = vrcp.f32 %v6491_v45  ;;  %v6660_v61 = vmul.f32 1.442695, %v6644_v25 }
0x1213   : > { %v6534_v4 = vadd.f32 -1.4531521, %v6522_v0  ;;  %9794 = vrcp.f32 %v6490_v30 }
0x1214   : > { %v6547_v52 = vmul.f32 %v9785_v58, %v6535_v1  ;;  %9796 = vpow2.f32 %v6658_v50  ;;  %v6647_v1 = vmul.f32 %v6635_v63, %v6467_v7 }
0x1215   : > { %v6546_v56 = vmul.f32 %v9787_v16, %v6534_v4  ;;  %9798 = vpow2.f32 %v6656_v36 }
0x1216   : > { %v6559_v18 = vadd.f32 1.4214138, %v6547_v52  ;;  %9800 = vpow2.f32 %v6662_v33  ;;  %v6646_v52 = vmul.f32 %v6634_v5, %v6466_v42  ;;  %v6666_v48 = vmul.f32 1.442695, %v6647_v1 }
0x1217   : > { %v6558_v57 = vadd.f32 1.4214138, %v6546_v56  ;;  %9802 = vpow2.f32 %v6660_v61  ;;  %v6450_v61 = vsel %vm6438_vm14, 1.0, %v10369_v20 }
0x1218   : > { %v13095_v12 = vpop.eup %9788  ;;  %v6571_v38 = vmul.f32 %v9785_v58, %v6559_v18  ;;  %9804 = vpow2.f32 %v6666_v48 }
0x1219   : > { %v13097_v39 = vpop.eup %9790  ;;  %v6570_v60 = vmul.f32 %v9787_v16, %v6558_v57  ;;  %v6525_v24 = vmul.f32 1.0614054, %v13095_v12 }
0x121a   : > { %v6583_v59 = vadd.f32 -0.28449672, %v6571_v38  ;;  %v6524_v46 = vmul.f32 1.0614054, %v13097_v39 }
0x121b   : > { %v6582_v29 = vadd.f32 -0.28449672, %v6570_v60  ;;  %v6537_v10 = vadd.f32 -1.4531521, %v6525_v24 }
0x121c   : > { %v6595_v6 = vmul.f32 %v9785_v58, %v6583_v59  ;;  %v6536_v15 = vadd.f32 -1.4531521, %v6524_v46  ;;  %v13104_v34 = vpop.eup %9792  ;;  %v6664_v59 = vmul.f32 1.442695, %v6646_v52 }
0x121d   : > { %v6594_v0 = vmul.f32 %v9787_v16, %v6582_v29  ;;  %v6549_v45 = vmul.f32 %v13095_v12, %v6537_v10  ;;  %v6527_v32 = vmul.f32 1.0614054, %v13104_v34  ;;  %v13113_v36 = vpop.eup %9794 }
0x121e   : > { %v6607_v41 = vadd.f32 0.2548296, %v6595_v6  ;;  %v6548_v11 = vmul.f32 %v13097_v39, %v6536_v15  ;;  %v9797_v56 = vpop.eup %9796  ;;  %v6526_v57 = vmul.f32 1.0614054, %v13113_v36  ;;  %9806 = vpow2.f32 %v6664_v59 }
0x121f   : > { %v6606_v50 = vadd.f32 0.2548296, %v6594_v0  ;;  %v6561_v4 = vadd.f32 1.4214138, %v6549_v45  ;;  %v6539_v30 = vadd.f32 -1.4531521, %v6527_v32  ;;  %v9799_v38 = vpop.eup %9798 }
0x1220   : > { %v6619_v14 = vmul.f32 %v9785_v58, %v6607_v41  ;;  %v6560_v37 = vadd.f32 1.4214138, %v6548_v11  ;;  %v6538_v63 = vadd.f32 -1.4531521, %v6526_v57 }
0x1221   : > { %v6618_v18 = vmul.f32 %v9787_v16, %v6606_v50  ;;  %v6573_v7 = vmul.f32 %v13095_v12, %v6561_v4  ;;  %v6551_v42 = vmul.f32 %v13104_v34, %v6539_v30  ;;  %v6451_v16 = vsel %vm6439_vm13, 1.0, %v10369_v20 }
0x1222   : > { %v6679_v25 = vmul.f32 %v9797_v56, %v6619_v14  ;;  %v6572_v60 = vmul.f32 %v13097_v39, %v6560_v37  ;;  %v6550_v6 = vmul.f32 %v13113_v36, %v6538_v63  ;;  %v9801_v37 = vpop.eup %9800 }
0x1223   : > { %v6678_v24 = vmul.f32 %v9799_v38, %v6618_v18  ;;  %v6585_v58 = vadd.f32 -0.28449672, %v6573_v7  ;;  %v6563_v29 = vadd.f32 1.4214138, %v6551_v42  ;;  %v9803_v7 = vpop.eup %9802 }
0x1224   : > { %v6691_v33 = vsub.f32 1.0, %v6679_v25  ;;  %v6584_v46 = vadd.f32 -0.28449672, %v6572_v60  ;;  %v6562_v41 = vadd.f32 1.4214138, %v6550_v6 }
0x1225   : > { %v6690_v10 = vsub.f32 1.0, %v6678_v24  ;;  %v6597_v5 = vmul.f32 %v13095_v12, %v6585_v58  ;;  %v6575_v45 = vmul.f32 %v13104_v34, %v6563_v29 }
0x1226   : > { %v6703_v15 = vmul.f32 %v6691_v33, %v6451_v16  ;;  %v6596_v0 = vmul.f32 %v13097_v39, %v6584_v46  ;;  %v6574_v56 = vmul.f32 %v13113_v36, %v6562_v41 }
0x1227   : > { %v6702_v51 = vmul.f32 %v6690_v10, %v6450_v61  ;;  %v6609_v1 = vadd.f32 0.2548296, %v6597_v5  ;;  %v8987_v11 = vpop.f32.mrb[128].mxu1  ;;  %v6587_v4 = vadd.f32 -0.28449672, %v6575_v45  ;;  %v6452_v10 = vsel %vm6440_vm0, 1.0, %v10369_v20 }
0x1228   : > { %v6715_v32 = vadd.f32 1.0, %v6703_v15  ;;  %v6608_v50 = vadd.f32 0.2548296, %v6596_v0  ;;  %v13131_v52 = vadd.f32 %v8987_v11, %v13045_v19  ;;  %v6393_v14 = vpop.f32.mrb[129].mxu1  ;;  %v6586_v60 = vadd.f32 -0.28449672, %v6574_v56 }
0x1229   : > { %v6714_v30 = vadd.f32 1.0, %v6702_v51  ;;  %v6621_v35 = vmul.f32 %v13095_v12, %v6609_v1  ;;  %v13136_v18 = vadd.f32 %v13045_v19, %v6393_v14  ;;  %v6599_v57 = vmul.f32 %v13104_v34, %v6587_v4 }
0x122a   : > { %v6620_v48 = vmul.f32 %v13097_v39, %v6608_v50  ;;  %v13144_v12 = vmul.f32 0.70710677, %v13131_v52  ;;  %v6727_v42 = vmul.f32 %v6715_v32, %v13102_v21  ;;  %v6598_v16 = vmul.f32 %v13113_v36, %v6586_v60  ;;  %v9805_v21 = vpop.eup %9804 }
0x122b   : > { %v6726_v38 = vmul.f32 %v6714_v30, %v13107_v3  ;;  %v6681_v25 = vmul.f32 %v9801_v37, %v6621_v35  ;;  %v6611_v58 = vadd.f32 0.2548296, %v6599_v57  ;;  %v13148_v63 = vmul.f32 0.70710677, %v13136_v18  ;;  %v9807_v51 = vpop.eup %9806 }
0x122c   : > { %v6680_v24 = vmul.f32 %v9803_v7, %v6620_v48  ;;  %v6469_v39 = vand.u32 2147483647, %v13144_v12  ;;  %v6453_v3 = vsel %vm6441_vm15, 1.0, %v10369_v20  ;;  %v6610_v5 = vadd.f32 0.2548296, %v6598_v16 }
0x122d   : > { %v6693_v59 = vsub.f32 1.0, %v6681_v25  ;;  %9010 = vmatprep.mubr.msk.f32.mxu0 %vm6751_vm12, %v6726_v38  ;;  %v6623_v46 = vmul.f32 %v13104_v34, %v6611_v58  ;;  %v6468_v44 = vand.u32 2147483647, %v13148_v63  ;;  %v6417_v34 = vmul.f32 0.5, %v13068_v62 }
0x122e   : > { %v6692_v33 = vsub.f32 1.0, %v6680_v24  ;;  %9011 = vmatmul.mubr.msk.f32.gmra.mrb[122].mxu0 %vm6751_vm12, %v6727_v42  ;;  %v6481_v6 = vmul.f32 0.3275911, %v6469_v39  ;;  %v6622_v41 = vmul.f32 %v13113_v36, %v6610_v5  ;;  %v6455_v14 = vsel %vm6443_vm1, 1.0, %v10369_v20 }
0x122f   : > { %v6705_v29 = vmul.f32 %v6693_v59, %v6453_v3  ;;  %v8990_v15 = vpop.f32.mrb[130].mxu1  ;;  %v6683_v0 = vmul.f32 %v9805_v21, %v6623_v46  ;;  %v6480_v4 = vmul.f32 0.3275911, %v6468_v44  ;;  %v6418_v25 = vmul.f32 0.5, %v13085_v17 }
0x1230   : > { %v6704_v61 = vmul.f32 %v6692_v33, %v6452_v10  ;;  %v6403_v45 = vpop.f32.mrb[131].mxu1  ;;  %v6493_v11 = vadd.f32 1.0, %v6481_v6  ;;  %v6682_v26 = vmul.f32 %v9807_v51, %v6622_v41  ;;  %v13169_v7 = vadd.f32 %v8990_v15, %v13045_v19 }
0x1231   : > { %v6717_v1 = vadd.f32 1.0, %v6705_v29  ;;  %v6695_v50 = vsub.f32 1.0, %v6683_v0  ;;  %v6492_v35 = vadd.f32 1.0, %v6480_v4  ;;  %v13172_v36 = vadd.f32 %v13045_v19, %v6403_v45 }
0x1232   : > { %v6716_v32 = vadd.f32 1.0, %v6704_v61  ;;  %9808 = vrcp.f32 %v6493_v11  ;;  %v6694_v62 = vsub.f32 1.0, %v6682_v26  ;;  %v13177_v22 = vmul.f32 0.70710677, %v13169_v7 }
0x1233   : > { %v6707_v30 = vmul.f32 %v6695_v50, %v6455_v14  ;;  %v6729_v56 = vmul.f32 %v6717_v1, %v6417_v34  ;;  %9810 = vrcp.f32 %v6492_v35  ;;  %v13181_v38 = vmul.f32 0.70710677, %v13172_v36 }
0x1234   : > { %v6728_v37 = vmul.f32 %v6716_v32, %v6416_v54  ;;  %v6706_v48 = vmul.f32 %v6694_v62, %v6454_v43  ;;  %v6637_v19 = vsub.f32 0.0, %v6469_v39  ;;  %v6471_v42 = vand.u32 2147483647, %v13177_v22 }
0x1235   : > { %v6719_v57 = vadd.f32 1.0, %v6707_v30  ;;  %v6419_v24 = vmul.f32 0.5, %v13081_v2  ;;  %v6470_v58 = vand.u32 2147483647, %v13181_v38  ;;  %v6636_v33 = vsub.f32 0.0, %v6468_v44 }
0x1236   : > { %9013 = vmatprep.mubr.msk.f32.mxu0 %vm6751_vm12, %v6728_v37  ;;  %v6718_v60 = vadd.f32 1.0, %v6706_v48  ;;  %v6483_v16 = vmul.f32 0.3275911, %v6471_v42  ;;  %v6649_v29 = vmul.f32 %v6637_v19, %v6469_v39  ;;  %v6639_v41 = vsub.f32 0.0, %v6471_v42 }
0x1237   : > { %9014 = vmatmul.mubr.msk.f32.gmra.mrb[124].mxu0 %vm6751_vm12, %v6729_v56  ;;  %v6731_v3 = vmul.f32 %v6719_v57, %v6419_v24  ;;  %v6482_v46 = vmul.f32 0.3275911, %v6470_v58  ;;  %v6648_v2 = vmul.f32 %v6636_v33, %v6468_v44  ;;  %v6638_v54 = vsub.f32 0.0, %v6470_v58 }
0x1238   : > { %v6730_v59 = vmul.f32 %v6718_v60, %v6418_v25  ;;  %v6495_v10 = vadd.f32 1.0, %v6483_v16  ;;  %v6670_v61 = vmul.f32 1.442695, %v6649_v29  ;;  %v6651_v26 = vmul.f32 %v6639_v41, %v6471_v42 }
0x1239   : > { %v6494_v17 = vadd.f32 1.0, %v6482_v46  ;;  %v6668_v1 = vmul.f32 1.442695, %v6648_v2  ;;  %v6650_v35 = vmul.f32 %v6638_v54, %v6470_v58  ;;  %vm6445_vm4 = vcmp.ge.f32.partialorder %v13144_v12, 0.0 }
0x123a   : > { %9016 = vmatprep.mubr.msk.f32.mxu0 %vm6751_vm12, %v6730_v59  ;;  %9812 = vrcp.f32 %v6495_v10  ;;  %v6674_v25 = vmul.f32 1.442695, %v6651_v26  ;;  %vm6444_vm5 = vcmp.ge.f32.partialorder %v13148_v63, 0.0  ;;  %vm6447_vm6 = vcmp.ge.f32.partialorder %v13177_v22, 0.0 }
0x123b   : > { %9017 = vmatmul.mubr.msk.f32.gmra.mrb[126].mxu0 %vm6751_vm12, %v6731_v3  ;;  %9814 = vrcp.f32 %v6494_v17  ;;  %v6672_v59 = vmul.f32 1.442695, %v6650_v35  ;;  %v6456_v12 = vsel %vm6444_vm5, 1.0, %v10369_v20  ;;  %vm6446_vm7 = vcmp.ge.f32.partialorder %v13181_v38, 0.0 }
0x123c   : > { %v9809_v21 = vpop.eup %9808  ;;  %9816 = vpow2.f32 %v6670_v61  ;;  %v6422_v22 = vmul.f32 0.5, %v13172_v36  ;;  %v6423_v38 = vmul.f32 0.5, %v13169_v7  ;;  %vm7272_vm5 = vcmask (!%p8030_p12), 1041409  }
0x123d   : > { %v6529_v5 = vmul.f32 1.0614054, %v9809_v21  ;;  %v9811_v6 = vpop.eup %9810  ;;  %9818 = vpow2.f32 %v6668_v1 }
0x123e   : > { %v6528_v0 = vmul.f32 1.0614054, %v9811_v6  ;;  %9820 = vpow2.f32 %v6674_v25 }
0x123f   : > { %v6541_v15 = vadd.f32 -1.4531521, %v6529_v5  ;;  %9822 = vpow2.f32 %v6672_v59 }
0x1240   : > { %v6540_v51 = vadd.f32 -1.4531521, %v6528_v0 }
0x1241   : > { %v6553_v45 = vmul.f32 %v9809_v21, %v6541_v15  ;;  %v6457_v15 = vsel %vm6445_vm4, 1.0, %v10369_v20 }
0x1242   : > { %v6552_v39 = vmul.f32 %v9811_v6, %v6540_v51 }
0x1243   : > { %v6565_v34 = vadd.f32 1.4214138, %v6553_v45 }
0x1244   : > { %v6564_v32 = vadd.f32 1.4214138, %v6552_v39  ;;  %v9813_v4 = vpop.eup %9812 }
0x1245   : > { %v6577_v11 = vmul.f32 %v9809_v21, %v6565_v34  ;;  %v9815_v37 = vpop.eup %9814  ;;  %v6531_v30 = vmul.f32 1.0614054, %v9813_v4 }
0x1246   : > { %v6576_v14 = vmul.f32 %v9811_v6, %v6564_v32  ;;  %v6530_v62 = vmul.f32 1.0614054, %v9815_v37  ;;  %v9817_v16 = vpop.eup %9816 }
0x1247   : > { %v6589_v50 = vadd.f32 -0.28449672, %v6577_v11  ;;  %v6543_v48 = vadd.f32 -1.4531521, %v6531_v30  ;;  %v9819_v10 = vpop.eup %9818  ;;  %v6420_v11 = vmul.f32 0.5, %v13136_v18 }
0x1248   : > { %v6588_v56 = vadd.f32 -0.28449672, %v6576_v14  ;;  %v6542_v60 = vadd.f32 -1.4531521, %v6530_v62  ;;  %v9821_v14 = vpop.eup %9820 }
0x1249   : > { %v6601_v44 = vmul.f32 %v9809_v21, %v6589_v50  ;;  %v6555_v24 = vmul.f32 %v9813_v4, %v6543_v48  ;;  %v6421_v50 = vmul.f32 0.5, %v13131_v52  ;;  %v9823_v30 = vpop.eup %9822  ;;  %v6459_v52 = vsel %vm6447_vm6, 1.0, %v10369_v20 }
0x124a   : > { %v6600_v57 = vmul.f32 %v9811_v6, %v6588_v56  ;;  %v6554_v33 = vmul.f32 %v9815_v37, %v6542_v60  ;;  %vm7275_vm6 = vcmask (!%p8030_p12), 1042434  }
0x124b   : > { %v6613_v43 = vadd.f32 0.2548296, %v6601_v44  ;;  %v6567_v46 = vadd.f32 1.4214138, %v6555_v24  ;;  %v13210_v24 = vld [vmem:[%s1094_s2] ss:$0 sm:$0xff] }
0x124c   : > { %v6612_v3 = vadd.f32 0.2548296, %v6600_v57  ;;  %v6566_v58 = vadd.f32 1.4214138, %v6554_v33 }
0x124d   : > { %v6625_v19 = vmul.f32 %v9809_v21, %v6613_v43  ;;  %v6579_v17 = vmul.f32 %v9813_v4, %v6567_v46 }
0x124e   : > { %v6624_v29 = vmul.f32 %v9811_v6, %v6612_v3  ;;  %v6578_v2 = vmul.f32 %v9815_v37, %v6566_v58 }
0x124f   : > { %v6685_v42 = vmul.f32 %v9817_v16, %v6625_v19  ;;  %v6591_v0 = vadd.f32 -0.28449672, %v6579_v17 }
0x1250   : > { %v6684_v21 = vmul.f32 %v9819_v10, %v6624_v29  ;;  %v6590_v51 = vadd.f32 -0.28449672, %v6578_v2 }
0x1251   : > { %v6697_v5 = vsub.f32 1.0, %v6685_v42  ;;  %v6603_v34 = vmul.f32 %v9813_v4, %v6591_v0 }
0x1252   : > { %v6696_v45 = vsub.f32 1.0, %v6684_v21  ;;  %v6602_v1 = vmul.f32 %v9815_v37, %v6590_v51 }
0x1253   : > { %v6709_v61 = vmul.f32 %v6697_v5, %v6457_v15  ;;  %v6615_v41 = vadd.f32 0.2548296, %v6603_v34 }
0x1254   : > { %v6708_v6 = vmul.f32 %v6696_v45, %v6456_v12  ;;  %v6614_v32 = vadd.f32 0.2548296, %v6602_v1 }
0x1255   : > { %v6721_v39 = vadd.f32 1.0, %v6709_v61  ;;  %v6627_v63 = vmul.f32 %v9813_v4, %v6615_v41 }
0x1256   : > { %v6720_v54 = vadd.f32 1.0, %v6708_v6  ;;  %v6626_v44 = vmul.f32 %v9815_v37, %v6614_v32  ;;  %v6458_v37 = vsel %vm6446_vm7, 1.0, %v10369_v20  ;;  %vm7278_vm7 = vcmask (!%p8030_p12), 1043459  }
0x1257   : > { %v6733_v35 = vmul.f32 %v6721_v39, %v6421_v50  ;;  %v6687_v56 = vmul.f32 %v9821_v14, %v6627_v63 }
0x1258   : > { %v6732_v26 = vmul.f32 %v6720_v54, %v6420_v11  ;;  %v6686_v62 = vmul.f32 %v9823_v30, %v6626_v44 }
0x1259   : > { %v6699_v18 = vsub.f32 1.0, %v6687_v56 }
0x125a   : > { %9019 = vmatprep.mubr.msk.f32.mxu0 %vm6751_vm12, %v6732_v26  ;;  %v6698_v4 = vsub.f32 1.0, %v6686_v62 }
0x125b   : > { %9020 = vmatmul.mubr.msk.f32.gmra.mrb[128].mxu0 %vm6751_vm12, %v6733_v35  ;;  %v6711_v43 = vmul.f32 %v6699_v18, %v6459_v52 }
0x125c   : > { %v6710_v48 = vmul.f32 %v6698_v4, %v6458_v37 }
0x125d   : > { %v6723_v57 = vadd.f32 1.0, %v6711_v43 }
0x125e   : > { %v6722_v25 = vadd.f32 1.0, %v6710_v48 }
0x125f   : > { %v6735_v19 = vmul.f32 %v6723_v57, %v6423_v38 }
0x1260   : > { %v6734_v60 = vmul.f32 %v6722_v25, %v6422_v22 }
0x1262   : > { %9022 = vmatprep.mubr.msk.f32.mxu0 %vm6751_vm12, %v6734_v60 }
0x1263   : > { %9023 = vmatmul.mubr.msk.f32.gmra.mrb[130].mxu0 %vm6751_vm12, %v6735_v19 }
0x12cd   : > { %v9009_v59 = vpop.f32.mrb[120].mxu0 }
0x12ce   : > { %v6860_v16 = vadd.f32 %v9009_v59, %v13210_v24  ;;  %v6854_v3 = vpop.f32.mrb[121].mxu0 }
0x12cf   : > { %v6855_v36 = vadd.f32 %v13210_v24, %v6854_v3 }
0x12d0   : > { %v6926_v33 = vmul.f32 0.70710677, %v6860_v16  ;;  %v6914_v60 = vmul.f32 0.5, %v6860_v16 }
0x12d1   : > { %v6925_v7 = vmul.f32 0.70710677, %v6855_v36  ;;  %v6913_v59 = vmul.f32 0.5, %v6855_v36 }
0x12d2   : > { %v6962_v42 = vand.u32 2147483647, %v6926_v33  ;;  %vm6938_vm8 = vcmp.ge.f32.partialorder %v6926_v33, 0.0 }
0x12d3   : > { %v6961_v46 = vand.u32 2147483647, %v6925_v7  ;;  %vm6937_vm9 = vcmp.ge.f32.partialorder %v6925_v7, 0.0  ;;  %v6950_v48 = vsel %vm6938_vm8, 1.0, %v10369_v20  ;;  %vm7281_vm8 = vcmask (!%p8030_p12), 257024  }
0x12d4   : > { %v6974_v29 = vmul.f32 0.3275911, %v6962_v42  ;;  %v7130_v17 = vsub.f32 0.0, %v6962_v42  ;;  %v6949_v25 = vsel %vm6937_vm9, 1.0, %v10369_v20  ;;  %vm10371_vm9 = vmmov (!%p8030_p12), 0  }
0x12d5   : > { %v6973_v58 = vmul.f32 0.3275911, %v6961_v46  ;;  %v7129_v15 = vsub.f32 0.0, %v6961_v46 }
0x12d6   : > { %v6986_v10 = vadd.f32 1.0, %v6974_v29  ;;  %v7142_v2 = vmul.f32 %v7130_v17, %v6962_v42 }
0x12d7   : > { %v6985_v5 = vadd.f32 1.0, %v6973_v58  ;;  %v7141_v45 = vmul.f32 %v7129_v15, %v6961_v46 }
0x12d8   : > { %9824 = vrcp.f32 %v6986_v10  ;;  %v7155_v34 = vmul.f32 1.442695, %v7142_v2 }
0x12d9   : > { %9826 = vrcp.f32 %v6985_v5  ;;  %v7153_v39 = vmul.f32 1.442695, %v7141_v45 }
0x12da   : > { %9828 = vpow2.f32 %v7155_v34 }
0x12db   : > { %9830 = vpow2.f32 %v7153_v39 }
0x12e2   : > { %v9825_v21 = vpop.eup %9824 }
0x12e3   : > { %v9827_v61 = vpop.eup %9826  ;;  %v7022_v0 = vmul.f32 1.0614054, %v9825_v21 }
0x12e4   : > { %v7021_v51 = vmul.f32 1.0614054, %v9827_v61  ;;  %v9829_v62 = vpop.eup %9828 }
0x12e5   : > { %v7034_v12 = vadd.f32 -1.4531521, %v7022_v0  ;;  %v9831_v52 = vpop.eup %9830 }
0x12e6   : > { %v7033_v6 = vadd.f32 -1.4531521, %v7021_v51 }
0x12e7   : > { %v7046_v1 = vmul.f32 %v9825_v21, %v7034_v12 }
0x12e8   : > { %v7045_v41 = vmul.f32 %v9827_v61, %v7033_v6 }
0x12e9   : > { %v7058_v11 = vadd.f32 1.4214138, %v7046_v1 }
0x12ea   : > { %v7057_v54 = vadd.f32 1.4214138, %v7045_v41 }
0x12eb   : > { %v7070_v32 = vmul.f32 %v9825_v21, %v7058_v11 }
0x12ec   : > { %v7069_v50 = vmul.f32 %v9827_v61, %v7057_v54 }
0x12ed   : > { %v7082_v63 = vadd.f32 -0.28449672, %v7070_v32 }
0x12ee   : > { %v7081_v14 = vadd.f32 -0.28449672, %v7069_v50 }
0x12ef   : > { %v7094_v26 = vmul.f32 %v9825_v21, %v7082_v63 }
0x12f0   : > { %v7093_v44 = vmul.f32 %v9827_v61, %v7081_v14 }
0x12f1   : > { %v7106_v30 = vadd.f32 0.2548296, %v7094_v26 }
0x12f2   : > { %v7105_v35 = vadd.f32 0.2548296, %v7093_v44 }
0x12f3   : > { %v7118_v56 = vmul.f32 %v9825_v21, %v7106_v30 }
0x12f4   : > { %v7117_v18 = vmul.f32 %v9827_v61, %v7105_v35 }
0x12f5   : > { %v7178_v4 = vmul.f32 %v9829_v62, %v7118_v56 }
0x12f6   : > { %v7177_v43 = vmul.f32 %v9831_v52, %v7117_v18 }
0x12f7   : > { %v7190_v37 = vsub.f32 1.0, %v7178_v4 }
0x12f8   : > { %v7189_v57 = vsub.f32 1.0, %v7177_v43 }
0x12f9   : > { %v7202_v22 = vmul.f32 %v7190_v37, %v6950_v48 }
0x12fa   : > { %v7201_v38 = vmul.f32 %v7189_v57, %v6949_v25 }
0x12fb   : > { %v7214_v19 = vadd.f32 1.0, %v7202_v22 }
0x12fc   : > { %v7213_v3 = vadd.f32 1.0, %v7201_v38 }
0x12fd   : > { %v7226_v42 = vmul.f32 %v7214_v19, %v6914_v60 }
0x12fe   : > { %v7225_v46 = vmul.f32 %v7213_v3, %v6913_v59 }
0x12ff   : > { %v7238_v29 = vadd.f32 %v7226_v42, %v12842_v47 }
0x1300   : > { %v13218_v33 = vadd.f32 %v7225_v46, %v12844_v9 }
0x1301   : > { %7250 = vst.msk [vmem:[#allocation2 + $0x8] sm:$0xff] %vm1334_vm3, %v7238_v29  ;;  %v9012_v7 = vpop.f32.mrb[122].mxu0 }
0x1302   : > { %7249 = vst.msk [vmem:[#allocation2] sm:$0xff] %vm1334_vm3, %v13218_v33  ;;  %v13224_v58 = vadd.f32 %v9012_v7, %v13210_v24  ;;  %v6864_v16 = vpop.f32.mrb[123].mxu0 }
0x1303   : > { %v13227_v36 = vadd.f32 %v13210_v24, %v6864_v16 }
0x1304   : > { %v13230_v10 = vmul.f32 0.70710677, %v13224_v58 }
0x1305   : > { %v13233_v47 = vmul.f32 0.70710677, %v13227_v36 }
0x1306   : > { %v6964_v9 = vand.u32 2147483647, %v13230_v10  ;;  %vm6940_vm10 = vcmp.ge.f32.partialorder %v13230_v10, 0.0 }
0x1307   : > { %v6963_v5 = vand.u32 2147483647, %v13233_v47  ;;  %vm6939_vm11 = vcmp.ge.f32.partialorder %v13233_v47, 0.0 }
0x1308   : > { %v6976_v17 = vmul.f32 0.3275911, %v6964_v9  ;;  %v7132_v39 = vsub.f32 0.0, %v6964_v9 }
0x1309   : > { %v6975_v15 = vmul.f32 0.3275911, %v6963_v5  ;;  %v7131_v54 = vsub.f32 0.0, %v6963_v5 }
0x130a   : > { %v6988_v21 = vadd.f32 1.0, %v6976_v17  ;;  %v9015_v2 = vpop.f32.mrb[124].mxu0  ;;  %v7144_v35 = vmul.f32 %v7132_v39, %v6964_v9 }
0x130b   : > { %v6987_v61 = vadd.f32 1.0, %v6975_v15  ;;  %v13238_v0 = vadd.f32 %v9015_v2, %v13210_v24  ;;  %v6874_v45 = vpop.f32.mrb[125].mxu0  ;;  %v7143_v18 = vmul.f32 %v7131_v54, %v6963_v5 }
0x130c   : > { %9832 = vrcp.f32 %v6988_v21  ;;  %v13241_v51 = vadd.f32 %v13210_v24, %v6874_v45  ;;  %v7159_v22 = vmul.f32 1.442695, %v7144_v35  ;;  %v6916_v35 = vmul.f32 0.5, %v13224_v58 }
0x130d   : > { %9834 = vrcp.f32 %v6987_v61  ;;  %v13244_v12 = vmul.f32 0.70710677, %v13238_v0  ;;  %v7157_v60 = vmul.f32 1.442695, %v7143_v18 }
0x130e   : > { %v13247_v34 = vmul.f32 0.70710677, %v13241_v51  ;;  %v9018_v11 = vpop.f32.mrb[126].mxu0 }
0x130f   : > { %v6966_v6 = vand.u32 2147483647, %v13244_v12  ;;  %v13252_v50 = vadd.f32 %v9018_v11, %v13210_v24  ;;  %v6884_v63 = vpop.f32.mrb[127].mxu0  ;;  %vm6942_vm12 = vcmp.ge.f32.partialorder %v13244_v12, 0.0 }
0x1310   : > { %v6965_v1 = vand.u32 2147483647, %v13247_v34  ;;  %v13255_v26 = vadd.f32 %v13210_v24, %v6884_v63  ;;  %vm6941_vm13 = vcmp.ge.f32.partialorder %v13247_v34, 0.0  ;;  %v6917_v34 = vmul.f32 0.5, %v13241_v51 }
0x1311   : > { %v6978_v41 = vmul.f32 0.3275911, %v6966_v6  ;;  %v13258_v30 = vmul.f32 0.70710677, %v13252_v50  ;;  %v7134_v3 = vsub.f32 0.0, %v6966_v6 }
0x1312   : > { %v6977_v32 = vmul.f32 0.3275911, %v6965_v1  ;;  %v13261_v56 = vmul.f32 0.70710677, %v13255_v26  ;;  %v7133_v29 = vsub.f32 0.0, %v6965_v1 }
0x1313   : > { %v6990_v14 = vadd.f32 1.0, %v6978_v41  ;;  %v6968_v52 = vand.u32 2147483647, %v13258_v30  ;;  %v7146_v15 = vmul.f32 %v7134_v3, %v6966_v6  ;;  %vm6944_vm14 = vcmp.ge.f32.partialorder %v13258_v30, 0.0 }
0x1314   : > { %v6989_v44 = vadd.f32 1.0, %v6977_v32  ;;  %v6967_v25 = vand.u32 2147483647, %v13261_v56  ;;  %v7145_v45 = vmul.f32 %v7133_v29, %v6965_v1  ;;  %vm6943_vm15 = vcmp.ge.f32.partialorder %v13261_v56, 0.0 }
0x1315   : > { %9836 = vrcp.f32 %v6990_v14  ;;  %v6980_v48 = vmul.f32 0.3275911, %v6968_v52  ;;  %v7136_v32 = vsub.f32 0.0, %v6968_v52  ;;  %v7163_v14 = vmul.f32 1.442695, %v7146_v15 }
0x1316   : > { %v9833_v62 = vpop.eup %9832  ;;  %9838 = vrcp.f32 %v6989_v44  ;;  %v6979_v42 = vmul.f32 0.3275911, %v6967_v25  ;;  %v6955_v56 = vsel %vm6943_vm15, 1.0, %v10369_v20 }
0x1317   : > { %v9835_v4 = vpop.eup %9834  ;;  %v7024_v43 = vmul.f32 1.0614054, %v9833_v62  ;;  %v6992_v19 = vadd.f32 1.0, %v6980_v48  ;;  %v6915_v48 = vmul.f32 0.5, %v13227_v36 }
0x1318   : > { %v7023_v37 = vmul.f32 1.0614054, %v9835_v4  ;;  %v6991_v16 = vadd.f32 1.0, %v6979_v42 }
0x1319   : > { %v7036_v57 = vadd.f32 -1.4531521, %v7024_v43  ;;  %9840 = vrcp.f32 %v6992_v19  ;;  %v7161_v43 = vmul.f32 1.442695, %v7145_v45  ;;  %v7148_v19 = vmul.f32 %v7136_v32, %v6968_v52 }
0x131a   : > { %v7035_v38 = vadd.f32 -1.4531521, %v7023_v37  ;;  %9842 = vpow2.f32 %v7159_v22  ;;  %v6952_v45 = vsel %vm6940_vm10, 1.0, %v10369_v20 }
0x131b   : > { %v7048_v59 = vmul.f32 %v9833_v62, %v7036_v57  ;;  %9844 = vpow2.f32 %v7157_v60  ;;  %v7135_v57 = vsub.f32 0.0, %v6967_v25 }
0x131c   : > { %v7047_v46 = vmul.f32 %v9835_v4, %v7035_v38  ;;  %9846 = vrcp.f32 %v6991_v16 }
0x131d   : > { %v7060_v7 = vadd.f32 1.4214138, %v7048_v59  ;;  %9848 = vpow2.f32 %v7163_v14  ;;  %v7147_v52 = vmul.f32 %v7135_v57, %v6967_v25 }
0x131e   : > { %v7059_v9 = vadd.f32 1.4214138, %v7047_v46  ;;  %9850 = vpow2.f32 %v7161_v43 }
0x131f   : > { %v13265_v5 = vpop.eup %9836  ;;  %v7072_v17 = vmul.f32 %v9833_v62, %v7060_v7 }
0x1320   : > { %v13267_v21 = vpop.eup %9838  ;;  %v7071_v2 = vmul.f32 %v9835_v4, %v7059_v9  ;;  %v7026_v61 = vmul.f32 1.0614054, %v13265_v5 }
0x1321   : > { %v7084_v39 = vadd.f32 -0.28449672, %v7072_v17  ;;  %v7025_v41 = vmul.f32 1.0614054, %v13267_v21 }
0x1322   : > { %v7083_v11 = vadd.f32 -0.28449672, %v7071_v2  ;;  %v7038_v54 = vadd.f32 -1.4531521, %v7026_v61  ;;  %v7167_v2 = vmul.f32 1.442695, %v7148_v19 }
0x1323   : > { %v7096_v63 = vmul.f32 %v9833_v62, %v7084_v39  ;;  %v7037_v44 = vadd.f32 -1.4531521, %v7025_v41  ;;  %v13275_v22 = vpop.eup %9840 }
0x1324   : > { %v7095_v18 = vmul.f32 %v9835_v4, %v7083_v11  ;;  %v7050_v6 = vmul.f32 %v13265_v5, %v7038_v54  ;;  %v9843_v59 = vpop.eup %9842  ;;  %v7028_v42 = vmul.f32 1.0614054, %v13275_v22  ;;  %v6951_v11 = vsel %vm6939_vm11, 1.0, %v10369_v20 }
0x1325   : > { %v7108_v37 = vadd.f32 0.2548296, %v7096_v63  ;;  %v7049_v1 = vmul.f32 %v13267_v21, %v7037_v44  ;;  %v9845_v46 = vpop.eup %9844  ;;  %9852 = vpow2.f32 %v7167_v2  ;;  %v6954_v2 = vsel %vm6942_vm12, 1.0, %v10369_v20 }
0x1326   : > { %v7107_v38 = vadd.f32 0.2548296, %v7095_v18  ;;  %v7062_v60 = vadd.f32 1.4214138, %v7050_v6  ;;  %v13281_v7 = vpop.eup %9846  ;;  %v7040_v17 = vadd.f32 -1.4531521, %v7028_v42 }
0x1327   : > { %v7120_v3 = vmul.f32 %v9833_v62, %v7108_v37  ;;  %v7061_v58 = vadd.f32 1.4214138, %v7049_v1  ;;  %v7027_v61 = vmul.f32 1.0614054, %v13281_v7  ;;  %v7165_v18 = vmul.f32 1.442695, %v7147_v52  ;;  %v9849_v19 = vpop.eup %9848 }
0x1328   : > { %v7119_v36 = vmul.f32 %v9835_v4, %v7107_v38  ;;  %v7074_v29 = vmul.f32 %v13265_v5, %v7062_v60  ;;  %v7052_v41 = vmul.f32 %v13275_v22, %v7040_v17 }
0x1329   : > { %v7180_v16 = vmul.f32 %v9843_v59, %v7120_v3  ;;  %v7073_v9 = vmul.f32 %v13267_v21, %v7061_v58  ;;  %v7039_v32 = vadd.f32 -1.4531521, %v7027_v61  ;;  %9854 = vpow2.f32 %v7165_v18 }
0x132a   : > { %v7179_v15 = vmul.f32 %v9845_v46, %v7119_v36  ;;  %v7086_v62 = vadd.f32 -0.28449672, %v7074_v29  ;;  %v7064_v44 = vadd.f32 1.4214138, %v7052_v41  ;;  %v9851_v46 = vpop.eup %9850 }
0x132b   : > { %v7192_v4 = vsub.f32 1.0, %v7180_v16  ;;  %v7085_v39 = vadd.f32 -0.28449672, %v7073_v9  ;;  %v7051_v43 = vmul.f32 %v13281_v7, %v7039_v32  ;;  %v6918_v32 = vmul.f32 0.5, %v13238_v0 }
0x132c   : > { %v7191_v54 = vsub.f32 1.0, %v7179_v15  ;;  %v7098_v25 = vmul.f32 %v13265_v5, %v7086_v62  ;;  %v7076_v47 = vmul.f32 %v13275_v22, %v7064_v44 }
0x132d   : > { %v7204_v63 = vmul.f32 %v7192_v4, %v6952_v45  ;;  %v7097_v14 = vmul.f32 %v13267_v21, %v7085_v39  ;;  %v7063_v60 = vadd.f32 1.4214138, %v7051_v43 }
0x132e   : > { %v7203_v6 = vmul.f32 %v7191_v54, %v6951_v11  ;;  %v7110_v10 = vadd.f32 0.2548296, %v7098_v25  ;;  %v7088_v58 = vadd.f32 -0.28449672, %v7076_v47  ;;  %v9021_v42 = vpop.f32.mrb[128].mxu0  ;;  %v6956_v47 = vsel %vm6944_vm14, 1.0, %v10369_v20 }
0x132f   : > { %v7216_v37 = vadd.f32 1.0, %v7204_v63  ;;  %v7109_v1 = vadd.f32 0.2548296, %v7097_v14  ;;  %v7075_v16 = vmul.f32 %v13281_v7, %v7063_v60  ;;  %v13302_v9 = vadd.f32 %v9021_v42, %v13210_v24  ;;  %v6894_v17 = vpop.f32.mrb[129].mxu0  ;;  %v9853_v25 = vpop.eup %9852 }
0x1330   : > { %v7215_v57 = vadd.f32 1.0, %v7203_v6  ;;  %v7122_v38 = vmul.f32 %v13265_v5, %v7110_v10 }
0x1331   : > { %v7228_v59 = vmul.f32 %v7216_v37, %v6916_v35  ;;  %v7121_v3 = vmul.f32 %v13267_v21, %v7109_v1  ;;  %v7100_v35 = vmul.f32 %v13275_v22, %v7088_v58  ;;  %v13309_v21 = vadd.f32 %v13210_v24, %v6894_v17 }
0x1332   : > { %v7227_v36 = vmul.f32 %v7215_v57, %v6915_v48  ;;  %v7182_v29 = vmul.f32 %v9849_v19, %v7122_v38  ;;  %v7087_v48 = vadd.f32 -0.28449672, %v7075_v16  ;;  %v13318_v45 = vmul.f32 0.70710677, %v13302_v9 }
0x1333   : > { %v13305_v5 = vadd.f32 %v7228_v59, %v12852_v28  ;;  %v7181_v52 = vmul.f32 %v9851_v46, %v7121_v3  ;;  %v7112_v28 = vadd.f32 0.2548296, %v7100_v35  ;;  %v13326_v41 = vmul.f32 0.70710677, %v13309_v21 }
0x1334   : > { %v7239_v15 = vadd.f32 %v7227_v36, %v12854_v8  ;;  %v7194_v62 = vsub.f32 1.0, %v7182_v29  ;;  %v6953_v8 = vsel %vm6941_vm13, 1.0, %v10369_v20  ;;  %v7099_v39 = vmul.f32 %v13281_v7, %v7087_v48 }
0x1335   : > { %7252 = vst.msk [vmem:[#allocation2 + $0x18] sm:$0xff] %vm1334_vm3, %v13305_v5  ;;  %v7193_v61 = vsub.f32 1.0, %v7181_v52  ;;  %v7124_v12 = vmul.f32 %v13275_v22, %v7112_v28  ;;  %v6970_v54 = vand.u32 2147483647, %v13318_v45  ;;  %v6969_v37 = vand.u32 2147483647, %v13326_v41  ;;  %v9855_v22 = vpop.eup %9854 }
0x1336   : > { %7251 = vst.msk [vmem:[#allocation2 + $0x10] sm:$0xff] %vm1334_vm3, %v7239_v15  ;;  %v7206_v4 = vmul.f32 %v7194_v62, %v6954_v2  ;;  %v7111_v14 = vadd.f32 0.2548296, %v7099_v39  ;;  %v9024_v38 = vpop.f32.mrb[130].mxu0  ;;  %v6919_v52 = vmul.f32 0.5, %v13255_v26  ;;  %vm6946_vm0 = vcmp.ge.f32.partialorder %v13318_v45, 0.0 }
0x1337   : > { %v7205_v11 = vmul.f32 %v7193_v61, %v6953_v8  ;;  %v7184_v18 = vmul.f32 %v9853_v25, %v7124_v12  ;;  %v6982_v6 = vmul.f32 0.3275911, %v6970_v54  ;;  %v6981_v60 = vmul.f32 0.3275911, %v6969_v37  ;;  %v6904_v19 = vpop.f32.mrb[131].mxu0 }
0x1338   : > { %v7218_v63 = vadd.f32 1.0, %v7206_v4  ;;  %v7123_v43 = vmul.f32 %v13281_v7, %v7111_v14  ;;  %v13341_v42 = vadd.f32 %v9024_v38, %v13210_v24  ;;  %v13347_v36 = vadd.f32 %v13210_v24, %v6904_v19 }
0x1339   : > { %v7217_v44 = vadd.f32 1.0, %v7205_v11  ;;  %v7196_v57 = vsub.f32 1.0, %v7184_v18  ;;  %v6994_v0 = vadd.f32 1.0, %v6982_v6  ;;  %v6993_v58 = vadd.f32 1.0, %v6981_v60 }
0x133a   : > { %v7230_v10 = vmul.f32 %v7218_v63, %v6918_v32  ;;  %v7183_v51 = vmul.f32 %v9855_v22, %v7123_v43  ;;  %v13350_v16 = vmul.f32 0.70710677, %v13341_v42  ;;  %v13353_v17 = vmul.f32 0.70710677, %v13347_v36 }
0x133b   : > { %v7229_v1 = vmul.f32 %v7217_v44, %v6917_v34  ;;  %v7208_v3 = vmul.f32 %v7196_v57, %v6956_v47  ;;  %9856 = vrcp.f32 %v6994_v0  ;;  %v7138_v15 = vsub.f32 0.0, %v6970_v54 }
0x133c   : > { %v7242_v30 = vadd.f32 %v7230_v10, %v12862_v27  ;;  %v7195_v7 = vsub.f32 1.0, %v7183_v51  ;;  %v6920_v27 = vmul.f32 0.5, %v13252_v50  ;;  %9858 = vrcp.f32 %v6993_v58 }
0x133d   : > { %v7241_v59 = vadd.f32 %v7229_v1, %v12864_v40  ;;  %v7220_v46 = vadd.f32 1.0, %v7208_v3  ;;  %v6972_v62 = vand.u32 2147483647, %v13350_v16  ;;  %v6971_v24 = vand.u32 2147483647, %v13353_v17 }
0x133e   : > { %7254 = vst.msk [vmem:[#allocation2 + $0x28] sm:$0xff] %vm1334_vm3, %v7242_v30  ;;  %v7207_v40 = vmul.f32 %v7195_v7, %v6955_v56  ;;  %v7137_v28 = vsub.f32 0.0, %v6969_v37  ;;  %v7150_v39 = vmul.f32 %v7138_v15, %v6970_v54  ;;  %vm6945_vm1 = vcmp.ge.f32.partialorder %v13326_v41, 0.0 }
0x133f   : > { %7253 = vst.msk [vmem:[#allocation2 + $0x20] sm:$0xff] %vm1334_vm3, %v7241_v59  ;;  %v7232_v29 = vmul.f32 %v7220_v46, %v6920_v27  ;;  %v6984_v2 = vmul.f32 0.3275911, %v6972_v62  ;;  %v6983_v4 = vmul.f32 0.3275911, %v6971_v24  ;;  %v7140_v54 = vsub.f32 0.0, %v6972_v62 }
0x1340   : > { %v7219_v35 = vadd.f32 1.0, %v7207_v40  ;;  %v7149_v32 = vmul.f32 %v7137_v28, %v6969_v37  ;;  %v7171_v63 = vmul.f32 1.442695, %v7150_v39  ;;  %v7139_v43 = vsub.f32 0.0, %v6971_v24 }
0x1341   : > { %v7244_v50 = vadd.f32 %v7232_v29, %v12872_v49  ;;  %v6996_v26 = vadd.f32 1.0, %v6984_v2  ;;  %v6995_v11 = vadd.f32 1.0, %v6983_v4  ;;  %v7152_v0 = vmul.f32 %v7140_v54, %v6972_v62 }
0x1342   : > { %v7231_v48 = vmul.f32 %v7219_v35, %v6919_v52  ;;  %v7169_v18 = vmul.f32 1.442695, %v7149_v32  ;;  %v7151_v51 = vmul.f32 %v7139_v43, %v6971_v24  ;;  %v6958_v4 = vsel %vm6946_vm0, 1.0, %v10369_v20 }
0x1343   : > { %7256 = vst.msk [vmem:[#allocation2 + $0x38] sm:$0xff] %vm1334_vm3, %v7244_v50  ;;  %9860 = vrcp.f32 %v6996_v26  ;;  %v7175_v58 = vmul.f32 1.442695, %v7152_v0  ;;  %v6922_v45 = vmul.f32 0.5, %v13302_v9  ;;  %vm6948_vm2 = vcmp.ge.f32.partialorder %v13350_v16, 0.0 }
0x1344   : > { %v13361_v61 = vadd.f32 %v7231_v48, %v12874_v53  ;;  %9862 = vrcp.f32 %v6995_v11  ;;  %v7173_v40 = vmul.f32 1.442695, %v7151_v51  ;;  %vm6947_vm4 = vcmp.ge.f32.partialorder %v13353_v17, 0.0 }
0x1345   : > { %v9857_v8 = vpop.eup %9856  ;;  %9864 = vpow2.f32 %v7171_v63  ;;  %v6923_v16 = vmul.f32 0.5, %v13347_v36 }
0x1346   : > { %7255 = vst.msk [vmem:[#allocation2 + $0x30] sm:$0xff] %vm1334_vm3, %v13361_v61  ;;  %v7030_v49 = vmul.f32 1.0614054, %v9857_v8  ;;  %v9859_v12 = vpop.eup %9858  ;;  %9866 = vpow2.f32 %v7169_v18  ;;  %v6921_v18 = vmul.f32 0.5, %v13309_v21 }
0x1347   : > { %v7029_v14 = vmul.f32 1.0614054, %v9859_v12  ;;  %9868 = vpow2.f32 %v7175_v58 }
0x1348   : > { %v7042_v25 = vadd.f32 -1.4531521, %v7030_v49  ;;  %9870 = vpow2.f32 %v7173_v40 }
0x1349   : > { %v7041_v53 = vadd.f32 -1.4531521, %v7029_v14 }
0x134a   : > { %v7054_v34 = vmul.f32 %v9857_v8, %v7042_v25 }
0x134b   : > { %v7053_v6 = vmul.f32 %v9859_v12, %v7041_v53 }
0x134c   : > { %v7066_v44 = vadd.f32 1.4214138, %v7054_v34 }
0x134d   : > { %v7065_v22 = vadd.f32 1.4214138, %v7053_v6  ;;  %v9861_v47 = vpop.eup %9860 }
0x134e   : > { %v7078_v10 = vmul.f32 %v9857_v8, %v7066_v44  ;;  %v9863_v38 = vpop.eup %9862  ;;  %v7032_v30 = vmul.f32 1.0614054, %v9861_v47 }
0x134f   : > { %v7077_v57 = vmul.f32 %v9859_v12, %v7065_v22  ;;  %v7031_v19 = vmul.f32 1.0614054, %v9863_v38  ;;  %v9865_v29 = vpop.eup %9864 }
0x1350   : > { %v7090_v1 = vadd.f32 -0.28449672, %v7078_v10  ;;  %v7044_v3 = vadd.f32 -1.4531521, %v7032_v30  ;;  %v9867_v24 = vpop.eup %9866 }
0x1351   : > { %v7089_v60 = vadd.f32 -0.28449672, %v7077_v57  ;;  %v7043_v27 = vadd.f32 -1.4531521, %v7031_v19  ;;  %v9869_v43 = vpop.eup %9868 }
0x1352   : > { %v7102_v37 = vmul.f32 %v9857_v8, %v7090_v1  ;;  %v7056_v56 = vmul.f32 %v9861_v47, %v7044_v3  ;;  %v9871_v57 = vpop.eup %9870 }
0x1353   : > { %v7101_v7 = vmul.f32 %v9859_v12, %v7089_v60  ;;  %v7055_v35 = vmul.f32 %v9863_v38, %v7043_v27  ;;  %v6924_v60 = vmul.f32 0.5, %v13341_v42  ;;  %v7274_v42 = vrot.slane (!%p8030_p12), %v13361_v61, 6 }
0x1354   : > { %v7114_v59 = vadd.f32 0.2548296, %v7102_v37  ;;  %v7068_v15 = vadd.f32 1.4214138, %v7056_v56 }
0x1355   : > { %v7113_v52 = vadd.f32 0.2548296, %v7101_v7  ;;  %v7067_v48 = vadd.f32 1.4214138, %v7055_v35 }
0x1356   : > { %v7126_v46 = vmul.f32 %v9857_v8, %v7114_v59  ;;  %v7080_v28 = vmul.f32 %v9861_v47, %v7068_v15 }
0x1357   : > { %v7125_v62 = vmul.f32 %v9859_v12, %v7113_v52  ;;  %v7079_v39 = vmul.f32 %v9863_v38, %v7067_v48  ;;  %v6957_v12 = vsel %vm6945_vm1, 1.0, %v10369_v20 }
0x1358   : > { %v7186_v50 = vmul.f32 %v9865_v29, %v7126_v46  ;;  %v7092_v49 = vadd.f32 -0.28449672, %v7080_v28 }
0x1359   : > { %v7185_v8 = vmul.f32 %v9867_v24, %v7125_v62  ;;  %v7091_v25 = vadd.f32 -0.28449672, %v7079_v39 }
0x135a   : > { %v7198_v2 = vsub.f32 1.0, %v7186_v50  ;;  %v7104_v63 = vmul.f32 %v9861_v47, %v7092_v49 }
0x135b   : > { %v7197_v11 = vsub.f32 1.0, %v7185_v8  ;;  %v7103_v34 = vmul.f32 %v9863_v38, %v7091_v25  ;;  %v7352_v25 = vld [vmem:[#allocation16 + $0x8] sm:$0xff] (!%p8030_p12) }
0x135c   : > { %v7210_v26 = vmul.f32 %v7198_v2, %v6958_v4  ;;  %v7116_v44 = vadd.f32 0.2548296, %v7104_v63  ;;  %v10372_v63 = vmov (!%p8030_p12), 0.0  }
0x135d   : > { %v7209_v14 = vmul.f32 %v7197_v11, %v6957_v12  ;;  %v7115_v41 = vadd.f32 0.2548296, %v7103_v34  ;;  %v7354_v12 = vld [vmem:[#allocation16 + $0x18] sm:$0xff] (!%p8030_p12)  ;;  %9033 = vmatprep.mubr.msk.f32.mxu0 (!%p8030_p12), %vm10371_vm9, %v10372_v63 }
0x135e   : > { %v7222_v32 = vadd.f32 1.0, %v7210_v26  ;;  %v7128_v10 = vmul.f32 %v9861_v47, %v7116_v44 }
0x135f   : > { %v7221_v6 = vadd.f32 1.0, %v7209_v14  ;;  %v7127_v1 = vmul.f32 %v9863_v38, %v7115_v41  ;;  %v6959_v38 = vsel %vm6947_vm4, 1.0, %v10369_v20 }
0x1360   : > { %v7234_v53 = vmul.f32 %v7222_v32, %v6922_v45  ;;  %v7188_v9 = vmul.f32 %v9869_v43, %v7128_v10  ;;  %v10370_v45 = vmov (!%p8030_p12), 0.0|0.0   ;;  %v8031_v43 = vld [vmem:[%s13700_s6] ss:$0 sm:$0xff] (!%p8030_p12) }
0x1361   : > { %v7233_v22 = vmul.f32 %v7221_v6, %v6921_v18  ;;  %v7187_v37 = vmul.f32 %v9871_v57, %v7127_v1  ;;  %9216 = vmatprep.subr.bf16.mxu0 (!%p8030_p12), %v10370_v45 }
0x1362   : > { %v7246_v54 = vadd.f32 %v7234_v53, %v12882_v13  ;;  %v7200_v21 = vsub.f32 1.0, %v7188_v9  ;;  %v6960_v13 = vsel %vm6948_vm2, 1.0, %v10369_v20  ;;  %v7271_v20 = vrot.slane (!%p8030_p12), %v13305_v5, 7 }
0x1363   : > { %v7245_v0 = vadd.f32 %v7233_v22, %v12884_v31  ;;  %v7199_v47 = vsub.f32 1.0, %v7187_v37 }
0x1364   : > { %7258 = vst.msk [vmem:[#allocation2 + $0x48] sm:$0xff] %vm1334_vm3, %v7246_v54  ;;  %v7212_v30 = vmul.f32 %v7200_v21, %v6960_v13  ;;  %v7277_v36 = vrot.slane (!%p8030_p12), %v7246_v54, 5  ;;  %v8032_v13 = vld [vmem:[%s13701_s27] ss:$0 sm:$0xff] (!%p8030_p12) }
0x1365   : > { %7257 = vst.msk [vmem:[#allocation2 + $0x40] sm:$0xff] %vm1334_vm3, %v7245_v0  ;;  %v7211_v51 = vmul.f32 %v7199_v47, %v6959_v38 }
0x1366   : > { %v7224_v19 = vadd.f32 1.0, %v7212_v30 }
0x1367   : > { %v7223_v59 = vadd.f32 1.0, %v7211_v51  ;;  %7264 = sbr.rel (%p8030_p12) target bundleno = 5515 (0x158b), region = 160 }
0x1368   : > { %v7236_v31 = vmul.f32 %v7224_v19, %v6924_v60 }
0x1369   : > { %v7235_v3 = vmul.f32 %v7223_v59, %v6923_v16 }
0x136a   : > { %v7248_v17 = vadd.f32 %v7236_v31, %v12892_v55  ;;  %v7273_v55 = vsel (!%p8030_p12), %vm7272_vm5, %v7271_v20, %v13218_v33 }
0x136b   : > { %v7247_v7 = vadd.f32 %v7235_v3, %v12894_v23  ;;  %v7276_v23 = vsel (!%p8030_p12), %vm7275_vm6, %v7274_v42, %v7273_v55 }
0x136c   : > { %7260 = vst.msk [vmem:[#allocation2 + $0x58] sm:$0xff] %vm1334_vm3, %v7248_v17  ;;  %v7279_v58 = vsel (!%p8030_p12), %vm7278_vm7, %v7277_v36, %v7276_v23  ;;  %v8033_v17 = vld [vmem:[%s13702_s5] ss:$0 sm:$0xff] (!%p8030_p12) }
0x136d   : > { %7259 = vst.msk [vmem:[#allocation2 + $0x50] sm:$0xff] %vm1334_vm3, %v7247_v7  ;;  %v7282_v27 = vsel (!%p8030_p12), %vm7281_vm8, %v7279_v58, 0.0 }
0x136e   : > { %7283 = vadd.xlane.f32.xlu0 %v7282_v27 }
0x13fb   : > { %v7284_v46 = vpop.xlane.xlu0 %7283 }
0x13fc   : > { %v7285_v56 = vmul.f32 0.03125, %v7284_v46 }
0x13fe   : > { %v7287_v40 = vrot.slane %v7285_v56, 1  ;;  %v7288_v29 = vrot.slane %v7285_v56, 2  ;;  %v7289_v52 = vrot.slane %v7285_v56, 3  ;;  %v7294_v35 = vsub.f32 %v13218_v33, %v7285_v56 }
0x1400   : > { %v7295_v50 = vsub.f32 %v13305_v5, %v7287_v40  ;;  %v7296_v15 = vsub.f32 %v13361_v61, %v7288_v29  ;;  %v7297_v62 = vsub.f32 %v7246_v54, %v7289_v52  ;;  %v7298_v28 = vmul.f32 %v7294_v35, %v7294_v35  ;;  %v7351_v5 = vld [vmem:[#allocation16] sm:$0xff]  ;;  %v7353_v61 = vld [vmem:[#allocation16 + $0x10] sm:$0xff] }
0x1401   : > { %v9217_v32 = vpack.c.bf16 %v7352_v25, %v7351_v5  ;;  %v9220_v14 = vpack.c.bf16 %v7354_v12, %v7353_v61 }
0x1402   : > { %v7299_v48 = vmul.f32 %v7295_v50, %v7295_v50  ;;  %v7300_v24 = vmul.f32 %v7296_v15, %v7296_v15  ;;  %v7301_v2 = vmul.f32 %v7297_v62, %v7297_v62 }
0x1403   : > { %9218 = vmatpush3.bf16.msra.mxu0 %v9217_v32 }
0x1404   : > { %v7306_v4 = vrot.slane %v7299_v48, 7  ;;  %v7308_v8 = vrot.slane %v7300_v24, 6  ;;  %v7310_v26 = vrot.slane %v7301_v2, 5  ;;  %9219 = vmatprep.subr.bf16.mxu0 %v10370_v45 }
0x1406   : > { %v7307_v39 = vsel %vm7272_vm5, %v7306_v4, %v7298_v28 }
0x1407   : > { %v7309_v49 = vsel %vm7275_vm6, %v7308_v8, %v7307_v39  ;;  %9221 = vmatpush3.bf16.msra.mxu0 %v9220_v14 }
0x1408   : > { %v7311_v11 = vsel %vm7278_vm7, %v7310_v26, %v7309_v49 }
0x1409   : > { %v7313_v33 = vsel %vm7281_vm8, %v7311_v11, 0.0 }
0x140a   : > { %7314 = vadd.xlane.f32.xlu0 %v7313_v33 }
0x1497   : > { %v7315_v34 = vpop.xlane.xlu0 %7314 }
0x1498   : > { %v7316_v53 = vmul.f32 0.03125, %v7315_v34 }
0x149a   : > { %v7317_v44 = vadd.f32 1e-05, %v7316_v53 }
0x149c   : > { %9884 = vrsqrt.f32 %v7317_v44 }
0x14a6   : > { %v9885_v18 = vpop.eup %9884 }
0x14a7   : > { %v7320_v6 = vrot.slane %v9885_v18, 1  ;;  %v7321_v41 = vrot.slane %v9885_v18, 2  ;;  %v7322_v54 = vrot.slane %v9885_v18, 3  ;;  %v7327_v10 = vmul.f32 %v9885_v18, %v7294_v35 }
0x14a9   : > { %v7328_v22 = vmul.f32 %v7320_v6, %v7295_v50  ;;  %v7329_v1 = vmul.f32 %v7321_v41, %v7296_v15  ;;  %v7330_v57 = vmul.f32 %v7322_v54, %v7297_v62  ;;  %v7337_v9 = vmul.f32 %v8031_v43, %v7327_v10 }
0x14ab   : > { %v7338_v0 = vmul.f32 %v8031_v43, %v7328_v22  ;;  %v7339_v37 = vmul.f32 %v8031_v43, %v7329_v1  ;;  %v7340_v21 = vmul.f32 %v8031_v43, %v7330_v57  ;;  %v7347_v51 = vadd.f32 %v8032_v13, %v7337_v9 }
0x14ad   : > { %v7348_v47 = vadd.f32 %v8032_v13, %v7338_v0  ;;  %v7349_v30 = vadd.f32 %v8032_v13, %v7339_v37  ;;  %v7350_v38 = vadd.f32 %v8032_v13, %v7340_v21 }
0x14af   : > { %v7366_v60 = vrot.slane %v7348_v47, 7  ;;  %v7368_v19 = vrot.slane %v7349_v30, 6  ;;  %v7370_v59 = vrot.slane %v7350_v38, 5 }
0x14b1   : > { %v7367_v16 = vsel %vm7272_vm5, %v7366_v60, %v7347_v51 }
0x14b2   : > { %v7369_v31 = vsel %vm7275_vm6, %v7368_v19, %v7367_v16 }
0x14b3   : > { %v7371_v3 = vsel %vm7278_vm7, %v7370_v59, %v7369_v31 }
0x14b4   : > { %9034 = vmatmul.mubr.msk.f32.vlgmr.msra.gmra.mrb[0].mxu0 %vm1334_vm3, %v7371_v3 }
0x1587   : > { %v7440_v7 = vpop.f32.mrb[0].mxu0 }
0x1588   : > { %v7441_v20 = vadd.f32 %v8033_v17, %v7440_v7  ;;  %v9035_v42 = vpop.f32.mrb[1].mxu0 }
0x158a   : > { %7444 = vst [vmem:[%s1066_s28] sm:$0xf] %v7441_v20 }
0x158b PF: > { %s13703_s7 = sld [smem:[#allocation29_spill]]  ;;  %s13704_s29 = sld [smem:[#allocation24_spill]] }
0x158c   : > { %s13705_s23 = sld [smem:[#allocation35_spill]]  ;;  %s13706_s16 = sld [smem:[#allocation79_spill]] }
0x158d   : > { %s7459_s12 = sshll.u32 %s1066_s28, 4  ;;  %s10373_s1 = smov [#allocation17]   ;;  %s7460_s12 = int_to_ptr.vmem [resolvable:$true] %s7459_s12 }
0x158e   : > { %s10210_s25 = scalar_lea.vmem %s7460_s12, 64  ;;  %s10214_s30 = sshll.u32 %s10373_s1, 4  ;;  %s10215_s30 = int_to_ptr.vmem [resolvable:$false] %s10214_s30 }
0x158f   : > { %p10211_p5 = scmp.ne.s32.totalorder %s7460_s12, %s10210_s25  ;;  %s10216_s19 = scalar_lea.vmem %s10215_s30, 128 }
0x1590   : > { %p10217_p3 = scmp.lt.s32.totalorder %s7460_s12, %s10215_s30  ;;  %p10218_p9 = scmp.lt.s32.totalorder %s10216_s19, %s10210_s25 }
0x1591   : > { %s8036_s3 = sshll.u32 %s13703_s7, 6  ;;  %s13707_s18 = sand.u32 1, %s13704_s29  }
0x1592   : > { %s13419_s10 = scalar_lea.hbm %s13706_s16, %s8036_s3  ;;  %s7446_s13 = scalar_lea.sflag [#allocation5], %s13707_s18 }
0x1593   : > { %p13708_p1 = scmp.ne.s32.totalorder %s13705_s23, 0  ;;  %p10219_p10 = por %p10218_p9, %p10217_p3 }
0x1595   : > { %p10212_p8 = pnand %p10211_p5, %p13708_p1 }
0x1597   : > { %p10213_p2 = pneg %p10212_p8 }
0x1599   : > { %p10220_p0 = pnand %p10219_p10, %p10213_p2 }
0x159b   : > { %10223 = shalt.err (!%p10220_p0)
}
0x159c   : > { %s10224_s9 = scalar_lea.hbm %s13419_s10, 64  ;;  %s10228_s2 = scalar_lea.hbm %s13706_s16, 128 }
0x159d   : > { %p10225_p7 = scmp.ne.s32.totalorder %s13419_s10, %s10224_s9  ;;  %p10229_p6 = scmp.lt.u32.totalorder %s13419_s10, %s13706_s16 }
0x159e   : > { %p10230_p13 = scmp.lt.u32.totalorder %s10228_s2, %s10224_s9  ;;  %p10232_p5 = scmp.lt.u32.totalorder %s10224_s9, %s13419_s10 }
0x159f   : > { %p10226_p11 = pnand %p10225_p7, %p13708_p1 }
0x15a0   : > { %p10231_p12 = por %p10230_p13, %p10229_p6 }
0x15a1   : > { %p10227_p4 = pneg %p10226_p11 }
0x15a2   : > { %p10233_p8 = por %p10232_p5, %p10231_p12 }
0x15a4   : > { %p10234_p2 = pnand %p10233_p8, %p10227_p4 }
0x15a6   : > { %10237 = shalt.err (!%p10234_p2)
}
0x15a7   : > { %9260 = dma.vmem_to_hbm [thread:$0]  (%p13708_p1), %s7460_s12, 64, %s13419_s10, %s7446_s13  }
0x15a8 PF: > { %s13709_s22 = sld [smem:[#allocation32_spill]]  ;;  %s13710_s24 = sld [smem:[#allocation23_spill]] }
0x15a9   : > { %s13711_s27 = sld [smem:[#allocation36_spill]] }
0x15ae   : > { %p9308_p3 = scmp.ge.s32.totalorder %s13709_s22, 2  ;;  %s7471_s8 = sand.u32 1, %s13710_s24  }
0x15af   : > { %p13712_p9 = scmp.ne.s32.totalorder %s13711_s27, 0  ;;  %s7472_s4 = scalar_lea.sflag [#allocation5], %s7471_s8 }
0x15b1   : > { %p9298_p10 = pnand %p9308_p3, %p13712_p9 }
0x15b3   : > { %10299 = dma.done.wait (!%p9298_p10), %s7472_s4, 64  }
0x15b4   : > { %10301 = vsyncadd (!%p9298_p10), %s7472_s4, 4294967232  ;;  %s37_s6 = sadd.s32 1, %s13709_s22   ;;  %s13713_s3 = sld [smem:[#allocation24_spill]] }
0x15b5   : > { %p34_p0 = scmp.ge.s32.totalorder %s37_s6, 6   ;;  %s13714_s28 = sld [smem:[#allocation25_spill]] }
0x15b6   : > { %s13715_s29 = sld [smem:[#allocation40_spill]]  ;;  %s13716_s30 = sld [smem:[#allocation26_spill]] }
0x15b7   : > { %s13717_s4 = sld [smem:[#allocation27_spill]]  ;;  %s13718_s0 = sld [smem:[#allocation39_spill]] }
0x15b8   : > { %s13719_s23 = sld [smem:[#allocation30_spill]]  ;;  %s13720_s1 = sld [smem:[#allocation31_spill]] }
0x15b9   : > { %s13721_s5 = sld [smem:[#allocation37_spill]]  ;;  %s13722_s24 = sld [smem:[#allocation38_spill]] }
0x15ba   :  { %36 = sbr.rel (!%p34_p0) target bundleno = 31 (0x1f), region = 267 }
0x15c1   :  { %7477 = vsyncpa [#allocation4], 1 }
0x15c2   :  { %7479 = vsyncpa [#allocation4 + $0x1], 1 }
0x15c3   :  { %7480 = vsyncpa [#allocation7], 1 }
0x15c4   :  { %7481 = vsyncpa [#allocation5], 1 }
0x15c5   :  { %7483 = vsyncpa [#allocation5 + $0x1], 1 }

</bundles_post_ra>
